<compile_context>
chip_gen: v7x
topology: tpu7x:2x2x1
jax: 0.10.0
libtpu: 0.0.40
codegen_flags: <defaults>
</compile_context>

<pallas_src>
import numpy as np
import jax
import jax.numpy as jnp
from jax.experimental import pallas as pl
from jax.experimental.pallas import tpu as pltpu

IN_CHANNELS = 5
CIN_PAD = 8              # input channels padded to a full sublane group
OUT_CHANNELS = 128
OUT_LEN = 48
EPS = 1e-5               # GroupNorm default eps in PyTorch


# ---------------------------------------------------------------------------
# In-kernel helpers (traced inside the Pallas kernel body)
# ---------------------------------------------------------------------------
def _elu(x):
    # ELU with alpha=1:  x if x > 0 else exp(x) - 1
    return jnp.where(x > 0, x, jnp.exp(jnp.minimum(x, 0.0)) - 1.0)


def _conv_gn_elu(h, wt_ref, packed, G, *, n_groups):
    """Fused Conv1d(k=3, p=1) + GroupNorm + ELU on a channels-last block.

    h:      (Nb, L, Cin)     f32 activations (channels on the lane axis)
    wt_ref: (3, Cin, Cout)   per-tap weights, wt[k][i, o] = w[o, i, k]
    packed: (8, Cout)        rows 0/1/2 = conv bias / GN gamma / GN beta
    G:      (g, Cout)        one-hot group-membership matrix
    """
    nb, L, cin = h.shape
    cout = wt_ref.shape[-1]
    m = nb * L

    # --- shifted taps per sample (zero padding at both ends along L) ---
    z = jnp.zeros((nb, 1, cin), jnp.float32)
    h_m1 = jnp.concatenate([z, h[:, :L - 1, :]], axis=1)     # x[l-1]
    h_p1 = jnp.concatenate([h[:, 1:, :], z], axis=1)         # x[l+1]

    # --- conv as three per-tap matmuls (no lane-axis repacking) + bias ---
    y = jnp.dot(h.reshape(m, cin), wt_ref[1],
                preferred_element_type=jnp.float32)
    y = y + jnp.dot(h_m1.reshape(m, cin), wt_ref[0],
                    preferred_element_type=jnp.float32)
    y = y + jnp.dot(h_p1.reshape(m, cin), wt_ref[2],
                    preferred_element_type=jnp.float32)
    y = y + packed[0:1, :]                                   # conv bias
    y3 = y.reshape(nb, L, cout)

    # --- GroupNorm: single-pass stats, stacked into ONE matmul each way ---
    inv_denom = 1.0 / float((cout // n_groups) * L)
    csum = jnp.sum(y3, axis=1)                               # (Nb, C)
    csq = jnp.sum(y3 * y3, axis=1)                           # (Nb, C)
    stats = jnp.concatenate([csum, csq], axis=0)             # (2*Nb, C)
    # channels -> groups (contract the channel axis of both operands)
    stats_g = jax.lax.dot_general(stats, G, (((1,), (1,)), ((), ())),
                                  preferred_element_type=jnp.float32)  # (2Nb,g)
    gmean = stats_g[:nb] * inv_denom                         # (Nb, g)
    gvar = jnp.maximum(stats_g[nb:] * inv_denom - gmean * gmean, 0.0)
    ginv = jax.lax.rsqrt(gvar + EPS)
    # groups -> channels (broadcast inv and mean*inv together)
    pack_g = jnp.concatenate([ginv, gmean * ginv], axis=0)   # (2*Nb, g)
    pack_c = jnp.dot(pack_g, G, preferred_element_type=jnp.float32)  # (2Nb, C)
    gamma = packed[1:2, :]
    scale = pack_c[:nb] * gamma                              # inv * gamma
    shift = packed[2:3, :] - pack_c[nb:] * gamma             # beta - mean*inv*gamma
    yn = y3 * scale[:, None, :] + shift[:, None, :]

    return _elu(yn)


# ---------------------------------------------------------------------------
# Pallas kernel: one block of Nb samples per grid step, full fused forward.
# ---------------------------------------------------------------------------
def encoder_kernel(x_ref, w1t_ref, p1_ref, g1_ref, w2t_ref, p2_ref, g2_ref,
                   ptb_ref, o_ref):
    nb, L, _ = x_ref.shape
    x = x_ref[...].astype(jnp.float32)                       # (Nb, L, 8)

    h = _conv_gn_elu(x, w1t_ref, p1_ref[...], g1_ref[...], n_groups=8)
    h = _conv_gn_elu(h, w2t_ref, p2_ref[...], g2_ref[...], n_groups=16)

    # AdaptiveAvgPool1d(out_len): one 2-D matmul with the block-diagonal
    # averaging matrix (Nb*out_len, Nb*L) @ (Nb*L, C) — no broadcast copies,
    # no per-sample tiny matmuls.
    cout = h.shape[-1]
    pooled = jnp.dot(ptb_ref[...], h.reshape(nb * L, cout),
                     preferred_element_type=jnp.float32)     # (Nb*out_len, C)
    o_ref[...] = pooled.reshape(nb, OUT_LEN, cout).astype(o_ref.dtype)


# ---------------------------------------------------------------------------
# Host-side glue
# ---------------------------------------------------------------------------
def make_pool_matrix(L, out_len):
    # Exact AdaptiveAvgPool1d semantics: bin i = [floor(i*L/out), ceil((i+1)*L/out))
    P = np.zeros((L, out_len), dtype=np.float32)
    for i in range(out_len):
        start = (i * L) // out_len
        end = -((-(i + 1) * L) // out_len)
        P[start:end, i] = 1.0 / float(end - start)
    return P


def make_group_matrix(num_groups, channels):
    G = np.zeros((num_groups, channels), dtype=np.float32)
    per = channels // num_groups
    for c in range(channels):
        G[c // per, c] = 1.0
    return jnp.asarray(G)


def conv_encoder_gn(x, params, *, block_n=8):
    """x: (N, Cin, L) NCL like the PyTorch module; returns (N, OUT_CHANNELS, OUT_LEN)."""
    N, cin, L = x.shape
    assert cin == IN_CHANNELS
    (w1, b1, g1w, g1b, w2, b2, g2w, g2b) = params
    c_mid = OUT_CHANNELS // 2

    nb = min(block_n, N)
    n_pad = ((N + nb - 1) // nb) * nb

    # channels-last input, batch padded to a multiple of nb, Cin padded 5 -> 8
    x_nlc = jnp.transpose(x, (0, 2, 1)).astype(jnp.float32)        # (N, L, 5)
    x_nlc = jnp.pad(x_nlc, ((0, n_pad - N), (0, 0), (0, CIN_PAD - cin)))

    # per-tap weights: wt[k, i, o] = w[o, i, k]  (k=0 -> tap x[l-1])
    w1t = jnp.pad(jnp.transpose(w1, (2, 1, 0)),
                  ((0, 0), (0, CIN_PAD - cin), (0, 0)))            # (3, 8, 64)
    w2t = jnp.transpose(w2, (2, 1, 0))                             # (3, 64, 128)

    # packed per-channel params: rows 0/1/2 = bias / gamma / beta (8 sublanes)
    p1 = (jnp.zeros((8, c_mid), jnp.float32)
          .at[0].set(b1).at[1].set(g1w).at[2].set(g1b))
    p2 = (jnp.zeros((8, OUT_CHANNELS), jnp.float32)
          .at[0].set(b2).at[1].set(g2w).at[2].set(g2b))

    G1 = make_group_matrix(8, c_mid)                               # (8, 64)
    G2 = make_group_matrix(16, OUT_CHANNELS)                       # (16, 128)

    # block-diagonal pooling matrix: (nb*out_len, nb*L)
    P = make_pool_matrix(L, OUT_LEN)                               # (L, 48) np
    PTb = jnp.asarray(np.kron(np.eye(nb, dtype=np.float32), P.T))  # (nb*48, nb*L)

    def full_spec(arr):
        nd = arr.ndim
        return pl.BlockSpec(arr.shape, lambda b, _nd=nd: (0,) * _nd)

    out_nlc = pl.pallas_call(
        encoder_kernel,
        out_shape=jax.ShapeDtypeStruct((n_pad, OUT_LEN, OUT_CHANNELS), jnp.float32),
        grid_spec=pltpu.PrefetchScalarGridSpec(
            num_scalar_prefetch=0,
            grid=(n_pad // nb,),
            in_specs=[
                pl.BlockSpec((nb, L, CIN_PAD), lambda b: (b, 0, 0)),
                full_spec(w1t), full_spec(p1), full_spec(G1),
                full_spec(w2t), full_spec(p2), full_spec(G2),
                full_spec(PTb),
            ],
            out_specs=pl.BlockSpec((nb, OUT_LEN, OUT_CHANNELS),
                                   lambda b: (b, 0, 0)),
        ),
        compiler_params=pltpu.CompilerParams(
            dimension_semantics=("parallel",),
            vmem_limit_bytes=32 * 1024 * 1024),
    )(x_nlc, w1t, p1, G1, w2t, p2, G2, PTb)

    # drop batch padding and transpose back to PyTorch NCL: (N, 128, 48)
    return jnp.transpose(out_nlc[:N], (0, 2, 1))


# ---------------------------------------------------------------------------
# Pure-JAX reference (for correctness check only)
# ---------------------------------------------------------------------------
def reference(x, params):
    (w1, b1, g1w, g1b, w2, b2, g2w, g2b) = params

    def conv1d(x, w, b):
        y = jax.lax.conv_general_dilated(
            x, w, window_strides=(1,), padding=((1, 1),),
            dimension_numbers=("NCH", "OIH", "NCH"))
        return y + b[None, :, None]

    def gn(x, groups, gw, gb):
        N, C, L = x.shape
        xg = x.reshape(N, groups, C // groups, L)
        m = xg.mean(axis=(2, 3), keepdims=True)
        v = ((xg - m) ** 2).mean(axis=(2, 3), keepdims=True)
        xn = ((xg - m) / jnp.sqrt(v + EPS)).reshape(N, C, L)
        return xn * gw[None, :, None] + gb[None, :, None]

    def elu(x):
        return jnp.where(x > 0, x, jnp.expm1(x))

    h = elu(gn(conv1d(x, w1, b1), 8, g1w, g1b))
    h = elu(gn(conv1d(h, w2, b2), 16, g2w, g2b))
    P = jnp.asarray(make_pool_matrix(x.shape[2], OUT_LEN))
    return jnp.einsum("ncl,lo->nco", h, P)


# ---------------------------------------------------------------------------
# Main
# ---------------------------------------------------------------------------
if __name__ == "__main__":
    key = jax.random.PRNGKey(0)
    keys = jax.random.split(key, 9)

    N, L = 16, 96          # grid = 2 steps of Nb=8 samples (both v7x TCs busy)
    c_mid = OUT_CHANNELS // 2

    x = jax.random.normal(keys[0], (N, IN_CHANNELS, L), dtype=jnp.float32)

    # Deterministic synthetic parameters (shapes from the module __init__).
    w1 = 0.1 * jax.random.normal(keys[1], (c_mid, IN_CHANNELS, 3), jnp.float32)
    b1 = 0.05 * jax.random.normal(keys[2], (c_mid,), jnp.float32)
    g1w = 1.0 + 0.1 * jax.random.normal(keys[3], (c_mid,), jnp.float32)
    g1b = 0.05 * jax.random.normal(keys[4], (c_mid,), jnp.float32)
    w2 = 0.1 * jax.random.normal(keys[5], (OUT_CHANNELS, c_mid, 3), jnp.float32)
    b2 = 0.05 * jax.random.normal(keys[6], (OUT_CHANNELS,), jnp.float32)
    g2w = 1.0 + 0.1 * jax.random.normal(keys[7], (OUT_CHANNELS,), jnp.float32)
    g2b = 0.05 * jax.random.normal(keys[8], (OUT_CHANNELS,), jnp.float32)

    params = (w1, b1, g1w, g1b, w2, b2, g2w, g2b)

    out = jax.block_until_ready(conv_encoder_gn(x, params, block_n=8))
    ref = jax.block_until_ready(reference(x, params))

    assert out.shape == (N, OUT_CHANNELS, OUT_LEN), out.shape
    assert jnp.allclose(out, ref, atol=2e-4, rtol=2e-4), float(
        jnp.max(jnp.abs(out - ref)))

    print("KERNEL_OK")
</pallas_src>

<mosaic_0001>
module attributes {stable_mosaic.version = 11 : i64} {
  func.func @encoder_kernel(%arg0: i32, %arg1: memref<8x96x8xf32, #tpu.memory_space<vmem>>, %arg2: memref<3x8x64xf32, #tpu.memory_space<vmem>>, %arg3: memref<8x64xf32, #tpu.memory_space<vmem>>, %arg4: memref<8x64xf32, #tpu.memory_space<vmem>>, %arg5: memref<3x64x128xf32, #tpu.memory_space<vmem>>, %arg6: memref<8x128xf32, #tpu.memory_space<vmem>>, %arg7: memref<16x128xf32, #tpu.memory_space<vmem>>, %arg8: memref<384x768xf32, #tpu.memory_space<vmem>>, %arg9: memref<8x48x128xf32, #tpu.memory_space<vmem>>) attributes {dimension_semantics = [#tpu.dimension_semantics<parallel>], iteration_bounds = array<i64: 2>, scalar_prefetch = 0 : i64, scratch_operands = 0 : i64, tpu.core_type = #tpu.core_type<tc>, window_params = [{transform_indices = @transform_0, window_bounds = array<i64: 8, 96, 8>}, {pipeline_mode = #tpu.pipeline_mode<synchronous>, transform_indices = @transform_1, window_bounds = array<i64: 3, 8, 64>}, {pipeline_mode = #tpu.pipeline_mode<synchronous>, transform_indices = @transform_2, window_bounds = array<i64: 8, 64>}, {pipeline_mode = #tpu.pipeline_mode<synchronous>, transform_indices = @transform_3, window_bounds = array<i64: 8, 64>}, {pipeline_mode = #tpu.pipeline_mode<synchronous>, transform_indices = @transform_4, window_bounds = array<i64: 3, 64, 128>}, {pipeline_mode = #tpu.pipeline_mode<synchronous>, transform_indices = @transform_5, window_bounds = array<i64: 8, 128>}, {pipeline_mode = #tpu.pipeline_mode<synchronous>, transform_indices = @transform_6, window_bounds = array<i64: 16, 128>}, {pipeline_mode = #tpu.pipeline_mode<synchronous>, transform_indices = @transform_7, window_bounds = array<i64: 384, 768>}, {transform_indices = @transform_8, window_bounds = array<i64: 8, 48, 128>}]} {
    %c0 = arith.constant 0 : index
    %c0_0 = arith.constant 0 : index
    %c0_1 = arith.constant 0 : index
    %0 = vector.load %arg1[%c0, %c0_0, %c0_1] : memref<8x96x8xf32, #tpu.memory_space<vmem>>, vector<8x96x8xf32>
    %c0_2 = arith.constant 0 : index
    %c0_3 = arith.constant 0 : index
    %1 = vector.load %arg3[%c0_2, %c0_3] : memref<8x64xf32, #tpu.memory_space<vmem>>, vector<8x64xf32>
    %c0_4 = arith.constant 0 : index
    %c0_5 = arith.constant 0 : index
    %2 = vector.load %arg4[%c0_4, %c0_5] : memref<8x64xf32, #tpu.memory_space<vmem>>, vector<8x64xf32>
    %cst = arith.constant 0.000000e+00 : f32
    %3 = vector.broadcast %cst : f32 to vector<8x1x8xf32>
    %4 = vector.extract_strided_slice %0 {offsets = [0, 0, 0], sizes = [8, 95, 8], strides = [1, 1, 1]} : vector<8x96x8xf32> to vector<8x95x8xf32>
    %5 = tpu.concatenate %3, %4 in 1 : vector<8x1x8xf32>, vector<8x95x8xf32> -> vector<8x96x8xf32>
    %6 = vector.extract_strided_slice %0 {offsets = [0, 1, 0], sizes = [8, 95, 8], strides = [1, 1, 1]} : vector<8x96x8xf32> to vector<8x95x8xf32>
    %7 = tpu.concatenate %6, %3 in 1 : vector<8x95x8xf32>, vector<8x1x8xf32> -> vector<8x96x8xf32>
    %8 = vector.shape_cast %0 : vector<8x96x8xf32> to vector<768x8xf32>
    %c1 = arith.constant 1 : index
    %c0_6 = arith.constant 0 : index
    %c0_7 = arith.constant 0 : index
    %9 = vector.load %arg2[%c1, %c0_6, %c0_7] : memref<3x8x64xf32, #tpu.memory_space<vmem>>, vector<1x8x64xf32>
    %10 = vector.shape_cast %9 : vector<1x8x64xf32> to vector<8x64xf32>
    %cst_8 = arith.constant dense<0.000000e+00> : vector<768x64xf32>
    %11 = tpu.matmul %8, %10, %cst_8 {dimension_numbers = #tpu.dot_dimension_numbers<[1], [0], [0], [1], [0, 0, 1, 1], [], []>} : vector<768x8xf32>, vector<8x64xf32>, vector<768x64xf32> -> vector<768x64xf32>
    %12 = vector.shape_cast %5 : vector<8x96x8xf32> to vector<768x8xf32>
    %c0_9 = arith.constant 0 : index
    %c0_10 = arith.constant 0 : index
    %c0_11 = arith.constant 0 : index
    %13 = vector.load %arg2[%c0_9, %c0_10, %c0_11] : memref<3x8x64xf32, #tpu.memory_space<vmem>>, vector<1x8x64xf32>
    %14 = vector.shape_cast %13 : vector<1x8x64xf32> to vector<8x64xf32>
    %cst_12 = arith.constant dense<0.000000e+00> : vector<768x64xf32>
    %15 = tpu.matmul %12, %14, %cst_12 {dimension_numbers = #tpu.dot_dimension_numbers<[1], [0], [0], [1], [0, 0, 1, 1], [], []>} : vector<768x8xf32>, vector<8x64xf32>, vector<768x64xf32> -> vector<768x64xf32>
    %16 = arith.addf %11, %15 : vector<768x64xf32>
    %17 = vector.shape_cast %7 : vector<8x96x8xf32> to vector<768x8xf32>
    %c2 = arith.constant 2 : index
    %c0_13 = arith.constant 0 : index
    %c0_14 = arith.constant 0 : index
    %18 = vector.load %arg2[%c2, %c0_13, %c0_14] : memref<3x8x64xf32, #tpu.memory_space<vmem>>, vector<1x8x64xf32>
    %19 = vector.shape_cast %18 : vector<1x8x64xf32> to vector<8x64xf32>
    %cst_15 = arith.constant dense<0.000000e+00> : vector<768x64xf32>
    %20 = tpu.matmul %17, %19, %cst_15 {dimension_numbers = #tpu.dot_dimension_numbers<[1], [0], [0], [1], [0, 0, 1, 1], [], []>} : vector<768x8xf32>, vector<8x64xf32>, vector<768x64xf32> -> vector<768x64xf32>
    %21 = arith.addf %16, %20 : vector<768x64xf32>
    %22 = vector.extract_strided_slice %1 {offsets = [0, 0], sizes = [1, 64], strides = [1, 1]} : vector<8x64xf32> to vector<1x64xf32>
    %23 = vector.broadcast %22 : vector<1x64xf32> to vector<768x64xf32>
    %24 = arith.addf %21, %23 : vector<768x64xf32>
    %25 = vector.shape_cast %24 : vector<768x64xf32> to vector<8x96x64xf32>
    %cst_16 = arith.constant dense<0.000000e+00> : vector<8x64xf32>
    %26 = vector.multi_reduction <add>, %25, %cst_16 [1] : vector<8x96x64xf32> to vector<8x64xf32>
    %27 = arith.mulf %25, %25 : vector<8x96x64xf32>
    %cst_17 = arith.constant dense<0.000000e+00> : vector<8x64xf32>
    %28 = vector.multi_reduction <add>, %27, %cst_17 [1] : vector<8x96x64xf32> to vector<8x64xf32>
    %29 = tpu.concatenate %26, %28 in 0 : vector<8x64xf32>, vector<8x64xf32> -> vector<16x64xf32>
    %cst_18 = arith.constant dense<0.000000e+00> : vector<16x8xf32>
    %30 = tpu.matmul %29, %2, %cst_18 {dimension_numbers = #tpu.dot_dimension_numbers<[1], [1], [0], [0], [0, 0, 1, 0], [], []>} : vector<16x64xf32>, vector<8x64xf32>, vector<16x8xf32> -> vector<16x8xf32>
    %31 = vector.extract_strided_slice %30 {offsets = [0, 0], sizes = [8, 8], strides = [1, 1]} : vector<16x8xf32> to vector<8x8xf32>
    %cst_19 = arith.constant 0.00130208337 : f32
    %32 = vector.broadcast %cst_19 : f32 to vector<8x8xf32>
    %33 = arith.mulf %31, %32 : vector<8x8xf32>
    %34 = vector.extract_strided_slice %30 {offsets = [8, 0], sizes = [8, 8], strides = [1, 1]} : vector<16x8xf32> to vector<8x8xf32>
    %cst_20 = arith.constant 0.00130208337 : f32
    %35 = vector.broadcast %cst_20 : f32 to vector<8x8xf32>
    %36 = arith.mulf %34, %35 : vector<8x8xf32>
    %37 = arith.mulf %33, %33 : vector<8x8xf32>
    %38 = arith.subf %36, %37 : vector<8x8xf32>
    %cst_21 = arith.constant 0.000000e+00 : f32
    %39 = vector.broadcast %cst_21 : f32 to vector<8x8xf32>
    %40 = arith.maximumf %38, %39 : vector<8x8xf32>
    %cst_22 = arith.constant 9.99999974E-6 : f32
    %41 = vector.broadcast %cst_22 : f32 to vector<8x8xf32>
    %42 = arith.addf %40, %41 : vector<8x8xf32>
    %43 = math.rsqrt %42 : vector<8x8xf32>
    %44 = arith.mulf %33, %43 : vector<8x8xf32>
    %45 = tpu.concatenate %43, %44 in 0 : vector<8x8xf32>, vector<8x8xf32> -> vector<16x8xf32>
    %cst_23 = arith.constant dense<0.000000e+00> : vector<16x64xf32>
    %46 = tpu.matmul %45, %2, %cst_23 {dimension_numbers = #tpu.dot_dimension_numbers<[1], [0], [0], [1], [0, 0, 1, 1], [], []>} : vector<16x8xf32>, vector<8x64xf32>, vector<16x64xf32> -> vector<16x64xf32>
    %47 = vector.extract_strided_slice %1 {offsets = [1, 0], sizes = [1, 64], strides = [1, 1]} : vector<8x64xf32> to vector<1x64xf32>
    %48 = vector.extract_strided_slice %46 {offsets = [0, 0], sizes = [8, 64], strides = [1, 1]} : vector<16x64xf32> to vector<8x64xf32>
    %49 = vector.broadcast %47 : vector<1x64xf32> to vector<8x64xf32>
    %50 = arith.mulf %48, %49 : vector<8x64xf32>
    %51 = vector.extract_strided_slice %1 {offsets = [2, 0], sizes = [1, 64], strides = [1, 1]} : vector<8x64xf32> to vector<1x64xf32>
    %52 = vector.extract_strided_slice %46 {offsets = [8, 0], sizes = [8, 64], strides = [1, 1]} : vector<16x64xf32> to vector<8x64xf32>
    %53 = vector.broadcast %47 : vector<1x64xf32> to vector<8x64xf32>
    %54 = arith.mulf %52, %53 : vector<8x64xf32>
    %55 = vector.broadcast %51 : vector<1x64xf32> to vector<8x64xf32>
    %56 = arith.subf %55, %54 : vector<8x64xf32>
    %57 = vector.shape_cast %50 : vector<8x64xf32> to vector<8x1x64xf32>
    %58 = vector.broadcast %57 : vector<8x1x64xf32> to vector<8x96x64xf32>
    %59 = arith.mulf %25, %58 : vector<8x96x64xf32>
    %60 = vector.shape_cast %56 : vector<8x64xf32> to vector<8x1x64xf32>
    %61 = vector.broadcast %60 : vector<8x1x64xf32> to vector<8x96x64xf32>
    %62 = arith.addf %59, %61 : vector<8x96x64xf32>
    %cst_24 = arith.constant 0.000000e+00 : f32
    %63 = vector.broadcast %cst_24 : f32 to vector<8x96x64xf32>
    %64 = arith.cmpf ogt, %62, %63 : vector<8x96x64xf32>
    %cst_25 = arith.constant 0.000000e+00 : f32
    %65 = vector.broadcast %cst_25 : f32 to vector<8x96x64xf32>
    %66 = arith.minimumf %62, %65 : vector<8x96x64xf32>
    %67 = math.exp %66 : vector<8x96x64xf32>
    %cst_26 = arith.constant 1.000000e+00 : f32
    %68 = vector.broadcast %cst_26 : f32 to vector<8x96x64xf32>
    %69 = arith.subf %67, %68 : vector<8x96x64xf32>
    %70 = arith.select %64, %62, %69 : vector<8x96x64xi1>, vector<8x96x64xf32>
    %c0_27 = arith.constant 0 : index
    %c0_28 = arith.constant 0 : index
    %71 = vector.load %arg6[%c0_27, %c0_28] : memref<8x128xf32, #tpu.memory_space<vmem>>, vector<8x128xf32>
    %c0_29 = arith.constant 0 : index
    %c0_30 = arith.constant 0 : index
    %72 = vector.load %arg7[%c0_29, %c0_30] : memref<16x128xf32, #tpu.memory_space<vmem>>, vector<16x128xf32>
    %cst_31 = arith.constant 0.000000e+00 : f32
    %73 = vector.broadcast %cst_31 : f32 to vector<8x1x64xf32>
    %74 = vector.extract_strided_slice %70 {offsets = [0, 0, 0], sizes = [8, 95, 64], strides = [1, 1, 1]} : vector<8x96x64xf32> to vector<8x95x64xf32>
    %75 = tpu.concatenate %73, %74 in 1 : vector<8x1x64xf32>, vector<8x95x64xf32> -> vector<8x96x64xf32>
    %76 = vector.extract_strided_slice %70 {offsets = [0, 1, 0], sizes = [8, 95, 64], strides = [1, 1, 1]} : vector<8x96x64xf32> to vector<8x95x64xf32>
    %77 = tpu.concatenate %76, %73 in 1 : vector<8x95x64xf32>, vector<8x1x64xf32> -> vector<8x96x64xf32>
    %78 = vector.shape_cast %70 : vector<8x96x64xf32> to vector<768x64xf32>
    %c1_32 = arith.constant 1 : index
    %c0_33 = arith.constant 0 : index
    %c0_34 = arith.constant 0 : index
    %79 = vector.load %arg5[%c1_32, %c0_33, %c0_34] : memref<3x64x128xf32, #tpu.memory_space<vmem>>, vector<1x64x128xf32>
    %80 = vector.shape_cast %79 : vector<1x64x128xf32> to vector<64x128xf32>
    %cst_35 = arith.constant dense<0.000000e+00> : vector<768x128xf32>
    %81 = tpu.matmul %78, %80, %cst_35 {dimension_numbers = #tpu.dot_dimension_numbers<[1], [0], [0], [1], [0, 0, 1, 1], [], []>} : vector<768x64xf32>, vector<64x128xf32>, vector<768x128xf32> -> vector<768x128xf32>
    %82 = vector.shape_cast %75 : vector<8x96x64xf32> to vector<768x64xf32>
    %c0_36 = arith.constant 0 : index
    %c0_37 = arith.constant 0 : index
    %c0_38 = arith.constant 0 : index
    %83 = vector.load %arg5[%c0_36, %c0_37, %c0_38] : memref<3x64x128xf32, #tpu.memory_space<vmem>>, vector<1x64x128xf32>
    %84 = vector.shape_cast %83 : vector<1x64x128xf32> to vector<64x128xf32>
    %cst_39 = arith.constant dense<0.000000e+00> : vector<768x128xf32>
    %85 = tpu.matmul %82, %84, %cst_39 {dimension_numbers = #tpu.dot_dimension_numbers<[1], [0], [0], [1], [0, 0, 1, 1], [], []>} : vector<768x64xf32>, vector<64x128xf32>, vector<768x128xf32> -> vector<768x128xf32>
    %86 = arith.addf %81, %85 : vector<768x128xf32>
    %87 = vector.shape_cast %77 : vector<8x96x64xf32> to vector<768x64xf32>
    %c2_40 = arith.constant 2 : index
    %c0_41 = arith.constant 0 : index
    %c0_42 = arith.constant 0 : index
    %88 = vector.load %arg5[%c2_40, %c0_41, %c0_42] : memref<3x64x128xf32, #tpu.memory_space<vmem>>, vector<1x64x128xf32>
    %89 = vector.shape_cast %88 : vector<1x64x128xf32> to vector<64x128xf32>
    %cst_43 = arith.constant dense<0.000000e+00> : vector<768x128xf32>
    %90 = tpu.matmul %87, %89, %cst_43 {dimension_numbers = #tpu.dot_dimension_numbers<[1], [0], [0], [1], [0, 0, 1, 1], [], []>} : vector<768x64xf32>, vector<64x128xf32>, vector<768x128xf32> -> vector<768x128xf32>
    %91 = arith.addf %86, %90 : vector<768x128xf32>
    %92 = vector.extract_strided_slice %71 {offsets = [0, 0], sizes = [1, 128], strides = [1, 1]} : vector<8x128xf32> to vector<1x128xf32>
    %93 = vector.broadcast %92 : vector<1x128xf32> to vector<768x128xf32>
    %94 = arith.addf %91, %93 : vector<768x128xf32>
    %95 = vector.shape_cast %94 : vector<768x128xf32> to vector<8x96x128xf32>
    %cst_44 = arith.constant dense<0.000000e+00> : vector<8x128xf32>
    %96 = vector.multi_reduction <add>, %95, %cst_44 [1] : vector<8x96x128xf32> to vector<8x128xf32>
    %97 = arith.mulf %95, %95 : vector<8x96x128xf32>
    %cst_45 = arith.constant dense<0.000000e+00> : vector<8x128xf32>
    %98 = vector.multi_reduction <add>, %97, %cst_45 [1] : vector<8x96x128xf32> to vector<8x128xf32>
    %99 = tpu.concatenate %96, %98 in 0 : vector<8x128xf32>, vector<8x128xf32> -> vector<16x128xf32>
    %cst_46 = arith.constant dense<0.000000e+00> : vector<16x16xf32>
    %100 = tpu.matmul %99, %72, %cst_46 {dimension_numbers = #tpu.dot_dimension_numbers<[1], [1], [0], [0], [0, 0, 1, 0], [], []>} : vector<16x128xf32>, vector<16x128xf32>, vector<16x16xf32> -> vector<16x16xf32>
    %101 = vector.extract_strided_slice %100 {offsets = [0, 0], sizes = [8, 16], strides = [1, 1]} : vector<16x16xf32> to vector<8x16xf32>
    %cst_47 = arith.constant 0.00130208337 : f32
    %102 = vector.broadcast %cst_47 : f32 to vector<8x16xf32>
    %103 = arith.mulf %101, %102 : vector<8x16xf32>
    %104 = vector.extract_strided_slice %100 {offsets = [8, 0], sizes = [8, 16], strides = [1, 1]} : vector<16x16xf32> to vector<8x16xf32>
    %cst_48 = arith.constant 0.00130208337 : f32
    %105 = vector.broadcast %cst_48 : f32 to vector<8x16xf32>
    %106 = arith.mulf %104, %105 : vector<8x16xf32>
    %107 = arith.mulf %103, %103 : vector<8x16xf32>
    %108 = arith.subf %106, %107 : vector<8x16xf32>
    %cst_49 = arith.constant 0.000000e+00 : f32
    %109 = vector.broadcast %cst_49 : f32 to vector<8x16xf32>
    %110 = arith.maximumf %108, %109 : vector<8x16xf32>
    %cst_50 = arith.constant 9.99999974E-6 : f32
    %111 = vector.broadcast %cst_50 : f32 to vector<8x16xf32>
    %112 = arith.addf %110, %111 : vector<8x16xf32>
    %113 = math.rsqrt %112 : vector<8x16xf32>
    %114 = arith.mulf %103, %113 : vector<8x16xf32>
    %115 = tpu.concatenate %113, %114 in 0 : vector<8x16xf32>, vector<8x16xf32> -> vector<16x16xf32>
    %cst_51 = arith.constant dense<0.000000e+00> : vector<16x128xf32>
    %116 = tpu.matmul %115, %72, %cst_51 {dimension_numbers = #tpu.dot_dimension_numbers<[1], [0], [0], [1], [0, 0, 1, 1], [], []>} : vector<16x16xf32>, vector<16x128xf32>, vector<16x128xf32> -> vector<16x128xf32>
    %117 = vector.extract_strided_slice %71 {offsets = [1, 0], sizes = [1, 128], strides = [1, 1]} : vector<8x128xf32> to vector<1x128xf32>
    %118 = vector.extract_strided_slice %116 {offsets = [0, 0], sizes = [8, 128], strides = [1, 1]} : vector<16x128xf32> to vector<8x128xf32>
    %119 = vector.broadcast %117 : vector<1x128xf32> to vector<8x128xf32>
    %120 = arith.mulf %118, %119 : vector<8x128xf32>
    %121 = vector.extract_strided_slice %71 {offsets = [2, 0], sizes = [1, 128], strides = [1, 1]} : vector<8x128xf32> to vector<1x128xf32>
    %122 = vector.extract_strided_slice %116 {offsets = [8, 0], sizes = [8, 128], strides = [1, 1]} : vector<16x128xf32> to vector<8x128xf32>
    %123 = vector.broadcast %117 : vector<1x128xf32> to vector<8x128xf32>
    %124 = arith.mulf %122, %123 : vector<8x128xf32>
    %125 = vector.broadcast %121 : vector<1x128xf32> to vector<8x128xf32>
    %126 = arith.subf %125, %124 : vector<8x128xf32>
    %127 = vector.shape_cast %120 : vector<8x128xf32> to vector<8x1x128xf32>
    %128 = vector.broadcast %127 : vector<8x1x128xf32> to vector<8x96x128xf32>
    %129 = arith.mulf %95, %128 : vector<8x96x128xf32>
    %130 = vector.shape_cast %126 : vector<8x128xf32> to vector<8x1x128xf32>
    %131 = vector.broadcast %130 : vector<8x1x128xf32> to vector<8x96x128xf32>
    %132 = arith.addf %129, %131 : vector<8x96x128xf32>
    %cst_52 = arith.constant 0.000000e+00 : f32
    %133 = vector.broadcast %cst_52 : f32 to vector<8x96x128xf32>
    %134 = arith.cmpf ogt, %132, %133 : vector<8x96x128xf32>
    %cst_53 = arith.constant 0.000000e+00 : f32
    %135 = vector.broadcast %cst_53 : f32 to vector<8x96x128xf32>
    %136 = arith.minimumf %132, %135 : vector<8x96x128xf32>
    %137 = math.exp %136 : vector<8x96x128xf32>
    %cst_54 = arith.constant 1.000000e+00 : f32
    %138 = vector.broadcast %cst_54 : f32 to vector<8x96x128xf32>
    %139 = arith.subf %137, %138 : vector<8x96x128xf32>
    %140 = arith.select %134, %132, %139 : vector<8x96x128xi1>, vector<8x96x128xf32>
    %c0_55 = arith.constant 0 : index
    %c0_56 = arith.constant 0 : index
    %141 = vector.load %arg8[%c0_55, %c0_56] : memref<384x768xf32, #tpu.memory_space<vmem>>, vector<384x768xf32>
    %142 = vector.shape_cast %140 : vector<8x96x128xf32> to vector<768x128xf32>
    %cst_57 = arith.constant dense<0.000000e+00> : vector<384x128xf32>
    %143 = tpu.matmul %141, %142, %cst_57 {dimension_numbers = #tpu.dot_dimension_numbers<[1], [0], [0], [1], [0, 0, 1, 1], [], []>} : vector<384x768xf32>, vector<768x128xf32>, vector<384x128xf32> -> vector<384x128xf32>
    %144 = vector.shape_cast %143 : vector<384x128xf32> to vector<8x48x128xf32>
    %c0_58 = arith.constant 0 : index
    %c0_59 = arith.constant 0 : index
    %c0_60 = arith.constant 0 : index
    %145 = vector.load %arg9[%c0_58, %c0_59, %c0_60] : memref<8x48x128xf32, #tpu.memory_space<vmem>>, vector<8x48x128xf32>
    tpu.vector_store %arg9[%c0_58, %c0_59, %c0_60], %144 {strides = array<i32>} : memref<8x48x128xf32, #tpu.memory_space<vmem>>, vector<8x48x128xf32>,
    return
  }
  func.func @transform_0(%arg0: i32) -> (i32, i32, i32) {
    %c0_i32 = arith.constant 0 : i32
    %c0_i32_0 = arith.constant 0 : i32
    %c0_i32_1 = arith.constant 0 : i32
    return %arg0, %c0_i32, %c0_i32_0 : i32, i32, i32
  }
  func.func @transform_1(%arg0: i32) -> (i32, i32, i32) {
    %c0_i32 = arith.constant 0 : i32
    %c0_i32_0 = arith.constant 0 : i32
    %c0_i32_1 = arith.constant 0 : i32
    %c0_i32_2 = arith.constant 0 : i32
    return %c0_i32, %c0_i32_0, %c0_i32_1 : i32, i32, i32
  }
  func.func @transform_2(%arg0: i32) -> (i32, i32) {
    %c0_i32 = arith.constant 0 : i32
    %c0_i32_0 = arith.constant 0 : i32
    %c0_i32_1 = arith.constant 0 : i32
    return %c0_i32, %c0_i32_0 : i32, i32
  }
  func.func @transform_3(%arg0: i32) -> (i32, i32) {
    %c0_i32 = arith.constant 0 : i32
    %c0_i32_0 = arith.constant 0 : i32
    %c0_i32_1 = arith.constant 0 : i32
    return %c0_i32, %c0_i32_0 : i32, i32
  }
  func.func @transform_4(%arg0: i32) -> (i32, i32, i32) {
    %c0_i32 = arith.constant 0 : i32
    %c0_i32_0 = arith.constant 0 : i32
    %c0_i32_1 = arith.constant 0 : i32
    %c0_i32_2 = arith.constant 0 : i32
    return %c0_i32, %c0_i32_0, %c0_i32_1 : i32, i32, i32
  }
  func.func @transform_5(%arg0: i32) -> (i32, i32) {
    %c0_i32 = arith.constant 0 : i32
    %c0_i32_0 = arith.constant 0 : i32
    %c0_i32_1 = arith.constant 0 : i32
    return %c0_i32, %c0_i32_0 : i32, i32
  }
  func.func @transform_6(%arg0: i32) -> (i32, i32) {
    %c0_i32 = arith.constant 0 : i32
    %c0_i32_0 = arith.constant 0 : i32
    %c0_i32_1 = arith.constant 0 : i32
    return %c0_i32, %c0_i32_0 : i32, i32
  }
  func.func @transform_7(%arg0: i32) -> (i32, i32) {
    %c0_i32 = arith.constant 0 : i32
    %c0_i32_0 = arith.constant 0 : i32
    %c0_i32_1 = arith.constant 0 : i32
    return %c0_i32, %c0_i32_0 : i32, i32
  }
  func.func @transform_8(%arg0: i32) -> (i32, i32, i32) {
    %c0_i32 = arith.constant 0 : i32
    %c0_i32_0 = arith.constant 0 : i32
    %c0_i32_1 = arith.constant 0 : i32
    return %arg0, %c0_i32, %c0_i32_0 : i32, i32, i32
  }
}

</mosaic_0001>

<bundles_post_ra>
// kernel: tpu_custom_call.1
= control target key start
LH: loop header
LB: loop body
LE: loop exit
PB: predicated region body
PF: predicated region fallthrough
CT: control target
= control target key end

     0   :  { %s22241_s0 = inlined_call_operand.vmem [shape: f32[16,96,8], index: 0, kind: input, shape index: {}]   ;;  %s22242_s1 = inlined_call_operand.hbm [shape: f32[3,8,64], index: 1, kind: input, shape index: {}]   ;;  %s22243_s2 = inlined_call_operand.hbm [shape: f32[8,64], index: 2, kind: input, shape index: {}]   ;;  %s22244_s3 = inlined_call_operand.hbm [shape: f32[8,64], index: 3, kind: input, shape index: {}]   ;;  %s22245_s4 = inlined_call_operand.hbm [shape: f32[3,64,128], index: 4, kind: input, shape index: {}]   ;;  %s22246_s5 = inlined_call_operand.hbm [shape: f32[8,128], index: 5, kind: input, shape index: {}]   ;;  %s22247_s6 = inlined_call_operand.hbm [shape: f32[16,128], index: 6, kind: input, shape index: {}]   ;;  %s22248_s7 = inlined_call_operand.hbm [shape: f32[384,768], index: 7, kind: input, shape index: {}]   ;;  %s22249_s8 = inlined_call_operand.hbm [shape: f32[16,48,128], index: 8, kind: output, shape index: {}]  }
   0x1   :  { %22648 = sst [smem:[#allocation123_spill]] %s22243_s2 }
   0x2   :  { %22649 = sst [smem:[#allocation124_spill]] %s22245_s4 }
   0x3   :  { %13 = vsyncpa [#allocation3], 0 }
   0x4   :  { %14 = vsyncpa [#allocation6], 0 }
   0x5   :  { %15 = vsyncpa [#allocation9], 0 }
   0x6   :  { %16 = vsyncpa [#allocation12], 0 }
   0x7   :  { %17 = vsyncpa [#allocation4], 0 }
   0x8   :  { %19 = vsyncpa [#allocation4 + $0x1], 0  ;;  %s15020_s27 = smov 0   ;;  %s15022_s28 = smov 0  }
   0x9   :  { %s15024_s29 = smov 0   ;;  %s15026_s30 = smov 0  }
   0xa LB: > { %22650 = sst [smem:[#allocation20_spill]] %s14953_s29  ;;  %s15041_s9 = sadd.s32 4294967295, %s14957_s30   ;;  %s14957_s30 = sphi %s15026_s30, %s23631_s30   ;;  %s14953_s29 = sphi %s15024_s29, %s23633_s29   ;;  %s14949_s28 = sphi %s15022_s28, %s23635_s28   ;;  %s14945_s27 = sphi %s15020_s27, %s23634_s27  }
   0xb   : > { %s11028_s10 = sadd.s32 4294967294, %s14957_s30   ;;  %s15045_s11 = sadd.s32 1, %s14957_s30  }
   0xc   : > { %22651 = sst [smem:[#allocation21_spill]] %s15045_s11  ;;  %s205_s12 = sadd.s32 1, %s14953_s29 }
   0xd   : > { %s202_s13 = ssub.s32 %s14957_s30, %s15045_s11  ;;  %p215_p0 = scmp.ne.s32.totalorder %s14953_s29, %s14949_s28 }
   0xe   : > { %p203_p1 = scmp.eq.s32.totalorder %s202_s13, 0  ;;  %p216_p2 = scmp.eq.s32.totalorder %s15041_s9, 1 }
   0xf   : > { %p221_p3 = scmp.ne.s32.totalorder %s14949_s28, %s14945_s27  ;;  %p222_p4 = scmp.eq.s32.totalorder %s11028_s10, 1 }
  0x10   : > { %s15056_s14 = scalar_select %p203_p1, %s14953_s29, %s205_s12  }
  0x11   : > { %p15058_p5 = por %p216_p2, %p215_p0  ;;  %p15062_p6 = por %p222_p4, %p221_p3 }
  0x12   : > { %22652 = sst [smem:[#allocation22_spill]] %s15056_s14  ;;  %p11029_p7 = scmp.ge.s32.totalorder %s14957_s30, 1 }
  0x13   : > { %s22653_s15 = scalar_select %p15058_p5, 1, 0 }
  0x14   : > { %s22654_s16 = scalar_select %p15062_p6, 1, 0 }
  0x15   : > { %p229_p8 = scmp.lt.s32.totalorder %s14957_s30, 3  ;;  %p22250_p9 = scmp.eq.s32.totalorder %s15041_s9, 0 }
  0x16   : > { %s14959_s18 = smov [#allocation5]   ;;  %s14960_s21 = smov [#allocation8]  }
  0x17   : > { %p15069_p10 = pnand %p11029_p7, %p229_p8  ;;  %s255_s19 = sshll.u32 %s14959_s18, 4  ;;  %s256_s19 = int_to_ptr.vmem [resolvable:$true] %s255_s19 }
  0x18   : > { %s276_s22 = sshll.u32 %s14960_s21, 4  ;;  %s14961_s23 = smov [#allocation11]   ;;  %s15081_s22 = int_to_ptr.vmem [resolvable:$true] %s276_s22 }
  0x19   : > { %s22655_s17 = scalar_select %p15069_p10, 1, 0 }
  0x1a   : > { %p14204_p11 = pneg %p15069_p10  ;;  %s15083_s24 = sshll.u32 %s14961_s23, 4  ;;  %s301_s24 = int_to_ptr.vmem [resolvable:$true] %s15083_s24 }
  0x1b   : > { %s22657_s2 = sld [smem:[#allocation123_spill]] }
  0x1c   : > { %p15077_p12 = pnand %p22250_p9, %p14204_p11 }
  0x1e   : > { %p15093_p0 = pneg %p15077_p12 }
  0x21   : > { %s14683_s10 = scalar_lea.hbm %s22657_s2, 128 }
  0x22   : > { %p14684_p13 = scmp.ne.s32.totalorder %s22657_s2, %s14683_s10  ;;  %p14690_p3 = scmp.lt.u32.totalorder %s14683_s10, %s22657_s2 }
  0x24   : > { %p14686_p1 = pnand %p15093_p0, %p14684_p13 }
  0x26   : > { %p14687_p2 = pneg %p14686_p1 }
  0x28   : > { %p14692_p4 = pnand %p14690_p3, %p14687_p2 }
  0x2a   : > { %14695 = shalt.err (!%p14692_p4)
}
  0x2b   : > { %s14696_s25 = scalar_lea.vmem %s256_s19, 128  ;;  %p14704_p9 = scmp.lt.s32.totalorder %s256_s19, %s256_s19 }
  0x2c   : > { %p14697_p7 = scmp.ne.s32.totalorder %s256_s19, %s14696_s25  ;;  %p14705_p6 = scmp.lt.s32.totalorder %s14696_s25, %s14696_s25 }
  0x2e   : > { %p14699_p8 = pnand %p14697_p7, %p15093_p0  ;;  %p14706_p5 = por %p14705_p6, %p14704_p9 }
  0x30   : > { %p14700_p11 = pneg %p14699_p8 }
  0x32   : > { %p14707_p10 = pnand %p14706_p5, %p14700_p11 }
  0x34   : > { %14710 = shalt.err (!%p14707_p10)
}
  0x35   : > { %14210 = dma.hbm_to_vmem [thread:$0]  (!%p15077_p12), %s22657_s2, 128, %s256_s19, [#allocation6]  }
  0x36   : > { %s22659_s4 = sld [smem:[#allocation124_spill]] }
  0x3c   : > { %s14711_s21 = scalar_lea.hbm %s22659_s4, 3072 }
  0x3d   : > { %p14712_p13 = scmp.ne.s32.totalorder %s22659_s4, %s14711_s21  ;;  %p14718_p5 = scmp.lt.u32.totalorder %s14711_s21, %s22659_s4 }
  0x3f   : > { %p14714_p1 = pnand %p14712_p13, %p15093_p0 }
  0x41   : > { %p14715_p6 = pneg %p14714_p1 }
  0x43   : > { %p14720_p9 = pnand %p14718_p5, %p14715_p6 }
  0x45   : > { %14723 = shalt.err (!%p14720_p9)
}
  0x46   : > { %s14724_s19 = scalar_lea.vmem %s15081_s22, 3072  ;;  %p14732_p4 = scmp.lt.s32.totalorder %s15081_s22, %s15081_s22 }
  0x47   : > { %p14725_p10 = scmp.ne.s32.totalorder %s15081_s22, %s14724_s19  ;;  %p14733_p7 = scmp.lt.s32.totalorder %s14724_s19, %s14724_s19 }
  0x49   : > { %p14727_p2 = pnand %p14725_p10, %p15093_p0  ;;  %p14734_p8 = por %p14733_p7, %p14732_p4 }
  0x4b   : > { %p14728_p3 = pneg %p14727_p2 }
  0x4d   : > { %p14735_p11 = pnand %p14734_p8, %p14728_p3 }
  0x4f   : > { %14738 = shalt.err (!%p14735_p11)
}
  0x50   : > { %s14962_s14 = smov 128   ;;  %s14963_s29 = smov 8  }
  0x51   : > { %14216 = dma.hbm_to_vmem [thread:$0]  (!%p15077_p12), %s22659_s4, 3072, %s15081_s22, [#allocation9], %s14962_s14, %s14962_s14, %s14963_s29  }
  0x52   : > { %s14739_s21 = scalar_lea.hbm %s22247_s6, 256 }
  0x53   : > { %p14740_p13 = scmp.ne.s32.totalorder %s22247_s6, %s14739_s21  ;;  %p14746_p5 = scmp.lt.u32.totalorder %s14739_s21, %s22247_s6 }
  0x55   : > { %p14742_p1 = pnand %p14740_p13, %p15093_p0 }
  0x57   : > { %p14743_p6 = pneg %p14742_p1 }
  0x59   : > { %p14748_p9 = pnand %p14746_p5, %p14743_p6 }
  0x5b   : > { %14751 = shalt.err (!%p14748_p9)
}
  0x5c   : > { %s14752_s26 = scalar_lea.vmem %s301_s24, 256  ;;  %p14760_p4 = scmp.lt.s32.totalorder %s301_s24, %s301_s24 }
  0x5d   : > { %p14753_p10 = scmp.ne.s32.totalorder %s301_s24, %s14752_s26  ;;  %p14761_p7 = scmp.lt.s32.totalorder %s14752_s26, %s14752_s26 }
  0x5f   : > { %p14755_p2 = pnand %p14753_p10, %p15093_p0  ;;  %p14762_p8 = por %p14761_p7, %p14760_p4 }
  0x61   : > { %p14756_p3 = pneg %p14755_p2 }
  0x63   : > { %p14763_p11 = pnand %p14762_p8, %p14756_p3 }
  0x65   : > { %14766 = shalt.err (!%p14763_p11)
}
  0x66   : > { %14222 = dma.hbm_to_vmem [thread:$0]  (!%p15077_p12), %s22247_s6, 256, %s301_s24, [#allocation12], %s14962_s14, %s14962_s14, %s14963_s29  }
  0x67   : > { %s14964_s12 = smov [#allocation2]   ;;  %s14965_s13 = smov [#allocation7]  }
  0x68   : > { %s241_s10 = sshll.u32 %s14964_s12, 4  ;;  %s266_s21 = sshll.u32 %s14965_s13, 4  ;;  %s242_s10 = int_to_ptr.vmem [resolvable:$true] %s241_s10  ;;  %s267_s21 = int_to_ptr.vmem [resolvable:$true] %s266_s21 }
  0x69   : > { %s14767_s19 = scalar_lea.hbm %s22242_s1, 384 }
  0x6a   : > { %p14768_p13 = scmp.ne.s32.totalorder %s22242_s1, %s14767_s19  ;;  %p14774_p5 = scmp.lt.u32.totalorder %s14767_s19, %s22242_s1 }
  0x6c   : > { %p14770_p1 = pnand %p14768_p13, %p15093_p0 }
  0x6e   : > { %p14771_p6 = pneg %p14770_p1 }
  0x70   : > { %p14776_p9 = pnand %p14774_p5, %p14771_p6 }
  0x72   : > { %14779 = shalt.err (!%p14776_p9)
}
  0x73   : > { %s14780_s24 = scalar_lea.vmem %s242_s10, 384  ;;  %p14788_p4 = scmp.lt.s32.totalorder %s242_s10, %s242_s10 }
  0x74   : > { %p14781_p10 = scmp.ne.s32.totalorder %s242_s10, %s14780_s24  ;;  %p14789_p7 = scmp.lt.s32.totalorder %s14780_s24, %s14780_s24 }
  0x76   : > { %p14783_p2 = pnand %p14781_p10, %p15093_p0  ;;  %p14790_p8 = por %p14789_p7, %p14788_p4 }
  0x78   : > { %p14784_p3 = pneg %p14783_p2 }
  0x7a   : > { %p14791_p11 = pnand %p14790_p8, %p14784_p3 }
  0x7c   : > { %14794 = shalt.err (!%p14791_p11)
}
  0x7d   : > { %14207 = dma.hbm_to_vmem [thread:$0]  (!%p15077_p12), %s22242_s1, 384, %s242_s10, [#allocation3], %s14962_s14, %s14962_s14, %s14963_s29  }
  0x7e   : > { %s14795_s13 = scalar_lea.hbm %s22244_s3, 128 }
  0x7f   : > { %p14796_p13 = scmp.ne.s32.totalorder %s22244_s3, %s14795_s13  ;;  %p14802_p5 = scmp.lt.u32.totalorder %s14795_s13, %s22244_s3 }
  0x81   : > { %p14798_p1 = pnand %p14796_p13, %p15093_p0 }
  0x83   : > { %p14799_p6 = pneg %p14798_p1 }
  0x85   : > { %p14804_p9 = pnand %p14802_p5, %p14799_p6 }
  0x87   : > { %14807 = shalt.err (!%p14804_p9)
}
  0x88   : > { %s14808_s2 = scalar_lea.vmem %s267_s21, 128  ;;  %p14816_p4 = scmp.lt.s32.totalorder %s267_s21, %s267_s21 }
  0x89   : > { %p14809_p10 = scmp.ne.s32.totalorder %s267_s21, %s14808_s2  ;;  %p14817_p7 = scmp.lt.s32.totalorder %s14808_s2, %s14808_s2 }
  0x8b   : > { %p14811_p2 = pnand %p14809_p10, %p15093_p0  ;;  %p14818_p8 = por %p14817_p7, %p14816_p4 }
  0x8d   : > { %p14812_p3 = pneg %p14811_p2 }
  0x8f   : > { %p14819_p11 = pnand %p14818_p8, %p14812_p3 }
  0x91   : > { %14822 = shalt.err (!%p14819_p11)
}
  0x92   : > { %14213 = dma.hbm_to_vmem [thread:$0]  (!%p15077_p12), %s22244_s3, 128, %s267_s21, [#allocation6]  }
  0x93   : > { %s14966_s10 = smov [#allocation10]   ;;  %s14967_s4 = smov [#allocation13]  }
  0x94   : > { %s290_s24 = sshll.u32 %s14966_s10, 4  ;;  %s313_s11 = sshll.u32 %s14967_s4, 4  ;;  %s291_s24 = int_to_ptr.vmem [resolvable:$true] %s290_s24  ;;  %s314_s11 = int_to_ptr.vmem [resolvable:$true] %s313_s11 }
  0x95   : > { %s14823_s13 = scalar_lea.hbm %s22246_s5, 128 }
  0x96   : > { %p14824_p13 = scmp.ne.s32.totalorder %s22246_s5, %s14823_s13  ;;  %p14830_p5 = scmp.lt.u32.totalorder %s14823_s13, %s22246_s5 }
  0x98   : > { %p14826_p1 = pnand %p14824_p13, %p15093_p0 }
  0x9a   : > { %p14827_p6 = pneg %p14826_p1 }
  0x9c   : > { %p14832_p9 = pnand %p14830_p5, %p14827_p6 }
  0x9e   : > { %14835 = shalt.err (!%p14832_p9)
}
  0x9f   : > { %s14836_s21 = scalar_lea.vmem %s291_s24, 128  ;;  %p14844_p4 = scmp.lt.s32.totalorder %s291_s24, %s291_s24 }
  0xa0   : > { %p14837_p10 = scmp.ne.s32.totalorder %s291_s24, %s14836_s21  ;;  %p14845_p7 = scmp.lt.s32.totalorder %s14836_s21, %s14836_s21 }
  0xa2   : > { %p14839_p2 = pnand %p14837_p10, %p15093_p0  ;;  %p14846_p8 = por %p14845_p7, %p14844_p4 }
  0xa4   : > { %p14840_p3 = pneg %p14839_p2 }
  0xa6   : > { %p14847_p11 = pnand %p14846_p8, %p14840_p3 }
  0xa8   : > { %14850 = shalt.err (!%p14847_p11)
}
  0xa9   : > { %14219 = dma.hbm_to_vmem [thread:$0]  (!%p15077_p12), %s22246_s5, 128, %s291_s24, [#allocation9]  }
  0xaa   : > { %s14851_s4 = scalar_lea.hbm %s22248_s7, 36864 }
  0xab   : > { %p14852_p13 = scmp.ne.s32.totalorder %s22248_s7, %s14851_s4  ;;  %p14858_p5 = scmp.lt.u32.totalorder %s14851_s4, %s22248_s7 }
  0xad   : > { %p14854_p1 = pnand %p14852_p13, %p15093_p0 }
  0xaf   : > { %p14855_p6 = pneg %p14854_p1 }
  0xb1   : > { %p14860_p9 = pnand %p14858_p5, %p14855_p6 }
  0xb3   : > { %14863 = shalt.err (!%p14860_p9)
}
  0xb4   : > { %s14864_s25 = scalar_lea.vmem %s314_s11, 36864  ;;  %p14872_p4 = scmp.lt.s32.totalorder %s314_s11, %s314_s11 }
  0xb5   : > { %p14865_p10 = scmp.ne.s32.totalorder %s314_s11, %s14864_s25  ;;  %p14873_p7 = scmp.lt.s32.totalorder %s14864_s25, %s14864_s25 }
  0xb7   : > { %p14867_p2 = pnand %p14865_p10, %p15093_p0  ;;  %p14874_p8 = por %p14873_p7, %p14872_p4 }
  0xb9   : > { %p14868_p3 = pneg %p14867_p2 }
  0xbb   : > { %p14875_p11 = pnand %p14874_p8, %p14868_p3 }
  0xbd   : > { %14878 = shalt.err (!%p14875_p11)
}
  0xbe   : > { %s14968_s24 = smov 768   ;;  %s14969_s19 = smov 48  }
  0xbf   : > { %14225 = dma.hbm_to_vmem [thread:$0]  (!%p15077_p12), %s22248_s7, 36864, %s314_s11, [#allocation12], %s14968_s24, %s14968_s24, %s14969_s19  }
  0xc0   : > { %p22660_p13 = scmp.ne.s32.totalorder %s22655_s17, 0 }
  0xc2   : > { %339 = sbr.rel (%p22660_p13) target bundleno = 3571 (0xdf3), region = 52 }
  0xc9   : > { %p22661_p1 = scmp.eq.s32.totalorder %s15041_s9, 0 }
  0xcb   : > { %14924 = dma.done.wait (%p22661_p1), [#allocation3], 384   ;;  %p22662_p0 = pmov %p22661_p1 }
  0xcd   : > { %14926 = vsyncadd (%p22662_p0), [#allocation3], 4294966912  ;;  %p22663_p6 = pmov %p22662_p0 }
  0xce   : > { %p22664_p5 = pmov %p22662_p0 }
  0xcf   : > { %14928 = dma.done.wait (%p22663_p6), [#allocation6], 256  }
  0xd0   : > { %14930 = vsyncadd (%p22664_p5), [#allocation6], 4294967040  ;;  %p22665_p9 = pmov %p22662_p0 }
  0xd1   : > { %p22666_p12 = pmov %p22662_p0 }
  0xd2   : > { %14932 = dma.done.wait (%p22665_p9), [#allocation9], 3200  }
  0xd3   : > { %14934 = vsyncadd (%p22666_p12), [#allocation9], 4294964096  ;;  %p22667_p10 = pmov %p22662_p0 }
  0xd4   : > { %p22668_p2 = pmov %p22662_p0 }
  0xd5   : > { %14936 = dma.done.wait (%p22667_p10), [#allocation12], 37120  }
  0xd6   : > { %14938 = vsyncadd (%p22668_p2), [#allocation12], 4294930176  ;;  %s11046_s17 = sshll.u32 %s15041_s9, 3  ;;  %v1004_v0 = vld [vmem:[#allocation2] sm:$0xff]  ;;  %vm600_vm0 = vcmask 1040384   ;;  %vm1005_vm1 = vcmask 64512  }
  0xd7   : > { %p399_p3 = scmp.lt.s32.totalorder %s11046_s17, 15  ;;  %12445 = vmatprep.subr.mxu0 %v1004_v0  ;;  %v1003_v42 = vld [vmem:[#allocation2 + $0x8] sm:$0xff]  ;;  %vm801_vm2 = vcmask 1046528   ;;  %vm3431_vm3 = vcmask 523264   ;;  %vm4000_vm4 = vcmask 1041409   ;;  %vm4002_vm5 = vcmask 1042434  }
  0xd8   : > { %12446 = vmatpush3.msra.mxu0 %v1004_v0  ;;  %vm4004_vm6 = vcmask 1043459   ;;  %vm4006_vm7 = vcmask 1044484   ;;  %vm4008_vm8 = vcmask 1045509   ;;  %vm4010_vm9 = vcmask 1046534   ;;  %s395_s14 = sand.u32 1, %s14949_s28   ;;  %s14173_s4 = smul.u32 6144, %s15041_s9 }
  0xd9   : > { %s23637_s17 = smov (!%p399_p3, %s11046_s17), 15  ;;  %12591 = vmatprep.subr.mxu0 %v1003_v42  ;;  %vm4012_vm10 = vcmask 1047559   ;;  %s14171_s29 = smul.u32 384, %s395_s14 }
  0xda   : > { %s14172_s20 = smul.u32 96, %s23637_s17  ;;  %s22193_s23 = scalar_lea.hbm %s22249_s8, %s14173_s4 }
  0xdb   : > { %s22139_s10 = scalar_lea.vmem [#allocation14], %s14171_s29  ;;  %s22200_s25 = scalar_lea.sflag [#allocation4], %s395_s14 }
  0xdc   : > { %s15254_s2 = scalar_lea.vmem %s22241_s0, %s14172_s20  ;;  %s10897_s22 = sshll.u32 %s22139_s10, 4  ;;  %s22195_s22 = int_to_ptr.vmem [resolvable:$true] %s10897_s22 }
  0xdd   : > { %v15257_v1 = vld [vmem:[%s15254_s2] sm:$0xff]  ;;  %v15260_v2 = vld [vmem:[%s15254_s2 + $0x8] sm:$0xff]  ;;  %v15263_v3 = vld [vmem:[%s15254_s2 + $0x10] sm:$0xff]  ;;  %s14879_s9 = scalar_lea.vmem %s22195_s22, 6144  ;;  %p23629_p7 = scmp.ne.s32.totalorder %s22653_s15, 0 }
  0xde   : > { %v601_v4 = vrot.slane %v15257_v1, 7  ;;  %v602_v5 = vrot.slane %v15260_v2, 7  ;;  %v604_v6 = vrot.slane %v15263_v3, 7  ;;  %v15269_v7 = vld [vmem:[%s15254_s2 + $0x18] sm:$0xff]  ;;  %v15272_v8 = vld [vmem:[%s15254_s2 + $0x20] sm:$0xff]  ;;  %v15280_v14 = vld [vmem:[%s15254_s2 + $0x28] sm:$0xff]  ;;  %p14880_p4 = scmp.ne.s32.totalorder %s22195_s22, %s14879_s9 }
  0xdf   : > { %v606_v9 = vrot.slane %v15269_v7, 7  ;;  %v608_v13 = vrot.slane %v15272_v8, 7  ;;  %v15284_v15 = vld [vmem:[%s15254_s2 + $0x30] sm:$0xff]  ;;  %v610_v17 = vrot.slane %v15280_v14, 7  ;;  %v15293_v20 = vld [vmem:[%s15254_s2 + $0x38] sm:$0xff]  ;;  %v15296_v21 = vld [vmem:[%s15254_s2 + $0x40] sm:$0xff] }
  0xe0   : > { %v793_v10 = vsel %vm600_vm0, 0.0, %v601_v4  ;;  %v603_v11 = vsel %vm600_vm0, %v601_v4, %v602_v5  ;;  %v605_v12 = vsel %vm600_vm0, %v602_v5, %v604_v6  ;;  %v612_v19 = vrot.slane %v15284_v15, 7  ;;  %v15305_v26 = vld [vmem:[%s15254_s2 + $0x48] sm:$0xff]  ;;  %v15308_v27 = vld [vmem:[%s15254_s2 + $0x50] sm:$0xff]  ;;  %v15317_v32 = vld [vmem:[%s15254_s2 + $0x58] sm:$0xff]  ;;  %p14881_p8 = pnand %p14880_p4, %p23629_p7  ;;  %s14972_s24 = smov [#allocation14]  }
  0xe1   : > { %12447 = vmatprep.mubr.msk.f32.mxu0 %vm1005_vm1, %v793_v10  ;;  %v607_v16 = vsel %vm600_vm0, %v604_v6, %v606_v9  ;;  %v609_v18 = vsel %vm600_vm0, %v606_v9, %v608_v13  ;;  %v611_v22 = vsel %vm600_vm0, %v608_v13, %v610_v17  ;;  %v614_v23 = vrot.slane %v15293_v20, 7  ;;  %v15320_v33 = vld [vmem:[%s15254_s2 + $0x60] sm:$0xff]  ;;  %v15329_v38 = vld [vmem:[%s15254_s2 + $0x68] sm:$0xff]  ;;  %v15332_v39 = vld [vmem:[%s15254_s2 + $0x70] sm:$0xff]  ;;  %s14883_s19 = sshll.u32 %s14972_s24, 4  ;;  %s14884_s19 = int_to_ptr.vmem [resolvable:$false] %s14883_s19 }
  0xe2   : > { %12448 = vmatmul.mubr.msk.f32.vlgmr.msra.gmra.mrb[0].mxu0 %vm1005_vm1, %v603_v11  ;;  %v613_v24 = vsel %vm600_vm0, %v610_v17, %v612_v19  ;;  %v616_v25 = vrot.slane %v15296_v21, 7  ;;  %v618_v29 = vrot.slane %v15305_v26, 7  ;;  %v620_v31 = vrot.slane %v15308_v27, 7  ;;  %v15341_v45 = vld [vmem:[%s15254_s2 + $0x78] sm:$0xff]  ;;  %v15344_v46 = vld [vmem:[%s15254_s2 + $0x80] sm:$0xff]  ;;  %v15353_v51 = vld [vmem:[%s15254_s2 + $0x88] sm:$0xff]  ;;  %p14882_p11 = pneg %p14881_p8  ;;  %p14886_p13 = scmp.lt.s32.totalorder %s22195_s22, %s14884_s19 }
  0xe3   : > { %12450 = vmatprep.mubr.msk.f32.mxu0 %vm1005_vm1, %v605_v12  ;;  %v615_v28 = vsel %vm600_vm0, %v612_v19, %v614_v23  ;;  %v622_v35 = vrot.slane %v15317_v32, 7  ;;  %v624_v37 = vrot.slane %v15320_v33, 7  ;;  %v625_v41 = vrot.slane %v15329_v38, 7  ;;  %12592 = vmatpush3.msra.mxu0 %v1003_v42  ;;  %v15356_v52 = vld [vmem:[%s15254_s2 + $0x90] sm:$0xff]  ;;  %v15365_v57 = vld [vmem:[%s15254_s2 + $0x98] sm:$0xff]  ;;  %v15368_v58 = vld [vmem:[%s15254_s2 + $0xa0] sm:$0xff] }
  0xe4   : > { %v617_v30 = vsel %vm600_vm0, %v614_v23, %v616_v25  ;;  %v619_v34 = vsel %vm600_vm0, %v616_v25, %v618_v29  ;;  %v621_v36 = vsel %vm600_vm0, %v618_v29, %v620_v31  ;;  %v627_v44 = vrot.slane %v15332_v39, 7  ;;  %v15377_v63 = vld [vmem:[%s15254_s2 + $0xa8] sm:$0xff]  ;;  %v15380_v0 = vld [vmem:[%s15254_s2 + $0xb0] sm:$0xff]  ;;  %v15389_v10 = vld [vmem:[%s15254_s2 + $0xb8] sm:$0xff]  ;;  %s14885_s26 = scalar_lea.vmem %s14884_s19, 12288 }
  0xe5   : > { %v623_v40 = vsel %vm600_vm0, %v620_v31, %v622_v35  ;;  %v794_v43 = vsel %vm600_vm0, 0.0, %v624_v37  ;;  %v626_v47 = vsel %vm600_vm0, %v624_v37, %v625_v41  ;;  %v629_v48 = vrot.slane %v15341_v45, 7  ;;  %v15392_v11 = vld [vmem:[%s15254_s2 + $0xc0] sm:$0xff]  ;;  %v15404_v19 = vld [vmem:[%s15254_s2 + $0xd0] sm:$0xff]  ;;  %p14887_p1 = scmp.lt.s32.totalorder %s14885_s26, %s14879_s9 }
  0xe6   : > { %12451 = vmatmul.mubr.msk.f32.gmra.mrb[2].mxu0 %vm1005_vm1, %v607_v16  ;;  %v628_v49 = vsel %vm600_vm0, %v625_v41, %v627_v44  ;;  %v631_v50 = vrot.slane %v15344_v46, 7  ;;  %v633_v54 = vrot.slane %v15353_v51, 7  ;;  %v635_v56 = vrot.slane %v15356_v52, 7  ;;  %v15416_v29 = vld [vmem:[%s15254_s2 + $0xe0] sm:$0xff]  ;;  %v15428_v37 = vld [vmem:[%s15254_s2 + $0xf0] sm:$0xff] }
  0xe7   : > { %12453 = vmatprep.mubr.msk.f32.mxu0 %vm1005_vm1, %v609_v18  ;;  %v630_v53 = vsel %vm600_vm0, %v627_v44, %v629_v48  ;;  %v637_v60 = vrot.slane %v15365_v57, 7  ;;  %v639_v62 = vrot.slane %v15368_v58, 7  ;;  %v641_v5 = vrot.slane %v15377_v63, 7  ;;  %v15401_v18 = vld [vmem:[%s15254_s2 + $0xc8] sm:$0xff]  ;;  %v15437_v44 = vld [vmem:[%s15254_s2 + $0xf8] sm:$0xff]  ;;  %p14888_p0 = por %p14887_p1, %p14886_p13 }
  0xe8   : > { %v632_v55 = vsel %vm600_vm0, %v629_v48, %v631_v50  ;;  %v634_v59 = vsel %vm600_vm0, %v631_v50, %v633_v54  ;;  %v636_v61 = vsel %vm600_vm0, %v633_v54, %v635_v56  ;;  %v643_v9 = vrot.slane %v15380_v0, 7  ;;  %v15449_v54 = vld [vmem:[%s15254_s2 + $0x108] sm:$0xff] }
  0xe9   : > { %v638_v4 = vsel %vm600_vm0, %v635_v56, %v637_v60  ;;  %v640_v6 = vsel %vm600_vm0, %v637_v60, %v639_v62  ;;  %v642_v12 = vsel %vm600_vm0, %v639_v62, %v641_v5  ;;  %v645_v13 = vrot.slane %v15389_v10, 7  ;;  %v15461_v62 = vld [vmem:[%s15254_s2 + $0x118] sm:$0xff]  ;;  %p14889_p6 = pnand %p14888_p0, %p14882_p11 }
  0xea   : > { %12454 = vmatmul.mubr.msk.f32.gmra.mrb[4].mxu0 %vm1005_vm1, %v611_v22  ;;  %v644_v16 = vsel %vm600_vm0, %v641_v5, %v643_v9  ;;  %v647_v17 = vrot.slane %v15392_v11, 7  ;;  %v648_v23 = vrot.slane %v15401_v18, 7  ;;  %v650_v25 = vrot.slane %v15404_v19, 7 }
  0xeb   : > { %12456 = vmatprep.mubr.msk.f32.mxu0 %vm1005_vm1, %v613_v24  ;;  %v646_v22 = vsel %vm600_vm0, %v643_v9, %v645_v13  ;;  %v654_v35 = vrot.slane %v15416_v29, 7  ;;  %v15473_v13 = vld [vmem:[%s15254_s2 + $0x128] sm:$0xff] }
  0xec   : > { %v795_v24 = vsel %vm600_vm0, 0.0, %v647_v17 }
  0xee   : > { %12457 = vmatmul.mubr.msk.f32.gmra.mrb[6].mxu0 %vm1005_vm1, %v615_v28  ;;  %v15413_v28 = vld [vmem:[%s15254_s2 + $0xd8] sm:$0xff] }
  0xef   : > { %12459 = vmatprep.mubr.msk.f32.mxu0 %vm1005_vm1, %v617_v30  ;;  %v649_v30 = vsel %vm600_vm0, %v647_v17, %v648_v23  ;;  %v652_v31 = vrot.slane %v15413_v28, 7 }
  0xf1   : > { %v655_v42 = vsel %vm600_vm0, %v652_v31, %v654_v35 }
  0xf2   : > { %12460 = vmatmul.mubr.msk.f32.gmra.mrb[8].mxu0 %vm1005_vm1, %v619_v34  ;;  %v651_v34 = vsel %vm600_vm0, %v648_v23, %v650_v25 }
  0xf3   : > { %12462 = vmatprep.mubr.msk.f32.mxu0 %vm1005_vm1, %v621_v36  ;;  %v15425_v36 = vld [vmem:[%s15254_s2 + $0xe8] sm:$0xff] }
  0xf4   : > { %v656_v41 = vrot.slane %v15425_v36, 7 }
  0xf6   : > { %12463 = vmatmul.mubr.msk.f32.gmra.mrb[10].mxu0 %vm1005_vm1, %v623_v40  ;;  %v653_v40 = vsel %vm600_vm0, %v650_v25, %v652_v31  ;;  %v657_v48 = vsel %vm600_vm0, %v654_v35, %v656_v41  ;;  %v15485_v25 = vld [vmem:[%s15254_s2 + $0x138] sm:$0xff] }
  0xf7   : > { %12465 = vmatprep.mubr.msk.f32.mxu0 %vm1005_vm1, %v794_v43  ;;  %v658_v43 = vrot.slane %v15428_v37, 7 }
  0xf9   : > { %v659_v50 = vsel %vm600_vm0, %v656_v41, %v658_v43  ;;  %v15497_v41 = vld [vmem:[%s15254_s2 + $0x148] sm:$0xff] }
  0xfa   : > { %12466 = vmatmul.mubr.msk.f32.gmra.mrb[12].mxu0 %vm1005_vm1, %v626_v47  ;;  %v15440_v47 = vld [vmem:[%s15254_s2 + $0x100] sm:$0xff] }
  0xfb   : > { %12468 = vmatprep.mubr.msk.f32.mxu0 %vm1005_vm1, %v628_v49  ;;  %v660_v49 = vrot.slane %v15437_v44, 7 }
  0xfd   : > { %v661_v56 = vsel %vm600_vm0, %v658_v43, %v660_v49 }
  0xfe   : > { %12469 = vmatmul.mubr.msk.f32.gmra.mrb[14].mxu0 %vm1005_vm1, %v630_v53  ;;  %v662_v53 = vrot.slane %v15440_v47, 7 }
  0xff   : > { %12471 = vmatprep.mubr.msk.f32.mxu0 %vm1005_vm1, %v632_v55  ;;  %v15452_v55 = vld [vmem:[%s15254_s2 + $0x110] sm:$0xff] }
 0x100   : > { %v663_v60 = vsel %vm600_vm0, %v660_v49, %v662_v53 }
 0x102   : > { %12472 = vmatmul.mubr.msk.f32.gmra.mrb[16].mxu0 %vm1005_vm1, %v634_v59  ;;  %v664_v59 = vrot.slane %v15449_v54, 7 }
 0x103   : > { %12474 = vmatprep.mubr.msk.f32.mxu0 %vm1005_vm1, %v636_v61  ;;  %v666_v61 = vrot.slane %v15452_v55, 7 }
 0x104   : > { %v665_v5 = vsel %vm600_vm0, %v662_v53, %v664_v59  ;;  %v15509_v53 = vld [vmem:[%s15254_s2 + $0x158] sm:$0xff] }
 0x105   : > { %v667_v9 = vsel %vm600_vm0, %v664_v59, %v666_v61 }
 0x106   : > { %12475 = vmatmul.mubr.msk.f32.gmra.mrb[18].mxu0 %vm1005_vm1, %v638_v4  ;;  %v15464_v4 = vld [vmem:[%s15254_s2 + $0x120] sm:$0xff] }
 0x107   : > { %12477 = vmatprep.mubr.msk.f32.mxu0 %vm1005_vm1, %v640_v6  ;;  %v668_v6 = vrot.slane %v15461_v62, 7 }
 0x109   : > { %v669_v17 = vsel %vm600_vm0, %v666_v61, %v668_v6  ;;  %v15521_v6 = vld [vmem:[%s15254_s2 + $0x168] sm:$0xff] }
 0x10a   : > { %12478 = vmatmul.mubr.msk.f32.gmra.mrb[20].mxu0 %vm1005_vm1, %v642_v12  ;;  %v670_v12 = vrot.slane %v15464_v4, 7 }
 0x10b   : > { %12480 = vmatprep.mubr.msk.f32.mxu0 %vm1005_vm1, %v644_v16  ;;  %v15476_v16 = vld [vmem:[%s15254_s2 + $0x130] sm:$0xff] }
 0x10c   : > { %v796_v23 = vsel %vm600_vm0, 0.0, %v670_v12 }
 0x10e   : > { %12481 = vmatmul.mubr.msk.f32.gmra.mrb[22].mxu0 %vm1005_vm1, %v646_v22  ;;  %v671_v22 = vrot.slane %v15473_v13, 7 }
 0x10f   : > { %12483 = vmatprep.mubr.msk.f32.mxu0 %vm1005_vm1, %v795_v24  ;;  %v673_v24 = vrot.slane %v15476_v16, 7 }
 0x110   : > { %v672_v31 = vsel %vm600_vm0, %v670_v12, %v671_v22 }
 0x111   : > { %v674_v35 = vsel %vm600_vm0, %v671_v22, %v673_v24 }
 0x112   : > { %12484 = vmatmul.mubr.msk.f32.gmra.mrb[24].mxu0 %vm1005_vm1, %v649_v30  ;;  %v15488_v30 = vld [vmem:[%s15254_s2 + $0x140] sm:$0xff] }
 0x113   : > { %12486 = vmatprep.mubr.msk.f32.mxu0 %vm1005_vm1, %v651_v34  ;;  %v675_v34 = vrot.slane %v15485_v25, 7 }
 0x115   : > { %v676_v43 = vsel %vm600_vm0, %v673_v24, %v675_v34  ;;  %v15533_v24 = vld [vmem:[%s15254_s2 + $0x178] sm:$0xff] }
 0x116   : > { %12487 = vmatmul.mubr.msk.f32.gmra.mrb[26].mxu0 %vm1005_vm1, %v653_v40  ;;  %v677_v40 = vrot.slane %v15488_v30, 7 }
 0x117   : > { %12489 = vmatprep.mubr.msk.f32.mxu0 %vm1005_vm1, %v655_v42  ;;  %v15500_v42 = vld [vmem:[%s15254_s2 + $0x150] sm:$0xff] }
 0x118   : > { %v678_v49 = vsel %vm600_vm0, %v675_v34, %v677_v40 }
 0x11a   : > { %12490 = vmatmul.mubr.msk.f32.gmra.mrb[28].mxu0 %vm1005_vm1, %v657_v48  ;;  %v679_v48 = vrot.slane %v15497_v41, 7 }
 0x11b   : > { %12492 = vmatprep.mubr.msk.f32.mxu0 %vm1005_vm1, %v659_v50  ;;  %v681_v50 = vrot.slane %v15500_v42, 7 }
 0x11c   : > { %v680_v59 = vsel %vm600_vm0, %v677_v40, %v679_v48 }
 0x11d   : > { %v682_v61 = vsel %vm600_vm0, %v679_v48, %v681_v50  ;;  %v15545_v48 = vld [vmem:[%s15254_s2 + $0x188] sm:$0xff] }
 0x11e   : > { %12493 = vmatmul.mubr.msk.f32.gmra.mrb[30].mxu0 %vm1005_vm1, %v661_v56  ;;  %v15512_v56 = vld [vmem:[%s15254_s2 + $0x160] sm:$0xff] }
 0x11f   : > { %12495 = vmatprep.mubr.msk.f32.mxu0 %vm1005_vm1, %v663_v60  ;;  %v683_v60 = vrot.slane %v15509_v53, 7 }
 0x121   : > { %v684_v12 = vsel %vm600_vm0, %v681_v50, %v683_v60 }
 0x122   : > { %12496 = vmatmul.mubr.msk.f32.gmra.mrb[32].mxu0 %vm1005_vm1, %v665_v5  ;;  %v685_v5 = vrot.slane %v15512_v56, 7 }
 0x123   : > { %12498 = vmatprep.mubr.msk.f32.mxu0 %vm1005_vm1, %v667_v9  ;;  %v15524_v9 = vld [vmem:[%s15254_s2 + $0x170] sm:$0xff] }
 0x124   : > { %v686_v22 = vsel %vm600_vm0, %v683_v60, %v685_v5 }
 0x126   : > { %12499 = vmatmul.mubr.msk.f32.gmra.mrb[34].mxu0 %vm1005_vm1, %v669_v17  ;;  %v687_v17 = vrot.slane %v15521_v6, 7 }
 0x127   : > { %12501 = vmatprep.mubr.msk.f32.mxu0 %vm1005_vm1, %v796_v23  ;;  %v689_v23 = vrot.slane %v15524_v9, 7 }
 0x128   : > { %v688_v34 = vsel %vm600_vm0, %v685_v5, %v687_v17  ;;  %v15557_v5 = vld [vmem:[%s15254_s2 + $0x198] sm:$0xff] }
 0x129   : > { %v690_v40 = vsel %vm600_vm0, %v687_v17, %v689_v23  ;;  %22670 = vst [vmem:[#allocation24_spill] sm:$0xff] %v15557_v5 }
 0x12a   : > { %12502 = vmatmul.mubr.msk.f32.gmra.mrb[36].mxu0 %vm1005_vm1, %v672_v31  ;;  %v15536_v31 = vld [vmem:[%s15254_s2 + $0x180] sm:$0xff] }
 0x12b   : > { %12504 = vmatprep.mubr.msk.f32.mxu0 %vm1005_vm1, %v674_v35  ;;  %v691_v35 = vrot.slane %v15533_v24, 7 }
 0x12d   : > { %v692_v50 = vsel %vm600_vm0, %v689_v23, %v691_v35  ;;  %v15569_v35 = vld [vmem:[%s15254_s2 + $0x1a8] sm:$0xff] }
 0x12e   : > { %12505 = vmatmul.mubr.msk.f32.gmra.mrb[38].mxu0 %vm1005_vm1, %v676_v43  ;;  %v693_v43 = vrot.slane %v15536_v31, 7  ;;  %22672 = vst [vmem:[#allocation26_spill] sm:$0xff] %v15569_v35 }
 0x12f   : > { %12507 = vmatprep.mubr.msk.f32.mxu0 %vm1005_vm1, %v678_v49  ;;  %v15548_v49 = vld [vmem:[%s15254_s2 + $0x190] sm:$0xff] }
 0x130   : > { %22669 = vst [vmem:[#allocation23_spill] sm:$0xff] %v15548_v49  ;;  %v797_v60 = vsel %vm600_vm0, 0.0, %v693_v43 }
 0x132   : > { %12508 = vmatmul.mubr.msk.f32.gmra.mrb[40].mxu0 %vm1005_vm1, %v680_v59  ;;  %v694_v59 = vrot.slane %v15545_v48, 7 }
 0x133   : > { %12510 = vmatprep.mubr.msk.f32.mxu0 %vm1005_vm1, %v682_v61  ;;  %v696_v61 = vrot.slane %v15548_v49, 7  ;;  %v15821_v49 = vld [vmem:[%s15254_s2 + $0x2f8] sm:$0xff] }
 0x134   : > { %v695_v17 = vsel %vm600_vm0, %v693_v43, %v694_v59  ;;  %v702_v43 = vrot.slane %v15569_v35, 7  ;;  %v15593_v35 = vld [vmem:[%s15254_s2 + $0x1c8] sm:$0xff]  ;;  %22712 = vst [vmem:[#allocation66_spill] sm:$0xff] %v15821_v49 }
 0x135   : > { %v697_v23 = vsel %vm600_vm0, %v694_v59, %v696_v61  ;;  %22676 = vst [vmem:[#allocation30_spill] sm:$0xff] %v15593_v35 }
 0x136   : > { %12511 = vmatmul.mubr.msk.f32.gmra.mrb[42].mxu0 %vm1005_vm1, %v684_v12  ;;  %v15560_v12 = vld [vmem:[%s15254_s2 + $0x1a0] sm:$0xff] }
 0x137   : > { %12513 = vmatprep.mubr.msk.f32.mxu0 %vm1005_vm1, %v686_v22  ;;  %22671 = vst [vmem:[#allocation25_spill] sm:$0xff] %v15560_v12  ;;  %v698_v22 = vrot.slane %v15557_v5, 7  ;;  %v15581_v5 = vld [vmem:[%s15254_s2 + $0x1b8] sm:$0xff] }
 0x138   : > { %22674 = vst [vmem:[#allocation28_spill] sm:$0xff] %v15581_v5 }
 0x13a   : > { %12514 = vmatmul.mubr.msk.f32.gmra.mrb[44].mxu0 %vm1005_vm1, %v688_v34  ;;  %v700_v34 = vrot.slane %v15560_v12, 7  ;;  %v15584_v12 = vld [vmem:[%s15254_s2 + $0x1c0] sm:$0xff] }
 0x13b   : > { %12516 = vmatprep.mubr.msk.f32.mxu0 %vm1005_vm1, %v690_v40  ;;  %v15572_v40 = vld [vmem:[%s15254_s2 + $0x1b0] sm:$0xff]  ;;  %22675 = vst [vmem:[#allocation29_spill] sm:$0xff] %v15584_v12 }
 0x13c   : > { %22673 = vst [vmem:[#allocation27_spill] sm:$0xff] %v15572_v40  ;;  %v704_v59 = vrot.slane %v15572_v40, 7  ;;  %v15596_v40 = vld [vmem:[%s15254_s2 + $0x1d0] sm:$0xff] }
 0x13d   : > { %22677 = vst [vmem:[#allocation31_spill] sm:$0xff] %v15596_v40 }
 0x13e   : > { %12517 = vmatmul.mubr.msk.f32.gmra.mrb[46].mxu0 %vm1005_vm1, %v692_v50  ;;  %v699_v50 = vsel %vm600_vm0, %v696_v61, %v698_v22  ;;  %v706_v61 = vrot.slane %v15581_v5, 7  ;;  %v15605_v5 = vld [vmem:[%s15254_s2 + $0x1d8] sm:$0xff] }
 0x13f   : > { %12519 = vmatprep.mubr.msk.f32.mxu0 %vm1005_vm1, %v797_v60  ;;  %v701_v60 = vsel %vm600_vm0, %v698_v22, %v700_v34  ;;  %v708_v22 = vrot.slane %v15584_v12, 7  ;;  %22678 = vst [vmem:[#allocation32_spill] sm:$0xff] %v15605_v5  ;;  %v15608_v12 = vld [vmem:[%s15254_s2 + $0x1e0] sm:$0xff] }
 0x140   : > { %22679 = vst [vmem:[#allocation33_spill] sm:$0xff] %v15608_v12 }
 0x142   : > { %12520 = vmatmul.mubr.msk.f32.gmra.mrb[48].mxu0 %vm1005_vm1, %v695_v17  ;;  %v703_v17 = vsel %vm600_vm0, %v700_v34, %v702_v43  ;;  %v710_v34 = vrot.slane %v15593_v35, 7  ;;  %v15617_v35 = vld [vmem:[%s15254_s2 + $0x1e8] sm:$0xff] }
 0x143   : > { %12522 = vmatprep.mubr.msk.f32.mxu0 %vm1005_vm1, %v697_v23  ;;  %v705_v23 = vsel %vm600_vm0, %v702_v43, %v704_v59  ;;  %v712_v43 = vrot.slane %v15596_v40, 7  ;;  %22680 = vst [vmem:[#allocation34_spill] sm:$0xff] %v15617_v35  ;;  %v15620_v40 = vld [vmem:[%s15254_s2 + $0x1f0] sm:$0xff] }
 0x144   : > { %22681 = vst [vmem:[#allocation35_spill] sm:$0xff] %v15620_v40 }
 0x146   : > { %12523 = vmatmul.mubr.msk.f32.gmra.mrb[50].mxu0 %vm1005_vm1, %v699_v50  ;;  %v707_v50 = vsel %vm600_vm0, %v704_v59, %v706_v61  ;;  %v714_v59 = vrot.slane %v15605_v5, 7  ;;  %v15629_v5 = vld [vmem:[%s15254_s2 + $0x1f8] sm:$0xff] }
 0x147   : > { %12525 = vmatprep.mubr.msk.f32.mxu0 %vm1005_vm1, %v701_v60  ;;  %v709_v60 = vsel %vm600_vm0, %v706_v61, %v708_v22  ;;  %v716_v61 = vrot.slane %v15608_v12, 7  ;;  %22682 = vst [vmem:[#allocation36_spill] sm:$0xff] %v15629_v5  ;;  %v15632_v12 = vld [vmem:[%s15254_s2 + $0x200] sm:$0xff] }
 0x148   : > { %22683 = vst [vmem:[#allocation37_spill] sm:$0xff] %v15632_v12 }
 0x14a   : > { %12526 = vmatmul.mubr.msk.f32.gmra.mrb[52].mxu0 %vm1005_vm1, %v703_v17  ;;  %v711_v17 = vsel %vm600_vm0, %v708_v22, %v710_v34  ;;  %v717_v22 = vrot.slane %v15617_v35, 7  ;;  %v15641_v35 = vld [vmem:[%s15254_s2 + $0x208] sm:$0xff] }
 0x14b   : > { %12528 = vmatprep.mubr.msk.f32.mxu0 %vm1005_vm1, %v705_v23  ;;  %v713_v23 = vsel %vm600_vm0, %v710_v34, %v712_v43  ;;  %v719_v34 = vrot.slane %v15620_v40, 7  ;;  %22684 = vst [vmem:[#allocation38_spill] sm:$0xff] %v15641_v35  ;;  %v15644_v40 = vld [vmem:[%s15254_s2 + $0x210] sm:$0xff] }
 0x14c   : > { %22685 = vst [vmem:[#allocation39_spill] sm:$0xff] %v15644_v40 }
 0x14e   : > { %12529 = vmatmul.mubr.msk.f32.gmra.mrb[54].mxu0 %vm1005_vm1, %v707_v50  ;;  %v715_v50 = vsel %vm600_vm0, %v712_v43, %v714_v59  ;;  %v721_v43 = vrot.slane %v15629_v5, 7  ;;  %v720_v59 = vsel %vm600_vm0, %v717_v22, %v719_v34  ;;  %v15653_v5 = vld [vmem:[%s15254_s2 + $0x218] sm:$0xff] }
 0x14f   : > { %12531 = vmatprep.mubr.msk.f32.mxu0 %vm1005_vm1, %v709_v60  ;;  %v798_v60 = vsel %vm600_vm0, 0.0, %v716_v61  ;;  %22686 = vst [vmem:[#allocation40_spill] sm:$0xff] %v15653_v5 }
 0x152   : > { %12532 = vmatmul.mubr.msk.f32.gmra.mrb[56].mxu0 %vm1005_vm1, %v711_v17  ;;  %v718_v17 = vsel %vm600_vm0, %v716_v61, %v717_v22  ;;  %v725_v61 = vrot.slane %v15641_v35, 7  ;;  %v727_v22 = vrot.slane %v15644_v40, 7  ;;  %v15665_v35 = vld [vmem:[%s15254_s2 + $0x228] sm:$0xff]  ;;  %v15668_v40 = vld [vmem:[%s15254_s2 + $0x230] sm:$0xff] }
 0x153   : > { %12534 = vmatprep.mubr.msk.f32.mxu0 %vm1005_vm1, %v713_v23  ;;  %v723_v23 = vrot.slane %v15632_v12, 7  ;;  %v15656_v12 = vld [vmem:[%s15254_s2 + $0x220] sm:$0xff]  ;;  %22688 = vst [vmem:[#allocation42_spill] sm:$0xff] %v15665_v35  ;;  %22689 = vst [vmem:[#allocation43_spill] sm:$0xff] %v15668_v40 }
 0x154   : > { %22687 = vst [vmem:[#allocation41_spill] sm:$0xff] %v15656_v12 }
 0x156   : > { %12535 = vmatmul.mubr.msk.f32.gmra.mrb[58].mxu0 %vm1005_vm1, %v715_v50  ;;  %v722_v50 = vsel %vm600_vm0, %v719_v34, %v721_v43  ;;  %v729_v34 = vrot.slane %v15653_v5, 7  ;;  %v15677_v5 = vld [vmem:[%s15254_s2 + $0x238] sm:$0xff] }
 0x157   : > { %12537 = vmatprep.mubr.msk.f32.mxu0 %vm1005_vm1, %v798_v60  ;;  %v724_v60 = vsel %vm600_vm0, %v721_v43, %v723_v23  ;;  %v731_v43 = vrot.slane %v15656_v12, 7  ;;  %22690 = vst [vmem:[#allocation44_spill] sm:$0xff] %v15677_v5  ;;  %v15680_v12 = vld [vmem:[%s15254_s2 + $0x240] sm:$0xff] }
 0x158   : > { %22691 = vst [vmem:[#allocation45_spill] sm:$0xff] %v15680_v12 }
 0x15a   : > { %12538 = vmatmul.mubr.msk.f32.gmra.mrb[60].mxu0 %vm1005_vm1, %v718_v17  ;;  %v726_v17 = vsel %vm600_vm0, %v723_v23, %v725_v61  ;;  %v733_v23 = vrot.slane %v15665_v35, 7  ;;  %v15689_v35 = vld [vmem:[%s15254_s2 + $0x248] sm:$0xff] }
 0x15b   : > { %12540 = vmatprep.mubr.msk.f32.mxu0 %vm1005_vm1, %v720_v59  ;;  %v728_v59 = vsel %vm600_vm0, %v725_v61, %v727_v22  ;;  %v735_v61 = vrot.slane %v15668_v40, 7  ;;  %22692 = vst [vmem:[#allocation46_spill] sm:$0xff] %v15689_v35  ;;  %v15692_v40 = vld [vmem:[%s15254_s2 + $0x250] sm:$0xff] }
 0x15c   : > { %22693 = vst [vmem:[#allocation47_spill] sm:$0xff] %v15692_v40 }
 0x15e   : > { %12541 = vmatmul.mubr.msk.f32.gmra.mrb[62].mxu0 %vm1005_vm1, %v722_v50  ;;  %v730_v50 = vsel %vm600_vm0, %v727_v22, %v729_v34  ;;  %v737_v22 = vrot.slane %v15677_v5, 7  ;;  %v15701_v5 = vld [vmem:[%s15254_s2 + $0x258] sm:$0xff] }
 0x15f   : > { %12543 = vmatprep.mubr.msk.f32.mxu0 %vm1005_vm1, %v724_v60  ;;  %v732_v60 = vsel %vm600_vm0, %v729_v34, %v731_v43  ;;  %v739_v34 = vrot.slane %v15680_v12, 7  ;;  %22694 = vst [vmem:[#allocation48_spill] sm:$0xff] %v15701_v5  ;;  %v15704_v12 = vld [vmem:[%s15254_s2 + $0x260] sm:$0xff] }
 0x160   : > { %22695 = vst [vmem:[#allocation49_spill] sm:$0xff] %v15704_v12 }
 0x162   : > { %12544 = vmatmul.mubr.msk.f32.gmra.mrb[64].mxu0 %vm1005_vm1, %v726_v17  ;;  %v734_v17 = vsel %vm600_vm0, %v731_v43, %v733_v23  ;;  %v740_v43 = vrot.slane %v15689_v35, 7  ;;  %v15713_v35 = vld [vmem:[%s15254_s2 + $0x268] sm:$0xff] }
 0x163   : > { %12546 = vmatprep.mubr.msk.f32.mxu0 %vm1005_vm1, %v728_v59  ;;  %v736_v59 = vsel %vm600_vm0, %v733_v23, %v735_v61  ;;  %v742_v23 = vrot.slane %v15692_v40, 7  ;;  %22696 = vst [vmem:[#allocation50_spill] sm:$0xff] %v15713_v35  ;;  %v15716_v40 = vld [vmem:[%s15254_s2 + $0x270] sm:$0xff] }
 0x164   : > { %22697 = vst [vmem:[#allocation51_spill] sm:$0xff] %v15716_v40 }
 0x166   : > { %12547 = vmatmul.mubr.msk.f32.gmra.mrb[66].mxu0 %vm1005_vm1, %v730_v50  ;;  %v738_v50 = vsel %vm600_vm0, %v735_v61, %v737_v22  ;;  %v744_v61 = vrot.slane %v15701_v5, 7  ;;  %v743_v22 = vsel %vm600_vm0, %v740_v43, %v742_v23  ;;  %v15725_v5 = vld [vmem:[%s15254_s2 + $0x278] sm:$0xff] }
 0x167   : > { %12549 = vmatprep.mubr.msk.f32.mxu0 %vm1005_vm1, %v732_v60  ;;  %v799_v60 = vsel %vm600_vm0, 0.0, %v739_v34  ;;  %22698 = vst [vmem:[#allocation52_spill] sm:$0xff] %v15725_v5 }
 0x16a   : > { %12550 = vmatmul.mubr.msk.f32.gmra.mrb[68].mxu0 %vm1005_vm1, %v734_v17  ;;  %v741_v17 = vsel %vm600_vm0, %v739_v34, %v740_v43  ;;  %v748_v34 = vrot.slane %v15713_v35, 7  ;;  %v750_v43 = vrot.slane %v15716_v40, 7  ;;  %v15737_v35 = vld [vmem:[%s15254_s2 + $0x288] sm:$0xff]  ;;  %v15740_v40 = vld [vmem:[%s15254_s2 + $0x290] sm:$0xff] }
 0x16b   : > { %12552 = vmatprep.mubr.msk.f32.mxu0 %vm1005_vm1, %v736_v59  ;;  %v746_v59 = vrot.slane %v15704_v12, 7  ;;  %v15728_v12 = vld [vmem:[%s15254_s2 + $0x280] sm:$0xff]  ;;  %22700 = vst [vmem:[#allocation54_spill] sm:$0xff] %v15737_v35  ;;  %22701 = vst [vmem:[#allocation55_spill] sm:$0xff] %v15740_v40 }
 0x16c   : > { %22699 = vst [vmem:[#allocation53_spill] sm:$0xff] %v15728_v12 }
 0x16e   : > { %12553 = vmatmul.mubr.msk.f32.gmra.mrb[70].mxu0 %vm1005_vm1, %v738_v50  ;;  %v745_v50 = vsel %vm600_vm0, %v742_v23, %v744_v61  ;;  %v752_v23 = vrot.slane %v15725_v5, 7  ;;  %v15749_v5 = vld [vmem:[%s15254_s2 + $0x298] sm:$0xff] }
 0x16f   : > { %12555 = vmatprep.mubr.msk.f32.mxu0 %vm1005_vm1, %v799_v60  ;;  %v747_v60 = vsel %vm600_vm0, %v744_v61, %v746_v59  ;;  %v754_v61 = vrot.slane %v15728_v12, 7  ;;  %22702 = vst [vmem:[#allocation56_spill] sm:$0xff] %v15749_v5  ;;  %v15752_v12 = vld [vmem:[%s15254_s2 + $0x2a0] sm:$0xff] }
 0x170   : > { %22703 = vst [vmem:[#allocation57_spill] sm:$0xff] %v15752_v12 }
 0x172   : > { %12556 = vmatmul.mubr.msk.f32.gmra.mrb[72].mxu0 %vm1005_vm1, %v741_v17  ;;  %v749_v17 = vsel %vm600_vm0, %v746_v59, %v748_v34  ;;  %v756_v59 = vrot.slane %v15737_v35, 7  ;;  %v15761_v35 = vld [vmem:[%s15254_s2 + $0x2a8] sm:$0xff] }
 0x173   : > { %12558 = vmatprep.mubr.msk.f32.mxu0 %vm1005_vm1, %v743_v22  ;;  %v751_v22 = vsel %vm600_vm0, %v748_v34, %v750_v43  ;;  %v758_v34 = vrot.slane %v15740_v40, 7  ;;  %22704 = vst [vmem:[#allocation58_spill] sm:$0xff] %v15761_v35  ;;  %v15764_v40 = vld [vmem:[%s15254_s2 + $0x2b0] sm:$0xff] }
 0x174   : > { %22705 = vst [vmem:[#allocation59_spill] sm:$0xff] %v15764_v40 }
 0x176   : > { %12559 = vmatmul.mubr.msk.f32.gmra.mrb[74].mxu0 %vm1005_vm1, %v745_v50  ;;  %v753_v50 = vsel %vm600_vm0, %v750_v43, %v752_v23  ;;  %v760_v43 = vrot.slane %v15749_v5, 7  ;;  %v15773_v5 = vld [vmem:[%s15254_s2 + $0x2b8] sm:$0xff] }
 0x177   : > { %12561 = vmatprep.mubr.msk.f32.mxu0 %vm1005_vm1, %v747_v60  ;;  %v755_v60 = vsel %vm600_vm0, %v752_v23, %v754_v61  ;;  %v762_v23 = vrot.slane %v15752_v12, 7  ;;  %22706 = vst [vmem:[#allocation60_spill] sm:$0xff] %v15773_v5  ;;  %v15776_v12 = vld [vmem:[%s15254_s2 + $0x2c0] sm:$0xff] }
 0x178   : > { %22707 = vst [vmem:[#allocation61_spill] sm:$0xff] %v15776_v12 }
 0x17a   : > { %12562 = vmatmul.mubr.msk.f32.gmra.mrb[76].mxu0 %vm1005_vm1, %v749_v17  ;;  %v757_v17 = vsel %vm600_vm0, %v754_v61, %v756_v59  ;;  %v763_v61 = vrot.slane %v15761_v35, 7  ;;  %v15785_v35 = vld [vmem:[%s15254_s2 + $0x2c8] sm:$0xff] }
 0x17b   : > { %12564 = vmatprep.mubr.msk.f32.mxu0 %vm1005_vm1, %v751_v22  ;;  %v759_v22 = vsel %vm600_vm0, %v756_v59, %v758_v34  ;;  %v765_v59 = vrot.slane %v15764_v40, 7  ;;  %22708 = vst [vmem:[#allocation62_spill] sm:$0xff] %v15785_v35  ;;  %v15788_v40 = vld [vmem:[%s15254_s2 + $0x2d0] sm:$0xff] }
 0x17c   : > { %22709 = vst [vmem:[#allocation63_spill] sm:$0xff] %v15788_v40 }
 0x17e   : > { %12565 = vmatmul.mubr.msk.f32.gmra.mrb[78].mxu0 %vm1005_vm1, %v753_v50  ;;  %v761_v50 = vsel %vm600_vm0, %v758_v34, %v760_v43  ;;  %v767_v34 = vrot.slane %v15773_v5, 7  ;;  %v766_v43 = vsel %vm600_vm0, %v763_v61, %v765_v59  ;;  %v15797_v5 = vld [vmem:[%s15254_s2 + $0x2d8] sm:$0xff] }
 0x17f   : > { %12567 = vmatprep.mubr.msk.f32.mxu0 %vm1005_vm1, %v755_v60  ;;  %v800_v60 = vsel %vm600_vm0, 0.0, %v762_v23  ;;  %22710 = vst [vmem:[#allocation64_spill] sm:$0xff] %v15797_v5 }
 0x182   : > { %12568 = vmatmul.mubr.msk.f32.gmra.mrb[80].mxu0 %vm1005_vm1, %v757_v17  ;;  %v764_v17 = vsel %vm600_vm0, %v762_v23, %v763_v61  ;;  %v771_v23 = vrot.slane %v15785_v35, 7  ;;  %v773_v61 = vrot.slane %v15788_v40, 7  ;;  %v15812_v40 = vld [vmem:[%s15254_s2 + $0x2f0] sm:$0xff] }
 0x183   : > { %12570 = vmatprep.mubr.msk.f32.mxu0 %vm1005_vm1, %v759_v22  ;;  %v769_v22 = vrot.slane %v15776_v12, 7  ;;  %v15800_v12 = vld [vmem:[%s15254_s2 + $0x2e0] sm:$0xff] }
 0x184   : > { %v777_v35 = vrot.slane %v15800_v12, 7 }
 0x186   : > { %12571 = vmatmul.mubr.msk.f32.gmra.mrb[82].mxu0 %vm1005_vm1, %v761_v50  ;;  %v768_v50 = vsel %vm600_vm0, %v765_v59, %v767_v34  ;;  %v774_v59 = vsel %vm600_vm0, %v771_v23, %v773_v61 }
 0x187   : > { %12573 = vmatprep.mubr.msk.f32.mxu0 %vm1005_vm1, %v800_v60  ;;  %v770_v60 = vsel %vm600_vm0, %v767_v34, %v769_v22  ;;  %v15809_v34 = vld [vmem:[%s15254_s2 + $0x2e8] sm:$0xff] }
 0x188   : > { %22711 = vst [vmem:[#allocation65_spill] sm:$0xff] %v15809_v34 }
 0x18a   : > { %12574 = vmatmul.mubr.msk.f32.gmra.mrb[84].mxu0 %vm1005_vm1, %v764_v17  ;;  %v772_v17 = vsel %vm600_vm0, %v769_v22, %v771_v23 }
 0x18b   : > { %12576 = vmatprep.mubr.msk.f32.mxu0 %vm1005_vm1, %v766_v43  ;;  %v775_v43 = vrot.slane %v15797_v5, 7  ;;  %v781_v5 = vrot.slane %v15812_v40, 7 }
 0x18d   : > { %v778_v22 = vsel %vm600_vm0, %v775_v43, %v777_v35 }
 0x18e   : > { %12577 = vmatmul.mubr.msk.f32.gmra.mrb[86].mxu0 %vm1005_vm1, %v768_v50  ;;  %v776_v50 = vsel %vm600_vm0, %v773_v61, %v775_v43  ;;  %v2489_v43 = vld [vmem:[#allocation2 + $0x10] sm:$0xff] }
 0x18f   : > { %12579 = vmatprep.mubr.msk.f32.mxu0 %vm1005_vm1, %v770_v60  ;;  %v779_v60 = vrot.slane %v15809_v34, 7  ;;  %12737 = vmatprep.subr.mxu0 %v2489_v43 }
 0x191   : > { %v780_v23 = vsel %vm600_vm0, %v777_v35, %v779_v60  ;;  %v22714_v35 = vld [vmem:[#allocation24_spill] sm:$0xff] }
 0x192   : > { %12580 = vmatmul.mubr.msk.f32.gmra.mrb[88].mxu0 %vm1005_vm1, %v772_v17  ;;  %v783_v17 = vrot.slane %v15821_v49, 7 }
 0x193   : > { %12582 = vmatprep.mubr.msk.f32.mxu0 %vm1005_vm1, %v774_v59  ;;  %v782_v59 = vsel %vm600_vm0, %v779_v60, %v781_v5  ;;  %v22716_v60 = vld [vmem:[#allocation26_spill] sm:$0xff] }
 0x194   : > { %v784_v61 = vsel %vm600_vm0, %v781_v5, %v783_v17  ;;  %v22713_v5 = vld [vmem:[#allocation23_spill] sm:$0xff]  ;;  %v22719_v17 = vld [vmem:[#allocation29_spill] sm:$0xff] }
 0x196   : > { %12583 = vmatmul.mubr.msk.f32.gmra.mrb[90].mxu0 %vm1005_vm1, %v776_v50  ;;  %v22715_v50 = vld [vmem:[#allocation25_spill] sm:$0xff] }
 0x197   : > { %12585 = vmatprep.mubr.msk.f32.mxu0 %vm1005_vm1, %v778_v22  ;;  %v22717_v22 = vld [vmem:[#allocation27_spill] sm:$0xff] }
 0x19a   : > { %12586 = vmatmul.mubr.msk.f32.gmra.mrb[92].mxu0 %vm1005_vm1, %v780_v23  ;;  %v22718_v23 = vld [vmem:[#allocation28_spill] sm:$0xff] }
 0x19b   : > { %12588 = vmatprep.mubr.msk.f32.mxu0 %vm1005_vm1, %v782_v59  ;;  %v22720_v59 = vld [vmem:[#allocation30_spill] sm:$0xff] }
 0x19e   : > { %12589 = vmatmul.mubr.msk.f32.gmra.mrb[94].mxu0 %vm1005_vm1, %v784_v61  ;;  %v22721_v61 = vld [vmem:[#allocation31_spill] sm:$0xff] }
 0x19f   : > { %12593 = vmatprep.mubr.msk.f32.mxu0 %vm1005_vm1, %v15257_v1 }
 0x1a2   : > { %12594 = vmatmul.mubr.msk.f32.vlgmr.msra.gmra.mrb[0].mxu0 %vm1005_vm1, %v15260_v2 }
 0x1a3   : > { %12596 = vmatprep.mubr.msk.f32.mxu0 %vm1005_vm1, %v15263_v3  ;;  %12738 = vmatpush3.msra.mxu0 %v2489_v43  ;;  %v22722_v43 = vld [vmem:[#allocation32_spill] sm:$0xff] }
 0x1a6   : > { %12597 = vmatmul.mubr.msk.f32.gmra.mrb[2].mxu0 %vm1005_vm1, %v15269_v7 }
 0x1a7   : > { %12599 = vmatprep.mubr.msk.f32.mxu0 %vm1005_vm1, %v15272_v8 }
 0x1aa   : > { %12600 = vmatmul.mubr.msk.f32.gmra.mrb[4].mxu0 %vm1005_vm1, %v15280_v14 }
 0x1ab   : > { %12602 = vmatprep.mubr.msk.f32.mxu0 %vm1005_vm1, %v15284_v15 }
 0x1ae   : > { %12603 = vmatmul.mubr.msk.f32.gmra.mrb[6].mxu0 %vm1005_vm1, %v15293_v20 }
 0x1af   : > { %12605 = vmatprep.mubr.msk.f32.mxu0 %vm1005_vm1, %v15296_v21 }
 0x1b2   : > { %12606 = vmatmul.mubr.msk.f32.gmra.mrb[8].mxu0 %vm1005_vm1, %v15305_v26 }
 0x1b3   : > { %12608 = vmatprep.mubr.msk.f32.mxu0 %vm1005_vm1, %v15308_v27 }
 0x1b6   : > { %12609 = vmatmul.mubr.msk.f32.gmra.mrb[10].mxu0 %vm1005_vm1, %v15317_v32 }
 0x1b7   : > { %12611 = vmatprep.mubr.msk.f32.mxu0 %vm1005_vm1, %v15320_v33 }
 0x1ba   : > { %12612 = vmatmul.mubr.msk.f32.gmra.mrb[12].mxu0 %vm1005_vm1, %v15329_v38 }
 0x1bb   : > { %12614 = vmatprep.mubr.msk.f32.mxu0 %vm1005_vm1, %v15332_v39 }
 0x1be   : > { %12615 = vmatmul.mubr.msk.f32.gmra.mrb[14].mxu0 %vm1005_vm1, %v15341_v45 }
 0x1bf   : > { %12617 = vmatprep.mubr.msk.f32.mxu0 %vm1005_vm1, %v15344_v46 }
 0x1c2   : > { %12618 = vmatmul.mubr.msk.f32.gmra.mrb[16].mxu0 %vm1005_vm1, %v15353_v51 }
 0x1c3   : > { %12620 = vmatprep.mubr.msk.f32.mxu0 %vm1005_vm1, %v15356_v52 }
 0x1c6   : > { %12621 = vmatmul.mubr.msk.f32.gmra.mrb[18].mxu0 %vm1005_vm1, %v15365_v57 }
 0x1c7   : > { %12623 = vmatprep.mubr.msk.f32.mxu0 %vm1005_vm1, %v15368_v58 }
 0x1ca   : > { %12624 = vmatmul.mubr.msk.f32.gmra.mrb[20].mxu0 %vm1005_vm1, %v15377_v63 }
 0x1cb   : > { %12626 = vmatprep.mubr.msk.f32.mxu0 %vm1005_vm1, %v15380_v0 }
 0x1ce   : > { %12627 = vmatmul.mubr.msk.f32.gmra.mrb[22].mxu0 %vm1005_vm1, %v15389_v10 }
 0x1cf   : > { %12629 = vmatprep.mubr.msk.f32.mxu0 %vm1005_vm1, %v15392_v11 }
 0x1d2   : > { %12630 = vmatmul.mubr.msk.f32.gmra.mrb[24].mxu0 %vm1005_vm1, %v15401_v18 }
 0x1d3   : > { %12632 = vmatprep.mubr.msk.f32.mxu0 %vm1005_vm1, %v15404_v19 }
 0x1d6   : > { %12633 = vmatmul.mubr.msk.f32.gmra.mrb[26].mxu0 %vm1005_vm1, %v15413_v28 }
 0x1d7   : > { %12635 = vmatprep.mubr.msk.f32.mxu0 %vm1005_vm1, %v15416_v29 }
 0x1da   : > { %12636 = vmatmul.mubr.msk.f32.gmra.mrb[28].mxu0 %vm1005_vm1, %v15425_v36 }
 0x1db   : > { %12638 = vmatprep.mubr.msk.f32.mxu0 %vm1005_vm1, %v15428_v37 }
 0x1de   : > { %12639 = vmatmul.mubr.msk.f32.gmra.mrb[30].mxu0 %vm1005_vm1, %v15437_v44 }
 0x1df   : > { %12641 = vmatprep.mubr.msk.f32.mxu0 %vm1005_vm1, %v15440_v47 }
 0x1e2   : > { %12642 = vmatmul.mubr.msk.f32.gmra.mrb[32].mxu0 %vm1005_vm1, %v15449_v54 }
 0x1e3   : > { %12644 = vmatprep.mubr.msk.f32.mxu0 %vm1005_vm1, %v15452_v55 }
 0x1e6   : > { %12645 = vmatmul.mubr.msk.f32.gmra.mrb[34].mxu0 %vm1005_vm1, %v15461_v62 }
 0x1e7   : > { %12647 = vmatprep.mubr.msk.f32.mxu0 %vm1005_vm1, %v15464_v4 }
 0x1ea   : > { %12648 = vmatmul.mubr.msk.f32.gmra.mrb[36].mxu0 %vm1005_vm1, %v15473_v13 }
 0x1eb   : > { %12650 = vmatprep.mubr.msk.f32.mxu0 %vm1005_vm1, %v15476_v16 }
 0x1ee   : > { %12651 = vmatmul.mubr.msk.f32.gmra.mrb[38].mxu0 %vm1005_vm1, %v15485_v25 }
 0x1ef   : > { %12653 = vmatprep.mubr.msk.f32.mxu0 %vm1005_vm1, %v15488_v30 }
 0x1f2   : > { %12654 = vmatmul.mubr.msk.f32.gmra.mrb[40].mxu0 %vm1005_vm1, %v15497_v41 }
 0x1f3   : > { %12656 = vmatprep.mubr.msk.f32.mxu0 %vm1005_vm1, %v15500_v42 }
 0x1f6   : > { %12657 = vmatmul.mubr.msk.f32.gmra.mrb[42].mxu0 %vm1005_vm1, %v15509_v53 }
 0x1f7   : > { %12659 = vmatprep.mubr.msk.f32.mxu0 %vm1005_vm1, %v15512_v56 }
 0x1fa   : > { %12660 = vmatmul.mubr.msk.f32.gmra.mrb[44].mxu0 %vm1005_vm1, %v15521_v6 }
 0x1fb   : > { %12662 = vmatprep.mubr.msk.f32.mxu0 %vm1005_vm1, %v15524_v9 }
 0x1fe   : > { %12663 = vmatmul.mubr.msk.f32.gmra.mrb[46].mxu0 %vm1005_vm1, %v15533_v24 }
 0x1ff   : > { %12665 = vmatprep.mubr.msk.f32.mxu0 %vm1005_vm1, %v15536_v31 }
 0x202   : > { %12666 = vmatmul.mubr.msk.f32.gmra.mrb[48].mxu0 %vm1005_vm1, %v15545_v48 }
 0x203   : > { %12668 = vmatprep.mubr.msk.f32.mxu0 %vm1005_vm1, %v22713_v5 }
 0x206   : > { %12669 = vmatmul.mubr.msk.f32.gmra.mrb[50].mxu0 %vm1005_vm1, %v22714_v35 }
 0x207   : > { %12671 = vmatprep.mubr.msk.f32.mxu0 %vm1005_vm1, %v22715_v50  ;;  %v22723_v50 = vld [vmem:[#allocation33_spill] sm:$0xff] }
 0x20a   : > { %12672 = vmatmul.mubr.msk.f32.gmra.mrb[52].mxu0 %vm1005_vm1, %v22716_v60  ;;  %v22724_v60 = vld [vmem:[#allocation34_spill] sm:$0xff] }
 0x20b   : > { %12674 = vmatprep.mubr.msk.f32.mxu0 %vm1005_vm1, %v22717_v22  ;;  %v22725_v22 = vld [vmem:[#allocation35_spill] sm:$0xff] }
 0x20e   : > { %12675 = vmatmul.mubr.msk.f32.gmra.mrb[54].mxu0 %vm1005_vm1, %v22718_v23  ;;  %v22726_v23 = vld [vmem:[#allocation36_spill] sm:$0xff] }
 0x20f   : > { %12677 = vmatprep.mubr.msk.f32.mxu0 %vm1005_vm1, %v22719_v17  ;;  %v22727_v17 = vld [vmem:[#allocation37_spill] sm:$0xff] }
 0x212   : > { %12678 = vmatmul.mubr.msk.f32.gmra.mrb[56].mxu0 %vm1005_vm1, %v22720_v59  ;;  %v22728_v59 = vld [vmem:[#allocation38_spill] sm:$0xff] }
 0x213   : > { %12680 = vmatprep.mubr.msk.f32.mxu0 %vm1005_vm1, %v22721_v61  ;;  %v22729_v61 = vld [vmem:[#allocation39_spill] sm:$0xff] }
 0x216   : > { %12681 = vmatmul.mubr.msk.f32.gmra.mrb[58].mxu0 %vm1005_vm1, %v22722_v43  ;;  %v22730_v43 = vld [vmem:[#allocation40_spill] sm:$0xff] }
 0x217   : > { %12683 = vmatprep.mubr.msk.f32.mxu0 %vm1005_vm1, %v22723_v50  ;;  %v22731_v50 = vld [vmem:[#allocation41_spill] sm:$0xff] }
 0x21a   : > { %12684 = vmatmul.mubr.msk.f32.gmra.mrb[60].mxu0 %vm1005_vm1, %v22724_v60  ;;  %v22732_v60 = vld [vmem:[#allocation42_spill] sm:$0xff] }
 0x21b   : > { %12686 = vmatprep.mubr.msk.f32.mxu0 %vm1005_vm1, %v22725_v22  ;;  %v22733_v22 = vld [vmem:[#allocation43_spill] sm:$0xff] }
 0x21e   : > { %12687 = vmatmul.mubr.msk.f32.gmra.mrb[62].mxu0 %vm1005_vm1, %v22726_v23  ;;  %v22734_v23 = vld [vmem:[#allocation44_spill] sm:$0xff] }
 0x21f   : > { %12689 = vmatprep.mubr.msk.f32.mxu0 %vm1005_vm1, %v22727_v17  ;;  %v22735_v17 = vld [vmem:[#allocation45_spill] sm:$0xff] }
 0x222   : > { %12690 = vmatmul.mubr.msk.f32.gmra.mrb[64].mxu0 %vm1005_vm1, %v22728_v59  ;;  %v22736_v59 = vld [vmem:[#allocation46_spill] sm:$0xff] }
 0x223   : > { %12692 = vmatprep.mubr.msk.f32.mxu0 %vm1005_vm1, %v22729_v61  ;;  %v22737_v61 = vld [vmem:[#allocation47_spill] sm:$0xff] }
 0x226   : > { %12693 = vmatmul.mubr.msk.f32.gmra.mrb[66].mxu0 %vm1005_vm1, %v22730_v43  ;;  %v22738_v43 = vld [vmem:[#allocation48_spill] sm:$0xff] }
 0x227   : > { %12695 = vmatprep.mubr.msk.f32.mxu0 %vm1005_vm1, %v22731_v50  ;;  %v22739_v50 = vld [vmem:[#allocation49_spill] sm:$0xff] }
 0x22a   : > { %12696 = vmatmul.mubr.msk.f32.gmra.mrb[68].mxu0 %vm1005_vm1, %v22732_v60  ;;  %v22740_v60 = vld [vmem:[#allocation50_spill] sm:$0xff] }
 0x22b   : > { %12698 = vmatprep.mubr.msk.f32.mxu0 %vm1005_vm1, %v22733_v22  ;;  %v22741_v22 = vld [vmem:[#allocation51_spill] sm:$0xff] }
 0x22e   : > { %12699 = vmatmul.mubr.msk.f32.gmra.mrb[70].mxu0 %vm1005_vm1, %v22734_v23  ;;  %v22742_v23 = vld [vmem:[#allocation52_spill] sm:$0xff] }
 0x22f   : > { %12701 = vmatprep.mubr.msk.f32.mxu0 %vm1005_vm1, %v22735_v17  ;;  %v22743_v17 = vld [vmem:[#allocation53_spill] sm:$0xff] }
 0x232   : > { %12702 = vmatmul.mubr.msk.f32.gmra.mrb[72].mxu0 %vm1005_vm1, %v22736_v59  ;;  %v22744_v59 = vld [vmem:[#allocation54_spill] sm:$0xff] }
 0x233   : > { %12704 = vmatprep.mubr.msk.f32.mxu0 %vm1005_vm1, %v22737_v61  ;;  %v22745_v61 = vld [vmem:[#allocation55_spill] sm:$0xff] }
 0x236   : > { %12705 = vmatmul.mubr.msk.f32.gmra.mrb[74].mxu0 %vm1005_vm1, %v22738_v43  ;;  %v22746_v43 = vld [vmem:[#allocation56_spill] sm:$0xff] }
 0x237   : > { %12707 = vmatprep.mubr.msk.f32.mxu0 %vm1005_vm1, %v22739_v50  ;;  %v22747_v50 = vld [vmem:[#allocation57_spill] sm:$0xff] }
 0x23a   : > { %12708 = vmatmul.mubr.msk.f32.gmra.mrb[76].mxu0 %vm1005_vm1, %v22740_v60  ;;  %v22748_v60 = vld [vmem:[#allocation58_spill] sm:$0xff] }
 0x23b   : > { %12710 = vmatprep.mubr.msk.f32.mxu0 %vm1005_vm1, %v22741_v22  ;;  %v22749_v22 = vld [vmem:[#allocation59_spill] sm:$0xff] }
 0x23e   : > { %12711 = vmatmul.mubr.msk.f32.gmra.mrb[78].mxu0 %vm1005_vm1, %v22742_v23  ;;  %v22750_v23 = vld [vmem:[#allocation60_spill] sm:$0xff] }
 0x23f   : > { %12713 = vmatprep.mubr.msk.f32.mxu0 %vm1005_vm1, %v22743_v17  ;;  %v22751_v17 = vld [vmem:[#allocation61_spill] sm:$0xff] }
 0x242   : > { %12714 = vmatmul.mubr.msk.f32.gmra.mrb[80].mxu0 %vm1005_vm1, %v22744_v59  ;;  %v22752_v59 = vld [vmem:[#allocation62_spill] sm:$0xff] }
 0x243   : > { %12716 = vmatprep.mubr.msk.f32.mxu0 %vm1005_vm1, %v22745_v61  ;;  %v22753_v61 = vld [vmem:[#allocation63_spill] sm:$0xff] }
 0x246   : > { %12717 = vmatmul.mubr.msk.f32.gmra.mrb[82].mxu0 %vm1005_vm1, %v22746_v43  ;;  %v22754_v43 = vld [vmem:[#allocation64_spill] sm:$0xff] }
 0x247   : > { %12719 = vmatprep.mubr.msk.f32.mxu0 %vm1005_vm1, %v22747_v50 }
 0x24a   : > { %12720 = vmatmul.mubr.msk.f32.gmra.mrb[84].mxu0 %vm1005_vm1, %v22748_v60  ;;  %v803_v60 = vrot.slane %v15260_v2, 1  ;;  %v809_v2 = vrot.slane %v15272_v8, 1 }
 0x24b   : > { %12722 = vmatprep.mubr.msk.f32.mxu0 %vm1005_vm1, %v22749_v22  ;;  %v802_v22 = vrot.slane %v15257_v1, 1 }
 0x24e   : > { %12723 = vmatmul.mubr.msk.f32.gmra.mrb[86].mxu0 %vm1005_vm1, %v22750_v23 }
 0x24f   : > { %12725 = vmatprep.mubr.msk.f32.mxu0 %vm1005_vm1, %v22751_v17  ;;  %v805_v17 = vrot.slane %v15263_v3, 1  ;;  %v811_v3 = vrot.slane %v15280_v14, 1  ;;  %v817_v14 = vrot.slane %v15296_v21, 1 }
 0x251   : > { %v806_v1 = vsel %vm801_vm2, %v803_v60, %v805_v17 }
 0x252   : > { %12726 = vmatmul.mubr.msk.f32.gmra.mrb[88].mxu0 %vm1005_vm1, %v22752_v59 }
 0x253   : > { %12728 = vmatprep.mubr.msk.f32.mxu0 %vm1005_vm1, %v22753_v61  ;;  %v804_v61 = vsel %vm801_vm2, %v802_v22, %v803_v60 }
 0x256   : > { %12729 = vmatmul.mubr.msk.f32.gmra.mrb[90].mxu0 %vm1005_vm1, %v22754_v43  ;;  %v807_v43 = vrot.slane %v15269_v7, 1  ;;  %v813_v7 = vrot.slane %v15284_v15, 1 }
 0x257   : > { %12731 = vmatprep.mubr.msk.f32.mxu0 %vm1005_vm1, %v15800_v12 }
 0x258   : > { %v810_v22 = vsel %vm801_vm2, %v807_v43, %v809_v2  ;;  %v814_v8 = vsel %vm801_vm2, %v811_v3, %v813_v7 }
 0x25a   : > { %12732 = vmatmul.mubr.msk.f32.gmra.mrb[92].mxu0 %vm1005_vm1, %v15809_v34  ;;  %v808_v34 = vsel %vm801_vm2, %v805_v17, %v807_v43  ;;  %v825_v43 = vrot.slane %v15320_v33, 1 }
 0x25b   : > { %12734 = vmatprep.mubr.msk.f32.mxu0 %vm1005_vm1, %v15812_v40 }
 0x25e   : > { %12735 = vmatmul.mubr.msk.f32.gmra.mrb[94].mxu0 %vm1005_vm1, %v15821_v49  ;;  %v812_v49 = vsel %vm801_vm2, %v809_v2, %v811_v3  ;;  %v830_v3 = vrot.slane %v15341_v45, 1  ;;  %v836_v45 = vrot.slane %v15356_v52, 1 }
 0x25f   : > { %12739 = vmatprep.mubr.msk.f32.mxu0 %vm1005_vm1, %v804_v61  ;;  %v815_v61 = vrot.slane %v15293_v20, 1  ;;  %v821_v20 = vrot.slane %v15308_v27, 1 }
 0x261   : > { %v816_v60 = vsel %vm801_vm2, %v813_v7, %v815_v61  ;;  %v818_v15 = vsel %vm801_vm2, %v815_v61, %v817_v14  ;;  %v834_v7 = vrot.slane %v15353_v51, 1  ;;  %v840_v51 = vrot.slane %v15368_v58, 1 }
 0x262   : > { %12740 = vmatmul.mubr.msk.f32.vlgmr.msra.gmra.mrb[0].mxu0 %vm1005_vm1, %v806_v1  ;;  %v826_v1 = vrot.slane %v15329_v38, 1  ;;  %v832_v38 = vrot.slane %v15344_v46, 1 }
 0x263   : > { %12742 = vmatprep.mubr.msk.f32.mxu0 %vm1005_vm1, %v808_v34  ;;  %v819_v34 = vrot.slane %v15305_v26, 1  ;;  %v837_v46 = vsel %vm801_vm2, %v834_v7, %v836_v45 }
 0x264   : > { %v827_v2 = vsel %vm801_vm2, %v825_v43, %v826_v1  ;;  %v835_v61 = vsel %vm801_vm2, %v832_v38, %v834_v7  ;;  %v857_v43 = vrot.slane %v15425_v36, 1  ;;  %v863_v36 = vrot.slane %v15440_v47, 1 }
 0x265   : > { %v820_v17 = vsel %vm801_vm2, %v817_v14, %v819_v34  ;;  %v822_v21 = vsel %vm801_vm2, %v819_v34, %v821_v20 }
 0x266   : > { %12743 = vmatmul.mubr.msk.f32.gmra.mrb[2].mxu0 %vm1005_vm1, %v810_v22 }
 0x267   : > { %12745 = vmatprep.mubr.msk.f32.mxu0 %vm1005_vm1, %v812_v49  ;;  %v823_v49 = vrot.slane %v15317_v32, 1  ;;  %v828_v32 = vrot.slane %v15332_v39, 1  ;;  %v833_v39 = vsel %vm801_vm2, %v830_v3, %v832_v38  ;;  %v871_v38 = vrot.slane %v15464_v4, 1 }
 0x269   : > { %v824_v26 = vsel %vm801_vm2, %v821_v20, %v823_v49  ;;  %v994_v27 = vsel %vm801_vm2, %v823_v49, 0.0  ;;  %v829_v33 = vsel %vm801_vm2, %v826_v1, %v828_v32  ;;  %v831_v22 = vsel %vm801_vm2, %v828_v32, %v830_v3 }
 0x26a   : > { %12746 = vmatmul.mubr.msk.f32.gmra.mrb[4].mxu0 %vm1005_vm1, %v814_v8  ;;  %v838_v8 = vrot.slane %v15365_v57, 1  ;;  %v844_v57 = vrot.slane %v15380_v0, 1  ;;  %v848_v20 = vrot.slane %v15392_v11, 1 }
 0x26b   : > { %12748 = vmatprep.mubr.msk.f32.mxu0 %vm1005_vm1, %v816_v60  ;;  %v842_v60 = vrot.slane %v15377_v63, 1 }
 0x26c   : > { %v839_v14 = vsel %vm801_vm2, %v836_v45, %v838_v8  ;;  %v841_v52 = vsel %vm801_vm2, %v838_v8, %v840_v51 }
 0x26d   : > { %v843_v34 = vsel %vm801_vm2, %v840_v51, %v842_v60  ;;  %v845_v58 = vsel %vm801_vm2, %v842_v60, %v844_v57 }
 0x26e   : > { %12749 = vmatmul.mubr.msk.f32.gmra.mrb[6].mxu0 %vm1005_vm1, %v818_v15  ;;  %v846_v15 = vrot.slane %v15389_v10, 1  ;;  %v851_v10 = vrot.slane %v15404_v19, 1 }
 0x26f   : > { %12751 = vmatprep.mubr.msk.f32.mxu0 %vm1005_vm1, %v820_v17  ;;  %v849_v17 = vrot.slane %v15401_v18, 1  ;;  %v855_v18 = vrot.slane %v15416_v29, 1 }
 0x270   : > { %v847_v63 = vsel %vm801_vm2, %v844_v57, %v846_v15  ;;  %v995_v0 = vsel %vm801_vm2, %v846_v15, 0.0  ;;  %v894_v57 = vrot.slane %v15536_v31, 1 }
 0x271   : > { %v850_v49 = vsel %vm801_vm2, %v848_v20, %v849_v17  ;;  %v852_v11 = vsel %vm801_vm2, %v849_v17, %v851_v10  ;;  %v858_v1 = vsel %vm801_vm2, %v855_v18, %v857_v43  ;;  %v22756_v17 = vld [vmem:[#allocation26_spill] sm:$0xff] }
 0x272   : > { %12752 = vmatmul.mubr.msk.f32.gmra.mrb[8].mxu0 %vm1005_vm1, %v822_v21  ;;  %v853_v21 = vrot.slane %v15413_v28, 1  ;;  %v859_v28 = vrot.slane %v15428_v37, 1 }
 0x273   : > { %12754 = vmatprep.mubr.msk.f32.mxu0 %vm1005_vm1, %v824_v26 }
 0x274   : > { %v854_v26 = vsel %vm801_vm2, %v851_v10, %v853_v21  ;;  %v856_v19 = vsel %vm801_vm2, %v853_v21, %v855_v18  ;;  %v860_v29 = vsel %vm801_vm2, %v857_v43, %v859_v28  ;;  %v22757_v10 = vld [vmem:[#allocation27_spill] sm:$0xff]  ;;  %v22758_v21 = vld [vmem:[#allocation28_spill] sm:$0xff] }
 0x276   : > { %12755 = vmatmul.mubr.msk.f32.gmra.mrb[10].mxu0 %vm1005_vm1, %v994_v27  ;;  %v861_v27 = vrot.slane %v15437_v44, 1  ;;  %v867_v44 = vrot.slane %v15452_v55, 1 }
 0x277   : > { %12757 = vmatprep.mubr.msk.f32.mxu0 %vm1005_vm1, %v827_v2  ;;  %v865_v2 = vrot.slane %v15449_v54, 1 }
 0x278   : > { %v862_v32 = vsel %vm801_vm2, %v859_v28, %v861_v27  ;;  %v864_v37 = vsel %vm801_vm2, %v861_v27, %v863_v36  ;;  %v22760_v28 = vld [vmem:[#allocation30_spill] sm:$0xff] }
 0x279   : > { %v866_v3 = vsel %vm801_vm2, %v863_v36, %v865_v2  ;;  %v868_v47 = vsel %vm801_vm2, %v865_v2, %v867_v44  ;;  %v22762_v2 = vld [vmem:[#allocation32_spill] sm:$0xff] }
 0x27a   : > { %12758 = vmatmul.mubr.msk.f32.gmra.mrb[12].mxu0 %vm1005_vm1, %v829_v33  ;;  %v869_v33 = vrot.slane %v15461_v62, 1  ;;  %v874_v62 = vrot.slane %v15476_v16, 1 }
 0x27b   : > { %12760 = vmatprep.mubr.msk.f32.mxu0 %vm1005_vm1, %v831_v22  ;;  %v872_v22 = vrot.slane %v15473_v13, 1  ;;  %v878_v13 = vrot.slane %v15488_v30, 1 }
 0x27c   : > { %v870_v54 = vsel %vm801_vm2, %v867_v44, %v869_v33  ;;  %v996_v55 = vsel %vm801_vm2, %v869_v33, 0.0  ;;  %v22763_v33 = vld [vmem:[#allocation33_spill] sm:$0xff] }
 0x27d   : > { %v873_v7 = vsel %vm801_vm2, %v871_v38, %v872_v22  ;;  %v875_v4 = vsel %vm801_vm2, %v872_v22, %v874_v62 }
 0x27e   : > { %12761 = vmatmul.mubr.msk.f32.gmra.mrb[14].mxu0 %vm1005_vm1, %v833_v39  ;;  %v876_v39 = vrot.slane %v15485_v25, 1  ;;  %v882_v25 = vrot.slane %v15500_v42, 1 }
 0x27f   : > { %12763 = vmatprep.mubr.msk.f32.mxu0 %vm1005_vm1, %v835_v61  ;;  %v880_v61 = vrot.slane %v15497_v41, 1  ;;  %v886_v41 = vrot.slane %v15512_v56, 1 }
 0x280   : > { %v877_v45 = vsel %vm801_vm2, %v874_v62, %v876_v39  ;;  %v879_v16 = vsel %vm801_vm2, %v876_v39, %v878_v13  ;;  %v22766_v39 = vld [vmem:[#allocation36_spill] sm:$0xff] }
 0x281   : > { %v881_v8 = vsel %vm801_vm2, %v878_v13, %v880_v61  ;;  %v883_v30 = vsel %vm801_vm2, %v880_v61, %v882_v25 }
 0x282   : > { %12764 = vmatmul.mubr.msk.f32.gmra.mrb[16].mxu0 %vm1005_vm1, %v837_v46  ;;  %v884_v46 = vrot.slane %v15509_v53, 1  ;;  %v890_v53 = vrot.slane %v15524_v9, 1 }
 0x283   : > { %12766 = vmatprep.mubr.msk.f32.mxu0 %vm1005_vm1, %v839_v14  ;;  %v888_v14 = vrot.slane %v15521_v6, 1 }
 0x284   : > { %v885_v51 = vsel %vm801_vm2, %v882_v25, %v884_v46  ;;  %v887_v42 = vsel %vm801_vm2, %v884_v46, %v886_v41  ;;  %v22768_v25 = vld [vmem:[#allocation38_spill] sm:$0xff] }
 0x285   : > { %v889_v60 = vsel %vm801_vm2, %v886_v41, %v888_v14  ;;  %v891_v56 = vsel %vm801_vm2, %v888_v14, %v890_v53  ;;  %v22770_v14 = vld [vmem:[#allocation40_spill] sm:$0xff] }
 0x286   : > { %12767 = vmatmul.mubr.msk.f32.gmra.mrb[18].mxu0 %vm1005_vm1, %v841_v52  ;;  %v892_v52 = vrot.slane %v15533_v24, 1  ;;  %v897_v24 = vrot.slane %v22713_v5, 1 }
 0x287   : > { %12769 = vmatprep.mubr.msk.f32.mxu0 %vm1005_vm1, %v843_v34  ;;  %v895_v34 = vrot.slane %v15545_v48, 1 }
 0x288   : > { %v893_v6 = vsel %vm801_vm2, %v890_v53, %v892_v52  ;;  %v997_v9 = vsel %vm801_vm2, %v892_v52, 0.0 }
 0x289   : > { %v896_v15 = vsel %vm801_vm2, %v894_v57, %v895_v34  ;;  %v898_v31 = vsel %vm801_vm2, %v895_v34, %v897_v24 }
 0x28a   : > { %12770 = vmatmul.mubr.msk.f32.gmra.mrb[20].mxu0 %vm1005_vm1, %v845_v58  ;;  %v899_v58 = vrot.slane %v22714_v35, 1  ;;  %v905_v35 = vrot.slane %v22757_v10, 1 }
 0x28b   : > { %12772 = vmatprep.mubr.msk.f32.mxu0 %vm1005_vm1, %v847_v63  ;;  %v22755_v63 = vld [vmem:[#allocation25_spill] sm:$0xff] }
 0x28c   : > { %v901_v48 = vrot.slane %v22755_v63, 1  ;;  %v900_v20 = vsel %vm801_vm2, %v897_v24, %v899_v58 }
 0x28e   : > { %12773 = vmatmul.mubr.msk.f32.gmra.mrb[22].mxu0 %vm1005_vm1, %v995_v0  ;;  %v903_v0 = vrot.slane %v22756_v17, 1  ;;  %v902_v5 = vsel %vm801_vm2, %v899_v58, %v901_v48  ;;  %v22774_v58 = vld [vmem:[#allocation44_spill] sm:$0xff] }
 0x28f   : > { %12775 = vmatprep.mubr.msk.f32.mxu0 %vm1005_vm1, %v850_v49 }
 0x290   : > { %v904_v49 = vsel %vm801_vm2, %v901_v48, %v903_v0  ;;  %v906_v18 = vsel %vm801_vm2, %v903_v0, %v905_v35  ;;  %v22776_v0 = vld [vmem:[#allocation46_spill] sm:$0xff] }
 0x292   : > { %12776 = vmatmul.mubr.msk.f32.gmra.mrb[24].mxu0 %vm1005_vm1, %v852_v11  ;;  %v907_v11 = vrot.slane %v22758_v21, 1 }
 0x293   : > { %12778 = vmatprep.mubr.msk.f32.mxu0 %vm1005_vm1, %v854_v26  ;;  %v22759_v26 = vld [vmem:[#allocation29_spill] sm:$0xff] }
 0x294   : > { %v909_v43 = vrot.slane %v22759_v26, 1 }
 0x296   : > { %12779 = vmatmul.mubr.msk.f32.gmra.mrb[26].mxu0 %vm1005_vm1, %v856_v19  ;;  %v908_v19 = vsel %vm801_vm2, %v905_v35, %v907_v11  ;;  %v910_v27 = vsel %vm801_vm2, %v907_v11, %v909_v43  ;;  %v22777_v35 = vld [vmem:[#allocation47_spill] sm:$0xff]  ;;  %v22778_v11 = vld [vmem:[#allocation48_spill] sm:$0xff] }
 0x297   : > { %12781 = vmatprep.mubr.msk.f32.mxu0 %vm1005_vm1, %v858_v1  ;;  %v911_v1 = vrot.slane %v22760_v28, 1 }
 0x29a   : > { %12782 = vmatmul.mubr.msk.f32.gmra.mrb[28].mxu0 %vm1005_vm1, %v860_v29  ;;  %v22761_v29 = vld [vmem:[#allocation31_spill] sm:$0xff] }
 0x29b   : > { %12784 = vmatprep.mubr.msk.f32.mxu0 %vm1005_vm1, %v862_v32  ;;  %v913_v36 = vrot.slane %v22761_v29, 1  ;;  %v912_v32 = vsel %vm801_vm2, %v909_v43, %v911_v1  ;;  %v22779_v43 = vld [vmem:[#allocation49_spill] sm:$0xff] }
 0x29d   : > { %v914_v44 = vsel %vm801_vm2, %v911_v1, %v913_v36  ;;  %v22780_v1 = vld [vmem:[#allocation50_spill] sm:$0xff] }
 0x29e   : > { %12785 = vmatmul.mubr.msk.f32.gmra.mrb[30].mxu0 %vm1005_vm1, %v864_v37  ;;  %v915_v37 = vrot.slane %v22762_v2, 1 }
 0x29f   : > { %12787 = vmatprep.mubr.msk.f32.mxu0 %vm1005_vm1, %v866_v3 }
 0x2a0   : > { %v916_v3 = vsel %vm801_vm2, %v913_v36, %v915_v37  ;;  %v998_v22 = vsel %vm801_vm2, %v915_v37, 0.0  ;;  %v22781_v36 = vld [vmem:[#allocation51_spill] sm:$0xff]  ;;  %v22782_v37 = vld [vmem:[#allocation52_spill] sm:$0xff] }
 0x2a2   : > { %12788 = vmatmul.mubr.msk.f32.gmra.mrb[32].mxu0 %vm1005_vm1, %v868_v47  ;;  %v917_v47 = vrot.slane %v22763_v33, 1  ;;  %v22783_v33 = vld [vmem:[#allocation53_spill] sm:$0xff] }
 0x2a3   : > { %12790 = vmatprep.mubr.msk.f32.mxu0 %vm1005_vm1, %v870_v54  ;;  %v22764_v54 = vld [vmem:[#allocation34_spill] sm:$0xff] }
 0x2a4   : > { %v918_v38 = vrot.slane %v22764_v54, 1 }
 0x2a6   : > { %12791 = vmatmul.mubr.msk.f32.gmra.mrb[34].mxu0 %vm1005_vm1, %v996_v55  ;;  %v22765_v55 = vld [vmem:[#allocation35_spill] sm:$0xff] }
 0x2a7   : > { %12793 = vmatprep.mubr.msk.f32.mxu0 %vm1005_vm1, %v873_v7  ;;  %v920_v62 = vrot.slane %v22765_v55, 1  ;;  %v919_v7 = vsel %vm801_vm2, %v917_v47, %v918_v38  ;;  %v955_v47 = vrot.slane %v22783_v33, 1 }
 0x2a9   : > { %v921_v13 = vsel %vm801_vm2, %v918_v38, %v920_v62  ;;  %v22784_v38 = vld [vmem:[#allocation54_spill] sm:$0xff] }
 0x2aa   : > { %12794 = vmatmul.mubr.msk.f32.gmra.mrb[36].mxu0 %vm1005_vm1, %v875_v4  ;;  %v922_v4 = vrot.slane %v22766_v39, 1 }
 0x2ab   : > { %12796 = vmatprep.mubr.msk.f32.mxu0 %vm1005_vm1, %v877_v45  ;;  %v22767_v45 = vld [vmem:[#allocation37_spill] sm:$0xff] }
 0x2ac   : > { %v924_v61 = vrot.slane %v22767_v45, 1 }
 0x2ae   : > { %12797 = vmatmul.mubr.msk.f32.gmra.mrb[38].mxu0 %vm1005_vm1, %v879_v16  ;;  %v923_v16 = vsel %vm801_vm2, %v920_v62, %v922_v4  ;;  %v925_v46 = vsel %vm801_vm2, %v922_v4, %v924_v61  ;;  %v22785_v62 = vld [vmem:[#allocation55_spill] sm:$0xff]  ;;  %v22786_v4 = vld [vmem:[#allocation56_spill] sm:$0xff] }
 0x2af   : > { %12799 = vmatprep.mubr.msk.f32.mxu0 %vm1005_vm1, %v881_v8  ;;  %v926_v8 = vrot.slane %v22768_v25, 1  ;;  %v22787_v25 = vld [vmem:[#allocation58_spill] sm:$0xff] }
 0x2b2   : > { %12800 = vmatmul.mubr.msk.f32.gmra.mrb[40].mxu0 %vm1005_vm1, %v883_v30  ;;  %v22769_v30 = vld [vmem:[#allocation39_spill] sm:$0xff] }
 0x2b3   : > { %12802 = vmatprep.mubr.msk.f32.mxu0 %vm1005_vm1, %v885_v51  ;;  %v928_v41 = vrot.slane %v22769_v30, 1  ;;  %v927_v51 = vsel %vm801_vm2, %v924_v61, %v926_v8  ;;  %v22788_v30 = vld [vmem:[#allocation59_spill] sm:$0xff] }
 0x2b5   : > { %v929_v53 = vsel %vm801_vm2, %v926_v8, %v928_v41  ;;  %v964_v8 = vrot.slane %v22787_v25, 1 }
 0x2b6   : > { %12803 = vmatmul.mubr.msk.f32.gmra.mrb[42].mxu0 %vm1005_vm1, %v887_v42  ;;  %v930_v42 = vrot.slane %v22770_v14, 1  ;;  %v968_v14 = vrot.slane %v22750_v23, 1 }
 0x2b7   : > { %12805 = vmatprep.mubr.msk.f32.mxu0 %vm1005_vm1, %v889_v60  ;;  %v22771_v60 = vld [vmem:[#allocation41_spill] sm:$0xff] }
 0x2b8   : > { %v932_v52 = vrot.slane %v22771_v60, 1 }
 0x2ba   : > { %12806 = vmatmul.mubr.msk.f32.gmra.mrb[44].mxu0 %vm1005_vm1, %v891_v56  ;;  %v931_v56 = vsel %vm801_vm2, %v928_v41, %v930_v42  ;;  %v933_v34 = vsel %vm801_vm2, %v930_v42, %v932_v52  ;;  %v966_v41 = vrot.slane %v22788_v30, 1  ;;  %v22789_v42 = vld [vmem:[#allocation61_spill] sm:$0xff] }
 0x2bb   : > { %12808 = vmatprep.mubr.msk.f32.mxu0 %vm1005_vm1, %v893_v6  ;;  %v22772_v6 = vld [vmem:[#allocation42_spill] sm:$0xff] }
 0x2bc   : > { %v934_v57 = vrot.slane %v22772_v6, 1  ;;  %v969_v60 = vsel %vm801_vm2, %v966_v41, %v968_v14  ;;  %v22790_v6 = vld [vmem:[#allocation63_spill] sm:$0xff] }
 0x2bd   : > { %v974_v23 = vrot.slane %v22790_v6, 1 }
 0x2be   : > { %12809 = vmatmul.mubr.msk.f32.gmra.mrb[46].mxu0 %vm1005_vm1, %v997_v9  ;;  %v22773_v9 = vld [vmem:[#allocation43_spill] sm:$0xff] }
 0x2bf   : > { %12811 = vmatprep.mubr.msk.f32.mxu0 %vm1005_vm1, %v896_v15  ;;  %v936_v24 = vrot.slane %v22773_v9, 1  ;;  %v935_v15 = vsel %vm801_vm2, %v932_v52, %v934_v57  ;;  %v972_v52 = vrot.slane %v22752_v59, 1  ;;  %v978_v59 = vrot.slane %v15800_v12, 1 }
 0x2c1   : > { %v937_v63 = vsel %vm801_vm2, %v934_v57, %v936_v24 }
 0x2c2   : > { %12812 = vmatmul.mubr.msk.f32.gmra.mrb[48].mxu0 %vm1005_vm1, %v898_v31  ;;  %v938_v31 = vrot.slane %v22774_v58, 1  ;;  %v22792_v58 = vld [vmem:[#allocation65_spill] sm:$0xff] }
 0x2c3   : > { %12814 = vmatprep.mubr.msk.f32.mxu0 %vm1005_vm1, %v900_v20  ;;  %v22775_v20 = vld [vmem:[#allocation45_spill] sm:$0xff] }
 0x2c4   : > { %v939_v48 = vsel %vm801_vm2, %v936_v24, %v938_v31  ;;  %v940_v17 = vrot.slane %v22775_v20, 1  ;;  %v999_v10 = vsel %vm801_vm2, %v938_v31, 0.0  ;;  %v975_v24 = vsel %vm801_vm2, %v972_v52, %v974_v23 }
 0x2c5   : > { %v980_v31 = vrot.slane %v22792_v58, 1 }
 0x2c6   : > { %12815 = vmatmul.mubr.msk.f32.gmra.mrb[50].mxu0 %vm1005_vm1, %v902_v5  ;;  %v941_v5 = vrot.slane %v22776_v0, 1 }
 0x2c7   : > { %12817 = vmatprep.mubr.msk.f32.mxu0 %vm1005_vm1, %v904_v49  ;;  %v943_v49 = vrot.slane %v22777_v35, 1  ;;  %v981_v20 = vsel %vm801_vm2, %v978_v59, %v980_v31 }
 0x2c8   : > { %v942_v21 = vsel %vm801_vm2, %v940_v17, %v941_v5  ;;  %v22793_v17 = vld [vmem:[#allocation66_spill] sm:$0xff] }
 0x2c9   : > { %v944_v26 = vsel %vm801_vm2, %v941_v5, %v943_v49  ;;  %v984_v0 = vrot.slane %v22793_v17, 1 }
 0x2ca   : > { %12818 = vmatmul.mubr.msk.f32.gmra.mrb[52].mxu0 %vm1005_vm1, %v906_v18  ;;  %v945_v18 = vrot.slane %v22778_v11, 1  ;;  %v3331_v11 = vlaneseq }
 0x2cb   : > { %12820 = vmatprep.mubr.msk.f32.mxu0 %vm1005_vm1, %v908_v19  ;;  %v947_v19 = vrot.slane %v22779_v43, 1 }
 0x2cc   : > { %v946_v28 = vsel %vm801_vm2, %v943_v49, %v945_v18  ;;  %v16312_v43 = vshrl.u32 %v3331_v11, 7 }
 0x2cd   : > { %v948_v29 = vsel %vm801_vm2, %v945_v18, %v947_v19 }
 0x2ce   : > { %12821 = vmatmul.mubr.msk.f32.gmra.mrb[54].mxu0 %vm1005_vm1, %v910_v27  ;;  %v949_v27 = vrot.slane %v22780_v1, 1  ;;  %22794 = vst [vmem:[#allocation23_spill] sm:$0xff] %v16312_v43  ;;  %v16315_v1 = vsub.s32 0, %v16312_v43 }
 0x2cf   : > { %12823 = vmatprep.mubr.msk.f32.mxu0 %vm1005_vm1, %v912_v32  ;;  %v951_v32 = vrot.slane %v22781_v36, 1 }
 0x2d0   : > { %v950_v2 = vsel %vm801_vm2, %v947_v19, %v949_v27  ;;  %22795 = vst [vmem:[#allocation24_spill] sm:$0xff] %v16315_v1 }
 0x2d2   : > { %12824 = vmatmul.mubr.msk.f32.gmra.mrb[56].mxu0 %vm1005_vm1, %v914_v44  ;;  %v953_v44 = vrot.slane %v22782_v37, 1 }
 0x2d3   : > { %12826 = vmatprep.mubr.msk.f32.mxu0 %vm1005_vm1, %v916_v3  ;;  %v952_v3 = vsel %vm801_vm2, %v949_v27, %v951_v32  ;;  %v502_v27 = vld [vmem:[#allocation5] sm:$0xff] }
 0x2d4   : > { %v954_v54 = vsel %vm801_vm2, %v951_v32, %v953_v44  ;;  %v956_v55 = vsel %vm801_vm2, %v953_v44, %v955_v47  ;;  %v16320_v32 = vrot.slane %v502_v27, %v16315_v1 }
 0x2d6   : > { %12827 = vmatmul.mubr.msk.f32.gmra.mrb[58].mxu0 %vm1005_vm1, %v998_v22  ;;  %v957_v22 = vrot.slane %v22784_v38, 1 }
 0x2d7   : > { %12829 = vmatprep.mubr.msk.f32.mxu0 %vm1005_vm1, %v919_v7  ;;  %v959_v7 = vrot.slane %v22785_v62, 1 }
 0x2d8   : > { %v958_v39 = vsel %vm801_vm2, %v955_v47, %v957_v22 }
 0x2d9   : > { %v960_v45 = vsel %vm801_vm2, %v957_v22, %v959_v7 }
 0x2da   : > { %12830 = vmatmul.mubr.msk.f32.gmra.mrb[60].mxu0 %vm1005_vm1, %v921_v13  ;;  %v961_v13 = vrot.slane %v22786_v4, 1 }
 0x2db   : > { %12832 = vmatprep.mubr.msk.f32.mxu0 %vm1005_vm1, %v923_v16  ;;  %v963_v16 = vrot.slane %v22747_v50, 1  ;;  %v967_v50 = vsel %vm801_vm2, %v964_v8, %v966_v41 }
 0x2dc   : > { %v962_v61 = vsel %vm801_vm2, %v959_v7, %v961_v13 }
 0x2de   : > { %12833 = vmatmul.mubr.msk.f32.gmra.mrb[62].mxu0 %vm1005_vm1, %v925_v46  ;;  %v1000_v46 = vsel %vm801_vm2, %v961_v13, 0.0 }
 0x2df   : > { %12835 = vmatprep.mubr.msk.f32.mxu0 %vm1005_vm1, %v927_v51  ;;  %v965_v51 = vsel %vm801_vm2, %v963_v16, %v964_v8 }
 0x2e2   : > { %12836 = vmatmul.mubr.msk.f32.gmra.mrb[64].mxu0 %vm1005_vm1, %v929_v53  ;;  %v970_v53 = vrot.slane %v22789_v42, 1 }
 0x2e3   : > { %12838 = vmatprep.mubr.msk.f32.mxu0 %vm1005_vm1, %v931_v56 }
 0x2e4   : > { %v971_v56 = vsel %vm801_vm2, %v968_v14, %v970_v53  ;;  %v973_v57 = vsel %vm801_vm2, %v970_v53, %v972_v52 }
 0x2e6   : > { %12839 = vmatmul.mubr.msk.f32.gmra.mrb[66].mxu0 %vm1005_vm1, %v933_v34  ;;  %v22791_v34 = vld [vmem:[#allocation64_spill] sm:$0xff] }
 0x2e7   : > { %12841 = vmatprep.mubr.msk.f32.mxu0 %vm1005_vm1, %v935_v15  ;;  %v976_v9 = vrot.slane %v22791_v34, 1 }
 0x2e9   : > { %v977_v15 = vsel %vm801_vm2, %v974_v23, %v976_v9 }
 0x2ea   : > { %12842 = vmatmul.mubr.msk.f32.gmra.mrb[68].mxu0 %vm1005_vm1, %v937_v63  ;;  %v979_v63 = vsel %vm801_vm2, %v976_v9, %v978_v59 }
 0x2eb   : > { %12844 = vmatprep.mubr.msk.f32.mxu0 %vm1005_vm1, %v939_v48  ;;  %v982_v48 = vrot.slane %v15812_v40, 1 }
 0x2ed   : > { %v983_v12 = vsel %vm801_vm2, %v980_v31, %v982_v48  ;;  %v985_v5 = vsel %vm801_vm2, %v982_v48, %v984_v0 }
 0x2ee   : > { %12845 = vmatmul.mubr.msk.f32.gmra.mrb[70].mxu0 %vm1005_vm1, %v999_v10  ;;  %v1001_v10 = vsel %vm801_vm2, %v984_v0, 0.0 }
 0x2ef   : > { %12847 = vmatprep.mubr.msk.f32.mxu0 %vm1005_vm1, %v942_v21 }
 0x2f2   : > { %12848 = vmatmul.mubr.msk.f32.gmra.mrb[72].mxu0 %vm1005_vm1, %v944_v26 }
 0x2f3   : > { %12850 = vmatprep.mubr.msk.f32.mxu0 %vm1005_vm1, %v946_v28 }
 0x2f6   : > { %12851 = vmatmul.mubr.msk.f32.gmra.mrb[74].mxu0 %vm1005_vm1, %v948_v29 }
 0x2f7   : > { %12853 = vmatprep.mubr.msk.f32.mxu0 %vm1005_vm1, %v950_v2 }
 0x2fa   : > { %12854 = vmatmul.mubr.msk.f32.gmra.mrb[76].mxu0 %vm1005_vm1, %v952_v3 }
 0x2fb   : > { %12856 = vmatprep.mubr.msk.f32.mxu0 %vm1005_vm1, %v954_v54 }
 0x2fe   : > { %12857 = vmatmul.mubr.msk.f32.gmra.mrb[78].mxu0 %vm1005_vm1, %v956_v55 }
 0x2ff   : > { %12859 = vmatprep.mubr.msk.f32.mxu0 %vm1005_vm1, %v958_v39 }
 0x302   : > { %12860 = vmatmul.mubr.msk.f32.gmra.mrb[80].mxu0 %vm1005_vm1, %v960_v45 }
 0x303   : > { %12862 = vmatprep.mubr.msk.f32.mxu0 %vm1005_vm1, %v962_v61 }
 0x306   : > { %12863 = vmatmul.mubr.msk.f32.gmra.mrb[82].mxu0 %vm1005_vm1, %v1000_v46 }
 0x307   : > { %12865 = vmatprep.mubr.msk.f32.mxu0 %vm1005_vm1, %v965_v51 }
 0x30a   : > { %12866 = vmatmul.mubr.msk.f32.gmra.mrb[84].mxu0 %vm1005_vm1, %v967_v50 }
 0x30b   : > { %12868 = vmatprep.mubr.msk.f32.mxu0 %vm1005_vm1, %v969_v60 }
 0x30e   : > { %12869 = vmatmul.mubr.msk.f32.gmra.mrb[86].mxu0 %vm1005_vm1, %v971_v56 }
 0x30f   : > { %12871 = vmatprep.mubr.msk.f32.mxu0 %vm1005_vm1, %v973_v57 }
 0x312   : > { %12872 = vmatmul.mubr.msk.f32.gmra.mrb[88].mxu0 %vm1005_vm1, %v975_v24 }
 0x313   : > { %12874 = vmatprep.mubr.msk.f32.mxu0 %vm1005_vm1, %v977_v15 }
 0x316   : > { %12875 = vmatmul.mubr.msk.f32.gmra.mrb[90].mxu0 %vm1005_vm1, %v979_v63 }
 0x317   : > { %12877 = vmatprep.mubr.msk.f32.mxu0 %vm1005_vm1, %v981_v20 }
 0x31a   : > { %12878 = vmatmul.mubr.msk.f32.gmra.mrb[92].mxu0 %vm1005_vm1, %v983_v12 }
 0x31b   : > { %12880 = vmatprep.mubr.msk.f32.mxu0 %vm1005_vm1, %v985_v5 }
 0x31e   : > { %12881 = vmatmul.mubr.msk.f32.gmra.mrb[94].mxu0 %vm1005_vm1, %v1001_v10 }
 0x335   : > { %v12741_v40 = vpop.f32.mrb[0].mxu0 }
 0x336   : > { %v2756_v35 = vpop.f32.mrb[1].mxu0  ;;  %v16327_v44 = vadd.f32 %v12741_v40, %v16320_v32 }
 0x337   : > { %v16330_v3 = vadd.f32 %v16320_v32, %v2756_v35 }
 0x338   : > { %v3433_v38 = vsel %vm3431_vm3, %v16327_v44, 0.0  ;;  %v3665_v55 = vmul.f32 %v16327_v44, %v16327_v44 }
 0x339   : > { %v12744_v49 = vpop.f32.mrb[2].mxu0  ;;  %v3432_v22 = vsel %vm3431_vm3, %v16330_v3, 0.0  ;;  %v3664_v62 = vmul.f32 %v16330_v3, %v16330_v3 }
 0x33a   : > { %v2766_v21 = vpop.f32.mrb[3].mxu0  ;;  %v3434_v4 = vadd.f32 %v3433_v38, %v3432_v22  ;;  %v16346_v45 = vadd.f32 %v12744_v49, %v16320_v32  ;;  %v3761_v25 = vsel %vm3431_vm3, %v3665_v55, 0.0 }
 0x33b   : > { %v16333_v33 = vadd.f32 %v16320_v32, %v2766_v21  ;;  %v3760_v8 = vsel %vm3431_vm3, %v3664_v62, 0.0 }
 0x33c   : > { %v3437_v51 = vsel %vm3431_vm3, %v16346_v45, 0.0  ;;  %v3762_v50 = vadd.f32 %v3761_v25, %v3760_v8  ;;  %v3667_v53 = vmul.f32 %v16346_v45, %v16346_v45 }
 0x33d   : > { %v12747_v18 = vpop.f32.mrb[4].mxu0  ;;  %v3435_v7 = vsel %vm3431_vm3, %v16333_v33, 0.0  ;;  %v3666_v61 = vmul.f32 %v16333_v33, %v16333_v33 }
 0x33e   : > { %v2776_v26 = vpop.f32.mrb[5].mxu0  ;;  %v3436_v16 = vadd.f32 %v3435_v7, %v3434_v4  ;;  %v16369_v23 = vadd.f32 %v12747_v18, %v16320_v32  ;;  %v3765_v9 = vsel %vm3431_vm3, %v3667_v53, 0.0 }
 0x33f   : > { %v16353_v46 = vadd.f32 %v16320_v32, %v2776_v26  ;;  %v3763_v14 = vsel %vm3431_vm3, %v3666_v61, 0.0 }
 0x340   : > { %v3438_v42 = vadd.f32 %v3437_v51, %v3436_v16  ;;  %v3764_v56 = vadd.f32 %v3763_v14, %v3762_v50  ;;  %v3441_v31 = vsel %vm3431_vm3, %v16369_v23, 0.0  ;;  %v3669_v17 = vmul.f32 %v16369_v23, %v16369_v23 }
 0x341   : > { %v12750_v19 = vpop.f32.mrb[6].mxu0  ;;  %v3439_v60 = vsel %vm3431_vm3, %v16353_v46, 0.0  ;;  %v3668_v57 = vmul.f32 %v16353_v46, %v16353_v46 }
 0x342   : > { %v2786_v28 = vpop.f32.mrb[7].mxu0  ;;  %v3440_v34 = vadd.f32 %v3439_v60, %v3438_v42  ;;  %v3766_v15 = vadd.f32 %v3765_v9, %v3764_v56  ;;  %v16400_v35 = vadd.f32 %v12750_v19, %v16320_v32  ;;  %v3769_v26 = vsel %vm3431_vm3, %v3669_v17, 0.0 }
 0x343   : > { %v16375_v24 = vadd.f32 %v16320_v32, %v2786_v28  ;;  %v3767_v63 = vsel %vm3431_vm3, %v3668_v57, 0.0 }
 0x344   : > { %v3442_v0 = vadd.f32 %v3441_v31, %v3440_v34  ;;  %v3768_v40 = vadd.f32 %v3767_v63, %v3766_v15  ;;  %v3445_v22 = vsel %vm3431_vm3, %v16400_v35, 0.0  ;;  %v3671_v8 = vmul.f32 %v16400_v35, %v16400_v35 }
 0x345   : > { %v16317_v29 = vpop.f32.mrb[8].mxu0  ;;  %v3443_v12 = vsel %vm3431_vm3, %v16375_v24, 0.0  ;;  %v3670_v49 = vmul.f32 %v16375_v24, %v16375_v24 }
 0x346   : > { %v2796_v36 = vpop.f32.mrb[9].mxu0  ;;  %v3444_v28 = vadd.f32 %v3443_v12, %v3442_v0  ;;  %v3770_v55 = vadd.f32 %v3769_v26, %v3768_v40  ;;  %v16442_v53 = vadd.f32 %v16317_v29, %v16320_v32 }
 0x347   : > { %v16412_v27 = vadd.f32 %v16320_v32, %v2796_v36  ;;  %v3771_v62 = vsel %vm3431_vm3, %v3670_v49, 0.0 }
 0x348   : > { %v3446_v16 = vadd.f32 %v3445_v22, %v3444_v28  ;;  %v3449_v12 = vsel %vm3431_vm3, %v16442_v53, 0.0  ;;  %v3673_v22 = vmul.f32 %v16442_v53, %v16442_v53 }
 0x349   : > { %v16322_v2 = vpop.f32.mrb[10].mxu0  ;;  %v3447_v51 = vsel %vm3431_vm3, %v16412_v27, 0.0  ;;  %v3672_v34 = vmul.f32 %v16412_v27, %v16412_v27 }
 0x34a   : > { %v16324_v37 = vpop.f32.mrb[11].mxu0  ;;  %v3448_v15 = vadd.f32 %v3447_v51, %v3446_v16 }
 0x34b   : > { %v16451_v63 = vadd.f32 %v16320_v32, %v16324_v37 }
 0x34d   : > { %v12759_v47 = vpop.f32.mrb[12].mxu0  ;;  %22801 = vst [vmem:[#allocation27_spill] sm:$0xff] %v16451_v63 }
 0x34e   : > { %v2816_v54 = vpop.f32.mrb[13].mxu0  ;;  %v16385_v48 = vadd.f32 %v12759_v47, %v16320_v32 }
 0x34f   : > { %v16388_v20 = vadd.f32 %v16320_v32, %v2816_v54 }
 0x350   : > { %22796 = vst [vmem:[#allocation57_spill] sm:$0xff] %v16385_v48  ;;  %v3677_v11 = vmul.f32 %v16385_v48, %v16385_v48  ;;  %v3462_v19 = vsel %vm3431_vm3, %v16385_v48, 0.0 }
 0x351   : > { %v12762_v39 = vpop.f32.mrb[14].mxu0  ;;  %22797 = vst [vmem:[#allocation60_spill] sm:$0xff] %v16388_v20  ;;  %v3676_v18 = vmul.f32 %v16388_v20, %v16388_v20  ;;  %v3461_v47 = vsel %vm3431_vm3, %v16388_v20, 0.0 }
 0x352   : > { %v2826_v13 = vpop.f32.mrb[15].mxu0  ;;  %v3790_v36 = vsel %vm3431_vm3, %v3677_v11, 0.0  ;;  %v3463_v25 = vadd.f32 %v3462_v19, %v3461_v47  ;;  %v3450_v19 = vadd.f32 %v3449_v12, %v3448_v15 }
 0x353   : > { %v16395_v5 = vadd.f32 %v16320_v32, %v2826_v13  ;;  %v3789_v4 = vsel %vm3431_vm3, %v3676_v18, 0.0  ;;  %v16426_v13 = vadd.f32 %v12762_v39, %v16320_v32  ;;  %v3772_v39 = vadd.f32 %v3771_v62, %v3770_v55 }
 0x354   : > { %v3791_v60 = vadd.f32 %v3790_v36, %v3789_v4  ;;  %v3775_v18 = vsel %vm3431_vm3, %v3672_v34, 0.0  ;;  %v3451_v55 = vsel %vm3431_vm3, %v16451_v63, 0.0  ;;  %v16484_v4 = vadd.f32 %v16322_v2, %v16320_v32 }
 0x355   : > { %v16355_v30 = vpop.f32.mrb[16].mxu0  ;;  %22798 = vst [vmem:[#allocation62_spill] sm:$0xff] %v16395_v5  ;;  %v3678_v54 = vmul.f32 %v16395_v5, %v16395_v5  ;;  %22799 = vst [vmem:[#allocation25_spill] sm:$0xff] %v16426_v13  ;;  %v3464_v61 = vsel %vm3431_vm3, %v16395_v5, 0.0  ;;  %v3679_v9 = vmul.f32 %v16426_v13, %v16426_v13  ;;  %v3466_v29 = vsel %vm3431_vm3, %v16426_v13, 0.0 }
 0x356   : > { %v2836_v41 = vpop.f32.mrb[17].mxu0  ;;  %v3465_v56 = vadd.f32 %v3464_v61, %v3463_v25  ;;  %v16467_v26 = vadd.f32 %v16355_v30, %v16320_v32  ;;  %22804 = vst [vmem:[#allocation30_spill] sm:$0xff] %v16484_v4  ;;  %v3674_v61 = vmul.f32 %v16451_v63, %v16451_v63 }
 0x357   : > { %v3792_v14 = vsel %vm3431_vm3, %v3678_v54, 0.0  ;;  %v16436_v50 = vadd.f32 %v16320_v32, %v2836_v41  ;;  %v3773_v41 = vsel %vm3431_vm3, %v3671_v8, 0.0  ;;  %v3794_v37 = vsel %vm3431_vm3, %v3679_v9, 0.0 }
 0x358   : > { %v3793_v31 = vadd.f32 %v3792_v14, %v3791_v60  ;;  %v3774_v40 = vadd.f32 %v3773_v41, %v3772_v39  ;;  %v3467_v49 = vadd.f32 %v3466_v29, %v3465_v56  ;;  %22802 = vst [vmem:[#allocation28_spill] sm:$0xff] %v16467_v26  ;;  %v3681_v25 = vmul.f32 %v16467_v26, %v16467_v26 }
 0x359   : > { %v16364_v52 = vpop.f32.mrb[18].mxu0  ;;  %22800 = vst [vmem:[#allocation26_spill] sm:$0xff] %v16436_v50  ;;  %v3680_v17 = vmul.f32 %v16436_v50, %v16436_v50  ;;  %v3468_v28 = vsel %vm3431_vm3, %v16436_v50, 0.0  ;;  %v3452_v8 = vadd.f32 %v3451_v55, %v3450_v19  ;;  %v3777_v39 = vsel %vm3431_vm3, %v3673_v22, 0.0 }
 0x35a   : > { %v16366_v6 = vpop.f32.mrb[19].mxu0  ;;  %v3795_v47 = vadd.f32 %v3794_v37, %v3793_v31  ;;  %v3776_v30 = vadd.f32 %v3775_v18, %v3774_v40  ;;  %v3470_v2 = vsel %vm3431_vm3, %v16467_v26, 0.0  ;;  %v3453_v9 = vsel %vm3431_vm3, %v16484_v4, 0.0 }
 0x35b   : > { %v16473_v54 = vadd.f32 %v16320_v32, %v16366_v6  ;;  %v3796_v62 = vsel %vm3431_vm3, %v3680_v17, 0.0  ;;  %v3469_v6 = vadd.f32 %v3468_v28, %v3467_v49  ;;  %v3779_v31 = vsel %vm3431_vm3, %v3674_v61, 0.0 }
 0x35c   : > { %v3797_v51 = vadd.f32 %v3796_v62, %v3795_v47  ;;  %v3778_v15 = vadd.f32 %v3777_v39, %v3776_v30  ;;  %v3798_v17 = vsel %vm3431_vm3, %v3681_v25, 0.0  ;;  %v3454_v40 = vadd.f32 %v3453_v9, %v3452_v8  ;;  %v503_v39 = vld [vmem:[#allocation7] sm:$0xff] }
 0x35d   : > { %v16377_v59 = vpop.f32.mrb[20].mxu0  ;;  %22803 = vst [vmem:[#allocation29_spill] sm:$0xff] %v16473_v54  ;;  %v3682_v14 = vmul.f32 %v16473_v54, %v16473_v54  ;;  %v3471_v41 = vadd.f32 %v3470_v2, %v3469_v6  ;;  %v3675_v22 = vmul.f32 %v16484_v4, %v16484_v4  ;;  %12883 = vmatprep.subr.msk.mxu1 %vm3431_vm3, %v503_v39 }
 0x35e   : > { %v16379_v58 = vpop.f32.mrb[21].mxu0  ;;  %v3799_v49 = vadd.f32 %v3798_v17, %v3797_v51  ;;  %v3780_v62 = vadd.f32 %v3779_v31, %v3778_v15  ;;  %v3455_v25 = vrot.slane %v3454_v40, 4  ;;  %12884 = vmatpush3.xpose.msk.msra.mxu1 %vm3431_vm3, %v503_v39 }
 0x35f   : > { %v3800_v18 = vsel %vm3431_vm3, %v3682_v14, 0.0  ;;  %v16523_v37 = vadd.f32 %v16320_v32, %v16379_v58  ;;  %v3781_v17 = vsel %vm3431_vm3, %v3675_v22, 0.0  ;;  %12888 = vmatprep.subr.mxu1 %v503_v39 }
 0x360   : > { %v3801_v51 = vadd.f32 %v3800_v18, %v3799_v49  ;;  %v3456_v22 = vadd.f32 %v3455_v25, %v3454_v40 }
 0x361   : > { %v16397_v10 = vpop.f32.mrb[22].mxu0  ;;  %22809 = vst [vmem:[#allocation35_spill] sm:$0xff] %v16523_v37  ;;  %v3684_v2 = vmul.f32 %v16523_v37, %v16523_v37 }
 0x362   : > { %v16404_v21 = vpop.f32.mrb[23].mxu0 }
 0x365   : > { %v12777_v38 = vpop.f32.mrb[24].mxu0 }
 0x366   : > { %v2876_v7 = vpop.f32.mrb[25].mxu0  ;;  %v16498_v60 = vadd.f32 %v12777_v38, %v16320_v32  ;;  %v16513_v38 = vadd.f32 %v16364_v52, %v16320_v32 }
 0x367   : > { %v16501_v56 = vadd.f32 %v16320_v32, %v2876_v7  ;;  %v3472_v7 = vsel %vm3431_vm3, %v16473_v54, 0.0 }
 0x368   : > { %22805 = vst [vmem:[#allocation31_spill] sm:$0xff] %v16498_v60  ;;  %22807 = vst [vmem:[#allocation33_spill] sm:$0xff] %v16513_v38  ;;  %v3491_v28 = vsel %vm3431_vm3, %v16498_v60, 0.0  ;;  %v3689_v52 = vmul.f32 %v16498_v60, %v16498_v60  ;;  %v3473_v55 = vadd.f32 %v3472_v7, %v3471_v41  ;;  %v3683_v30 = vmul.f32 %v16513_v38, %v16513_v38 }
 0x369   : > { %v16438_v42 = vpop.f32.mrb[26].mxu0  ;;  %22806 = vst [vmem:[#allocation32_spill] sm:$0xff] %v16501_v56  ;;  %v3490_v19 = vsel %vm3431_vm3, %v16501_v56, 0.0  ;;  %v3474_v8 = vsel %vm3431_vm3, %v16513_v38, 0.0  ;;  %v16559_v7 = vadd.f32 %v16377_v59, %v16320_v32  ;;  %v3782_v59 = vadd.f32 %v3781_v17, %v3780_v62 }
 0x36a   : > { %v2886_v57 = vpop.f32.mrb[27].mxu0  ;;  %v3492_v14 = vadd.f32 %v3491_v28, %v3490_v19  ;;  %v3819_v9 = vsel %vm3431_vm3, %v3689_v52, 0.0  ;;  %v16553_v31 = vadd.f32 %v16438_v42, %v16320_v32  ;;  %v3475_v49 = vadd.f32 %v3474_v8, %v3473_v55 }
 0x36b   : > { %v16518_v12 = vadd.f32 %v16320_v32, %v2886_v57  ;;  %v3688_v57 = vmul.f32 %v16501_v56, %v16501_v56  ;;  %22811 = vst [vmem:[#allocation37_spill] sm:$0xff] %v16559_v7  ;;  %v3802_v52 = vsel %vm3431_vm3, %v3683_v30, 0.0  ;;  %v3476_v42 = vsel %vm3431_vm3, %v16523_v37, 0.0 }
 0x36c   : > { %22810 = vst [vmem:[#allocation36_spill] sm:$0xff] %v16553_v31  ;;  %v16573_v8 = vadd.f32 %v16320_v32, %v16404_v21  ;;  %v3495_v30 = vsel %vm3431_vm3, %v16553_v31, 0.0  ;;  %v3685_v25 = vmul.f32 %v16559_v7, %v16559_v7 }
 0x36d   : > { %v16457_v0 = vpop.f32.mrb[28].mxu0  ;;  %22808 = vst [vmem:[#allocation34_spill] sm:$0xff] %v16518_v12  ;;  %v3493_v61 = vsel %vm3431_vm3, %v16518_v12, 0.0  ;;  %v3690_v6 = vmul.f32 %v16518_v12, %v16518_v12  ;;  %v3818_v15 = vsel %vm3431_vm3, %v3688_v57, 0.0  ;;  %v3803_v12 = vadd.f32 %v3802_v52, %v3801_v51 }
 0x36e   : > { %v16461_v11 = vpop.f32.mrb[29].mxu0  ;;  %v3494_v18 = vadd.f32 %v3493_v61, %v3492_v14  ;;  %v3820_v55 = vadd.f32 %v3819_v9, %v3818_v15  ;;  %v3804_v61 = vsel %vm3431_vm3, %v3684_v2, 0.0  ;;  %22813 = vst [vmem:[#allocation39_spill] sm:$0xff] %v16573_v8  ;;  %v3457_v2 = vrot.slane %v3456_v22, 2 }
 0x36f   : > { %v3821_v19 = vsel %vm3431_vm3, %v3690_v6, 0.0  ;;  %v16568_v57 = vadd.f32 %v16320_v32, %v16461_v11  ;;  %v3691_v6 = vmul.f32 %v16553_v31, %v16553_v31  ;;  %v3477_v11 = vadd.f32 %v3476_v42, %v3475_v49 }
 0x370   : > { %v3822_v39 = vadd.f32 %v3821_v19, %v3820_v55  ;;  %v3496_v40 = vadd.f32 %v3495_v30, %v3494_v18  ;;  %v3783_v9 = vrot.slane %v3782_v59, 4  ;;  %v3478_v15 = vsel %vm3431_vm3, %v16559_v7, 0.0 }
 0x371   : > { %v16480_v36 = vpop.f32.mrb[30].mxu0  ;;  %22812 = vst [vmem:[#allocation38_spill] sm:$0xff] %v16568_v57  ;;  %v3497_v51 = vsel %vm3431_vm3, %v16568_v57, 0.0  ;;  %v3692_v21 = vmul.f32 %v16568_v57, %v16568_v57  ;;  %v3805_v17 = vadd.f32 %v3804_v61, %v3803_v12  ;;  %v16591_v49 = vadd.f32 %v16397_v10, %v16320_v32 }
 0x372   : > { %v16488_v16 = vpop.f32.mrb[31].mxu0  ;;  %v3686_v18 = vmul.f32 %v16573_v8, %v16573_v8  ;;  %v3823_v52 = vsel %vm3431_vm3, %v3691_v6, 0.0  ;;  %v16598_v42 = vadd.f32 %v16457_v0, %v16320_v32  ;;  %v3479_v55 = vadd.f32 %v3478_v15, %v3477_v11 }
 0x373   : > { %22814 = vst [vmem:[#allocation40_spill] sm:$0xff] %v16591_v49  ;;  %v3498_v30 = vadd.f32 %v3497_v51, %v3496_v40  ;;  %v3824_v57 = vadd.f32 %v3823_v52, %v3822_v39  ;;  %v3806_v12 = vsel %vm3431_vm3, %v3685_v25, 0.0  ;;  %v3480_v10 = vsel %vm3431_vm3, %v16573_v8, 0.0 }
 0x374   : > { %22815 = vst [vmem:[#allocation41_spill] sm:$0xff] %v16598_v42  ;;  %v3825_v61 = vsel %vm3431_vm3, %v3692_v21, 0.0  ;;  %v16608_v6 = vadd.f32 %v16320_v32, %v16488_v16  ;;  %v16610_v60 = vadd.f32 %v3457_v2, %v3456_v22  ;;  %v3784_v0 = vadd.f32 %v3783_v9, %v3782_v59 }
 0x375   : > { %v16503_v34 = vpop.f32.mrb[32].mxu0  ;;  %v3807_v56 = vadd.f32 %v3806_v12, %v3805_v17  ;;  %v3687_v11 = vmul.f32 %v16591_v49, %v16591_v49  ;;  %v3808_v39 = vsel %vm3431_vm3, %v3686_v18, 0.0  ;;  %v3499_v40 = vsel %vm3431_vm3, %v16598_v42, 0.0 }
 0x376   : > { %v16508_v29 = vpop.f32.mrb[33].mxu0  ;;  %22816 = vst [vmem:[#allocation42_spill] sm:$0xff] %v16608_v6  ;;  %v3693_v25 = vmul.f32 %v16598_v42, %v16598_v42  ;;  %v3481_v21 = vadd.f32 %v3480_v10, %v3479_v55  ;;  %v3826_v16 = vadd.f32 %v3825_v61, %v3824_v57  ;;  %v3500_v15 = vadd.f32 %v3499_v40, %v3498_v30 }
 0x377   : > { %v3501_v59 = vsel %vm3431_vm3, %v16608_v6, 0.0  ;;  %v3694_v2 = vmul.f32 %v16608_v6, %v16608_v6  ;;  %v3785_v52 = vrot.slane %v3784_v0, 2  ;;  %v3809_v55 = vadd.f32 %v3808_v39, %v3807_v56 }
 0x378   : > { %v16636_v57 = vadd.f32 %v16480_v36, %v16320_v32  ;;  %v3482_v30 = vsel %vm3431_vm3, %v16591_v49, 0.0  ;;  %v3810_v12 = vsel %vm3431_vm3, %v3687_v11, 0.0  ;;  %v3827_v10 = vsel %vm3431_vm3, %v3693_v25, 0.0 }
 0x379   : > { %v16533_v47 = vpop.f32.mrb[34].mxu0  ;;  %v16647_v61 = vadd.f32 %v3482_v30, %v3481_v21  ;;  %v3502_v40 = vadd.f32 %v3501_v59, %v3500_v15  ;;  %v3828_v56 = vadd.f32 %v3827_v10, %v3826_v16  ;;  %v16651_v36 = vadd.f32 %v16503_v34, %v16320_v32 }
 0x37a   : > { %v16537_v58 = vpop.f32.mrb[35].mxu0  ;;  %22819 = vst [vmem:[#allocation45_spill] sm:$0xff] %v16636_v57  ;;  %v3829_v18 = vsel %vm3431_vm3, %v3694_v2, 0.0  ;;  %v16658_v11 = vadd.f32 %v16320_v32, %v16508_v29  ;;  %v16664_v21 = vadd.f32 %v3785_v52, %v3784_v0  ;;  %v16666_v16 = vadd.f32 %v3810_v12, %v3809_v55 }
 0x37b   : > { %22821 = vst [vmem:[#allocation47_spill] sm:$0xff] %v16651_v36  ;;  %v3503_v34 = vsel %vm3431_vm3, %v16636_v57, 0.0  ;;  %v3695_v15 = vmul.f32 %v16636_v57, %v16636_v57  ;;  %v3830_v30 = vadd.f32 %v3829_v18, %v3828_v56  ;;  %v3697_v12 = vmul.f32 %v16651_v36, %v16651_v36 }
 0x37c   : > { %22822 = vst [vmem:[#allocation48_spill] sm:$0xff] %v16658_v11  ;;  %v3504_v10 = vadd.f32 %v3503_v34, %v3502_v40  ;;  %v3505_v18 = vsel %vm3431_vm3, %v16658_v11, 0.0  ;;  %v3507_v55 = vsel %vm3431_vm3, %v16651_v36, 0.0  ;;  %v16717_v7 = vadd.f32 %v16320_v32, %v16537_v58 }
 0x37d   : > { %v12795_v41 = vpop.f32.mrb[36].mxu0  ;;  %v3831_v34 = vsel %vm3431_vm3, %v3695_v15, 0.0  ;;  %v3835_v42 = vsel %vm3431_vm3, %v3697_v12, 0.0 }
 0x37e   : > { %v2936_v28 = vpop.f32.mrb[37].mxu0  ;;  %v16628_v9 = vadd.f32 %v12795_v41, %v16320_v32  ;;  %22827 = vst [vmem:[#allocation53_spill] sm:$0xff] %v16717_v7 }
 0x37f   : > { %v16631_v17 = vadd.f32 %v16320_v32, %v2936_v28 }
 0x380   : > { %22817 = vst [vmem:[#allocation43_spill] sm:$0xff] %v16628_v9  ;;  %v3520_v29 = vsel %vm3431_vm3, %v16628_v9, 0.0 }
 0x381   : > { %v16579_v14 = vpop.f32.mrb[38].mxu0  ;;  %22818 = vst [vmem:[#allocation44_spill] sm:$0xff] %v16631_v17  ;;  %v3700_v25 = vmul.f32 %v16631_v17, %v16631_v17  ;;  %v3519_v59 = vsel %vm3431_vm3, %v16631_v17, 0.0  ;;  %v3696_v17 = vmul.f32 %v16658_v11, %v16658_v11  ;;  %v3832_v11 = vadd.f32 %v3831_v34, %v3830_v30 }
 0x382   : > { %v2946_v62 = vpop.f32.mrb[39].mxu0  ;;  %v16678_v2 = vadd.f32 %v16579_v14, %v16320_v32  ;;  %v3521_v56 = vadd.f32 %v3520_v29, %v3519_v59  ;;  %v3506_v59 = vadd.f32 %v3505_v18, %v3504_v10 }
 0x383   : > { %v16643_v41 = vadd.f32 %v16320_v32, %v2946_v62  ;;  %v3701_v62 = vmul.f32 %v16628_v9, %v16628_v9  ;;  %v3847_v57 = vsel %vm3431_vm3, %v3700_v25, 0.0  ;;  %v3833_v15 = vsel %vm3431_vm3, %v3696_v17, 0.0 }
 0x384   : > { %22823 = vst [vmem:[#allocation49_spill] sm:$0xff] %v16678_v2 }
 0x385   : > { %v16600_v19 = vpop.f32.mrb[40].mxu0  ;;  %22820 = vst [vmem:[#allocation46_spill] sm:$0xff] %v16643_v41  ;;  %v3702_v0 = vmul.f32 %v16643_v41, %v16643_v41  ;;  %v3848_v14 = vsel %vm3431_vm3, %v3701_v62, 0.0  ;;  %v3522_v6 = vsel %vm3431_vm3, %v16643_v41, 0.0  ;;  %v3703_v62 = vmul.f32 %v16678_v2, %v16678_v2 }
 0x386   : > { %v2956_v31 = vpop.f32.mrb[41].mxu0  ;;  %v3849_v49 = vadd.f32 %v3848_v14, %v3847_v57  ;;  %v3523_v8 = vadd.f32 %v3522_v6, %v3521_v56  ;;  %v16728_v17 = vadd.f32 %v16600_v19, %v16320_v32 }
 0x387   : > { %v16699_v40 = vadd.f32 %v16320_v32, %v2956_v31  ;;  %v3850_v25 = vsel %vm3431_vm3, %v3702_v0, 0.0  ;;  %v3852_v30 = vsel %vm3431_vm3, %v3703_v62, 0.0 }
 0x388   : > { %v3851_v0 = vadd.f32 %v3850_v25, %v3849_v49  ;;  %22828 = vst [vmem:[#allocation54_spill] sm:$0xff] %v16728_v17 }
 0x389   : > { %v16619_v51 = vpop.f32.mrb[42].mxu0  ;;  %22824 = vst [vmem:[#allocation50_spill] sm:$0xff] %v16699_v40  ;;  %v3704_v57 = vmul.f32 %v16699_v40, %v16699_v40  ;;  %v3526_v10 = vsel %vm3431_vm3, %v16699_v40, 0.0 }
 0x38a   : > { %v16621_v22 = vpop.f32.mrb[43].mxu0 }
 0x38b   : > { %v3854_v40 = vsel %vm3431_vm3, %v3704_v57, 0.0 }
 0x38d   : > { %v16645_v28 = vpop.f32.mrb[44].mxu0 }
 0x38e   : > { %v16653_v39 = vpop.f32.mrb[45].mxu0 }
 0x391   : > { %v16682_v52 = vpop.f32.mrb[46].mxu0 }
 0x392   : > { %v16687_v9 = vpop.f32.mrb[47].mxu0 }
 0x393   : > { %v16850_v38 = vadd.f32 %v16320_v32, %v16687_v9  ;;  %v16862_v9 = vadd.f32 %v16682_v52, %v16320_v32 }
 0x395   : > { %v12813_v41 = vpop.f32.mrb[48].mxu0  ;;  %22836 = vst [vmem:[#allocation63_spill] sm:$0xff] %v16850_v38  ;;  %22837 = vst [vmem:[#allocation64_spill] sm:$0xff] %v16862_v9 }
 0x396   : > { %v16709_v29 = vadd.f32 %v12813_v41, %v16320_v32  ;;  %v2996_v31 = vpop.f32.mrb[49].mxu0  ;;  %v3524_v41 = vsel %vm3431_vm3, %v16678_v2, 0.0 }
 0x397   : > { %v16713_v36 = vadd.f32 %v16320_v32, %v2996_v31  ;;  %v3525_v49 = vadd.f32 %v3524_v41, %v3523_v8  ;;  %v3834_v8 = vadd.f32 %v3833_v15, %v3832_v11  ;;  %v3508_v31 = vadd.f32 %v3507_v55, %v3506_v59 }
 0x398   : > { %22825 = vst [vmem:[#allocation51_spill] sm:$0xff] %v16709_v29  ;;  %v3713_v6 = vmul.f32 %v16709_v29, %v16709_v29  ;;  %v3549_v14 = vsel %vm3431_vm3, %v16709_v29, 0.0  ;;  %v3853_v41 = vadd.f32 %v3852_v30, %v3851_v0  ;;  %v16749_v29 = vadd.f32 %v16320_v32, %v16621_v22 }
 0x399   : > { %22826 = vst [vmem:[#allocation52_spill] sm:$0xff] %v16713_v36  ;;  %v3712_v58 = vmul.f32 %v16713_v36, %v16713_v36  ;;  %v12816_v12 = vpop.f32.mrb[50].mxu0  ;;  %v3548_v18 = vsel %vm3431_vm3, %v16713_v36, 0.0  ;;  %v3705_v11 = vmul.f32 %v16728_v17, %v16728_v17  ;;  %v3527_v55 = vadd.f32 %v3526_v10, %v3525_v49 }
 0x39a   : > { %v3006_v56 = vpop.f32.mrb[51].mxu0  ;;  %v3877_v34 = vsel %vm3431_vm3, %v3713_v6, 0.0  ;;  %v16741_v62 = vadd.f32 %v12816_v12, %v16320_v32  ;;  %22829 = vst [vmem:[#allocation55_spill] sm:$0xff] %v16749_v29  ;;  %v3550_v36 = vadd.f32 %v3549_v14, %v3548_v18  ;;  %v16767_v14 = vadd.f32 %v16533_v47, %v16320_v32 }
 0x39b   : > { %v3876_v19 = vsel %vm3431_vm3, %v3712_v58, 0.0  ;;  %v16744_v25 = vadd.f32 %v16320_v32, %v3006_v56  ;;  %v3509_v56 = vsel %vm3431_vm3, %v16717_v7, 0.0  ;;  %v3698_v18 = vmul.f32 %v16717_v7, %v16717_v7 }
 0x39c   : > { %v3878_v59 = vadd.f32 %v3877_v34, %v3876_v19  ;;  %v3715_v22 = vmul.f32 %v16741_v62, %v16741_v62  ;;  %22830 = vst [vmem:[#allocation56_spill] sm:$0xff] %v16767_v14  ;;  %v3855_v2 = vadd.f32 %v3854_v40, %v3853_v41  ;;  %v3510_v10 = vadd.f32 %v3509_v56, %v3508_v31 }
 0x39d   : > { %v3551_v6 = vsel %vm3431_vm3, %v16744_v25, 0.0  ;;  %v3714_v58 = vmul.f32 %v16744_v25, %v16744_v25  ;;  %v12819_v12 = vpop.f32.mrb[52].mxu0  ;;  %v3836_v34 = vadd.f32 %v3835_v42, %v3834_v8  ;;  %v3706_v19 = vmul.f32 %v16749_v29, %v16749_v29 }
 0x39e   : > { %v3016_v15 = vpop.f32.mrb[53].mxu0  ;;  %v3552_v0 = vadd.f32 %v3551_v6, %v3550_v36  ;;  %v3856_v47 = vsel %vm3431_vm3, %v3705_v11, 0.0  ;;  %v3553_v40 = vsel %vm3431_vm3, %v16741_v62, 0.0  ;;  %v3881_v31 = vsel %vm3431_vm3, %v3715_v22, 0.0 }
 0x39f   : > { %v3879_v57 = vsel %vm3431_vm3, %v3714_v58, 0.0  ;;  %v16763_v30 = vadd.f32 %v16320_v32, %v3016_v15  ;;  %v3528_v58 = vsel %vm3431_vm3, %v16728_v17, 0.0  ;;  %v16780_v15 = vadd.f32 %v16619_v51, %v16320_v32 }
 0x3a0   : > { %v3880_v49 = vadd.f32 %v3879_v57, %v3878_v59  ;;  %v3529_v8 = vadd.f32 %v3528_v58, %v3527_v55  ;;  %v16786_v41 = vadd.f32 %v12819_v12, %v16320_v32  ;;  %v3554_v56 = vadd.f32 %v3553_v40, %v3552_v0 }
 0x3a1   : > { %v3716_v36 = vmul.f32 %v16763_v30, %v16763_v30  ;;  %v12822_v6 = vpop.f32.mrb[54].mxu0  ;;  %22831 = vst [vmem:[#allocation58_spill] sm:$0xff] %v16780_v15  ;;  %v3530_v59 = vsel %vm3431_vm3, %v16749_v29, 0.0  ;;  %v3857_v57 = vadd.f32 %v3856_v47, %v3855_v2  ;;  %v3555_v11 = vsel %vm3431_vm3, %v16763_v30, 0.0 }
 0x3a2   : > { %v3026_v42 = vpop.f32.mrb[55].mxu0  ;;  %v3882_v51 = vadd.f32 %v3881_v31, %v3880_v49  ;;  %v3858_v17 = vsel %vm3431_vm3, %v3706_v19, 0.0  ;;  %v16795_v7 = vadd.f32 %v16320_v32, %v16653_v39  ;;  %v22833_v0 = vrot.slane %v16647_v61, 4 }
 0x3a3   : > { %v3883_v55 = vsel %vm3431_vm3, %v3716_v36, 0.0  ;;  %v16799_v12 = vadd.f32 %v16320_v32, %v3026_v42  ;;  %v3837_v58 = vsel %vm3431_vm3, %v3698_v18, 0.0  ;;  %v3707_v49 = vmul.f32 %v16780_v15, %v16780_v15 }
 0x3a4   : > { %22832 = vst [vmem:[#allocation59_spill] sm:$0xff] %v16795_v7  ;;  %v16804_v2 = vadd.f32 %v22833_v0, %v16647_v61  ;;  %v16811_v39 = vadd.f32 %v16645_v28, %v16320_v32  ;;  %v22835_v36 = vrot.slane %v16666_v16, 4  ;;  %v3531_v40 = vadd.f32 %v3530_v59, %v3529_v8 }
 0x3a5   : > { %v12825_v22 = vpop.f32.mrb[56].mxu0  ;;  %v3717_v61 = vmul.f32 %v16786_v41, %v16786_v41  ;;  %v3556_v42 = vadd.f32 %v3555_v11, %v3554_v56  ;;  %v3511_v18 = vsel %vm3431_vm3, %v16767_v14, 0.0  ;;  %v3699_v31 = vmul.f32 %v16767_v14, %v16767_v14 }
 0x3a6   : > { %22834 = vst [vmem:[#allocation61_spill] sm:$0xff] %v16811_v39  ;;  %v3036_v19 = vpop.f32.mrb[57].mxu0  ;;  %v16816_v47 = vadd.f32 %v22835_v36, %v16666_v16  ;;  %v3859_v0 = vadd.f32 %v3858_v17, %v3857_v57  ;;  %v3884_v28 = vadd.f32 %v3883_v55, %v3882_v51  ;;  %v16824_v29 = vadd.f32 %v3511_v18, %v3510_v10 }
 0x3a7   : > { %v3838_v37 = vadd.f32 %v3837_v58, %v3836_v34  ;;  %v3708_v16 = vmul.f32 %v16795_v7, %v16795_v7  ;;  %v3718_v8 = vmul.f32 %v16799_v12, %v16799_v12  ;;  %v3532_v56 = vsel %vm3431_vm3, %v16780_v15, 0.0 }
 0x3a8   : > { %v3860_v11 = vsel %vm3431_vm3, %v3707_v49, 0.0  ;;  %v3709_v17 = vmul.f32 %v16811_v39, %v16811_v39  ;;  %v3557_v10 = vsel %vm3431_vm3, %v16786_v41, 0.0  ;;  %v3533_v57 = vadd.f32 %v3532_v56, %v3531_v40 }
 0x3a9   : > { %v16830_v59 = vpop.f32.mrb[58].mxu0  ;;  %v3885_v51 = vsel %vm3431_vm3, %v3717_v61, 0.0  ;;  %v16841_v55 = vadd.f32 %v12822_v6, %v16320_v32  ;;  %v3558_v58 = vadd.f32 %v3557_v10, %v3556_v42  ;;  %v3534_v36 = vsel %vm3431_vm3, %v16795_v7, 0.0 }
 0x3aa   : > { %v3046_v34 = vpop.f32.mrb[59].mxu0  ;;  %v3861_v18 = vadd.f32 %v3860_v11, %v3859_v0  ;;  %v3559_v49 = vsel %vm3431_vm3, %v16799_v12, 0.0  ;;  %v3886_v15 = vadd.f32 %v3885_v51, %v3884_v28  ;;  %v3862_v14 = vsel %vm3431_vm3, %v3708_v16, 0.0 }
 0x3ab   : > { %v3887_v40 = vsel %vm3431_vm3, %v3718_v8, 0.0  ;;  %v16854_v6 = vadd.f32 %v16320_v32, %v3036_v19  ;;  %v3839_v28 = vsel %vm3431_vm3, %v3699_v31, 0.0  ;;  %v3535_v16 = vadd.f32 %v3534_v36, %v3533_v57 }
 0x3ac   : > { %v3719_v8 = vmul.f32 %v16841_v55, %v16841_v55  ;;  %v3560_v19 = vadd.f32 %v3559_v49, %v3558_v58  ;;  %v3513_v10 = vrot.slane %v16824_v29, 4  ;;  %v16867_v51 = vadd.f32 %v3839_v28, %v3838_v37 }
 0x3ad   : > { %v12831_v61 = vpop.f32.mrb[60].mxu0  ;;  %v3863_v42 = vadd.f32 %v3862_v14, %v3861_v18  ;;  %v3888_v0 = vadd.f32 %v3887_v40, %v3886_v15  ;;  %v3536_v56 = vsel %vm3431_vm3, %v16811_v39, 0.0  ;;  %v3864_v31 = vsel %vm3431_vm3, %v3709_v17, 0.0 }
 0x3ae   : > { %v3056_v11 = vpop.f32.mrb[61].mxu0  ;;  %v3710_v57 = vmul.f32 %v16850_v38, %v16850_v38  ;;  %v3720_v52 = vmul.f32 %v16854_v6, %v16854_v6  ;;  %v3561_v58 = vsel %vm3431_vm3, %v16841_v55, 0.0  ;;  %v16879_v37 = vadd.f32 %v12825_v22, %v16320_v32 }
 0x3af   : > { %v16882_v14 = vadd.f32 %v12831_v61, %v16320_v32  ;;  %v16885_v15 = vadd.f32 %v16320_v32, %v3056_v11  ;;  %v3711_v18 = vmul.f32 %v16862_v9, %v16862_v9  ;;  %v3537_v49 = vadd.f32 %v3536_v56, %v3535_v16 }
 0x3b0   : > { %v3889_v40 = vsel %vm3431_vm3, %v3719_v8, 0.0  ;;  %v3562_v28 = vadd.f32 %v3561_v58, %v3560_v19  ;;  %v3865_v39 = vadd.f32 %v3864_v31, %v3863_v42  ;;  %v3563_v7 = vsel %vm3431_vm3, %v16854_v6, 0.0 }
 0x3b1   : > { %v12834_v36 = vpop.f32.mrb[62].mxu0  ;;  %22838 = vst [vmem:[#allocation65_spill] sm:$0xff] %v16882_v14  ;;  %v3890_v22 = vadd.f32 %v3889_v40, %v3888_v0  ;;  %v3538_v61 = vsel %vm3431_vm3, %v16850_v38, 0.0  ;;  %v3866_v11 = vsel %vm3431_vm3, %v3710_v57, 0.0  ;;  %v3891_v26 = vsel %vm3431_vm3, %v3720_v52, 0.0 }
 0x3b2   : > { %v3066_v17 = vpop.f32.mrb[63].mxu0  ;;  %v16900_v56 = vadd.f32 %v16320_v32, %v3046_v34  ;;  %v3841_v42 = vrot.slane %v16867_v51, 4  ;;  %v3721_v8 = vmul.f32 %v16879_v37, %v16879_v37  ;;  %v3725_v0 = vmul.f32 %v16882_v14, %v16882_v14 }
 0x3b3   : > { %v16893_v54 = vadd.f32 %v16320_v32, %v3066_v17  ;;  %v3724_v19 = vmul.f32 %v16885_v15, %v16885_v15  ;;  %v16910_v57 = vadd.f32 %v3513_v10, %v16824_v29  ;;  %v3540_v34 = vsel %vm3431_vm3, %v16862_v9, 0.0 }
 0x3b4   : > { %v3868_v52 = vsel %vm3431_vm3, %v3711_v18, 0.0  ;;  %v3564_v58 = vadd.f32 %v3563_v7, %v3562_v28  ;;  %v3539_v17 = vadd.f32 %v3538_v61, %v3537_v49  ;;  %v3867_v40 = vadd.f32 %v3866_v11, %v3865_v39 }
 0x3b5   : > { %22839 = vst [vmem:[#allocation66_spill] sm:$0xff] %v16893_v54  ;;  %v12837_v16 = vpop.f32.mrb[64].mxu0  ;;  %v3892_v38 = vadd.f32 %v3891_v26, %v3890_v22  ;;  %v3726_v50 = vmul.f32 %v16893_v54, %v16893_v54  ;;  %v3565_v13 = vsel %vm3431_vm3, %v16879_v37, 0.0  ;;  %v3722_v5 = vmul.f32 %v16900_v56, %v16900_v56 }
 0x3b6   : > { %v3076_v31 = vpop.f32.mrb[65].mxu0  ;;  %v3578_v29 = vsel %vm3431_vm3, %v16882_v14, 0.0  ;;  %v3577_v10 = vsel %vm3431_vm3, %v16885_v15, 0.0  ;;  %v3893_v7 = vsel %vm3431_vm3, %v3721_v8, 0.0  ;;  %v3906_v26 = vsel %vm3431_vm3, %v3725_v0, 0.0 }
 0x3b7   : > { %v3905_v39 = vsel %vm3431_vm3, %v3724_v19, 0.0  ;;  %v16929_v49 = vadd.f32 %v12834_v36, %v16320_v32  ;;  %v16933_v22 = vadd.f32 %v16830_v59, %v16320_v32  ;;  %v3566_v61 = vadd.f32 %v3565_v13, %v3564_v58 }
 0x3b8   : > { %v3567_v11 = vsel %vm3431_vm3, %v16900_v56, 0.0  ;;  %v3580_v9 = vsel %vm3431_vm3, %v16893_v54, 0.0  ;;  %v3894_v8 = vadd.f32 %v3893_v7, %v3892_v38  ;;  %v3579_v48 = vadd.f32 %v3578_v29, %v3577_v10 }
 0x3b9   : > { %v12840_v18 = vpop.f32.mrb[66].mxu0  ;;  %22840 = vst [vmem:[#allocation67_spill] sm:$0xff] %v16929_v49  ;;  %v3908_v0 = vsel %vm3431_vm3, %v3726_v50, 0.0  ;;  %v16941_v19 = vadd.f32 %v16320_v32, %v3076_v31  ;;  %v3541_v36 = vadd.f32 %v3540_v34, %v3539_v17  ;;  %v3869_v20 = vadd.f32 %v3868_v52, %v3867_v40 }
 0x3ba   : > { %v3086_v28 = vpop.f32.mrb[67].mxu0  ;;  %v3895_v4 = vsel %vm3431_vm3, %v3722_v5, 0.0  ;;  %v3907_v59 = vadd.f32 %v3906_v26, %v3905_v39  ;;  %v22842_v13 = vrot.slane %v16610_v60, 1  ;;  %v22843_v38 = vrot.slane %v16664_v21, 1 }
 0x3bb   : > { %22841 = vst [vmem:[#allocation68_spill] sm:$0xff] %v16941_v19  ;;  %v3727_v50 = vmul.f32 %v16929_v49, %v16929_v49  ;;  %v3581_v31 = vadd.f32 %v3580_v9, %v3579_v48  ;;  %v22844_v5 = vrot.slane %v16804_v2, 2  ;;  %v3723_v17 = vmul.f32 %v16933_v22, %v16933_v22 }
 0x3bc   : > { %v16949_v58 = vadd.f32 %v22842_v13, %v16610_v60  ;;  %v16954_v29 = vadd.f32 %v22843_v38, %v16664_v21  ;;  %v3568_v60 = vadd.f32 %v3567_v11, %v3566_v61  ;;  %v3909_v40 = vadd.f32 %v3908_v0, %v3907_v59 }
 0x3bd   : > { %v16944_v14 = vpop.f32.mrb[68].mxu0  ;;  %v16961_v52 = vadd.f32 %v22844_v5, %v16804_v2  ;;  %v22845_v10 = vrot.slane %v16816_v47, 2  ;;  %v16971_v7 = vadd.f32 %v3841_v42, %v16867_v51  ;;  %v3896_v48 = vadd.f32 %v3895_v4, %v3894_v8 }
 0x3be   : > { %v3096_v34 = vpop.f32.mrb[69].mxu0  ;;  %v3728_v9 = vmul.f32 %v16941_v19, %v16941_v19  ;;  %v3515_v2 = vrot.slane %v16910_v57, 2  ;;  %v3542_v26 = vrot.slane %v3541_v36, 4  ;;  %v3870_v39 = vrot.slane %v3869_v20, 4 }
 0x3bf   : > { %v16968_v21 = vadd.f32 %v22845_v10, %v16816_v47  ;;  %v3582_v61 = vsel %vm3431_vm3, %v16929_v49, 0.0  ;;  %v3569_v47 = vsel %vm3431_vm3, %v16933_v22, 0.0  ;;  %v3910_v0 = vsel %vm3431_vm3, %v3727_v50, 0.0 }
 0x3c0   : > { %v16984_v51 = vadd.f32 %v12837_v16, %v16320_v32  ;;  %v3583_v4 = vadd.f32 %v3582_v61, %v3581_v31  ;;  %v3897_v8 = vsel %vm3431_vm3, %v3723_v17, 0.0  ;;  %v16989_v59 = vadd.f32 %v3569_v47, %v3568_v60 }
 0x3c1   : > { %v16978_v11 = vpop.f32.mrb[70].mxu0  ;;  %v3584_v13 = vsel %vm3431_vm3, %v16941_v19, 0.0  ;;  %v3911_v38 = vadd.f32 %v3910_v0, %v3909_v40  ;;  %v16994_v10 = vadd.f32 %v3897_v8, %v3896_v48  ;;  %v3912_v50 = vsel %vm3431_vm3, %v3728_v9, 0.0 }
 0x3c2   : > { %22846 = vst [vmem:[#allocation69_spill] sm:$0xff] %v16984_v51  ;;  %v16986_v42 = vpop.f32.mrb[71].mxu0  ;;  %v16998_v16 = vadd.f32 %v16320_v32, %v3086_v28  ;;  %v17002_v61 = vadd.f32 %v3515_v2, %v16910_v57  ;;  %v17006_v60 = vadd.f32 %v12840_v18, %v16320_v32  ;;  %v17008_v47 = vadd.f32 %v3542_v26, %v3541_v36 }
 0x3c3   : > { %v3729_v48 = vmul.f32 %v16984_v51, %v16984_v51  ;;  %v3585_v9 = vadd.f32 %v3584_v13, %v3583_v4  ;;  %v17015_v8 = vadd.f32 %v3870_v39, %v3869_v20  ;;  %v3913_v2 = vadd.f32 %v3912_v50, %v3911_v38 }
 0x3c4   : > { %22847 = vst [vmem:[#allocation70_spill] sm:$0xff] %v16998_v16  ;;  %22848 = vst [vmem:[#allocation71_spill] sm:$0xff] %v17006_v60  ;;  %v3586_v36 = vsel %vm3431_vm3, %v16984_v51, 0.0  ;;  %v3730_v26 = vmul.f32 %v16998_v16, %v16998_v16  ;;  %v3731_v20 = vmul.f32 %v17006_v60, %v17006_v60  ;;  %v3588_v5 = vsel %vm3431_vm3, %v16998_v16, 0.0 }
 0x3c5   : > { %v12849_v40 = vpop.f32.mrb[72].mxu0 }
 0x3c6   : > { %v17013_v28 = vadd.f32 %v12849_v40, %v16320_v32  ;;  %v3116_v0 = vpop.f32.mrb[73].mxu0  ;;  %v3914_v40 = vsel %vm3431_vm3, %v3729_v48, 0.0  ;;  %v17049_v48 = vadd.f32 %v16320_v32, %v3096_v34 }
 0x3c7   : > { %v17019_v31 = vadd.f32 %v16320_v32, %v3116_v0  ;;  %v3587_v0 = vadd.f32 %v3586_v36, %v3585_v9  ;;  %v3915_v57 = vadd.f32 %v3914_v40, %v3913_v2  ;;  %v3918_v2 = vsel %vm3431_vm3, %v3731_v20, 0.0 }
 0x3c8   : > { %22849 = vst [vmem:[#allocation72_spill] sm:$0xff] %v17013_v28  ;;  %v3737_v4 = vmul.f32 %v17013_v28, %v17013_v28  ;;  %v3607_v39 = vsel %vm3431_vm3, %v17013_v28, 0.0  ;;  %22853 = vst [vmem:[#allocation76_spill] sm:$0xff] %v17049_v48 }
 0x3c9   : > { %22850 = vst [vmem:[#allocation73_spill] sm:$0xff] %v17019_v31  ;;  %v3606_v13 = vsel %vm3431_vm3, %v17019_v31, 0.0  ;;  %v3736_v38 = vmul.f32 %v17019_v31, %v17019_v31  ;;  %v12852_v50 = vpop.f32.mrb[74].mxu0  ;;  %v3916_v31 = vsel %vm3431_vm3, %v3730_v26, 0.0  ;;  %v3589_v26 = vadd.f32 %v3588_v5, %v3587_v0 }
 0x3ca   : > { %v17040_v17 = vadd.f32 %v12852_v50, %v16320_v32  ;;  %v3126_v18 = vpop.f32.mrb[75].mxu0  ;;  %v3935_v28 = vsel %vm3431_vm3, %v3737_v4, 0.0  ;;  %v3608_v9 = vadd.f32 %v3607_v39, %v3606_v13  ;;  %v3590_v50 = vsel %vm3431_vm3, %v17006_v60, 0.0 }
 0x3cb   : > { %v3934_v51 = vsel %vm3431_vm3, %v3736_v38, 0.0  ;;  %v17045_v19 = vadd.f32 %v16320_v32, %v3126_v18  ;;  %v3917_v16 = vadd.f32 %v3916_v31, %v3915_v57  ;;  %v17065_v60 = vadd.f32 %v16944_v14, %v16320_v32 }
 0x3cc   : > { %22851 = vst [vmem:[#allocation74_spill] sm:$0xff] %v17040_v17  ;;  %v3739_v36 = vmul.f32 %v17040_v17, %v17040_v17  ;;  %v3936_v40 = vadd.f32 %v3935_v28, %v3934_v51  ;;  %v3611_v51 = vsel %vm3431_vm3, %v17040_v17, 0.0 }
 0x3cd   : > { %22852 = vst [vmem:[#allocation75_spill] sm:$0xff] %v17045_v19  ;;  %v3609_v4 = vsel %vm3431_vm3, %v17045_v19, 0.0  ;;  %v3738_v18 = vmul.f32 %v17045_v19, %v17045_v19  ;;  %v12855_v38 = vpop.f32.mrb[76].mxu0  ;;  %22855 = vst [vmem:[#allocation78_spill] sm:$0xff] %v17065_v60  ;;  %v3732_v19 = vmul.f32 %v17049_v48, %v17049_v48 }
 0x3ce   : > { %v3610_v34 = vadd.f32 %v3609_v4, %v3608_v9  ;;  %v17061_v39 = vadd.f32 %v12855_v38, %v16320_v32  ;;  %v3136_v13 = vpop.f32.mrb[77].mxu0  ;;  %v3939_v5 = vsel %vm3431_vm3, %v3739_v36, 0.0  ;;  %v3591_v4 = vadd.f32 %v3590_v50, %v3589_v26 }
 0x3cf   : > { %v3937_v20 = vsel %vm3431_vm3, %v3738_v18, 0.0  ;;  %v17069_v49 = vadd.f32 %v16320_v32, %v3136_v13  ;;  %v3592_v18 = vsel %vm3431_vm3, %v17049_v48, 0.0  ;;  %v3920_v17 = vsel %vm3431_vm3, %v3732_v19, 0.0 }
 0x3d0   : > { %22854 = vst [vmem:[#allocation77_spill] sm:$0xff] %v17061_v39  ;;  %v3938_v28 = vadd.f32 %v3937_v20, %v3936_v40  ;;  %v3741_v31 = vmul.f32 %v17061_v39, %v17061_v39  ;;  %v3612_v57 = vadd.f32 %v3611_v51, %v3610_v34  ;;  %v3919_v40 = vadd.f32 %v3918_v2, %v3917_v16 }
 0x3d1   : > { %22856 = vst [vmem:[#allocation79_spill] sm:$0xff] %v17069_v49  ;;  %v3613_v14 = vsel %vm3431_vm3, %v17069_v49, 0.0  ;;  %v3740_v0 = vmul.f32 %v17069_v49, %v17069_v49  ;;  %v12858_v9 = vpop.f32.mrb[78].mxu0  ;;  %v17094_v50 = vadd.f32 %v16320_v32, %v16986_v42  ;;  %v3615_v26 = vsel %vm3431_vm3, %v17061_v39, 0.0 }
 0x3d2   : > { %v3940_v38 = vadd.f32 %v3939_v5, %v3938_v28  ;;  %v17085_v13 = vadd.f32 %v12858_v9, %v16320_v32  ;;  %v3146_v36 = vpop.f32.mrb[79].mxu0  ;;  %v3614_v20 = vadd.f32 %v3613_v14, %v3612_v57  ;;  %v3943_v28 = vsel %vm3431_vm3, %v3741_v31, 0.0 }
 0x3d3   : > { %v3941_v34 = vsel %vm3431_vm3, %v3740_v0, 0.0  ;;  %v17089_v51 = vadd.f32 %v16320_v32, %v3146_v36  ;;  %22859 = vst [vmem:[#allocation82_spill] sm:$0xff] %v17094_v50  ;;  %v3733_v42 = vmul.f32 %v17065_v60, %v17065_v60  ;;  %v3593_v36 = vadd.f32 %v3592_v18, %v3591_v4 }
 0x3d4   : > { %22857 = vst [vmem:[#allocation80_spill] sm:$0xff] %v17085_v13  ;;  %v3942_v5 = vadd.f32 %v3941_v34, %v3940_v38  ;;  %v3616_v9 = vadd.f32 %v3615_v26, %v3614_v20  ;;  %v3743_v14 = vmul.f32 %v17085_v13, %v17085_v13  ;;  %v22861_v26 = vrot.slane %v16989_v59, 4 }
 0x3d5   : > { %22858 = vst [vmem:[#allocation81_spill] sm:$0xff] %v17089_v51  ;;  %v3617_v16 = vsel %vm3431_vm3, %v17089_v51, 0.0  ;;  %v3742_v2 = vmul.f32 %v17089_v51, %v17089_v51  ;;  %v12861_v57 = vpop.f32.mrb[80].mxu0  ;;  %v22862_v19 = vrot.slane %v16994_v10, 4  ;;  %v3921_v49 = vadd.f32 %v3920_v17, %v3919_v40 }
 0x3d6   : > { %v3944_v0 = vadd.f32 %v3943_v28, %v3942_v5  ;;  %v3156_v38 = vpop.f32.mrb[81].mxu0  ;;  %v3618_v31 = vadd.f32 %v3617_v16, %v3616_v9  ;;  %v17115_v51 = vadd.f32 %v22861_v26, %v16989_v59  ;;  %v3594_v4 = vsel %vm3431_vm3, %v17065_v60, 0.0 }
 0x3d7   : > { %v3945_v20 = vsel %vm3431_vm3, %v3742_v2, 0.0  ;;  %v17110_v34 = vadd.f32 %v16320_v32, %v3156_v38  ;;  %v17120_v39 = vadd.f32 %v22862_v19, %v16994_v10  ;;  %v3734_v18 = vmul.f32 %v17094_v50, %v17094_v50 }
 0x3d8   : > { %v3946_v5 = vadd.f32 %v3945_v20, %v3944_v0  ;;  %v3619_v28 = vsel %vm3431_vm3, %v17085_v13, 0.0  ;;  %v17132_v16 = vadd.f32 %v16978_v11, %v16320_v32  ;;  %v3947_v10 = vsel %vm3431_vm3, %v3743_v14, 0.0 }
 0x3d9   : > { %22860 = vst [vmem:[#allocation83_spill] sm:$0xff] %v17110_v34  ;;  %v3744_v59 = vmul.f32 %v17110_v34, %v17110_v34  ;;  %v12864_v9 = vpop.f32.mrb[82].mxu0  ;;  %v17136_v17 = vadd.f32 %v12861_v57, %v16320_v32  ;;  %v3620_v40 = vadd.f32 %v3619_v28, %v3618_v31  ;;  %v3922_v19 = vsel %vm3431_vm3, %v3733_v42, 0.0 }
 0x3da   : > { %22863 = vst [vmem:[#allocation84_spill] sm:$0xff] %v17132_v16  ;;  %v3166_v2 = vpop.f32.mrb[83].mxu0  ;;  %v3595_v0 = vadd.f32 %v3594_v4, %v3593_v36  ;;  %v3621_v38 = vsel %vm3431_vm3, %v17110_v34, 0.0  ;;  %v3948_v20 = vadd.f32 %v3947_v10, %v3946_v5  ;;  %v3596_v26 = vsel %vm3431_vm3, %v17094_v50, 0.0 }
 0x3db   : > { %22864 = vst [vmem:[#allocation85_spill] sm:$0xff] %v17136_v17  ;;  %v3923_v13 = vadd.f32 %v3922_v19, %v3921_v49  ;;  %v3949_v11 = vsel %vm3431_vm3, %v3744_v59, 0.0  ;;  %v17145_v14 = vadd.f32 %v16320_v32, %v3166_v2  ;;  %v3924_v36 = vsel %vm3431_vm3, %v3734_v18, 0.0 }
 0x3dc   : > { %v3598_v5 = vsel %vm3431_vm3, %v17132_v16, 0.0  ;;  %v3745_v49 = vmul.f32 %v17136_v17, %v17136_v17  ;;  %v3622_v28 = vadd.f32 %v3621_v38, %v3620_v40  ;;  %v3735_v2 = vmul.f32 %v17132_v16, %v17132_v16 }
 0x3dd   : > { %22865 = vst [vmem:[#allocation86_spill] sm:$0xff] %v17145_v14  ;;  %v12867_v4 = vpop.f32.mrb[84].mxu0  ;;  %v3597_v19 = vadd.f32 %v3596_v26, %v3595_v0  ;;  %v3950_v31 = vadd.f32 %v3949_v11, %v3948_v20  ;;  %v3925_v18 = vadd.f32 %v3924_v36, %v3923_v13  ;;  %v3623_v57 = vsel %vm3431_vm3, %v17136_v17, 0.0 }
 0x3de   : > { %v17156_v59 = vadd.f32 %v12867_v4, %v16320_v32  ;;  %v3176_v10 = vpop.f32.mrb[85].mxu0  ;;  %v3746_v34 = vmul.f32 %v17145_v14, %v17145_v14  ;;  %v17170_v38 = vadd.f32 %v12864_v9, %v16320_v32  ;;  %v3951_v11 = vsel %vm3431_vm3, %v3745_v49, 0.0 }
 0x3df   : > { %v17161_v42 = vadd.f32 %v16320_v32, %v3176_v10  ;;  %v3624_v36 = vadd.f32 %v3623_v57, %v3622_v28  ;;  %v3625_v4 = vsel %vm3431_vm3, %v17145_v14, 0.0  ;;  %v3952_v17 = vadd.f32 %v3951_v11, %v3950_v31 }
 0x3e0   : > { %22866 = vst [vmem:[#allocation87_spill] sm:$0xff] %v17156_v59  ;;  %v3749_v40 = vmul.f32 %v17156_v59, %v17156_v59  ;;  %22868 = vst [vmem:[#allocation89_spill] sm:$0xff] %v17170_v38  ;;  %v3636_v0 = vsel %vm3431_vm3, %v17156_v59, 0.0  ;;  %v3599_v60 = vadd.f32 %v3598_v5, %v3597_v19  ;;  %v3953_v57 = vsel %vm3431_vm3, %v3746_v34, 0.0 }
 0x3e1   : > { %22867 = vst [vmem:[#allocation88_spill] sm:$0xff] %v17161_v42  ;;  %v3635_v20 = vsel %vm3431_vm3, %v17161_v42, 0.0  ;;  %v3748_v13 = vmul.f32 %v17161_v42, %v17161_v42  ;;  %v12870_v26 = vpop.f32.mrb[86].mxu0  ;;  %v3926_v42 = vsel %vm3431_vm3, %v3735_v2, 0.0  ;;  %v3747_v28 = vmul.f32 %v17170_v38, %v17170_v38 }
 0x3e2   : > { %v17182_v10 = vadd.f32 %v12870_v26, %v16320_v32  ;;  %v3186_v9 = vpop.f32.mrb[87].mxu0  ;;  %v3964_v59 = vsel %vm3431_vm3, %v3749_v40, 0.0  ;;  %v3637_v49 = vadd.f32 %v3636_v0, %v3635_v20  ;;  %v3626_v11 = vadd.f32 %v3625_v4, %v3624_v36 }
 0x3e3   : > { %v3963_v16 = vsel %vm3431_vm3, %v3748_v13, 0.0  ;;  %v17187_v50 = vadd.f32 %v16320_v32, %v3186_v9  ;;  %v3927_v19 = vadd.f32 %v3926_v42, %v3925_v18  ;;  %v3954_v0 = vadd.f32 %v3953_v57, %v3952_v17 }
 0x3e4   : > { %22869 = vst [vmem:[#allocation90_spill] sm:$0xff] %v17182_v10  ;;  %v3751_v26 = vmul.f32 %v17182_v10, %v17182_v10  ;;  %v3965_v9 = vadd.f32 %v3964_v59, %v3963_v16  ;;  %v3627_v48 = vsel %vm3431_vm3, %v17170_v38, 0.0  ;;  %v3955_v57 = vsel %vm3431_vm3, %v3747_v28, 0.0 }
 0x3e5   : > { %22870 = vst [vmem:[#allocation91_spill] sm:$0xff] %v17187_v50  ;;  %v3638_v31 = vsel %vm3431_vm3, %v17187_v50, 0.0  ;;  %v3750_v40 = vmul.f32 %v17187_v50, %v17187_v50  ;;  %v12873_v13 = vpop.f32.mrb[88].mxu0  ;;  %v3640_v50 = vsel %vm3431_vm3, %v17182_v10, 0.0 }
 0x3e6   : > { %v3639_v2 = vadd.f32 %v3638_v31, %v3637_v49  ;;  %v17200_v5 = vadd.f32 %v12873_v13, %v16320_v32  ;;  %v3196_v34 = vpop.f32.mrb[89].mxu0  ;;  %v3968_v59 = vsel %vm3431_vm3, %v3751_v26, 0.0  ;;  %v3628_v49 = vadd.f32 %v3627_v48, %v3626_v11 }
 0x3e7   : > { %v3966_v20 = vsel %vm3431_vm3, %v3750_v40, 0.0  ;;  %v17204_v14 = vadd.f32 %v16320_v32, %v3196_v34 }
 0x3e8   : > { %22871 = vst [vmem:[#allocation92_spill] sm:$0xff] %v17200_v5  ;;  %v3967_v36 = vadd.f32 %v3966_v20, %v3965_v9  ;;  %v3753_v16 = vmul.f32 %v17200_v5, %v17200_v5  ;;  %v3641_v4 = vadd.f32 %v3640_v50, %v3639_v2  ;;  %v3956_v9 = vadd.f32 %v3955_v57, %v3954_v0 }
 0x3e9   : > { %22872 = vst [vmem:[#allocation93_spill] sm:$0xff] %v17204_v14  ;;  %v3642_v17 = vsel %vm3431_vm3, %v17204_v14, 0.0  ;;  %v3752_v42 = vmul.f32 %v17204_v14, %v17204_v14  ;;  %v12876_v18 = vpop.f32.mrb[90].mxu0  ;;  %v3600_v2 = vrot.slane %v3599_v60, 4  ;;  %v3644_v20 = vsel %vm3431_vm3, %v17200_v5, 0.0 }
 0x3ea   : > { %v3969_v31 = vadd.f32 %v3968_v59, %v3967_v36  ;;  %v17219_v40 = vadd.f32 %v12876_v18, %v16320_v32  ;;  %v3206_v13 = vpop.f32.mrb[91].mxu0  ;;  %v3643_v34 = vadd.f32 %v3642_v17, %v3641_v4  ;;  %v3972_v14 = vsel %vm3431_vm3, %v3753_v16, 0.0 }
 0x3eb   : > { %v3970_v26 = vsel %vm3431_vm3, %v3752_v42, 0.0  ;;  %v17223_v50 = vadd.f32 %v16320_v32, %v3206_v13  ;;  %v3928_v4 = vrot.slane %v3927_v19, 4  ;;  %v3629_v17 = vrot.slane %v3628_v49, 4 }
 0x3ec   : > { %22873 = vst [vmem:[#allocation94_spill] sm:$0xff] %v17219_v40  ;;  %v3971_v28 = vadd.f32 %v3970_v26, %v3969_v31  ;;  %v3755_v48 = vmul.f32 %v17219_v40, %v17219_v40  ;;  %v3645_v11 = vadd.f32 %v3644_v20, %v3643_v34  ;;  %v3957_v16 = vrot.slane %v3956_v9, 4 }
 0x3ed   : > { %22874 = vst [vmem:[#allocation95_spill] sm:$0xff] %v17223_v50  ;;  %v3646_v0 = vsel %vm3431_vm3, %v17223_v50, 0.0  ;;  %v3754_v36 = vmul.f32 %v17223_v50, %v17223_v50  ;;  %v12879_v59 = vpop.f32.mrb[92].mxu0  ;;  %v3601_v26 = vadd.f32 %v3600_v2, %v3599_v60  ;;  %v3648_v20 = vsel %vm3431_vm3, %v17219_v40, 0.0 }
 0x3ee   : > { %v3973_v42 = vadd.f32 %v3972_v14, %v3971_v28  ;;  %v17235_v18 = vadd.f32 %v12879_v59, %v16320_v32  ;;  %v3216_v57 = vpop.f32.mrb[93].mxu0  ;;  %v3647_v31 = vadd.f32 %v3646_v0, %v3645_v11  ;;  %v3976_v14 = vsel %vm3431_vm3, %v3755_v48, 0.0 }
 0x3ef   : > { %v3974_v13 = vsel %vm3431_vm3, %v3754_v36, 0.0  ;;  %v17239_v34 = vadd.f32 %v16320_v32, %v3216_v57  ;;  %v3929_v36 = vadd.f32 %v3928_v4, %v3927_v19  ;;  %v3630_v57 = vadd.f32 %v3629_v17, %v3628_v49 }
 0x3f0   : > { %22875 = vst [vmem:[#allocation96_spill] sm:$0xff] %v17235_v18  ;;  %v3975_v50 = vadd.f32 %v3974_v13, %v3973_v42  ;;  %v3757_v5 = vmul.f32 %v17235_v18, %v17235_v18  ;;  %v3649_v28 = vadd.f32 %v3648_v20, %v3647_v31  ;;  %v3958_v13 = vadd.f32 %v3957_v16, %v3956_v9 }
 0x3f1   : > { %22876 = vst [vmem:[#allocation97_spill] sm:$0xff] %v17239_v34  ;;  %v3650_v59 = vsel %vm3431_vm3, %v17239_v34, 0.0  ;;  %v3756_v11 = vmul.f32 %v17239_v34, %v17239_v34  ;;  %v12882_v0 = vpop.f32.mrb[94].mxu0  ;;  %v3602_v31 = vrot.slane %v3601_v26, 2  ;;  %v3652_v20 = vsel %vm3431_vm3, %v17235_v18, 0.0 }
 0x3f2   : > { %v3977_v60 = vadd.f32 %v3976_v14, %v3975_v50  ;;  %v17251_v2 = vadd.f32 %v12882_v0, %v16320_v32  ;;  %v3226_v42 = vpop.f32.mrb[95].mxu0  ;;  %v3651_v40 = vadd.f32 %v3650_v59, %v3649_v28  ;;  %v3980_v34 = vsel %vm3431_vm3, %v3757_v5, 0.0 }
 0x3f3   : > { %v3978_v10 = vsel %vm3431_vm3, %v3756_v11, 0.0  ;;  %v17255_v48 = vadd.f32 %v16320_v32, %v3226_v42  ;;  %v22879_v32 = vrot.slane %v16971_v7, 2  ;;  %v3930_v16 = vrot.slane %v3929_v36, 2 }
 0x3f4   : > { %22877 = vst [vmem:[#allocation98_spill] sm:$0xff] %v17251_v2  ;;  %v3979_v19 = vadd.f32 %v3978_v10, %v3977_v60  ;;  %v3759_v49 = vmul.f32 %v17251_v2, %v17251_v2  ;;  %v3653_v50 = vadd.f32 %v3652_v20, %v3651_v40  ;;  %v3631_v28 = vrot.slane %v3630_v57, 2 }
 0x3f5   : > { %22878 = vst [vmem:[#allocation99_spill] sm:$0xff] %v17255_v48  ;;  %v3654_v9 = vsel %vm3431_vm3, %v17255_v48, 0.0  ;;  %v3758_v4 = vmul.f32 %v17255_v48, %v17255_v48  ;;  %v3844_v17 = vadd.f32 %v22879_v32, %v16971_v7  ;;  %v22880_v10 = vrot.slane %v17008_v47, 2 }
 0x3f6   : > { %v3981_v14 = vadd.f32 %v3980_v34, %v3979_v19  ;;  %v3959_v59 = vrot.slane %v3958_v13, 2  ;;  %v3655_v40 = vadd.f32 %v3654_v9, %v3653_v50  ;;  %v22881_v0 = vrot.slane %v17015_v8, 2 }
 0x3f7   : > { %v3545_v5 = vadd.f32 %v22880_v10, %v17008_v47  ;;  %v3982_v11 = vsel %vm3431_vm3, %v3758_v4, 0.0  ;;  %v22882_v42 = vrot.slane %v17115_v51, 2  ;;  %v3656_v34 = vsel %vm3431_vm3, %v17251_v2, 0.0 }
 0x3f8   : > { %v3873_v60 = vadd.f32 %v22881_v0, %v17015_v8  ;;  %v3983_v20 = vadd.f32 %v3982_v11, %v3981_v14  ;;  %v22883_v47 = vrot.slane %v17120_v39, 2  ;;  %v3984_v50 = vsel %vm3431_vm3, %v3759_v49, 0.0 }
 0x3f9   : > { %v3574_v7 = vadd.f32 %v22882_v42, %v17115_v51  ;;  %v3657_v9 = vadd.f32 %v3656_v34, %v3655_v40  ;;  %v3603_v4 = vadd.f32 %v3602_v31, %v3601_v26  ;;  %v3517_v8 = vrot.slane %v17002_v61, 1 }
 0x3fa   : > { %v3902_v19 = vadd.f32 %v22883_v47, %v17120_v39  ;;  %v3931_v32 = vadd.f32 %v3930_v16, %v3929_v36  ;;  %v3985_v10 = vadd.f32 %v3984_v50, %v3983_v20  ;;  %v3632_v0 = vadd.f32 %v3631_v28, %v3630_v57 }
 0x3fb   : > { %v3845_v51 = vrot.slane %v3844_v17, 1  ;;  %v3546_v42 = vrot.slane %v3545_v5, 1  ;;  %v3658_v2 = vrot.slane %v3657_v9, 4  ;;  %v3960_v14 = vadd.f32 %v3959_v59, %v3958_v13 }
 0x3fc   : > { %v22884_v11 = vrot.slane %v16961_v52, 1  ;;  %v3874_v47 = vrot.slane %v3873_v60, 1  ;;  %v3986_v49 = vrot.slane %v3985_v10, 4  ;;  %v3575_v40 = vrot.slane %v3574_v7, 1 }
 0x3fd   : > { %v22885_v26 = vrot.slane %v16968_v21, 1  ;;  %v3903_v36 = vrot.slane %v3902_v19, 1  ;;  %v3604_v16 = vrot.slane %v3603_v4, 1  ;;  %v3659_v57 = vadd.f32 %v3658_v2, %v3657_v9 }
 0x3fe   : > { %v3489_v39 = vadd.f32 %v22884_v11, %v16961_v52  ;;  %v3518_v28 = vadd.f32 %v3517_v8, %v17002_v61  ;;  %v3633_v34 = vrot.slane %v3632_v0, 1  ;;  %v3932_v20 = vrot.slane %v3931_v32, 1 }
 0x3ff   : > { %v3817_v31 = vadd.f32 %v22885_v26, %v16968_v21  ;;  %v3987_v50 = vadd.f32 %v3986_v49, %v3985_v10  ;;  %v3846_v13 = vadd.f32 %v3845_v51, %v3844_v17  ;;  %v3547_v59 = vadd.f32 %v3546_v42, %v3545_v5 }
 0x400   : > { %v3660_v48 = vrot.slane %v3659_v57, 2  ;;  %v3961_v18 = vrot.slane %v3960_v14, 1  ;;  %v3875_v52 = vadd.f32 %v3874_v47, %v3873_v60  ;;  %v3576_v11 = vadd.f32 %v3575_v40, %v3574_v7 }
 0x401   : > { %v4001_v38 = vsel %vm4000_vm4, %v3489_v39, %v16949_v58  ;;  %v3988_v54 = vrot.slane %v3987_v50, 2  ;;  %v3605_v63 = vadd.f32 %v3604_v16, %v3603_v4  ;;  %v3904_v26 = vadd.f32 %v3903_v36, %v3902_v19  ;;  %v5668_v39 = vld [vmem:[#allocation8 + $0x8] sm:$0xff] }
 0x402   : > { %v3661_v21 = vadd.f32 %v3660_v48, %v3659_v57  ;;  %v4022_v2 = vsel %vm4000_vm4, %v3817_v31, %v16954_v29  ;;  %v3634_v61 = vadd.f32 %v3633_v34, %v3632_v0  ;;  %v4003_v9 = vsel %vm4002_vm5, %v3518_v28, %v4001_v38 }
 0x403   : > { %v3933_v8 = vadd.f32 %v3932_v20, %v3931_v32  ;;  %v3989_v17 = vadd.f32 %v3988_v54, %v3987_v50  ;;  %v4005_v10 = vsel %vm4004_vm6, %v3547_v59, %v4003_v9  ;;  %v3962_v60 = vadd.f32 %v3961_v18, %v3960_v14  ;;  %v14680_v14 = vld [vmem:[#allocation7] sm:$0xff]  ;;  %v5660_v59 = vld [vmem:[#allocation8 + $0x48] sm:$0xff] }
 0x404   : > { %v3662_v5 = vrot.slane %v3661_v21, 1  ;;  %v4023_v7 = vsel %vm4002_vm5, %v3846_v13, %v4022_v2  ;;  %v4007_v58 = vsel %vm4006_vm7, %v3576_v11, %v4005_v10  ;;  %v5659_v13 = vld [vmem:[#allocation8 + $0x40] sm:$0xff]  ;;  %v5662_v2 = vld [vmem:[#allocation8 + $0x58] sm:$0xff]  ;;  %v5672_v10 = vld [vmem:[#allocation8 + $0x28] sm:$0xff] }
 0x405   : > { %v3990_v4 = vrot.slane %v3989_v17, 1  ;;  %v4024_v48 = vsel %vm4004_vm6, %v3875_v52, %v4023_v7  ;;  %v4009_v29 = vsel %vm4008_vm8, %v3605_v63, %v4007_v58  ;;  %v5667_v63 = vld [vmem:[#allocation8] sm:$0xff]  ;;  %v5669_v52 = vld [vmem:[#allocation8 + $0x10] sm:$0xff]  ;;  %v17313_v11 = vpack.c.bf16 %v5660_v59, %v5659_v13  ;;  %v5674_v58 = vld [vmem:[#allocation8 + $0x38] sm:$0xff] }
 0x406   : > { %v3663_v19 = vadd.f32 %v3662_v5, %v3661_v21  ;;  %v4025_v0 = vsel %vm4006_vm7, %v3904_v26, %v4024_v48  ;;  %v4011_v38 = vsel %vm4010_vm9, %v3634_v61, %v4009_v29  ;;  %v13387_v47 = vpack.c.bf16 %v5668_v39, %v5667_v63  ;;  %v5670_v21 = vld [vmem:[#allocation8 + $0x18] sm:$0xff]  ;;  %v5661_v26 = vld [vmem:[#allocation8 + $0x50] sm:$0xff]  ;;  %v5671_v5 = vld [vmem:[#allocation8 + $0x20] sm:$0xff] }
 0x407   : > { %v3991_v54 = vadd.f32 %v3990_v4, %v3989_v17  ;;  %v4026_v32 = vsel %vm4008_vm8, %v3933_v8, %v4025_v0  ;;  %v13391_v61 = vpack.c.bf16 %v5670_v21, %v5669_v52  ;;  %v17315_v9 = vpack.c.bf16 %v5662_v2, %v5661_v26  ;;  %v5663_v8 = vld [vmem:[#allocation8 + $0x60] sm:$0xff]  ;;  %v5664_v17 = vld [vmem:[#allocation8 + $0x68] sm:$0xff]  ;;  %v5673_v7 = vld [vmem:[#allocation8 + $0x30] sm:$0xff] }
 0x408   : > { %v4013_v18 = vsel %vm4012_vm10, %v3663_v19, %v4011_v38  ;;  %v4027_v51 = vsel %vm4010_vm9, %v3962_v60, %v4026_v32  ;;  %13388 = vmatprep.subr.bf16.mxu0 %v13387_v47  ;;  %v13395_v60 = vpack.c.bf16 %v5672_v10, %v5671_v5  ;;  %v17320_v4 = vpack.c.bf16 %v5664_v17, %v5663_v8  ;;  %v5665_v48 = vld [vmem:[#allocation8 + $0x70] sm:$0xff]  ;;  %v5666_v19 = vld [vmem:[#allocation8 + $0x78] sm:$0xff] }
 0x409   : > { %12885 = vmatprep.mubr.msk.f32.mxu1 %vm3431_vm3, %v4013_v18  ;;  %v4028_v42 = vsel %vm4012_vm10, %v3991_v54, %v4027_v51  ;;  %13390 = vmatpush3.bf16.msra.mxu0 %v13387_v47  ;;  %v13399_v29 = vpack.c.bf16 %v5674_v58, %v5673_v7  ;;  %v17324_v0 = vpack.c.bf16 %v5666_v19, %v5665_v48  ;;  %v14970_v38 = vmov 1966171168  }
 0x40a   : > { %12886 = vmatmul.mubr.msk.f32.vlgmr.msra.gmra.mrb[0].mxu1 %vm3431_vm3, %v4028_v42  ;;  %13392 = vmatprep.subr.bf16.mxu0 %v13391_v61  ;;  %v4214_v54 = vunpack.c.l.s4 %v14970_v38  ;;  %v22418_v32 = vsub.s32 1, %v16312_v43  ;;  %v22417_v18 = vsub.s32 2, %v16312_v43  ;;  %v14681_v42 = vld [vmem:[#allocation5] sm:$0xff] }
 0x40b   : > { %12889 = vmatpush3.msra.mxu1 %v14680_v14 }
 0x40c   : > { %13587 = vmatprep.subr.bf16.mxu1 %v17313_v11  ;;  %v4215_v51 = vunpack.c.0.s8 %v4214_v54  ;;  %v4203_v14 = vrot.slane %v14681_v42, %v22418_v32  ;;  %v4209_v63 = vrot.slane %v14681_v42, %v22417_v18 }
 0x40d   : > { %13394 = vmatpush3.bf16.msra.mxu0 %v13391_v61 }
 0x40e   : > { %13396 = vmatprep.subr.bf16.mxu0 %v13395_v60  ;;  %v17337_v47 = vsub.s32 %v4215_v51, %v16312_v43 }
 0x410   : > { %22886 = vst [vmem:[#allocation100_spill] sm:$0xff] %v17337_v47 }
 0x411   : > { %13398 = vmatpush3.bf16.msra.mxu0 %v13395_v60 }
 0x412   : > { %13400 = vmatprep.subr.bf16.mxu0 %v13399_v29 }
 0x415   : > { %13402 = vmatpush3.bf16.msra.mxu0 %v13399_v29 }
 0x416   : > { %13404 = vmatprep.subr.bf16.mxu0 %v17313_v11 }
 0x4dd   : > { %v12887_v49 = vpop.f32.mrb[0].mxu1 }
 0x4de   : > { %v4102_v40 = vpop.f32.mrb[1].mxu1  ;;  %v4112_v36 = vmul.f32 0.0013020834, %v12887_v49 }
 0x4df   : > { %v4111_v31 = vmul.f32 0.0013020834, %v4102_v40 }
 0x4e1   : > { %v4113_v16 = vmul.f32 %v4111_v31, %v4111_v31 }
 0x4e3   : > { %v4114_v57 = vsub.f32 %v4112_v36, %v4113_v16 }
 0x4e5   : > { %v4115_v28 = vmax.f32 %v4114_v57, 0.0 }
 0x4e7   : > { %v4116_v34 = vadd.f32 1e-05, %v4115_v28 }
 0x4e9   : > { %14292 = vrsqrt.f32 %v4116_v34 }
 0x4f3   : > { %v14293_v20 = vpop.eup %14292 }
 0x4f4   : > { %v4118_v50 = vmul.f32 %v14293_v20, %v4111_v31  ;;  %12890 = vmatprep.mubr.msk.f32.mxu1 %vm1005_vm1, %v14293_v20 }
 0x4f6   : > { %12891 = vmatmul.mubr.msk.f32.vlgmr.msra.gmra.mrb[2].mxu1 %vm1005_vm1, %v4118_v50 }
 0x4f7   : > { %13591 = vmatpush3.bf16.msra.mxu1 %v17313_v11 }
 0x4f8   : > { %13588 = vmatprep.subr.bf16.mxu1 %v17315_v9 }
 0x4fb   : > { %13592 = vmatpush3.bf16.msra.mxu1 %v17315_v9 }
 0x4fc   : > { %13589 = vmatprep.subr.bf16.mxu1 %v17320_v4 }
 0x4ff   : > { %13593 = vmatpush3.bf16.msra.mxu1 %v17320_v4 }
 0x500   : > { %13590 = vmatprep.subr.bf16.mxu1 %v17324_v0 }
 0x503   : > { %13594 = vmatpush3.bf16.msra.mxu1 %v17324_v0 }
 0x5c9   : > { %v12892_v39 = vpop.f32.mrb[2].mxu1 }
 0x5ca   : > { %v4205_v49 = vmul.f32 %v12892_v39, %v4203_v14  ;;  %v4191_v40 = vpop.f32.mrb[3].mxu1 }
 0x5cb   : > { %v4204_v31 = vmul.f32 %v4203_v14, %v4191_v40 }
 0x5cc   : > { %v4210_v36 = vsub.f32 %v4209_v63, %v4205_v49 }
 0x5cd   : > { %v4212_v16 = vcombine.high %v4204_v31, %v4204_v31  ;;  %v17340_v57 = vrot.slane %v4204_v31, %v17337_v47 }
 0x5ce   : > { %v4398_v28 = vcombine.high %v4210_v36, %v4210_v36  ;;  %v17343_v34 = vrot.slane %v4210_v36, %v17337_v47 }
 0x5cf   : > { %v17346_v20 = vrot.slane %v4212_v16, %v17337_v47  ;;  %v17353_v13 = vrot.slane %v17340_v57, %v17337_v47 }
 0x5d0   : > { %v17349_v50 = vrot.slane %v4398_v28, %v17337_v47  ;;  %v17357_v59 = vrot.slane %v17343_v34, %v17337_v47 }
 0x5d1   : > { %v17365_v21 = vrot.slane %v17346_v20, %v17337_v47  ;;  %v17369_v26 = vrot.slane %v17353_v13, %v16315_v1  ;;  %v4228_v16 = vcombine.high %v17346_v20, %v17346_v20 }
 0x5d2   : > { %v17361_v52 = vrot.slane %v17349_v50, %v17337_v47  ;;  %v17373_v2 = vrot.slane %v17357_v59, %v16315_v1 }
 0x5d3   : > { %v17381_v8 = vrot.slane %v17365_v21, %v16315_v1  ;;  %v4301_v5 = vmul.f32 %v17369_v26, %v16330_v3  ;;  %v4302_v60 = vmul.f32 %v17369_v26, %v16327_v44  ;;  %v4303_v58 = vmul.f32 %v17369_v26, %v16333_v33 }
 0x5d4   : > { %v17377_v61 = vrot.slane %v17361_v52, %v16315_v1  ;;  %v4306_v20 = vmul.f32 %v17369_v26, %v16369_v23  ;;  %v4307_v23 = vmul.f32 %v17369_v26, %v16375_v24 }
 0x5d5   : > { %v4351_v17 = vmul.f32 %v17381_v8, %v16744_v25  ;;  %v4352_v10 = vmul.f32 %v17381_v8, %v16741_v62  ;;  %v4353_v7 = vmul.f32 %v17381_v8, %v16763_v30  ;;  %v4354_v48 = vmul.f32 %v17381_v8, %v16786_v41 }
 0x5d6   : > { %v4304_v25 = vmul.f32 %v17369_v26, %v16346_v45  ;;  %v17403_v62 = vadd.f32 %v17373_v2, %v4301_v5  ;;  %v17409_v30 = vadd.f32 %v17373_v2, %v4302_v60  ;;  %v17415_v41 = vadd.f32 %v17373_v2, %v4303_v58 }
 0x5d7   : > { %v17400_v3 = vadd.f32 %v17377_v61, %v4351_v17  ;;  %v17406_v44 = vadd.f32 %v17377_v61, %v4352_v10  ;;  %v17412_v33 = vadd.f32 %v17377_v61, %v4353_v7  ;;  %v17423_v38 = vadd.f32 %v17377_v61, %v4354_v48 }
 0x5d8   : > { %v17418_v45 = vadd.f32 %v17373_v2, %v4304_v25  ;;  %v4679_v29 = vmin.f32 %v17403_v62, 0.0  ;;  %v4680_v51 = vmin.f32 %v17409_v30, 0.0  ;;  %v4681_v40 = vmin.f32 %v17415_v41, 0.0 }
 0x5d9   : > { %v4729_v19 = vmin.f32 %v17400_v3, 0.0  ;;  %v4730_v54 = vmin.f32 %v17406_v44, 0.0  ;;  %v4731_v63 = vmin.f32 %v17412_v33, 0.0  ;;  %v4732_v36 = vmin.f32 %v17423_v38, 0.0 }
 0x5da   : > { %v4775_v14 = vmul.f32 1.442695, %v4679_v29  ;;  %v4777_v49 = vmul.f32 1.442695, %v4680_v51  ;;  %v4779_v28 = vmul.f32 1.442695, %v4681_v40  ;;  %v4355_v10 = vmul.f32 %v17381_v8, %v16799_v12 }
 0x5db   : > { %v4875_v42 = vmul.f32 1.442695, %v4729_v19  ;;  %v4877_v39 = vmul.f32 1.442695, %v4730_v54  ;;  %v4879_v31 = vmul.f32 1.442695, %v4731_v63  ;;  %v4305_v60 = vmul.f32 %v17369_v26, %v16353_v46 }
 0x5dc   : > { %v4682_v17 = vmin.f32 %v17418_v45, 0.0  ;;  %v4881_v5 = vmul.f32 1.442695, %v4732_v36  ;;  %v4356_v58 = vmul.f32 %v17381_v8, %v16841_v55  ;;  %v17442_v48 = vadd.f32 %v17377_v61, %v4355_v10 }
 0x5dd   : > { %14294 = vpow2.f32 %v4875_v42  ;;  %v17445_v25 = vadd.f32 %v17373_v2, %v4305_v60  ;;  %v4357_v12 = vmul.f32 %v17381_v8, %v16854_v6  ;;  %v17453_v19 = vadd.f32 %v17373_v2, %v4306_v20 }
 0x5de   : > { %14296 = vpow2.f32 %v4775_v14  ;;  %v4781_v7 = vmul.f32 1.442695, %v4682_v17  ;;  %v17450_v46 = vadd.f32 %v17377_v61, %v4356_v58  ;;  %v4414_v55 = vcombine.high %v17349_v50, %v17349_v50 }
 0x5df   : > { %14298 = vpow2.f32 %v4877_v39  ;;  %v4227_v29 = vcombine.high %v17340_v57, %v17340_v57  ;;  %v4733_v54 = vmin.f32 %v17442_v48, 0.0  ;;  %v17463_v6 = vrot.slane %v4228_v16, %v17337_v47 }
 0x5e0   : > { %14300 = vpow2.f32 %v4777_v49  ;;  %v4683_v51 = vmin.f32 %v17445_v25, 0.0  ;;  %v4734_v42 = vmin.f32 %v17450_v46, 0.0  ;;  %vm4633_vm11 = vcmp.gt.f32.partialorder %v17400_v3, 0.0 }
 0x5e1   : > { %14302 = vpow2.f32 %v4879_v31  ;;  %v4883_v24 = vmul.f32 1.442695, %v4733_v54  ;;  %v4684_v14 = vmin.f32 %v17453_v19, 0.0  ;;  %v17470_v50 = vadd.f32 %v17377_v61, %v4357_v12 }
 0x5e2   : > { %14304 = vpow2.f32 %v4779_v28  ;;  %vm4583_vm12 = vcmp.gt.f32.partialorder %v17403_v62, 0.0  ;;  %v4783_v63 = vmul.f32 1.442695, %v4683_v51  ;;  %v4885_v39 = vmul.f32 1.442695, %v4734_v42 }
 0x5e3   : > { %14306 = vpow2.f32 %v4881_v5  ;;  %v17474_v49 = vadd.f32 %v17373_v2, %v4307_v23  ;;  %vm4634_vm13 = vcmp.gt.f32.partialorder %v17406_v44, 0.0  ;;  %v4785_v31 = vmul.f32 1.442695, %v4684_v14 }
 0x5e4   : > { %14308 = vpow2.f32 %v4781_v7  ;;  %v4735_v36 = vmin.f32 %v17470_v50, 0.0  ;;  %vm4584_vm14 = vcmp.gt.f32.partialorder %v17409_v30, 0.0  ;;  %v4358_v7 = vmul.f32 %v17381_v8, %v16879_v37 }
 0x5e5   : > { %14310 = vpow2.f32 %v4883_v24  ;;  %v4685_v17 = vmin.f32 %v17474_v49, 0.0  ;;  %vm4635_vm15 = vcmp.gt.f32.partialorder %v17412_v33, 0.0  ;;  %vm4585_vm1 = vcmp.gt.f32.partialorder %v17415_v41, 0.0 }
 0x5e6   : > { %14312 = vpow2.f32 %v4783_v63  ;;  %v4887_v60 = vmul.f32 1.442695, %v4735_v36 }
 0x5e7   : > { %v14295_v40 = vpop.eup %14294  ;;  %14314 = vpow2.f32 %v4885_v39  ;;  %v4787_v23 = vmul.f32 1.442695, %v4685_v17  ;;  %v17520_v17 = vrot.slane %v4414_v55, %v17337_v47 }
 0x5e8   : > { %v14297_v16 = vpop.eup %14296  ;;  %v11391_v28 = vadd.f32 -1.0, %v14295_v40  ;;  %14316 = vpow2.f32 %v4785_v31  ;;  %v17510_v40 = vadd.f32 %v17377_v61, %v4358_v7  ;;  %v17539_v7 = vrot.slane %v17463_v6, %v16315_v1 }
 0x5e9   : > { %v14299_v5 = vpop.eup %14298  ;;  %v11341_v10 = vadd.f32 -1.0, %v14297_v16  ;;  %14318 = vpow2.f32 %v4887_v60 }
 0x5ea   : > { %v14301_v58 = vpop.eup %14300  ;;  %v17485_v20 = vsel %vm4633_vm11, %v17400_v3, %v11391_v28  ;;  %v11392_v12 = vadd.f32 -1.0, %v14299_v5  ;;  %14320 = vpow2.f32 %v4787_v23  ;;  %vm4636_vm11 = vcmp.gt.f32.partialorder %v17423_v38, 0.0 }
 0x5eb   : > { %22887 = vst [vmem:[#allocation101_spill] sm:$0xff] %v17485_v20  ;;  %v14303_v54 = vpop.eup %14302  ;;  %13144 = vmatprep.mubr.msk.f32.mxu1 %vm3431_vm3, %v17485_v20  ;;  %v17492_v51 = vsel %vm4583_vm12, %v17403_v62, %v11341_v10  ;;  %v11342_v42 = vadd.f32 -1.0, %v14301_v58  ;;  %vm4586_vm12 = vcmp.gt.f32.partialorder %v17418_v45, 0.0  ;;  %v22996_v20 = vld [vmem:[#allocation49_spill] sm:$0xff] }
 0x5ec   : > { %22888 = vst [vmem:[#allocation102_spill] sm:$0xff] %v17492_v51  ;;  %v14305_v37 = vpop.eup %14304  ;;  %v5258_v3 = vrot.slane %v17492_v51, 7  ;;  %v17500_v24 = vsel %vm4634_vm13, %v17406_v44, %v11392_v12  ;;  %v11393_v14 = vadd.f32 -1.0, %v14303_v54  ;;  %vm4637_vm13 = vcmp.gt.f32.partialorder %v17442_v48, 0.0 }
 0x5ed   : > { %22889 = vst [vmem:[#allocation103_spill] sm:$0xff] %v17500_v24  ;;  %v14307_v63 = vpop.eup %14306  ;;  %13145 = vmatmul.mubr.msk.f32.vlgmr.msra.gmra.mrb[4].mxu1 %vm3431_vm3, %v17500_v24  ;;  %v17507_v62 = vsel %vm4584_vm14, %v17409_v30, %v11342_v42  ;;  %v11343_v39 = vadd.f32 -1.0, %v14305_v37  ;;  %v4308_v42 = vmul.f32 %v17369_v26, %v16400_v35  ;;  %vm4587_vm14 = vcmp.gt.f32.partialorder %v17445_v25, 0.0 }
 0x5ee   : > { %22890 = vst [vmem:[#allocation104_spill] sm:$0xff] %v17507_v62  ;;  %v14309_v31 = vpop.eup %14308  ;;  %v5450_v44 = vsel %vm600_vm0, 0.0, %v5258_v3  ;;  %v5259_v36 = vrot.slane %v17507_v62, 7  ;;  %v17517_v16 = vsel %vm4635_vm15, %v17412_v33, %v11393_v14  ;;  %v11394_v28 = vadd.f32 -1.0, %v14307_v63 }
 0x5ef   : > { %12909 = vmatprep.mubr.msk.f32.mxu0 %vm3431_vm3, %v5450_v44  ;;  %13147 = vmatprep.mubr.msk.f32.mxu1 %vm3431_vm3, %v17517_v16  ;;  %v17528_v30 = vsel %vm4585_vm1, %v17415_v41, %v11343_v39  ;;  %v11344_v5 = vadd.f32 -1.0, %v14309_v31  ;;  %v14311_v60 = vpop.eup %14310  ;;  %vm4638_vm15 = vcmp.gt.f32.partialorder %v17450_v46, 0.0  ;;  %v17565_v39 = vadd.f32 %v17373_v2, %v4308_v42 }
 0x5f0   : > { %22891 = vst [vmem:[#allocation105_spill] sm:$0xff] %v17528_v30  ;;  %v5260_v33 = vsel %vm600_vm0, %v5258_v3, %v5259_v36  ;;  %v5261_v10 = vrot.slane %v17528_v30, 7  ;;  %v17534_v55 = vsel %vm4636_vm11, %v17423_v38, %v11394_v28  ;;  %v4736_v38 = vmin.f32 %v17510_v40, 0.0  ;;  %v14313_v58 = vpop.eup %14312 }
 0x5f1   : > { %12910 = vmatmul.mubr.msk.f32.vlgmr.msra.gmra.mrb[96].mxu0 %vm3431_vm3, %v5260_v33  ;;  %13148 = vmatmul.mubr.msk.f32.gmra.mrb[6].mxu1 %vm3431_vm3, %v17534_v55  ;;  %v17545_v41 = vsel %vm4586_vm12, %v17418_v45, %v11344_v5  ;;  %v11395_v54 = vadd.f32 -1.0, %v14311_v60  ;;  %v14315_v37 = vpop.eup %14314  ;;  %v11345_v45 = vadd.f32 -1.0, %v14313_v58  ;;  %vm4588_vm1 = vcmp.gt.f32.partialorder %v17453_v19, 0.0 }
 0x5f2   : > { %22892 = vst [vmem:[#allocation106_spill] sm:$0xff] %v17545_v41  ;;  %v5262_v12 = vsel %vm600_vm0, %v5259_v36, %v5261_v10  ;;  %v5263_v23 = vrot.slane %v17545_v41, 7  ;;  %13406 = vmatpush3.bf16.msra.mxu0 %v17313_v11  ;;  %v4889_v3 = vmul.f32 1.442695, %v4736_v38  ;;  %v14317_v14 = vpop.eup %14316  ;;  %v11396_v11 = vadd.f32 -1.0, %v14315_v37 }
 0x5f3   : > { %12912 = vmatprep.mubr.msk.f32.mxu0 %vm3431_vm3, %v5262_v12  ;;  %13408 = vmatprep.subr.bf16.mxu0 %v17315_v9  ;;  %v17562_v35 = vsel %vm4637_vm13, %v17442_v48, %v11395_v54  ;;  %v17571_v31 = vsel %vm4587_vm14, %v17445_v25, %v11345_v45  ;;  %v11346_v44 = vadd.f32 -1.0, %v14317_v14  ;;  %v4359_v36 = vmul.f32 %v17381_v8, %v16900_v56  ;;  %v14319_v28 = vpop.eup %14318 }
 0x5f4   : > { %v5264_v63 = vsel %vm600_vm0, %v5261_v10, %v5263_v23  ;;  %13150 = vmatprep.mubr.msk.f32.mxu1 %vm3431_vm3, %v17562_v35  ;;  %22893 = vst [vmem:[#allocation107_spill] sm:$0xff] %v17571_v31  ;;  %v4309_v48 = vmul.f32 %v17369_v26, %v16412_v27  ;;  %v5265_v5 = vrot.slane %v17571_v31, 7  ;;  %v17581_v33 = vsel %vm4638_vm15, %v17450_v46, %v11396_v11  ;;  %v14321_v25 = vpop.eup %14320 }
 0x5f5   : > { %12913 = vmatmul.mubr.msk.f32.gmra.mrb[98].mxu0 %vm3431_vm3, %v5264_v63  ;;  %14322 = vpow2.f32 %v4889_v3  ;;  %13151 = vmatmul.mubr.msk.f32.gmra.mrb[8].mxu1 %vm3431_vm3, %v17581_v33  ;;  %v17588_v56 = vsel %vm4588_vm1, %v17453_v19, %v11346_v44  ;;  %vm4639_vm11 = vcmp.gt.f32.partialorder %v17470_v50, 0.0  ;;  %v11397_v27 = vadd.f32 -1.0, %v14319_v28  ;;  %v22897_v28 = vld [vmem:[#allocation65_spill] sm:$0xff] }
 0x5f6   : > { %13410 = vmatpush3.bf16.msra.mxu0 %v17315_v9  ;;  %22894 = vst [vmem:[#allocation108_spill] sm:$0xff] %v17588_v56  ;;  %vm4589_vm12 = vcmp.gt.f32.partialorder %v17474_v49, 0.0  ;;  %v5266_v46 = vsel %vm600_vm0, %v5263_v23, %v5265_v5  ;;  %v5267_v10 = vrot.slane %v17588_v56, 7  ;;  %v11347_v60 = vadd.f32 -1.0, %v14321_v25 }
 0x5f7   : > { %13412 = vmatprep.subr.bf16.mxu0 %v17320_v4  ;;  %v4686_v9 = vmin.f32 %v17565_v39, 0.0  ;;  %12915 = vmatprep.mubr.msk.f32.mxu0 %vm3431_vm3, %v5266_v46  ;;  %v17598_v38 = vsel %vm4639_vm11, %v17470_v50, %v11397_v27  ;;  %v17601_v19 = vadd.f32 %v17377_v61, %v4359_v36  ;;  %v17604_v58 = vadd.f32 %v17373_v2, %v4309_v48  ;;  %v22896_v48 = vld [vmem:[#allocation27_spill] sm:$0xff] }
 0x5f8   : > { %v4360_v12 = vmul.f32 %v17381_v8, %v16933_v22  ;;  %v4413_v23 = vcombine.high %v17343_v34, %v17343_v34  ;;  %v5268_v54 = vsel %vm600_vm0, %v5265_v5, %v5267_v10  ;;  %13153 = vmatprep.mubr.msk.f32.mxu1 %vm3431_vm3, %v17598_v38  ;;  %v17614_v50 = vsel %vm4589_vm12, %v17474_v49, %v11347_v60 }
 0x5f9   : > { %22895 = vst [vmem:[#allocation109_spill] sm:$0xff] %v17614_v50  ;;  %v17619_v42 = vrot.slane %v17520_v17, %v16315_v1  ;;  %12916 = vmatmul.mubr.msk.f32.gmra.mrb[100].mxu0 %vm3431_vm3, %v5268_v54  ;;  %v5269_v22 = vrot.slane %v17614_v50, 7  ;;  %v4789_v37 = vmul.f32 1.442695, %v4686_v9  ;;  %v4737_v34 = vmin.f32 %v17601_v19, 0.0  ;;  %v22898_v54 = vld [vmem:[#allocation30_spill] sm:$0xff] }
 0x5fa   : > { %13414 = vmatpush3.bf16.msra.mxu0 %v17320_v4  ;;  %v17629_v49 = vrot.slane %v4227_v29, %v17337_v47  ;;  %v4687_v4 = vmin.f32 %v17604_v58, 0.0  ;;  %v17633_v45 = vadd.f32 %v17377_v61, %v4360_v12  ;;  %v4310_v3 = vmul.f32 %v17369_v26, %v16442_v53  ;;  %v22950_v50 = vld [vmem:[#allocation81_spill] sm:$0xff] }
 0x5fb   : > { %13416 = vmatprep.subr.bf16.mxu0 %v17324_v0  ;;  %v5270_v14 = vsel %vm600_vm0, %v5267_v10, %v5269_v22  ;;  %14324 = vpow2.f32 %v4789_v37  ;;  %v4891_v63 = vmul.f32 1.442695, %v4737_v34  ;;  %v4361_v11 = vmul.f32 %v17539_v7, %v16885_v15 }
 0x5fc   : > { %v17643_v57 = vrot.slane %v4413_v23, %v17337_v47  ;;  %12918 = vmatprep.mubr.msk.f32.mxu0 %vm3431_vm3, %v5270_v14  ;;  %v4791_v29 = vmul.f32 1.442695, %v4687_v4  ;;  %v4738_v44 = vmin.f32 %v17633_v45, 0.0  ;;  %v17648_v36 = vadd.f32 %v17373_v2, %v4310_v3 }
 0x5fd   : > { %14326 = vpow2.f32 %v4891_v63  ;;  %v17652_v53 = vadd.f32 %v17619_v42, %v4361_v11  ;;  %v4311_v15 = vmul.f32 %v17369_v26, %v22896_v48  ;;  %v4362_v5 = vmul.f32 %v17539_v7, %v22897_v28 }
 0x5fe   : > { %13418 = vmatpush3.bf16.msra.mxu0 %v17324_v0  ;;  %v17660_v27 = vrot.slane %v17629_v49, %v16315_v1  ;;  %14328 = vpow2.f32 %v4791_v29  ;;  %v4893_v46 = vmul.f32 1.442695, %v4738_v44  ;;  %v4688_v10 = vmin.f32 %v17648_v36, 0.0  ;;  %v22900_v44 = vld [vmem:[#allocation60_spill] sm:$0xff] }
 0x5ff   : > { %v14323_v25 = vpop.eup %14322  ;;  %vm4640_vm13 = vcmp.gt.f32.partialorder %v17510_v40, 0.0  ;;  %v4739_v60 = vmin.f32 %v17652_v53, 0.0  ;;  %v17666_v9 = vadd.f32 %v17373_v2, %v4311_v15  ;;  %v17669_v23 = vadd.f32 %v17619_v42, %v4362_v5  ;;  %v22901_v15 = vld [vmem:[#allocation67_spill] sm:$0xff]  ;;  %v22902_v5 = vld [vmem:[#allocation57_spill] sm:$0xff] }
 0x600   : > { %v11398_v0 = vadd.f32 -1.0, %v14323_v25  ;;  %14330 = vpow2.f32 %v4893_v46  ;;  %v4793_v12 = vmul.f32 1.442695, %v4688_v10  ;;  %v4312_v37 = vmul.f32 %v17369_v26, %v22898_v54 }
 0x601   : > { %v4895_v4 = vmul.f32 1.442695, %v4739_v60  ;;  %v4689_v3 = vmin.f32 %v17666_v9, 0.0  ;;  %v17679_v14 = vrot.slane %v17643_v57, %v16315_v1  ;;  %v4740_v11 = vmin.f32 %v17669_v23, 0.0 }
 0x602   : > { %v17674_v34 = vsel %vm4640_vm13, %v17510_v40, %v11398_v0  ;;  %14332 = vpow2.f32 %v4793_v12  ;;  %v17685_v26 = vadd.f32 %v17373_v2, %v4312_v37  ;;  %v22899_v40 = vld [vmem:[#allocation66_spill] sm:$0xff]  ;;  %v4313_v48 = vmul.f32 %v17660_v27, %v22900_v44 }
 0x603   : > { %13154 = vmatmul.mubr.msk.f32.gmra.mrb[10].mxu1 %vm3431_vm3, %v17674_v34  ;;  %14334 = vpow2.f32 %v4895_v4  ;;  %v4795_v63 = vmul.f32 1.442695, %v4689_v3  ;;  %v4363_v29 = vmul.f32 %v17539_v7, %v22899_v40  ;;  %v4364_v28 = vmul.f32 %v17539_v7, %v22901_v15 }
 0x604   : > { %v4314_v25 = vmul.f32 %v17660_v27, %v22902_v5  ;;  %v4897_v10 = vmul.f32 1.442695, %v4740_v11  ;;  %v4690_v0 = vmin.f32 %v17685_v26, 0.0  ;;  %v17700_v12 = vadd.f32 %v17679_v14, %v4313_v48 }
 0x605   : > { %v14325_v46 = vpop.eup %14324  ;;  %14336 = vpow2.f32 %v4795_v63  ;;  %v17697_v2 = vadd.f32 %v17619_v42, %v4363_v29  ;;  %v17703_v54 = vadd.f32 %v17619_v42, %v4364_v28  ;;  %vm4590_vm14 = vcmp.gt.f32.partialorder %v17565_v39, 0.0 }
 0x606   : > { %v11348_v60 = vadd.f32 -1.0, %v14325_v46  ;;  %14338 = vpow2.f32 %v4897_v10  ;;  %v4797_v4 = vmul.f32 1.442695, %v4690_v0  ;;  %v17707_v3 = vadd.f32 %v17679_v14, %v4314_v25 }
 0x607   : > { %v14327_v37 = vpop.eup %14326  ;;  %v4741_v29 = vmin.f32 %v17697_v2, 0.0  ;;  %vm4641_vm15 = vcmp.gt.f32.partialorder %v17601_v19, 0.0  ;;  %vm4591_vm1 = vcmp.gt.f32.partialorder %v17604_v58, 0.0  ;;  %v4691_v25 = vmin.f32 %v17700_v12, 0.0 }
 0x608   : > { %v14329_v63 = vpop.eup %14328  ;;  %v17710_v11 = vsel %vm4590_vm14, %v17565_v39, %v11348_v60  ;;  %v11399_v40 = vadd.f32 -1.0, %v14327_v37  ;;  %14340 = vpow2.f32 %v4797_v4  ;;  %vm4642_vm11 = vcmp.gt.f32.partialorder %v17633_v45, 0.0 }
 0x609   : > { %22903 = vst [vmem:[#allocation27_spill] sm:$0xff] %v17710_v11  ;;  %v5271_v44 = vrot.slane %v17710_v11, 7  ;;  %v11349_v48 = vadd.f32 -1.0, %v14329_v63  ;;  %v4899_v5 = vmul.f32 1.442695, %v4741_v29  ;;  %vm4592_vm12 = vcmp.gt.f32.partialorder %v17648_v36, 0.0 }
 0x60a   : > { %v14331_v15 = vpop.eup %14330  ;;  %v17716_v28 = vsel %vm4641_vm15, %v17601_v19, %v11399_v40  ;;  %v4799_v60 = vmul.f32 1.442695, %v4691_v25  ;;  %v4742_v4 = vmin.f32 %v17703_v54, 0.0  ;;  %v4692_v63 = vmin.f32 %v17707_v3, 0.0 }
 0x60b   : > { %v5272_v39 = vsel %vm600_vm0, %v5269_v22, %v5271_v44  ;;  %13156 = vmatprep.mubr.msk.f32.mxu1 %vm3431_vm3, %v17716_v28  ;;  %v17726_v46 = vsel %vm4591_vm1, %v17604_v58, %v11349_v48  ;;  %v11400_v0 = vadd.f32 -1.0, %v14331_v15  ;;  %14342 = vpow2.f32 %v4899_v5  ;;  %v22905_v58 = vld [vmem:[#allocation68_spill] sm:$0xff] }
 0x60c   : > { %22904 = vst [vmem:[#allocation65_spill] sm:$0xff] %v17726_v46  ;;  %v14333_v19 = vpop.eup %14332  ;;  %12919 = vmatmul.mubr.msk.f32.gmra.mrb[102].mxu0 %vm3431_vm3, %v5272_v39  ;;  %v5273_v10 = vrot.slane %v17726_v46, 7  ;;  %v4365_v40 = vmul.f32 %v17539_v7, %v22905_v58  ;;  %14344 = vpow2.f32 %v4799_v60  ;;  %vm4643_vm13 = vcmp.gt.f32.partialorder %v17652_v53, 0.0  ;;  %v22908_v60 = vld [vmem:[#allocation62_spill] sm:$0xff] }
 0x60d   : > { %v14335_v37 = vpop.eup %14334  ;;  %v11350_v22 = vadd.f32 -1.0, %v14333_v19  ;;  %v17738_v48 = vsel %vm4642_vm11, %v17633_v45, %v11400_v0  ;;  %v4901_v5 = vmul.f32 1.442695, %v4742_v4  ;;  %v4801_v19 = vmul.f32 1.442695, %v4692_v63 }
 0x60e   : > { %v5274_v29 = vsel %vm600_vm0, %v5271_v44, %v5273_v10  ;;  %v11401_v39 = vadd.f32 -1.0, %v14335_v37  ;;  %13157 = vmatmul.mubr.msk.f32.gmra.mrb[12].mxu1 %vm3431_vm3, %v17738_v48  ;;  %vm4593_vm14 = vcmp.gt.f32.partialorder %v17666_v9, 0.0  ;;  %v4315_v37 = vmul.f32 %v17660_v27, %v22908_v60 }
 0x60f   : > { %v14337_v18 = vpop.eup %14336  ;;  %12921 = vmatprep.mubr.msk.f32.mxu0 %vm3431_vm3, %v5274_v29  ;;  %v17746_v15 = vsel %vm4592_vm12, %v17648_v36, %v11350_v22  ;;  %14346 = vpow2.f32 %v4901_v5  ;;  %v17757_v36 = vadd.f32 %v17619_v42, %v4365_v40  ;;  %vm4644_vm15 = vcmp.gt.f32.partialorder %v17669_v23, 0.0  ;;  %v22911_v5 = vld [vmem:[#allocation25_spill] sm:$0xff] }
 0x610   : > { %22906 = vst [vmem:[#allocation30_spill] sm:$0xff] %v17746_v15  ;;  %v5275_v44 = vrot.slane %v17746_v15, 7  ;;  %v17751_v45 = vsel %vm4643_vm13, %v17652_v53, %v11401_v39  ;;  %v11351_v25 = vadd.f32 -1.0, %v14337_v18  ;;  %v14339_v0 = vpop.eup %14338  ;;  %14348 = vpow2.f32 %v4801_v19  ;;  %v22926_v15 = vld [vmem:[#allocation35_spill] sm:$0xff] }
 0x611   : > { %22907 = vst [vmem:[#allocation66_spill] sm:$0xff] %v17751_v45  ;;  %13159 = vmatprep.mubr.msk.f32.mxu1 %vm3431_vm3, %v17751_v45  ;;  %v11402_v18 = vadd.f32 -1.0, %v14339_v0  ;;  %v4743_v58 = vmin.f32 %v17757_v36, 0.0  ;;  %v17770_v40 = vadd.f32 %v17679_v14, %v4315_v37  ;;  %vm4594_vm1 = vcmp.gt.f32.partialorder %v17685_v26, 0.0 }
 0x612   : > { %v5276_v22 = vsel %vm600_vm0, %v5273_v10, %v5275_v44  ;;  %v17763_v53 = vsel %vm4593_vm14, %v17666_v9, %v11351_v25  ;;  %v14341_v4 = vpop.eup %14340  ;;  %v22910_v9 = vld [vmem:[#allocation69_spill] sm:$0xff]  ;;  %v4316_v25 = vmul.f32 %v17660_v27, %v22911_v5  ;;  %vm4645_vm11 = vcmp.gt.f32.partialorder %v17697_v2, 0.0 }
 0x613   : > { %22909 = vst [vmem:[#allocation60_spill] sm:$0xff] %v17763_v53  ;;  %12922 = vmatmul.mubr.msk.f32.gmra.mrb[104].mxu0 %vm3431_vm3, %v5276_v22  ;;  %v5277_v63 = vrot.slane %v17763_v53, 7  ;;  %v17773_v29 = vsel %vm4644_vm15, %v17669_v23, %v11402_v18  ;;  %v11352_v10 = vadd.f32 -1.0, %v14341_v4  ;;  %v4366_v39 = vmul.f32 %v17539_v7, %v22910_v9 }
 0x614   : > { %13160 = vmatmul.mubr.msk.f32.gmra.mrb[14].mxu1 %vm3431_vm3, %v17773_v29  ;;  %v4903_v0 = vmul.f32 1.442695, %v4743_v58  ;;  %v4693_v37 = vmin.f32 %v17770_v40, 0.0  ;;  %v17793_v4 = vadd.f32 %v17679_v14, %v4316_v25  ;;  %vm4595_vm12 = vcmp.gt.f32.partialorder %v17700_v12, 0.0 }
 0x615   : > { %v5278_v19 = vsel %vm600_vm0, %v5275_v44, %v5277_v63  ;;  %v14343_v60 = vpop.eup %14342  ;;  %v17785_v23 = vsel %vm4594_vm1, %v17685_v26, %v11352_v10  ;;  %v17789_v22 = vadd.f32 %v17619_v42, %v4366_v39  ;;  %v22913_v26 = vld [vmem:[#allocation70_spill] sm:$0xff]  ;;  %vm4646_vm13 = vcmp.gt.f32.partialorder %v17703_v54, 0.0 }
 0x616   : > { %12924 = vmatprep.mubr.msk.f32.mxu0 %vm3431_vm3, %v5278_v19  ;;  %22912 = vst [vmem:[#allocation67_spill] sm:$0xff] %v17785_v23  ;;  %v5279_v18 = vrot.slane %v17785_v23, 7  ;;  %v11403_v44 = vadd.f32 -1.0, %v14343_v60  ;;  %14350 = vpow2.f32 %v4903_v0  ;;  %v14345_v9 = vpop.eup %14344  ;;  %v4803_v58 = vmul.f32 1.442695, %v4693_v37  ;;  %v22915_v37 = vld [vmem:[#allocation26_spill] sm:$0xff] }
 0x617   : > { %v4744_v5 = vmin.f32 %v17789_v22, 0.0  ;;  %v4367_v10 = vmul.f32 %v17539_v7, %v22913_v26  ;;  %v11353_v32 = vadd.f32 -1.0, %v14345_v9  ;;  %vm4596_vm14 = vcmp.gt.f32.partialorder %v17707_v3, 0.0 }
 0x618   : > { %v5280_v19 = vsel %vm600_vm0, %v5277_v63, %v5279_v18  ;;  %v17801_v39 = vsel %vm4645_vm11, %v17697_v2, %v11403_v44  ;;  %14352 = vpow2.f32 %v4803_v58  ;;  %v4694_v63 = vmin.f32 %v17793_v4, 0.0 }
 0x619   : > { %12925 = vmatmul.mubr.msk.f32.gmra.mrb[106].mxu0 %vm3431_vm3, %v5280_v19  ;;  %13162 = vmatprep.mubr.msk.f32.mxu1 %vm3431_vm3, %v17801_v39  ;;  %v4905_v25 = vmul.f32 1.442695, %v4744_v5  ;;  %v14347_v0 = vpop.eup %14346  ;;  %v17809_v60 = vsel %vm4595_vm12, %v17700_v12, %v11353_v32  ;;  %v17813_v2 = vadd.f32 %v17619_v42, %v4367_v10  ;;  %v4317_v18 = vmul.f32 %v17660_v27, %v22915_v37  ;;  %v22916_v19 = vld [vmem:[#allocation71_spill] sm:$0xff] }
 0x61a   : > { %22914 = vst [vmem:[#allocation57_spill] sm:$0xff] %v17809_v60  ;;  %v14349_v44 = vpop.eup %14348  ;;  %v5281_v9 = vrot.slane %v17809_v60, 7  ;;  %v11404_v26 = vadd.f32 -1.0, %v14347_v0  ;;  %v4368_v58 = vmul.f32 %v17539_v7, %v22916_v19  ;;  %v4805_v12 = vmul.f32 1.442695, %v4694_v63  ;;  %v22918_v19 = vld [vmem:[#allocation28_spill] sm:$0xff] }
 0x61b   : > { %14354 = vpow2.f32 %v4905_v25  ;;  %v11354_v32 = vadd.f32 -1.0, %v14349_v44  ;;  %v4745_v5 = vmin.f32 %v17813_v2, 0.0  ;;  %v17829_v47 = vadd.f32 %v17679_v14, %v4317_v18 }
 0x61c   : > { %v5451_v10 = vsel %vm600_vm0, 0.0, %v5281_v9  ;;  %v17826_v37 = vsel %vm4646_vm13, %v17703_v54, %v11404_v26  ;;  %v17832_v25 = vadd.f32 %v17619_v42, %v4368_v58  ;;  %14356 = vpow2.f32 %v4805_v12 }
 0x61d   : > { %12927 = vmatprep.mubr.msk.f32.mxu0 %vm3431_vm3, %v5451_v10  ;;  %13163 = vmatmul.mubr.msk.f32.gmra.mrb[16].mxu1 %vm3431_vm3, %v17826_v37  ;;  %v17838_v0 = vsel %vm4596_vm14, %v17707_v3, %v11354_v32  ;;  %v4907_v44 = vmul.f32 1.442695, %v4745_v5  ;;  %v4695_v54 = vmin.f32 %v17829_v47, 0.0  ;;  %vm4647_vm15 = vcmp.gt.f32.partialorder %v17757_v36, 0.0  ;;  %v22919_v10 = vld [vmem:[#allocation76_spill] sm:$0xff] }
 0x61e   : > { %22917 = vst [vmem:[#allocation68_spill] sm:$0xff] %v17838_v0  ;;  %v5282_v63 = vrot.slane %v17838_v0, 7  ;;  %v4746_v18 = vmin.f32 %v17832_v25, 0.0  ;;  %v4318_v58 = vmul.f32 %v17660_v27, %v22918_v19  ;;  %v4369_v43 = vmul.f32 %v17539_v7, %v22919_v10  ;;  %v22920_v0 = vld [vmem:[#allocation29_spill] sm:$0xff] }
 0x61f   : > { %14358 = vpow2.f32 %v4907_v44  ;;  %v4807_v12 = vmul.f32 1.442695, %v4695_v54  ;;  %v4319_v19 = vmul.f32 %v17660_v27, %v22920_v0  ;;  %v22922_v54 = vld [vmem:[#allocation33_spill] sm:$0xff]  ;;  %vm4597_vm1 = vcmp.gt.f32.partialorder %v17770_v40, 0.0 }
 0x620   : > { %v14351_v26 = vpop.eup %14350  ;;  %v5283_v3 = vsel %vm600_vm0, %v5281_v9, %v5282_v63  ;;  %v4909_v5 = vmul.f32 1.442695, %v4746_v18  ;;  %v17851_v45 = vadd.f32 %v17679_v14, %v4318_v58  ;;  %v17854_v24 = vadd.f32 %v17619_v42, %v4369_v43  ;;  %v22921_v9 = vld [vmem:[#allocation78_spill] sm:$0xff] }
 0x621   : > { %v11405_v32 = vadd.f32 -1.0, %v14351_v26  ;;  %12928 = vmatmul.mubr.msk.f32.gmra.mrb[108].mxu0 %vm3431_vm3, %v5283_v3  ;;  %14360 = vpow2.f32 %v4807_v12  ;;  %v4370_v44 = vmul.f32 %v17539_v7, %v22921_v9  ;;  %v4320_v26 = vmul.f32 %v17660_v27, %v22922_v54 }
 0x622   : > { %v14353_v60 = vpop.eup %14352  ;;  %14362 = vpow2.f32 %v4909_v5  ;;  %vm4648_vm11 = vcmp.gt.f32.partialorder %v17789_v22, 0.0  ;;  %v4747_v0 = vmin.f32 %v17854_v24, 0.0  ;;  %v4257_v53 = vcombine.high %v17353_v13, %v17353_v13 }
 0x623   : > { %v17859_v10 = vsel %vm4647_vm15, %v17757_v36, %v11405_v32  ;;  %v11355_v18 = vadd.f32 -1.0, %v14353_v60  ;;  %v4696_v36 = vmin.f32 %v17851_v45, 0.0  ;;  %v17875_v32 = vadd.f32 %v17679_v14, %v4319_v19 }
 0x624   : > { %13165 = vmatprep.mubr.msk.f32.mxu1 %vm3431_vm3, %v17859_v10  ;;  %v17878_v12 = vadd.f32 %v17619_v42, %v4370_v44  ;;  %v4911_v9 = vmul.f32 1.442695, %v4747_v0  ;;  %v17882_v54 = vadd.f32 %v17679_v14, %v4320_v26  ;;  %vm4598_vm12 = vcmp.gt.f32.partialorder %v17793_v4, 0.0 }
 0x625   : > { %v14355_v43 = vpop.eup %14354  ;;  %v17872_v58 = vsel %vm4597_vm1, %v17770_v40, %v11355_v18  ;;  %v4809_v5 = vmul.f32 1.442695, %v4696_v36  ;;  %v4258_v40 = vcombine.high %v17365_v21, %v17365_v21  ;;  %v4697_v44 = vmin.f32 %v17875_v32, 0.0 }
 0x626   : > { %22923 = vst [vmem:[#allocation62_spill] sm:$0xff] %v17872_v58  ;;  %v11406_v3 = vadd.f32 -1.0, %v14355_v43  ;;  %v5284_v60 = vrot.slane %v17872_v58, 7  ;;  %v14357_v23 = vpop.eup %14356  ;;  %v4444_v18 = vcombine.high %v17361_v52, %v17361_v52  ;;  %vm4649_vm13 = vcmp.gt.f32.partialorder %v17813_v2, 0.0 }
 0x627   : > { %v11356_v26 = vadd.f32 -1.0, %v14357_v23  ;;  %14364 = vpow2.f32 %v4809_v5  ;;  %v4811_v13 = vmul.f32 1.442695, %v4697_v44  ;;  %v4748_v21 = vmin.f32 %v17878_v12, 0.0 }
 0x628   : > { %v17889_v19 = vsel %vm4648_vm11, %v17789_v22, %v11406_v3  ;;  %v5285_v43 = vsel %vm600_vm0, %v5282_v63, %v5284_v60  ;;  %14366 = vpow2.f32 %v4911_v9  ;;  %v4698_v52 = vmin.f32 %v17882_v54, 0.0  ;;  %v22925_v63 = vld [vmem:[#allocation82_spill] sm:$0xff] }
 0x629   : > { %13166 = vmatmul.mubr.msk.f32.gmra.mrb[18].mxu1 %vm3431_vm3, %v17889_v19  ;;  %12930 = vmatprep.mubr.msk.f32.mxu0 %vm3431_vm3, %v5285_v43  ;;  %v14359_v22 = vpop.eup %14358  ;;  %v17902_v36 = vsel %vm4598_vm12, %v17793_v4, %v11356_v26  ;;  %v4371_v0 = vmul.f32 %v17539_v7, %v22925_v63  ;;  %14368 = vpow2.f32 %v4811_v13  ;;  %v4913_v43 = vmul.f32 1.442695, %v4748_v21  ;;  %v22927_v26 = vld [vmem:[#allocation84_spill] sm:$0xff] }
 0x62a   : > { %22924 = vst [vmem:[#allocation69_spill] sm:$0xff] %v17902_v36  ;;  %v5286_v23 = vrot.slane %v17902_v36, 7  ;;  %v11407_v3 = vadd.f32 -1.0, %v14359_v22  ;;  %v4813_v5 = vmul.f32 1.442695, %v4698_v52  ;;  %v4321_v4 = vmul.f32 %v17660_v27, %v22926_v15 }
 0x62b   : > { %v14361_v58 = vpop.eup %14360  ;;  %v17909_v44 = vadd.f32 %v17619_v42, %v4371_v0  ;;  %v4372_v9 = vmul.f32 %v17539_v7, %v22927_v26  ;;  %14370 = vpow2.f32 %v4913_v43  ;;  %v17922_v21 = vrot.slane %v4258_v40, %v16315_v1 }
 0x62c   : > { %v14363_v46 = vpop.eup %14362  ;;  %v5287_v11 = vsel %vm600_vm0, %v5284_v60, %v5286_v23  ;;  %v17919_v22 = vsel %vm4649_vm13, %v17813_v2, %v11407_v3  ;;  %v11357_v13 = vadd.f32 -1.0, %v14361_v58  ;;  %vm4599_vm14 = vcmp.gt.f32.partialorder %v17829_v47, 0.0 }
 0x62d   : > { %12931 = vmatmul.mubr.msk.f32.gmra.mrb[110].mxu0 %vm3431_vm3, %v5287_v11  ;;  %13168 = vmatprep.mubr.msk.f32.mxu1 %vm3431_vm3, %v17919_v22  ;;  %v11408_v7 = vadd.f32 -1.0, %v14363_v46  ;;  %14372 = vpow2.f32 %v4813_v5  ;;  %vm4650_vm15 = vcmp.gt.f32.partialorder %v17832_v25, 0.0  ;;  %v4749_v2 = vmin.f32 %v17909_v44, 0.0  ;;  %v22929_v46 = vld [vmem:[#allocation37_spill] sm:$0xff] }
 0x62e   : > { %v17929_v15 = vsel %vm4599_vm14, %v17829_v47, %v11357_v13  ;;  %v17934_v58 = vadd.f32 %v17679_v14, %v4321_v4  ;;  %v17941_v40 = vadd.f32 %v17619_v42, %v4372_v9  ;;  %v4322_v52 = vmul.f32 %v17660_v27, %v22929_v46  ;;  %v22931_v4 = vld [vmem:[#allocation39_spill] sm:$0xff] }
 0x62f   : > { %22928 = vst [vmem:[#allocation25_spill] sm:$0xff] %v17929_v15  ;;  %v5288_v60 = vrot.slane %v17929_v15, 7  ;;  %v17938_v11 = vsel %vm4650_vm15, %v17832_v25, %v11408_v7  ;;  %v4443_v47 = vcombine.high %v17357_v59, %v17357_v59  ;;  %v17948_v63 = vrot.slane %v4444_v18, %v16315_v1 }
 0x630   : > { %v17951_v0 = vrot.slane %v4257_v53, %v16315_v1  ;;  %13169 = vmatmul.mubr.msk.f32.gmra.mrb[20].mxu1 %vm3431_vm3, %v17938_v11  ;;  %v4915_v25 = vmul.f32 1.442695, %v4749_v2  ;;  %vm4600_vm1 = vcmp.gt.f32.partialorder %v17851_v45, 0.0  ;;  %v4699_v42 = vmin.f32 %v17934_v58, 0.0  ;;  %v22930_v53 = vld [vmem:[#allocation73_spill] sm:$0xff] }
 0x631   : > { %v5289_v3 = vsel %vm600_vm0, %v5286_v23, %v5288_v60  ;;  %v4750_v43 = vmin.f32 %v17941_v40, 0.0  ;;  %v14365_v5 = vpop.eup %14364  ;;  %v17961_v59 = vadd.f32 %v17679_v14, %v4322_v52  ;;  %v4373_v18 = vmul.f32 %v17922_v21, %v22930_v53 }
 0x632   : > { %12933 = vmatprep.mubr.msk.f32.mxu0 %vm3431_vm3, %v5289_v3  ;;  %14374 = vpow2.f32 %v4915_v25  ;;  %v4323_v26 = vmul.f32 %v17660_v27, %v22931_v4  ;;  %v14367_v23 = vpop.eup %14366  ;;  %v11358_v9 = vadd.f32 -1.0, %v14365_v5  ;;  %vm4651_vm11 = vcmp.gt.f32.partialorder %v17854_v24, 0.0 }
 0x633   : > { %v4815_v13 = vmul.f32 1.442695, %v4699_v42  ;;  %v4917_v7 = vmul.f32 1.442695, %v4750_v43  ;;  %v14369_v2 = vpop.eup %14368  ;;  %v11409_v46 = vadd.f32 -1.0, %v14367_v23  ;;  %vm4601_vm12 = vcmp.gt.f32.partialorder %v17875_v32, 0.0 }
 0x634   : > { %v4700_v25 = vmin.f32 %v17961_v59, 0.0  ;;  %v17971_v52 = vadd.f32 %v17948_v63, %v4373_v18  ;;  %v17976_v3 = vsel %vm4600_vm1, %v17851_v45, %v11358_v9  ;;  %v11359_v53 = vadd.f32 -1.0, %v14369_v2 }
 0x635   : > { %22932 = vst [vmem:[#allocation70_spill] sm:$0xff] %v17976_v3  ;;  %14376 = vpow2.f32 %v4815_v13  ;;  %v17979_v5 = vadd.f32 %v17679_v14, %v4323_v26  ;;  %v14371_v42 = vpop.eup %14370  ;;  %v5290_v43 = vrot.slane %v17976_v3, 7  ;;  %v17983_v4 = vsel %vm4651_vm11, %v17854_v24, %v11409_v46  ;;  %v22934_v26 = vld [vmem:[#allocation72_spill] sm:$0xff] }
 0x636   : > { %14378 = vpow2.f32 %v4917_v7  ;;  %v4817_v23 = vmul.f32 1.442695, %v4700_v25  ;;  %13171 = vmatprep.mubr.msk.f32.mxu1 %vm3431_vm3, %v17983_v4  ;;  %v17988_v45 = vsel %vm4601_vm12, %v17875_v32, %v11359_v53  ;;  %vm4652_vm13 = vcmp.gt.f32.partialorder %v17878_v12, 0.0 }
 0x637   : > { %v14373_v18 = vpop.eup %14372  ;;  %22933 = vst [vmem:[#allocation26_spill] sm:$0xff] %v17988_v45  ;;  %v11410_v9 = vadd.f32 -1.0, %v14371_v42  ;;  %v4374_v13 = vmul.f32 %v17922_v21, %v22934_v26  ;;  %v5291_v2 = vsel %vm600_vm0, %v5288_v60, %v5290_v43  ;;  %v5292_v24 = vrot.slane %v17988_v45, 7  ;;  %v22937_v26 = vld [vmem:[#allocation75_spill] sm:$0xff]  ;;  %v22938_v45 = vld [vmem:[#allocation32_spill] sm:$0xff] }
 0x638   : > { %v11360_v46 = vadd.f32 -1.0, %v14373_v18  ;;  %14380 = vpow2.f32 %v4817_v23  ;;  %12934 = vmatmul.mubr.msk.f32.gmra.mrb[112].mxu0 %vm3431_vm3, %v5291_v2  ;;  %vm4602_vm14 = vcmp.gt.f32.partialorder %v17882_v54, 0.0  ;;  %v4751_v32 = vmin.f32 %v17971_v52, 0.0 }
 0x639   : > { %v17997_v7 = vsel %vm4652_vm13, %v17878_v12, %v11410_v9  ;;  %v18002_v25 = vrot.slane %v4443_v47, %v16315_v1  ;;  %v5293_v53 = vsel %vm600_vm0, %v5290_v43, %v5292_v24  ;;  %v4701_v23 = vmin.f32 %v17979_v5, 0.0  ;;  %v22936_v9 = vld [vmem:[#allocation40_spill] sm:$0xff] }
 0x63a   : > { %13172 = vmatmul.mubr.msk.f32.gmra.mrb[22].mxu1 %vm3431_vm3, %v17997_v7  ;;  %v18008_v60 = vsel %vm4602_vm14, %v17882_v54, %v11360_v46  ;;  %12936 = vmatprep.mubr.msk.f32.mxu0 %vm3431_vm3, %v5293_v53  ;;  %v4919_v42 = vmul.f32 1.442695, %v4751_v32  ;;  %v18014_v18 = vadd.f32 %v17948_v63, %v4374_v13  ;;  %v4324_v43 = vmul.f32 %v17660_v27, %v22936_v9  ;;  %v22939_v46 = vld [vmem:[#allocation74_spill] sm:$0xff] }
 0x63b   : > { %22935 = vst [vmem:[#allocation71_spill] sm:$0xff] %v18008_v60  ;;  %v5294_v12 = vrot.slane %v18008_v60, 7  ;;  %v4375_v2 = vmul.f32 %v17922_v21, %v22937_v26  ;;  %v4325_v54 = vmul.f32 %v17951_v0, %v22938_v45  ;;  %v4376_v53 = vmul.f32 %v17922_v21, %v22939_v46 }
 0x63c   : > { %v14375_v47 = vpop.eup %14374  ;;  %14382 = vpow2.f32 %v4919_v42  ;;  %v4819_v3 = vmul.f32 1.442695, %v4701_v23  ;;  %vm4653_vm15 = vcmp.gt.f32.partialorder %v17909_v44, 0.0  ;;  %v4752_v27 = vmin.f32 %v18014_v18, 0.0 }
 0x63d   : > { %v5295_v32 = vsel %vm600_vm0, %v5292_v24, %v5294_v12  ;;  %v11411_v60 = vadd.f32 -1.0, %v14375_v47  ;;  %v18029_v13 = vadd.f32 %v17679_v14, %v4324_v43  ;;  %v18032_v9 = vadd.f32 %v17948_v63, %v4375_v2 }
 0x63e   : > { %12937 = vmatmul.mubr.msk.f32.gmra.mrb[114].mxu0 %vm3431_vm3, %v5295_v32  ;;  %14384 = vpow2.f32 %v4819_v3  ;;  %v18038_v24 = vadd.f32 %v18002_v25, %v4325_v54  ;;  %v18041_v42 = vadd.f32 %v17948_v63, %v4376_v53  ;;  %v4921_v47 = vmul.f32 1.442695, %v4752_v27 }
 0x63f   : > { %v14377_v45 = vpop.eup %14376  ;;  %v18035_v26 = vsel %vm4653_vm15, %v17909_v44, %v11411_v60  ;;  %vm4603_vm1 = vcmp.gt.f32.partialorder %v17934_v58, 0.0  ;;  %v4702_v2 = vmin.f32 %v18029_v13, 0.0  ;;  %vm4654_vm11 = vcmp.gt.f32.partialorder %v17941_v40, 0.0 }
 0x640   : > { %v14379_v23 = vpop.eup %14378  ;;  %13174 = vmatprep.mubr.msk.f32.mxu1 %vm3431_vm3, %v18035_v26  ;;  %v11361_v14 = vadd.f32 -1.0, %v14377_v45  ;;  %14386 = vpow2.f32 %v4921_v47  ;;  %v4753_v60 = vmin.f32 %v18032_v9, 0.0  ;;  %vm4604_vm12 = vcmp.gt.f32.partialorder %v17961_v59, 0.0 }
 0x641   : > { %v11412_v43 = vadd.f32 -1.0, %v14379_v23  ;;  %v4821_v32 = vmul.f32 1.442695, %v4702_v2  ;;  %vm4655_vm13 = vcmp.gt.f32.partialorder %v17971_v52, 0.0  ;;  %v4754_v47 = vmin.f32 %v18041_v42, 0.0  ;;  %v22942_v2 = vld [vmem:[#allocation31_spill] sm:$0xff] }
 0x642   : > { %v14381_v44 = vpop.eup %14380  ;;  %v18048_v3 = vsel %vm4603_vm1, %v17934_v58, %v11361_v14  ;;  %v4923_v27 = vmul.f32 1.442695, %v4753_v60  ;;  %v4703_v58 = vmin.f32 %v18038_v24, 0.0  ;;  %v22943_v60 = vld [vmem:[#allocation79_spill] sm:$0xff]  ;;  %vm4605_vm14 = vcmp.gt.f32.partialorder %v17979_v5, 0.0 }
 0x643   : > { %22940 = vst [vmem:[#allocation28_spill] sm:$0xff] %v18048_v3  ;;  %v5296_v54 = vrot.slane %v18048_v3, 7  ;;  %v18054_v46 = vsel %vm4654_vm11, %v17941_v40, %v11412_v43  ;;  %v11362_v53 = vadd.f32 -1.0, %v14381_v44  ;;  %14388 = vpow2.f32 %v4821_v32  ;;  %v22945_v3 = vld [vmem:[#allocation77_spill] sm:$0xff] }
 0x644   : > { %13175 = vmatmul.mubr.msk.f32.gmra.mrb[24].mxu1 %vm3431_vm3, %v18054_v46  ;;  %14390 = vpow2.f32 %v4923_v27  ;;  %v4823_v14 = vmul.f32 1.442695, %v4703_v58  ;;  %v4326_v44 = vmul.f32 %v17951_v0, %v22942_v2  ;;  %v4378_v32 = vmul.f32 %v17922_v21, %v22945_v3 }
 0x645   : > { %v5297_v45 = vsel %vm600_vm0, %v5294_v12, %v5296_v54  ;;  %v18062_v23 = vsel %vm4604_vm12, %v17961_v59, %v11362_v53  ;;  %v4377_v12 = vmul.f32 %v17922_v21, %v22943_v60  ;;  %v22944_v59 = vld [vmem:[#allocation34_spill] sm:$0xff]  ;;  %v4925_v27 = vmul.f32 1.442695, %v4754_v47 }
 0x646   : > { %22941 = vst [vmem:[#allocation76_spill] sm:$0xff] %v18062_v23  ;;  %12939 = vmatprep.mubr.msk.f32.mxu0 %vm3431_vm3, %v5297_v45  ;;  %v5298_v40 = vrot.slane %v18062_v23, 7  ;;  %v14383_v43 = vpop.eup %14382  ;;  %v4327_v53 = vmul.f32 %v17951_v0, %v22944_v59  ;;  %14392 = vpow2.f32 %v4823_v14  ;;  %v18079_v15 = vadd.f32 %v18002_v25, %v4326_v44  ;;  %v22947_v14 = vld [vmem:[#allocation36_spill] sm:$0xff] }
 0x647   : > { %v11413_v23 = vadd.f32 -1.0, %v14383_v43  ;;  %v18082_v2 = vadd.f32 %v17948_v63, %v4377_v12  ;;  %v18088_v59 = vadd.f32 %v17948_v63, %v4378_v32  ;;  %14394 = vpow2.f32 %v4925_v27 }
 0x648   : > { %v5299_v45 = vsel %vm600_vm0, %v5296_v54, %v5298_v40  ;;  %v14385_v58 = vpop.eup %14384  ;;  %v18085_v60 = vadd.f32 %v18002_v25, %v4327_v53  ;;  %v4328_v47 = vmul.f32 %v17951_v0, %v22947_v14  ;;  %v4704_v43 = vmin.f32 %v18079_v15, 0.0 }
 0x649   : > { %12940 = vmatmul.mubr.msk.f32.gmra.mrb[116].mxu0 %vm3431_vm3, %v5299_v45  ;;  %v18093_v3 = vsel %vm4655_vm13, %v17971_v52, %v11413_v23  ;;  %v11363_v54 = vadd.f32 -1.0, %v14385_v58  ;;  %v4755_v53 = vmin.f32 %v18082_v2, 0.0  ;;  %vm4656_vm15 = vcmp.gt.f32.partialorder %v18014_v18, 0.0 }
 0x64a   : > { %22946 = vst [vmem:[#allocation29_spill] sm:$0xff] %v18093_v3  ;;  %13177 = vmatprep.mubr.msk.f32.mxu1 %vm3431_vm3, %v18093_v3  ;;  %v14387_v44 = vpop.eup %14386  ;;  %v4705_v52 = vmin.f32 %v18085_v60, 0.0  ;;  %v4825_v45 = vmul.f32 1.442695, %v4704_v43  ;;  %v4756_v14 = vmin.f32 %v18088_v59, 0.0  ;;  %v18110_v3 = vadd.f32 %v18002_v25, %v4328_v47 }
 0x64b   : > { %v18102_v12 = vsel %vm4605_vm14, %v17979_v5, %v11363_v54  ;;  %v11414_v32 = vadd.f32 -1.0, %v14387_v44  ;;  %v4927_v27 = vmul.f32 1.442695, %v4755_v53  ;;  %vm4606_vm1 = vcmp.gt.f32.partialorder %v18029_v13, 0.0 }
 0x64c   : > { %22948 = vst [vmem:[#allocation78_spill] sm:$0xff] %v18102_v12  ;;  %v5300_v23 = vrot.slane %v18102_v12, 7  ;;  %v4827_v58 = vmul.f32 1.442695, %v4705_v52  ;;  %14396 = vpow2.f32 %v4825_v45  ;;  %v4379_v12 = vmul.f32 %v17922_v21, %v22950_v50  ;;  %v22952_v52 = vld [vmem:[#allocation38_spill] sm:$0xff] }
 0x64d   : > { %v14389_v36 = vpop.eup %14388  ;;  %v18114_v54 = vsel %vm4656_vm15, %v18014_v18, %v11414_v32  ;;  %14398 = vpow2.f32 %v4927_v27  ;;  %vm4657_vm11 = vcmp.gt.f32.partialorder %v18032_v9, 0.0  ;;  %v4929_v18 = vmul.f32 1.442695, %v4756_v14 }
 0x64e   : > { %v5301_v5 = vsel %vm600_vm0, %v5298_v40, %v5300_v23  ;;  %22949 = vst [vmem:[#allocation33_spill] sm:$0xff] %v18114_v54  ;;  %v14391_v56 = vpop.eup %14390  ;;  %13178 = vmatmul.mubr.msk.f32.gmra.mrb[26].mxu1 %vm3431_vm3, %v18114_v54  ;;  %v11364_v47 = vadd.f32 -1.0, %v14389_v36  ;;  %14400 = vpow2.f32 %v4827_v58  ;;  %v4706_v50 = vmin.f32 %v18110_v3, 0.0 }
 0x64f   : > { %12942 = vmatprep.mubr.msk.f32.mxu0 %vm3431_vm3, %v5301_v5  ;;  %v11415_v40 = vadd.f32 -1.0, %v14391_v56  ;;  %v18128_v53 = vadd.f32 %v17948_v63, %v4379_v12  ;;  %v4329_v32 = vmul.f32 %v17951_v0, %v22952_v52  ;;  %14402 = vpow2.f32 %v4929_v18  ;;  %v22957_v52 = vld [vmem:[#allocation83_spill] sm:$0xff] }
 0x650   : > { %v14393_v43 = vpop.eup %14392  ;;  %v18124_v44 = vsel %vm4606_vm1, %v18029_v13, %v11364_v47  ;;  %vm4607_vm12 = vcmp.gt.f32.partialorder %v18038_v24, 0.0  ;;  %vm4658_vm13 = vcmp.gt.f32.partialorder %v18041_v42, 0.0  ;;  %v4829_v13 = vmul.f32 1.442695, %v4706_v50 }
 0x651   : > { %22951 = vst [vmem:[#allocation82_spill] sm:$0xff] %v18124_v44  ;;  %v5302_v36 = vrot.slane %v18124_v44, 7  ;;  %v18134_v45 = vsel %vm4657_vm11, %v18032_v9, %v11415_v40  ;;  %v11365_v56 = vadd.f32 -1.0, %v14393_v43  ;;  %v14395_v27 = vpop.eup %14394  ;;  %v4757_v9 = vmin.f32 %v18128_v53, 0.0  ;;  %v22954_v40 = vld [vmem:[#allocation80_spill] sm:$0xff] }
 0x652   : > { %13180 = vmatprep.mubr.msk.f32.mxu1 %vm3431_vm3, %v18134_v45  ;;  %v11416_v14 = vadd.f32 -1.0, %v14395_v27  ;;  %14404 = vpow2.f32 %v4829_v13  ;;  %v18148_v47 = vadd.f32 %v18002_v25, %v4329_v32  ;;  %v4380_v18 = vmul.f32 %v17922_v21, %v22954_v40 }
 0x653   : > { %v5303_v12 = vsel %vm600_vm0, %v5300_v23, %v5302_v36  ;;  %v18142_v58 = vsel %vm4607_vm12, %v18038_v24, %v11365_v56  ;;  %v4931_v23 = vmul.f32 1.442695, %v4757_v9  ;;  %v22956_v24 = vld [vmem:[#allocation41_spill] sm:$0xff]  ;;  %v4381_v36 = vmul.f32 %v17922_v21, %v22957_v52 }
 0x654   : > { %22953 = vst [vmem:[#allocation35_spill] sm:$0xff] %v18142_v58  ;;  %12943 = vmatmul.mubr.msk.f32.gmra.mrb[118].mxu0 %vm3431_vm3, %v5303_v12  ;;  %v5304_v5 = vrot.slane %v18142_v58, 7  ;;  %v18153_v43 = vsel %vm4658_vm13, %v18041_v42, %v11416_v14  ;;  %v4330_v50 = vmul.f32 %v17951_v0, %v22956_v24  ;;  %v4707_v42 = vmin.f32 %v18148_v47, 0.0  ;;  %v22959_v58 = vld [vmem:[#allocation42_spill] sm:$0xff] }
 0x655   : > { %22955 = vst [vmem:[#allocation84_spill] sm:$0xff] %v18153_v43  ;;  %13181 = vmatmul.mubr.msk.f32.gmra.mrb[28].mxu1 %vm3431_vm3, %v18153_v43  ;;  %14406 = vpow2.f32 %v4931_v23  ;;  %v18167_v13 = vadd.f32 %v17948_v63, %v4380_v18  ;;  %vm4608_vm14 = vcmp.gt.f32.partialorder %v18079_v15, 0.0  ;;  %vm4659_vm15 = vcmp.gt.f32.partialorder %v18082_v2, 0.0 }
 0x656   : > { %v5452_v27 = vsel %vm600_vm0, 0.0, %v5304_v5  ;;  %v14397_v32 = vpop.eup %14396  ;;  %v18170_v12 = vadd.f32 %v18002_v25, %v4330_v50  ;;  %v18175_v40 = vadd.f32 %v17948_v63, %v4381_v36  ;;  %vm4609_vm1 = vcmp.gt.f32.partialorder %v18085_v60, 0.0 }
 0x657   : > { %12945 = vmatprep.mubr.msk.f32.mxu0 %vm3431_vm3, %v5452_v27  ;;  %v14399_v14 = vpop.eup %14398  ;;  %v11366_v9 = vadd.f32 -1.0, %v14397_v32  ;;  %v4831_v23 = vmul.f32 1.442695, %v4707_v42  ;;  %v4758_v18 = vmin.f32 %v18167_v13, 0.0  ;;  %v4331_v32 = vmul.f32 %v17951_v0, %v22959_v58 }
 0x658   : > { %v14401_v24 = vpop.eup %14400  ;;  %v11417_v52 = vadd.f32 -1.0, %v14399_v14  ;;  %v4708_v56 = vmin.f32 %v18170_v12, 0.0  ;;  %vm4660_vm11 = vcmp.gt.f32.partialorder %v18088_v59, 0.0  ;;  %vm4610_vm12 = vcmp.gt.f32.partialorder %v18110_v3, 0.0 }
 0x659   : > { %v18180_v27 = vsel %vm4608_vm14, %v18079_v15, %v11366_v9  ;;  %v11367_v50 = vadd.f32 -1.0, %v14401_v24  ;;  %v14403_v44 = vpop.eup %14402  ;;  %14408 = vpow2.f32 %v4831_v23  ;;  %v4933_v14 = vmul.f32 1.442695, %v4758_v18  ;;  %v22962_v9 = vld [vmem:[#allocation85_spill] sm:$0xff] }
 0x65a   : > { %22958 = vst [vmem:[#allocation37_spill] sm:$0xff] %v18180_v27  ;;  %v5305_v36 = vrot.slane %v18180_v27, 7  ;;  %v18187_v43 = vsel %vm4659_vm15, %v18082_v2, %v11417_v52  ;;  %v11418_v42 = vadd.f32 -1.0, %v14403_v44  ;;  %v4382_v58 = vmul.f32 %v17922_v21, %v22962_v9  ;;  %v22966_v9 = vld [vmem:[#allocation86_spill] sm:$0xff] }
 0x65b   : > { %22960 = vst [vmem:[#allocation73_spill] sm:$0xff] %v18187_v43  ;;  %13183 = vmatprep.mubr.msk.f32.mxu1 %vm3431_vm3, %v18187_v43  ;;  %v18192_v15 = vsel %vm4609_vm1, %v18085_v60, %v11367_v50  ;;  %14410 = vpow2.f32 %v4933_v14  ;;  %v4833_v2 = vmul.f32 1.442695, %v4708_v56  ;;  %v4445_v23 = vcombine.high %v17643_v57, %v17643_v57 }
 0x65c   : > { %22961 = vst [vmem:[#allocation39_spill] sm:$0xff] %v18192_v15  ;;  %v5306_v24 = vsel %vm600_vm0, %v5304_v5, %v5305_v36  ;;  %v5307_v27 = vrot.slane %v18192_v15, 7  ;;  %v14405_v52 = vpop.eup %14404  ;;  %v18203_v60 = vsel %vm4660_vm11, %v18088_v59, %v11418_v42  ;;  %v4759_v44 = vmin.f32 %v18175_v40, 0.0 }
 0x65d   : > { %12946 = vmatmul.mubr.msk.f32.gmra.mrb[120].mxu0 %vm3431_vm3, %v5306_v24  ;;  %22963 = vst [vmem:[#allocation72_spill] sm:$0xff] %v18203_v60  ;;  %v18207_v18 = vadd.f32 %v18002_v25, %v4331_v32  ;;  %v4446_v5 = vcombine.high %v17520_v17, %v17520_v17  ;;  %v4260_v56 = vcombine.high %v17463_v6, %v17463_v6  ;;  %v11368_v57 = vadd.f32 -1.0, %v14405_v52 }
 0x65e   : > { %v5308_v50 = vsel %vm600_vm0, %v5305_v36, %v5307_v27  ;;  %13184 = vmatmul.mubr.msk.f32.gmra.mrb[30].mxu1 %vm3431_vm3, %v18203_v60  ;;  %14412 = vpow2.f32 %v4833_v2  ;;  %v4935_v59 = vmul.f32 1.442695, %v4759_v44  ;;  %v18223_v6 = vadd.f32 %v17948_v63, %v4382_v58  ;;  %v22965_v36 = vld [vmem:[#allocation45_spill] sm:$0xff] }
 0x65f   : > { %12948 = vmatprep.mubr.msk.f32.mxu0 %vm3431_vm3, %v5308_v50  ;;  %v4709_v32 = vmin.f32 %v18207_v18, 0.0  ;;  %v14407_v14 = vpop.eup %14406  ;;  %v18220_v17 = vsel %vm4610_vm12, %v18110_v3, %v11368_v57  ;;  %v4332_v42 = vmul.f32 %v17951_v0, %v22965_v36  ;;  %v4383_v24 = vmul.f32 %v17922_v21, %v22966_v9  ;;  %v22968_v9 = vld [vmem:[#allocation48_spill] sm:$0xff] }
 0x660   : > { %22964 = vst [vmem:[#allocation40_spill] sm:$0xff] %v18220_v17  ;;  %v5309_v52 = vrot.slane %v18220_v17, 7  ;;  %v11419_v50 = vadd.f32 -1.0, %v14407_v14  ;;  %14414 = vpow2.f32 %v4935_v59  ;;  %vm4661_vm13 = vcmp.gt.f32.partialorder %v18128_v53, 0.0 }
 0x661   : > { %v4835_v2 = vmul.f32 1.442695, %v4709_v32  ;;  %v4760_v44 = vmin.f32 %v18223_v6, 0.0  ;;  %v18233_v3 = vadd.f32 %v18002_v25, %v4332_v42  ;;  %v18236_v58 = vadd.f32 %v17948_v63, %v4383_v24 }
 0x662   : > { %v5310_v57 = vsel %vm600_vm0, %v5307_v27, %v5309_v52  ;;  %v18240_v36 = vsel %vm4661_vm13, %v18128_v53, %v11419_v50  ;;  %v4333_v59 = vmul.f32 %v17951_v0, %v22968_v9  ;;  %v18245_v14 = vrot.slane %v4445_v23, %v16315_v1 }
 0x663   : > { %22967 = vst [vmem:[#allocation75_spill] sm:$0xff] %v18240_v36  ;;  %14416 = vpow2.f32 %v4835_v2  ;;  %v14409_v32 = vpop.eup %14408  ;;  %v18248_v17 = vrot.slane %v4446_v5, %v16315_v1  ;;  %v18251_v42 = vrot.slane %v4260_v56, %v16315_v1  ;;  %12949 = vmatmul.mubr.msk.f32.gmra.mrb[122].mxu0 %vm3431_vm3, %v5310_v57  ;;  %13186 = vmatprep.mubr.msk.f32.mxu1 %vm3431_vm3, %v18240_v36  ;;  %v4937_v53 = vmul.f32 1.442695, %v4760_v44  ;;  %v22969_v56 = vld [vmem:[#allocation89_spill] sm:$0xff]  ;;  %v22970_v57 = vld [vmem:[#allocation47_spill] sm:$0xff] }
 0x664   : > { %vm4611_vm14 = vcmp.gt.f32.partialorder %v18148_v47, 0.0  ;;  %v11369_v27 = vadd.f32 -1.0, %v14409_v32  ;;  %v4710_v24 = vmin.f32 %v18233_v3, 0.0  ;;  %v4761_v23 = vmin.f32 %v18236_v58, 0.0 }
 0x665   : > { %v14411_v50 = vpop.eup %14410  ;;  %14418 = vpow2.f32 %v4937_v53  ;;  %v18260_v5 = vadd.f32 %v18002_v25, %v4333_v59  ;;  %v4384_v2 = vmul.f32 %v17922_v21, %v22969_v56  ;;  %v4334_v9 = vmul.f32 %v17951_v0, %v22970_v57 }
 0x666   : > { %v18267_v44 = vsel %vm4611_vm14, %v18148_v47, %v11369_v27  ;;  %v11420_v15 = vadd.f32 -1.0, %v14411_v50  ;;  %v4837_v32 = vmul.f32 1.442695, %v4710_v24  ;;  %v4939_v36 = vmul.f32 1.442695, %v4761_v23  ;;  %v22973_v27 = vld [vmem:[#allocation88_spill] sm:$0xff] }
 0x667   : > { %22971 = vst [vmem:[#allocation32_spill] sm:$0xff] %v18267_v44  ;;  %v5311_v60 = vrot.slane %v18267_v44, 7  ;;  %vm4662_vm15 = vcmp.gt.f32.partialorder %v18167_v13, 0.0  ;;  %v4711_v53 = vmin.f32 %v18260_v5, 0.0  ;;  %v18273_v59 = vadd.f32 %v17948_v63, %v4384_v2 }
 0x668   : > { %v14413_v43 = vpop.eup %14412  ;;  %v18276_v21 = vsel %vm4662_vm15, %v18167_v13, %v11420_v15  ;;  %14420 = vpow2.f32 %v4837_v32  ;;  %v18279_v47 = vadd.f32 %v18002_v25, %v4334_v9  ;;  %v4385_v24 = vmul.f32 %v18251_v42, %v22973_v27 }
 0x669   : > { %22972 = vst [vmem:[#allocation74_spill] sm:$0xff] %v18276_v21  ;;  %v22974_v23 = vcombine.high %v17629_v49, %v17629_v49  ;;  %v5312_v56 = vsel %vm600_vm0, %v5309_v52, %v5311_v60  ;;  %13187 = vmatmul.mubr.msk.f32.gmra.mrb[32].mxu1 %vm3431_vm3, %v18276_v21  ;;  %v11370_v13 = vadd.f32 -1.0, %v14413_v43  ;;  %vm4612_vm1 = vcmp.gt.f32.partialorder %v18170_v12, 0.0 }
 0x66a   : > { %v14415_v15 = vpop.eup %14414  ;;  %12951 = vmatprep.mubr.msk.f32.mxu0 %vm3431_vm3, %v5312_v56  ;;  %14422 = vpow2.f32 %v4939_v36  ;;  %v4839_v2 = vmul.f32 1.442695, %v4711_v53  ;;  %v4762_v57 = vmin.f32 %v18273_v59, 0.0  ;;  %vm4663_vm11 = vcmp.gt.f32.partialorder %v18175_v40, 0.0 }
 0x66b   : > { %v18287_v50 = vrot.slane %v22974_v23, %v16315_v1  ;;  %v18297_v49 = vsel %vm4612_vm1, %v18170_v12, %v11370_v13  ;;  %v11421_v9 = vadd.f32 -1.0, %v14415_v15  ;;  %v4712_v52 = vmin.f32 %v18279_v47, 0.0  ;;  %v22977_v12 = vld [vmem:[#allocation53_spill] sm:$0xff]  ;;  %v22982_v15 = vld [vmem:[#allocation44_spill] sm:$0xff] }
 0x66c   : > { %22975 = vst [vmem:[#allocation31_spill] sm:$0xff] %v18297_v49  ;;  %v5313_v43 = vrot.slane %v18297_v49, 7  ;;  %14424 = vpow2.f32 %v4839_v2  ;;  %v4941_v27 = vmul.f32 1.442695, %v4762_v57  ;;  %v18303_v23 = vadd.f32 %v18248_v17, %v4385_v24 }
 0x66d   : > { %v14417_v32 = vpop.eup %14416  ;;  %v18306_v36 = vsel %vm4663_vm11, %v18175_v40, %v11421_v9  ;;  %v4841_v56 = vmul.f32 1.442695, %v4712_v52  ;;  %v4335_v13 = vmul.f32 %v17951_v0, %v22977_v12  ;;  %vm4613_vm12 = vcmp.gt.f32.partialorder %v18207_v18, 0.0  ;;  %v22979_v52 = vld [vmem:[#allocation87_spill] sm:$0xff]  ;;  %v22980_v12 = vld [vmem:[#allocation56_spill] sm:$0xff] }
 0x66e   : > { %22976 = vst [vmem:[#allocation79_spill] sm:$0xff] %v18306_v36  ;;  %v11371_v53 = vadd.f32 -1.0, %v14417_v32  ;;  %v5314_v63 = vsel %vm600_vm0, %v5311_v60, %v5313_v43  ;;  %13189 = vmatprep.mubr.msk.f32.mxu1 %vm3431_vm3, %v18306_v36  ;;  %14426 = vpow2.f32 %v4941_v27  ;;  %vm4664_vm13 = vcmp.gt.f32.partialorder %v18223_v6, 0.0 }
 0x66f   : > { %v14419_v24 = vpop.eup %14418  ;;  %12952 = vmatmul.mubr.msk.f32.gmra.mrb[124].mxu0 %vm3431_vm3, %v5314_v63  ;;  %14428 = vpow2.f32 %v4841_v56  ;;  %v4763_v2 = vmin.f32 %v18303_v23, 0.0  ;;  %v18323_v9 = vadd.f32 %v18002_v25, %v4335_v13  ;;  %v4386_v32 = vmul.f32 %v18251_v42, %v22979_v52 }
 0x670   : > { %v18317_v40 = vsel %vm4613_vm12, %v18207_v18, %v11371_v53  ;;  %v11422_v60 = vadd.f32 -1.0, %v14419_v24  ;;  %v4336_v63 = vmul.f32 %v17951_v0, %v22980_v12  ;;  %v22981_v18 = vld [vmem:[#allocation91_spill] sm:$0xff]  ;;  %v4337_v56 = vmul.f32 %v18287_v50, %v22982_v15 }
 0x671   : > { %22978 = vst [vmem:[#allocation34_spill] sm:$0xff] %v18317_v40  ;;  %v5315_v57 = vrot.slane %v18317_v40, 7  ;;  %v4943_v27 = vmul.f32 1.442695, %v4763_v2  ;;  %v4387_v53 = vmul.f32 %v18251_v42, %v22981_v18  ;;  %v4713_v52 = vmin.f32 %v18323_v9, 0.0 }
 0x672   : > { %v14421_v1 = vpop.eup %14420  ;;  %v18336_v13 = vsel %vm4664_vm13, %v18223_v6, %v11422_v60  ;;  %vm4614_vm14 = vcmp.gt.f32.partialorder %v18233_v3, 0.0  ;;  %v18348_v6 = vadd.f32 %v18002_v25, %v4336_v63  ;;  %vm4665_vm15 = vcmp.gt.f32.partialorder %v18236_v58, 0.0 }
 0x673   : > { %v5316_v24 = vsel %vm600_vm0, %v5313_v43, %v5315_v57  ;;  %22983 = vst [vmem:[#allocation77_spill] sm:$0xff] %v18336_v13  ;;  %13190 = vmatmul.mubr.msk.f32.gmra.mrb[34].mxu1 %vm3431_vm3, %v18336_v13  ;;  %v11372_v0 = vadd.f32 -1.0, %v14421_v1  ;;  %14430 = vpow2.f32 %v4943_v27  ;;  %v4843_v12 = vmul.f32 1.442695, %v4713_v52 }
 0x674   : > { %12954 = vmatprep.mubr.msk.f32.mxu0 %vm3431_vm3, %v5316_v24  ;;  %v14423_v15 = vpop.eup %14422  ;;  %v18345_v43 = vadd.f32 %v18248_v17, %v4386_v32  ;;  %v18351_v60 = vadd.f32 %v18248_v17, %v4387_v53  ;;  %v18358_v1 = vadd.f32 %v18245_v14, %v4337_v56  ;;  %vm4615_vm1 = vcmp.gt.f32.partialorder %v18260_v5, 0.0  ;;  %v22987_v32 = vld [vmem:[#allocation90_spill] sm:$0xff] }
 0x675   : > { %v18355_v24 = vsel %vm4614_vm14, %v18233_v3, %v11372_v0  ;;  %v11423_v40 = vadd.f32 -1.0, %v14423_v15  ;;  %14432 = vpow2.f32 %v4843_v12  ;;  %v4714_v3 = vmin.f32 %v18348_v6, 0.0 }
 0x676   : > { %22984 = vst [vmem:[#allocation36_spill] sm:$0xff] %v18355_v24  ;;  %v14425_v27 = vpop.eup %14424  ;;  %v5317_v52 = vrot.slane %v18355_v24, 7  ;;  %v4764_v25 = vmin.f32 %v18345_v43, 0.0  ;;  %vm4666_vm11 = vcmp.gt.f32.partialorder %v18273_v59, 0.0  ;;  %v4388_v18 = vmul.f32 %v18251_v42, %v22987_v32 }
 0x677   : > { %v18365_v63 = vsel %vm4665_vm15, %v18236_v58, %v11423_v40  ;;  %v11373_v53 = vadd.f32 -1.0, %v14425_v27  ;;  %v4845_v27 = vmul.f32 1.442695, %v4714_v3  ;;  %v4765_v24 = vmin.f32 %v18351_v60, 0.0 }
 0x678   : > { %22985 = vst [vmem:[#allocation81_spill] sm:$0xff] %v18365_v63  ;;  %v14427_v0 = vpop.eup %14426  ;;  %v5318_v56 = vsel %vm600_vm0, %v5315_v57, %v5317_v52  ;;  %13192 = vmatprep.mubr.msk.f32.mxu1 %vm3431_vm3, %v18365_v63  ;;  %v4945_v15 = vmul.f32 1.442695, %v4764_v25  ;;  %vm4616_vm12 = vcmp.gt.f32.partialorder %v18279_v47, 0.0  ;;  %vm4667_vm13 = vcmp.gt.f32.partialorder %v18303_v23, 0.0 }
 0x679   : > { %v14429_v12 = vpop.eup %14428  ;;  %12955 = vmatmul.mubr.msk.f32.gmra.mrb[126].mxu0 %vm3431_vm3, %v5318_v56  ;;  %v18375_v58 = vsel %vm4615_vm1, %v18260_v5, %v11373_v53  ;;  %v11424_v40 = vadd.f32 -1.0, %v14427_v0  ;;  %v4715_v5 = vmin.f32 %v18358_v1, 0.0  ;;  %v4947_v56 = vmul.f32 1.442695, %v4765_v24  ;;  %v22991_v53 = vld [vmem:[#allocation93_spill] sm:$0xff] }
 0x67a   : > { %22986 = vst [vmem:[#allocation38_spill] sm:$0xff] %v18375_v58  ;;  %v5319_v57 = vrot.slane %v18375_v58, 7  ;;  %v11374_v2 = vadd.f32 -1.0, %v14429_v12  ;;  %14434 = vpow2.f32 %v4945_v15  ;;  %v18397_v12 = vadd.f32 %v18248_v17, %v4388_v18  ;;  %v22992_v58 = vld [vmem:[#allocation46_spill] sm:$0xff] }
 0x67b   : > { %v18382_v49 = vsel %vm4666_vm11, %v18273_v59, %v11424_v40  ;;  %14436 = vpow2.f32 %v4845_v27  ;;  %v4847_v15 = vmul.f32 1.442695, %v4715_v5  ;;  %v22990_v27 = vld [vmem:[#allocation43_spill] sm:$0xff]  ;;  %v4389_v25 = vmul.f32 %v18251_v42, %v22991_v53 }
 0x67c   : > { %22988 = vst [vmem:[#allocation80_spill] sm:$0xff] %v18382_v49  ;;  %v5320_v32 = vsel %vm600_vm0, %v5317_v52, %v5319_v57  ;;  %13193 = vmatmul.mubr.msk.f32.gmra.mrb[36].mxu1 %vm3431_vm3, %v18382_v49  ;;  %v18392_v3 = vsel %vm4616_vm12, %v18279_v47, %v11374_v2  ;;  %v4338_v52 = vmul.f32 %v18287_v50, %v22990_v27  ;;  %14438 = vpow2.f32 %v4947_v56 }
 0x67d   : > { %22989 = vst [vmem:[#allocation41_spill] sm:$0xff] %v18392_v3  ;;  %v14431_v0 = vpop.eup %14430  ;;  %12957 = vmatprep.mubr.msk.f32.mxu0 %vm3431_vm3, %v5320_v32  ;;  %v5321_v59 = vrot.slane %v18392_v3, 7  ;;  %v4339_v47 = vmul.f32 %v18287_v50, %v22992_v58  ;;  %v4766_v24 = vmin.f32 %v18397_v12, 0.0  ;;  %14440 = vpow2.f32 %v4847_v15  ;;  %v22995_v58 = vld [vmem:[#allocation92_spill] sm:$0xff] }
 0x67e   : > { %v11425_v40 = vadd.f32 -1.0, %v14431_v0  ;;  %v18413_v32 = vadd.f32 %v18245_v14, %v4338_v52  ;;  %v18416_v53 = vadd.f32 %v18248_v17, %v4389_v25  ;;  %vm4617_vm14 = vcmp.gt.f32.partialorder %v18323_v9, 0.0  ;;  %v7158_v25 = vld [vmem:[#allocation8 + $0x80] sm:$0xff] }
 0x67f   : > { %v5322_v2 = vsel %vm600_vm0, %v5319_v57, %v5321_v59  ;;  %v14433_v5 = vpop.eup %14432  ;;  %v4949_v0 = vmul.f32 1.442695, %v4766_v24  ;;  %v18422_v56 = vadd.f32 %v18245_v14, %v4339_v47  ;;  %vm4668_vm15 = vcmp.gt.f32.partialorder %v18345_v43, 0.0 }
 0x680   : > { %12958 = vmatmul.mubr.msk.f32.gmra.mrb[128].mxu0 %vm3431_vm3, %v5322_v2  ;;  %v18410_v18 = vsel %vm4667_vm13, %v18303_v23, %v11425_v40  ;;  %v11375_v57 = vadd.f32 -1.0, %v14433_v5  ;;  %v4716_v23 = vmin.f32 %v18413_v32, 0.0  ;;  %v4767_v15 = vmin.f32 %v18416_v53, 0.0  ;;  %v7159_v40 = vld [vmem:[#allocation8 + $0x88] sm:$0xff] }
 0x681   : > { %22993 = vst [vmem:[#allocation83_spill] sm:$0xff] %v18410_v18  ;;  %13195 = vmatprep.mubr.msk.f32.mxu1 %vm3431_vm3, %v18410_v18  ;;  %vm4618_vm1 = vcmp.gt.f32.partialorder %v18348_v6, 0.0  ;;  %14442 = vpow2.f32 %v4949_v0  ;;  %v4717_v52 = vmin.f32 %v18422_v56, 0.0  ;;  %v4390_v18 = vmul.f32 %v18251_v42, %v22995_v58 }
 0x682   : > { %v18429_v27 = vsel %vm4617_vm14, %v18323_v9, %v11375_v57  ;;  %v4849_v24 = vmul.f32 1.442695, %v4716_v23  ;;  %v4951_v5 = vmul.f32 1.442695, %v4767_v15  ;;  %v13419_v63 = vpack.c.bf16 %v7159_v40, %v7158_v25 }
 0x683   : > { %22994 = vst [vmem:[#allocation42_spill] sm:$0xff] %v18429_v27  ;;  %v5323_v2 = vrot.slane %v18429_v27, 7  ;;  %v4851_v49 = vmul.f32 1.442695, %v4717_v52  ;;  %v4340_v9 = vmul.f32 %v18287_v50, %v22996_v20  ;;  %v18440_v13 = vadd.f32 %v18248_v17, %v4390_v18  ;;  %v22997_v20 = vld [vmem:[#allocation95_spill] sm:$0xff] }
 0x684   : > { %v14435_v47 = vpop.eup %14434  ;;  %14444 = vpow2.f32 %v4849_v24  ;;  %13420 = vmatprep.subr.bf16.mxu1 %v13419_v63  ;;  %vm4669_vm11 = vcmp.gt.f32.partialorder %v18351_v60, 0.0  ;;  %vm4619_vm12 = vcmp.gt.f32.partialorder %v18358_v1, 0.0  ;;  %v7161_v18 = vld [vmem:[#allocation8 + $0x98] sm:$0xff]  ;;  %vm4670_vm13 = vcmp.gt.f32.partialorder %v18397_v12, 0.0 }
 0x685   : > { %v14437_v3 = vpop.eup %14436  ;;  %v11426_v44 = vadd.f32 -1.0, %v14435_v47  ;;  %v5324_v57 = vsel %vm600_vm0, %v5321_v59, %v5323_v2  ;;  %14446 = vpow2.f32 %v4951_v5  ;;  %v18449_v23 = vadd.f32 %v18245_v14, %v4340_v9  ;;  %13422 = vmatpush3.bf16.msra.mxu1 %v13419_v63 }
 0x686   : > { %v11376_v0 = vadd.f32 -1.0, %v14437_v3  ;;  %12960 = vmatprep.mubr.msk.f32.mxu0 %vm3431_vm3, %v5324_v57  ;;  %v4391_v59 = vmul.f32 %v18251_v42, %v22997_v20  ;;  %14448 = vpow2.f32 %v4851_v49  ;;  %v4768_v40 = vmin.f32 %v18440_v13, 0.0  ;;  %v23000_v20 = vld [vmem:[#allocation94_spill] sm:$0xff] }
 0x687   : > { %v18446_v58 = vsel %vm4668_vm15, %v18345_v43, %v11426_v44  ;;  %v14439_v43 = vpop.eup %14438  ;;  %v4718_v24 = vmin.f32 %v18449_v23, 0.0  ;;  %v4392_v15 = vmul.f32 %v18251_v42, %v23000_v20  ;;  %v7160_v3 = vld [vmem:[#allocation8 + $0x90] sm:$0xff]  ;;  %vm4620_vm14 = vcmp.gt.f32.partialorder %v18413_v32, 0.0 }
 0x688   : > { %13196 = vmatmul.mubr.msk.f32.gmra.mrb[38].mxu1 %vm3431_vm3, %v18446_v58  ;;  %v18460_v44 = vsel %vm4618_vm1, %v18348_v6, %v11376_v0  ;;  %v14441_v52 = vpop.eup %14440  ;;  %v11427_v47 = vadd.f32 -1.0, %v14439_v43  ;;  %v18468_v5 = vadd.f32 %v18248_v17, %v4391_v59  ;;  %v22999_v6 = vld [vmem:[#allocation50_spill] sm:$0xff]  ;;  %v4953_v0 = vmul.f32 1.442695, %v4768_v40 }
 0x689   : > { %22998 = vst [vmem:[#allocation85_spill] sm:$0xff] %v18460_v44  ;;  %v5325_v25 = vrot.slane %v18460_v44, 7  ;;  %v4341_v49 = vmul.f32 %v18287_v50, %v22999_v6  ;;  %v11377_v57 = vadd.f32 -1.0, %v14441_v52  ;;  %v4853_v43 = vmul.f32 1.442695, %v4718_v24  ;;  %v23002_v20 = vld [vmem:[#allocation54_spill] sm:$0xff] }
 0x68a   : > { %v18477_v63 = vsel %vm4669_vm11, %v18351_v60, %v11427_v47  ;;  %v4769_v59 = vmin.f32 %v18468_v5, 0.0  ;;  %14450 = vpow2.f32 %v4953_v0  ;;  %v18493_v24 = vadd.f32 %v18248_v17, %v4392_v15  ;;  %v23008_v44 = vld [vmem:[#allocation96_spill] sm:$0xff] }
 0x68b   : > { %v5326_v9 = vsel %vm600_vm0, %v5323_v2, %v5325_v25  ;;  %v14443_v6 = vpop.eup %14442  ;;  %13198 = vmatprep.mubr.msk.f32.mxu1 %vm3431_vm3, %v18477_v63  ;;  %v18485_v25 = vsel %vm4619_vm12, %v18358_v1, %v11377_v57  ;;  %14452 = vpow2.f32 %v4853_v43  ;;  %v18490_v47 = vadd.f32 %v18245_v14, %v4341_v49 }
 0x68c   : > { %12961 = vmatmul.mubr.msk.f32.gmra.mrb[130].mxu0 %vm3431_vm3, %v5326_v9  ;;  %23001 = vst [vmem:[#allocation45_spill] sm:$0xff] %v18485_v25  ;;  %v5327_v60 = vrot.slane %v18485_v25, 7  ;;  %v11428_v40 = vadd.f32 -1.0, %v14443_v6  ;;  %v4955_v52 = vmul.f32 1.442695, %v4769_v59  ;;  %v13423_v9 = vpack.c.bf16 %v7161_v18, %v7160_v3  ;;  %v23003_v6 = vld [vmem:[#allocation97_spill] sm:$0xff] }
 0x68d   : > { %v4342_v2 = vmul.f32 %v18287_v50, %v23002_v20  ;;  %v4393_v43 = vmul.f32 %v18251_v42, %v23003_v6  ;;  %vm4671_vm15 = vcmp.gt.f32.partialorder %v18416_v53, 0.0  ;;  %vm4621_vm1 = vcmp.gt.f32.partialorder %v18422_v56, 0.0 }
 0x68e   : > { %v14445_v1 = vpop.eup %14444  ;;  %v5453_v57 = vsel %vm600_vm0, 0.0, %v5327_v60  ;;  %v18499_v0 = vsel %vm4670_vm13, %v18397_v12, %v11428_v40  ;;  %14454 = vpow2.f32 %v4955_v52  ;;  %v4719_v15 = vmin.f32 %v18490_v47, 0.0  ;;  %13424 = vmatprep.subr.bf16.mxu1 %v13423_v9 }
 0x68f   : > { %v14447_v59 = vpop.eup %14446  ;;  %12963 = vmatprep.mubr.msk.f32.mxu0 %vm3431_vm3, %v5453_v57  ;;  %13199 = vmatmul.mubr.msk.f32.gmra.mrb[40].mxu1 %vm3431_vm3, %v18499_v0  ;;  %v11378_v3 = vadd.f32 -1.0, %v14445_v1  ;;  %v4770_v40 = vmin.f32 %v18493_v24, 0.0  ;;  %v18516_v57 = vadd.f32 %v18245_v14, %v4342_v2  ;;  %v18519_v1 = vadd.f32 %v18248_v17, %v4393_v43 }
 0x690   : > { %v14449_v18 = vpop.eup %14448  ;;  %v11429_v12 = vadd.f32 -1.0, %v14447_v59  ;;  %13426 = vmatpush3.bf16.msra.mxu1 %v13423_v9  ;;  %v4855_v49 = vmul.f32 1.442695, %v4719_v15  ;;  %vm4672_vm11 = vcmp.gt.f32.partialorder %v18440_v13, 0.0  ;;  %vm4622_vm12 = vcmp.gt.f32.partialorder %v18449_v23, 0.0  ;;  %v23007_v15 = vld [vmem:[#allocation55_spill] sm:$0xff] }
 0x691   : > { %v18513_v52 = vsel %vm4620_vm14, %v18413_v32, %v11378_v3  ;;  %v11379_v20 = vadd.f32 -1.0, %v14449_v18  ;;  %v4957_v25 = vmul.f32 1.442695, %v4770_v40  ;;  %v4720_v43 = vmin.f32 %v18516_v57, 0.0  ;;  %v7162_v3 = vld [vmem:[#allocation8 + $0xa0] sm:$0xff]  ;;  %v7163_v18 = vld [vmem:[#allocation8 + $0xa8] sm:$0xff] }
 0x692   : > { %23004 = vst [vmem:[#allocation86_spill] sm:$0xff] %v18513_v52  ;;  %v5328_v6 = vrot.slane %v18513_v52, 7  ;;  %v18523_v59 = vsel %vm4671_vm15, %v18416_v53, %v11429_v12  ;;  %14456 = vpow2.f32 %v4855_v49  ;;  %v4343_v40 = vmul.f32 %v18287_v50, %v23007_v15 }
 0x693   : > { %23005 = vst [vmem:[#allocation48_spill] sm:$0xff] %v18523_v59  ;;  %13201 = vmatprep.mubr.msk.f32.mxu1 %vm3431_vm3, %v18523_v59  ;;  %v18532_v2 = vsel %vm4621_vm1, %v18422_v56, %v11379_v20  ;;  %14458 = vpow2.f32 %v4957_v25  ;;  %v4771_v56 = vmin.f32 %v18519_v1, 0.0  ;;  %v4857_v49 = vmul.f32 1.442695, %v4720_v43  ;;  %v23009_v43 = vld [vmem:[#allocation58_spill] sm:$0xff] }
 0x694   : > { %23006 = vst [vmem:[#allocation89_spill] sm:$0xff] %v18532_v2  ;;  %v5329_v9 = vsel %vm600_vm0, %v5327_v60, %v5328_v6  ;;  %v5330_v53 = vrot.slane %v18532_v2, 7  ;;  %v14451_v12 = vpop.eup %14450  ;;  %v4394_v2 = vmul.f32 %v18251_v42, %v23008_v44  ;;  %v18548_v27 = vadd.f32 %v18245_v14, %v4343_v40 }
 0x695   : > { %12964 = vmatmul.mubr.msk.f32.gmra.mrb[132].mxu0 %vm3431_vm3, %v5329_v9  ;;  %v14453_v20 = vpop.eup %14452  ;;  %v11430_v32 = vadd.f32 -1.0, %v14451_v12  ;;  %v4959_v9 = vmul.f32 1.442695, %v4771_v56  ;;  %v13427_v25 = vpack.c.bf16 %v7163_v18, %v7162_v3  ;;  %14460 = vpow2.f32 %v4857_v49 }
 0x696   : > { %v5331_v60 = vsel %vm600_vm0, %v5328_v6, %v5330_v53  ;;  %v11380_v52 = vadd.f32 -1.0, %v14453_v20  ;;  %v18556_v6 = vadd.f32 %v18248_v17, %v4394_v2  ;;  %v4344_v44 = vmul.f32 %v18287_v50, %v23009_v43 }
 0x697   : > { %12966 = vmatprep.mubr.msk.f32.mxu0 %vm3431_vm3, %v5331_v60  ;;  %v18553_v15 = vsel %vm4672_vm11, %v18440_v13, %v11430_v32  ;;  %13428 = vmatprep.subr.bf16.mxu1 %v13427_v25  ;;  %vm4673_vm13 = vcmp.gt.f32.partialorder %v18468_v5, 0.0  ;;  %14462 = vpow2.f32 %v4959_v9  ;;  %v4721_v2 = vmin.f32 %v18548_v27, 0.0  ;;  %v23013_v60 = vld [vmem:[#allocation59_spill] sm:$0xff] }
 0x698   : > { %v14455_v59 = vpop.eup %14454  ;;  %13202 = vmatmul.mubr.msk.f32.gmra.mrb[42].mxu1 %vm3431_vm3, %v18553_v15  ;;  %v18567_v3 = vsel %vm4622_vm12, %v18449_v23, %v11380_v52  ;;  %v4772_v20 = vmin.f32 %v18556_v6, 0.0  ;;  %v18578_v23 = vadd.f32 %v18245_v14, %v4344_v44  ;;  %v7164_v52 = vld [vmem:[#allocation8 + $0xb0] sm:$0xff]  ;;  %vm4623_vm14 = vcmp.gt.f32.partialorder %v18490_v47, 0.0  ;;  %v23012_v44 = vld [vmem:[#allocation99_spill] sm:$0xff] }
 0x699   : > { %23010 = vst [vmem:[#allocation47_spill] sm:$0xff] %v18567_v3  ;;  %v11431_v13 = vadd.f32 -1.0, %v14455_v59  ;;  %v5332_v32 = vrot.slane %v18567_v3, 7  ;;  %13430 = vmatpush3.bf16.msra.mxu1 %v13427_v25  ;;  %v7165_v59 = vld [vmem:[#allocation8 + $0xb8] sm:$0xff]  ;;  %v4859_v25 = vmul.f32 1.442695, %v4721_v2  ;;  %v4345_v18 = vmul.f32 %v18287_v50, %v23013_v60 }
 0x69a   : > { %v4722_v43 = vmin.f32 %v18578_v23, 0.0  ;;  %v13431_v12 = vpack.c.bf16 %v7165_v59, %v7164_v52  ;;  %vm4674_vm15 = vcmp.gt.f32.partialorder %v18493_v24, 0.0  ;;  %v23016_v52 = vld [vmem:[#allocation61_spill] sm:$0xff]  ;;  %vm4624_vm1 = vcmp.gt.f32.partialorder %v18516_v57, 0.0 }
 0x69b   : > { %v18574_v40 = vsel %vm4673_vm13, %v18468_v5, %v11431_v13  ;;  %v5333_v9 = vsel %vm600_vm0, %v5330_v53, %v5332_v32  ;;  %v4961_v5 = vmul.f32 1.442695, %v4772_v20  ;;  %v4395_v13 = vmul.f32 %v18251_v42, %v23012_v44  ;;  %v23014_v53 = vld [vmem:[#allocation98_spill] sm:$0xff] }
 0x69c   : > { %23011 = vst [vmem:[#allocation88_spill] sm:$0xff] %v18574_v40  ;;  %13204 = vmatprep.mubr.msk.f32.mxu1 %vm3431_vm3, %v18574_v40  ;;  %12967 = vmatmul.mubr.msk.f32.gmra.mrb[134].mxu0 %vm3431_vm3, %v5333_v9  ;;  %v14457_v56 = vpop.eup %14456  ;;  %14464 = vpow2.f32 %v4859_v25  ;;  %v4396_v49 = vmul.f32 %v18251_v42, %v23014_v53  ;;  %v4861_v9 = vmul.f32 1.442695, %v4722_v43  ;;  %v18599_v44 = vadd.f32 %v18245_v14, %v4345_v18 }
 0x69d   : > { %v14459_v2 = vpop.eup %14458  ;;  %v11381_v3 = vadd.f32 -1.0, %v14457_v56  ;;  %14466 = vpow2.f32 %v4961_v5  ;;  %v18595_v20 = vadd.f32 %v18248_v17, %v4395_v13  ;;  %13432 = vmatprep.subr.bf16.mxu1 %v13431_v12  ;;  %v4346_v59 = vmul.f32 %v18287_v50, %v23016_v52 }
 0x69e   : > { %v11432_v40 = vadd.f32 -1.0, %v14459_v2  ;;  %v18602_v25 = vadd.f32 %v18248_v17, %v4396_v49  ;;  %14468 = vpow2.f32 %v4861_v9  ;;  %13434 = vmatpush3.bf16.msra.mxu1 %v13431_v12  ;;  %v4723_v49 = vmin.f32 %v18599_v44, 0.0 }
 0x69f   : > { %v18607_v42 = vsel %vm4623_vm14, %v18490_v47, %v11381_v3  ;;  %v4773_v56 = vmin.f32 %v18595_v20, 0.0  ;;  %v14461_v60 = vpop.eup %14460  ;;  %v18630_v52 = vadd.f32 %v18245_v14, %v4346_v59  ;;  %vm4675_vm11 = vcmp.gt.f32.partialorder %v18519_v1, 0.0 }
 0x6a0   : > { %23015 = vst [vmem:[#allocation53_spill] sm:$0xff] %v18607_v42  ;;  %v5334_v5 = vrot.slane %v18607_v42, 7  ;;  %v18615_v17 = vsel %vm4674_vm15, %v18493_v24, %v11432_v40  ;;  %v11382_v43 = vadd.f32 -1.0, %v14461_v60  ;;  %v4863_v2 = vmul.f32 1.442695, %v4723_v49  ;;  %v23019_v49 = vld [vmem:[#allocation63_spill] sm:$0xff] }
 0x6a1   : > { %23017 = vst [vmem:[#allocation87_spill] sm:$0xff] %v18615_v17  ;;  %13205 = vmatmul.mubr.msk.f32.gmra.mrb[44].mxu1 %vm3431_vm3, %v18615_v17  ;;  %v4963_v13 = vmul.f32 1.442695, %v4773_v56  ;;  %v14463_v12 = vpop.eup %14462  ;;  %v4774_v24 = vmin.f32 %v18602_v25, 0.0  ;;  %v4347_v3 = vmul.f32 %v18287_v50, %v23019_v49  ;;  %vm4625_vm12 = vcmp.gt.f32.partialorder %v18548_v27, 0.0 }
 0x6a2   : > { %v5335_v53 = vsel %vm600_vm0, %v5332_v32, %v5334_v5  ;;  %v18627_v40 = vsel %vm4624_vm1, %v18516_v57, %v11382_v43  ;;  %v11433_v9 = vadd.f32 -1.0, %v14463_v12  ;;  %v4724_v57 = vmin.f32 %v18630_v52, 0.0 }
 0x6a3   : > { %12969 = vmatprep.mubr.msk.f32.mxu0 %vm3431_vm3, %v5335_v53  ;;  %23018 = vst [vmem:[#allocation56_spill] sm:$0xff] %v18627_v40  ;;  %14470 = vpow2.f32 %v4963_v13  ;;  %v5336_v56 = vrot.slane %v18627_v40, 7  ;;  %v4965_v32 = vmul.f32 1.442695, %v4774_v24  ;;  %vm4676_vm13 = vcmp.gt.f32.partialorder %v18556_v6, 0.0 }
 0x6a4   : > { %14472 = vpow2.f32 %v4863_v2  ;;  %v18637_v53 = vsel %vm4675_vm11, %v18519_v1, %v11433_v9  ;;  %v4865_v9 = vmul.f32 1.442695, %v4724_v57  ;;  %v23022_v57 = vld [vmem:[#allocation52_spill] sm:$0xff]  ;;  %vm4626_vm14 = vcmp.gt.f32.partialorder %v18578_v23, 0.0 }
 0x6a5   : > { %v5337_v12 = vsel %vm600_vm0, %v5334_v5, %v5336_v56  ;;  %13207 = vmatprep.mubr.msk.f32.mxu1 %vm3431_vm3, %v18637_v53  ;;  %14474 = vpow2.f32 %v4965_v32  ;;  %v23020_v5 = vld [vmem:[#allocation64_spill] sm:$0xff]  ;;  %vm4677_vm15 = vcmp.gt.f32.partialorder %v18595_v20, 0.0  ;;  %vm4627_vm1 = vcmp.gt.f32.partialorder %v18599_v44, 0.0 }
 0x6a6   : > { %v14465_v43 = vpop.eup %14464  ;;  %12970 = vmatmul.mubr.msk.f32.gmra.mrb[136].mxu0 %vm3431_vm3, %v5337_v12  ;;  %v4348_v18 = vmul.f32 %v18287_v50, %v23020_v5  ;;  %14476 = vpow2.f32 %v4865_v9  ;;  %v18657_v12 = vadd.f32 %v18245_v14, %v4347_v3  ;;  %vm4678_vm11 = vcmp.gt.f32.partialorder %v18602_v25, 0.0 }
 0x6a7   : > { %v14467_v2 = vpop.eup %14466  ;;  %v11383_v1 = vadd.f32 -1.0, %v14465_v43  ;;  %v4349_v43 = vmul.f32 %v17381_v8, %v23022_v57 }
 0x6a8   : > { %v11434_v59 = vadd.f32 -1.0, %v14467_v2  ;;  %v14469_v13 = vpop.eup %14468  ;;  %v18666_v60 = vadd.f32 %v18245_v14, %v4348_v18  ;;  %v4725_v3 = vmin.f32 %v18657_v12, 0.0 }
 0x6a9   : > { %v18654_v32 = vsel %vm4625_vm12, %v18548_v27, %v11383_v1  ;;  %v11384_v2 = vadd.f32 -1.0, %v14469_v13  ;;  %v18684_v5 = vadd.f32 %v17377_v61, %v4349_v43  ;;  %vm4628_vm12 = vcmp.gt.f32.partialorder %v18630_v52, 0.0 }
 0x6aa   : > { %23021 = vst [vmem:[#allocation91_spill] sm:$0xff] %v18654_v32  ;;  %v5338_v49 = vrot.slane %v18654_v32, 7  ;;  %v18663_v24 = vsel %vm4676_vm13, %v18556_v6, %v11434_v59  ;;  %v4726_v14 = vmin.f32 %v18666_v60, 0.0  ;;  %v4867_v9 = vmul.f32 1.442695, %v4725_v3 }
 0x6ab   : > { %13208 = vmatmul.mubr.msk.f32.gmra.mrb[46].mxu1 %vm3431_vm3, %v18663_v24  ;;  %v18677_v13 = vsel %vm4626_vm14, %v18578_v23, %v11384_v2  ;;  %v23024_v23 = vld [vmem:[#allocation51_spill] sm:$0xff]  ;;  %v5459_v3 = vrot.slane %v17507_v62, 1  ;;  %vm4629_vm13 = vcmp.gt.f32.partialorder %v18657_v12, 0.0  ;;  %vm4630_vm14 = vcmp.gt.f32.partialorder %v18666_v60, 0.0 }
 0x6ac   : > { %v5339_v6 = vsel %vm600_vm0, %v5336_v56, %v5338_v49  ;;  %23023 = vst [vmem:[#allocation44_spill] sm:$0xff] %v18677_v13  ;;  %v5340_v59 = vrot.slane %v18677_v13, 7  ;;  %v4869_v56 = vmul.f32 1.442695, %v4726_v14  ;;  %v4350_v2 = vmul.f32 %v17381_v8, %v23024_v23 }
 0x6ad   : > { %v14471_v18 = vpop.eup %14470  ;;  %12972 = vmatprep.mubr.msk.f32.mxu0 %vm3431_vm3, %v5339_v6  ;;  %v5458_v6 = vrot.slane %v17492_v51, 1  ;;  %14478 = vpow2.f32 %v4867_v9  ;;  %v4727_v14 = vmin.f32 %v18684_v5, 0.0  ;;  %v23032_v8 = vrot.slane %v17517_v16, 7  ;;  %v23050_v51 = vld [vmem:[#allocation73_spill] sm:$0xff] }
 0x6ae   : > { %v14473_v57 = vpop.eup %14472  ;;  %v11435_v1 = vadd.f32 -1.0, %v14471_v18  ;;  %v5341_v50 = vsel %vm600_vm0, %v5338_v49, %v5340_v59  ;;  %14480 = vpow2.f32 %v4869_v56  ;;  %v18709_v9 = vadd.f32 %v17377_v61, %v4350_v2 }
 0x6af   : > { %v11385_v27 = vadd.f32 -1.0, %v14473_v57  ;;  %v14475_v47 = vpop.eup %14474  ;;  %12973 = vmatmul.mubr.msk.f32.gmra.mrb[138].mxu0 %vm3431_vm3, %v5341_v50  ;;  %v5463_v61 = vrot.slane %v17545_v41, 1  ;;  %v23028_v2 = vrot.slane %v17528_v30, 1  ;;  %v23033_v56 = vrot.slane %v17562_v35, 7 }
 0x6b0   : > { %v18693_v43 = vsel %vm4677_vm15, %v18595_v20, %v11435_v1  ;;  %v11436_v50 = vadd.f32 -1.0, %v14475_v47  ;;  %v4871_v1 = vmul.f32 1.442695, %v4727_v14  ;;  %v14477_v57 = vpop.eup %14476  ;;  %vm4631_vm15 = vcmp.gt.f32.partialorder %v18684_v5, 0.0 }
 0x6b1   : > { %13210 = vmatprep.mubr.msk.f32.mxu1 %vm3431_vm3, %v18693_v43  ;;  %v18704_v49 = vsel %vm4627_vm1, %v18599_v44, %v11385_v27  ;;  %v11386_v47 = vadd.f32 -1.0, %v14477_v57  ;;  %v5460_v27 = vsel %vm801_vm2, %v5458_v6, %v5459_v3  ;;  %v5465_v6 = vrot.slane %v17571_v31, 1 }
 0x6b2   : > { %23025 = vst [vmem:[#allocation90_spill] sm:$0xff] %v18704_v49  ;;  %v5342_v20 = vrot.slane %v18704_v49, 7  ;;  %v18715_v18 = vsel %vm4678_vm11, %v18602_v25, %v11436_v50  ;;  %14482 = vpow2.f32 %v4871_v1  ;;  %v4728_v25 = vmin.f32 %v18709_v9, 0.0 }
 0x6b3   : > { %23026 = vst [vmem:[#allocation43_spill] sm:$0xff] %v18715_v18  ;;  %13211 = vmatmul.mubr.msk.f32.gmra.mrb[48].mxu1 %vm3431_vm3, %v18715_v18  ;;  %v18730_v50 = vsel %vm4628_vm12, %v18630_v52, %v11386_v47  ;;  %v23029_v23 = vmov %v23028_v2  ;;  %v23031_v47 = vrot.slane %v17534_v55, 7  ;;  %vm4632_vm1 = vcmp.gt.f32.partialorder %v18709_v9, 0.0 }
 0x6b4   : > { %v5343_v44 = vsel %vm600_vm0, %v5340_v59, %v5342_v20  ;;  %13229 = vmatprep.mubr.msk.f32.mxu1 %vm3431_vm3, %v5460_v27  ;;  %23027 = vst [vmem:[#allocation93_spill] sm:$0xff] %v18730_v50  ;;  %v5462_v27 = vsel %vm801_vm2, %v5459_v3, %v23028_v2  ;;  %v4873_v1 = vmul.f32 1.442695, %v4728_v25  ;;  %v5464_v14 = vsel %vm801_vm2, %v23029_v23, %v5463_v61  ;;  %v23030_v59 = vld [vmem:[#allocation108_spill] sm:$0xff] }
 0x6b5   : > { %12975 = vmatprep.mubr.msk.f32.mxu0 %vm3431_vm3, %v5343_v44  ;;  %v5344_v44 = vrot.slane %v18730_v50, 7  ;;  %v5467_v52 = vrot.slane %v23030_v59, 1  ;;  %v18748_v57 = vsel %vm600_vm0, %v23032_v8, %v23031_v47  ;;  %v23034_v3 = vmov %v23031_v47 }
 0x6b6   : > { %v18755_v2 = vsel %vm600_vm0, %v23034_v3, %v23033_v56  ;;  %14484 = vpow2.f32 %v4873_v1  ;;  %v23035_v59 = vrot.slane %v17581_v33, 7  ;;  %v23036_v8 = vmov %v23033_v56 }
 0x6b7   : > { %13230 = vmatmul.mubr.msk.f32.vlgmr.msra.gmra.mrb[50].mxu1 %vm3431_vm3, %v5462_v27  ;;  %v14479_v25 = vpop.eup %14478  ;;  %v5345_v23 = vsel %vm600_vm0, %v5342_v20, %v5344_v44  ;;  %v5466_v20 = vsel %vm801_vm2, %v5463_v61, %v5465_v6  ;;  %v23038_v27 = vrot.slane %v17598_v38, 7  ;;  %v23043_v61 = vld [vmem:[#allocation27_spill] sm:$0xff] }
 0x6b8   : > { %13232 = vmatprep.mubr.msk.f32.mxu1 %vm3431_vm3, %v5464_v14  ;;  %v18765_v47 = vsel %vm600_vm0, %v23036_v8, %v23035_v59  ;;  %v14481_v31 = vpop.eup %14480  ;;  %12976 = vmatmul.mubr.msk.f32.gmra.mrb[140].mxu0 %vm3431_vm3, %v5345_v23  ;;  %v11387_v56 = vadd.f32 -1.0, %v14479_v25  ;;  %v23037_v14 = vld [vmem:[#allocation109_spill] sm:$0xff]  ;;  %v23039_v30 = vmov %v23035_v59  ;;  %v23040_v8 = vrot.slane %v17674_v34, 7 }
 0x6b9   : > { %v11388_v3 = vadd.f32 -1.0, %v14481_v31  ;;  %v5469_v1 = vrot.slane %v23037_v14, 1  ;;  %v18777_v59 = vsel %vm600_vm0, %v23039_v30, %v23038_v27  ;;  %v23041_v41 = vmov %v23038_v27 }
 0x6ba   : > { %v18784_v23 = vsel %vm600_vm0, %v23041_v41, %v23040_v8  ;;  %v18787_v25 = vsel %vm4629_vm13, %v18657_v12, %v11387_v56  ;;  %v5468_v31 = vsel %vm801_vm2, %v5465_v6, %v5467_v52  ;;  %v5471_v14 = vrot.slane %v23043_v61, 1 }
 0x6bb   : > { %23042 = vst [vmem:[#allocation46_spill] sm:$0xff] %v18787_v25  ;;  %13233 = vmatmul.mubr.msk.f32.gmra.mrb[52].mxu1 %vm3431_vm3, %v5466_v20  ;;  %v5346_v27 = vrot.slane %v18787_v25, 7  ;;  %v18796_v62 = vsel %vm4630_vm14, %v18666_v60, %v11388_v3  ;;  %v23045_v41 = vrot.slane %v17716_v28, 7  ;;  %v23046_v12 = vmov %v23040_v8  ;;  %v23047_v20 = vld [vmem:[#allocation84_spill] sm:$0xff] }
 0x6bc   : > { %23044 = vst [vmem:[#allocation92_spill] sm:$0xff] %v18796_v62  ;;  %13235 = vmatprep.mubr.msk.f32.mxu1 %vm3431_vm3, %v5468_v31  ;;  %v5348_v30 = vrot.slane %v18796_v62, 7  ;;  %v23048_v61 = vrot.slane %v17738_v48, 7  ;;  %v14483_v31 = vpop.eup %14482  ;;  %v5472_v49 = vsel %vm801_vm2, %v5469_v1, %v5471_v14  ;;  %v23053_v25 = vld [vmem:[#allocation72_spill] sm:$0xff] }
 0x6bd   : > { %v18804_v56 = vsel %vm600_vm0, %v23046_v12, %v23045_v41  ;;  %v23049_v60 = vmov %v23045_v41  ;;  %v5347_v50 = vsel %vm600_vm0, %v5344_v44, %v5346_v27  ;;  %v5470_v41 = vsel %vm801_vm2, %v5467_v52, %v5469_v1  ;;  %v23051_v12 = vld [vmem:[#allocation65_spill] sm:$0xff] }
 0x6be   : > { %v18814_v3 = vsel %vm600_vm0, %v23049_v60, %v23048_v61  ;;  %v5473_v6 = vrot.slane %v23051_v12, 1  ;;  %12978 = vmatprep.mubr.msk.f32.mxu0 %vm3431_vm3, %v5347_v50  ;;  %v5349_v8 = vsel %vm600_vm0, %v5346_v27, %v5348_v30  ;;  %v11389_v62 = vadd.f32 -1.0, %v14483_v31  ;;  %v23052_v61 = vld [vmem:[#allocation30_spill] sm:$0xff]  ;;  %v23056_v30 = vld [vmem:[#allocation75_spill] sm:$0xff] }
 0x6bf   : > { %13236 = vmatmul.mubr.msk.f32.gmra.mrb[54].mxu1 %vm3431_vm3, %v5470_v41  ;;  %v5475_v60 = vrot.slane %v23052_v61, 1  ;;  %12979 = vmatmul.mubr.msk.f32.gmra.mrb[142].mxu0 %vm3431_vm3, %v5349_v8  ;;  %v23054_v50 = vrot.slane %v17801_v39, 7  ;;  %v23055_v44 = vrot.slane %v17773_v29, 7  ;;  %v23058_v8 = vrot.slane %v17826_v37, 7 }
 0x6c0   : > { %13238 = vmatprep.mubr.msk.f32.mxu1 %vm3431_vm3, %v5472_v49  ;;  %v18840_v31 = vsel %vm4631_vm15, %v18684_v5, %v11389_v62  ;;  %v14485_v13 = vpop.eup %14484  ;;  %v23062_v1 = vrot.slane %v17859_v10, 7 }
 0x6c1   : > { %v18835_v52 = vsel %vm600_vm0, %v23055_v44, %v23054_v50  ;;  %23057 = vst [vmem:[#allocation49_spill] sm:$0xff] %v18840_v31  ;;  %v23059_v41 = vmov %v23054_v50  ;;  %v5350_v32 = vrot.slane %v18840_v31, 7  ;;  %v5474_v50 = vsel %vm801_vm2, %v5471_v14, %v5473_v6  ;;  %v23061_v44 = vld [vmem:[#allocation60_spill] sm:$0xff] }
 0x6c2   : > { %v18847_v49 = vsel %vm600_vm0, %v23059_v41, %v23058_v8  ;;  %v5477_v61 = vrot.slane %v23061_v44, 1  ;;  %v23063_v27 = vmov %v23058_v8  ;;  %v11390_v5 = vadd.f32 -1.0, %v14485_v13  ;;  %v23065_v41 = vld [vmem:[#allocation67_spill] sm:$0xff] }
 0x6c3   : > { %23060 = vst [vmem:[#allocation95_spill] sm:$0xff] %v18847_v49  ;;  %v18857_v62 = vsel %vm600_vm0, %v23063_v27, %v23062_v1  ;;  %13239 = vmatmul.mubr.msk.f32.gmra.mrb[56].mxu1 %vm3431_vm3, %v5474_v50  ;;  %v5476_v8 = vsel %vm801_vm2, %v5473_v6, %v5475_v60  ;;  %v5479_v12 = vrot.slane %v23065_v41, 1  ;;  %v23066_v31 = vrot.slane %v17889_v19, 7 }
 0x6c4   : > { %23064 = vst [vmem:[#allocation50_spill] sm:$0xff] %v18857_v62  ;;  %v23067_v14 = vmov %v23062_v1  ;;  %v5454_v42 = vsel %vm600_vm0, 0.0, %v5350_v32  ;;  %13241 = vmatprep.mubr.msk.f32.mxu1 %vm3431_vm3, %v5476_v8  ;;  %v23069_v13 = vrot.slane %v17919_v22, 7  ;;  %v5409_v27 = vrot.slane %v18276_v21, 7  ;;  %v23089_v62 = vld [vmem:[#allocation101_spill] sm:$0xff]  ;;  %v23103_v21 = vld [vmem:[#allocation80_spill] sm:$0xff] }
 0x6c5   : > { %v18867_v44 = vsel %vm600_vm0, %v23067_v14, %v23066_v31  ;;  %v23070_v6 = vmov %v23066_v31  ;;  %12981 = vmatprep.mubr.msk.f32.mxu0 %vm3431_vm3, %v5454_v42  ;;  %v18884_v50 = vsel %vm4632_vm1, %v18709_v9, %v11390_v5  ;;  %v23073_v14 = vrot.slane %v17938_v11, 7 }
 0x6c6   : > { %23068 = vst [vmem:[#allocation94_spill] sm:$0xff] %v18867_v44  ;;  %v18878_v1 = vsel %vm600_vm0, %v23070_v6, %v23069_v13  ;;  %23072 = vst [vmem:[#allocation97_spill] sm:$0xff] %v18884_v50  ;;  %v23074_v8 = vmov %v23069_v13  ;;  %v5351_v41 = vrot.slane %v18884_v50, 7  ;;  %v5478_v13 = vsel %vm801_vm2, %v5475_v60, %v5477_v61  ;;  %v23083_v50 = vld [vmem:[#allocation68_spill] sm:$0xff] }
 0x6c7   : > { %23071 = vst [vmem:[#allocation54_spill] sm:$0xff] %v18878_v1  ;;  %v18891_v40 = vsel %vm600_vm0, %v23074_v8, %v23073_v14  ;;  %v23076_v6 = vrot.slane %v17983_v4, 7  ;;  %v23077_v31 = vmov %v23073_v14  ;;  %v23079_v9 = vrot.slane %v17997_v7, 7  ;;  %13242 = vmatmul.mubr.msk.f32.gmra.mrb[58].mxu1 %vm3431_vm3, %v5478_v13  ;;  %v23082_v8 = vld [vmem:[#allocation57_spill] sm:$0xff]  ;;  %v23087_v13 = vld [vmem:[#allocation103_spill] sm:$0xff] }
 0x6c8   : > { %23075 = vst [vmem:[#allocation55_spill] sm:$0xff] %v18891_v40  ;;  %v5480_v14 = vsel %vm801_vm2, %v5477_v61, %v5479_v12  ;;  %v5481_v60 = vrot.slane %v23082_v8, 1  ;;  %v5482_v40 = vrot.slane %v23083_v50, 1  ;;  %v23084_v44 = vrot.slane %v18035_v26, 7  ;;  %v23088_v61 = vld [vmem:[#allocation77_spill] sm:$0xff]  ;;  %v23095_v50 = vld [vmem:[#allocation62_spill] sm:$0xff] }
 0x6c9   : > { %v18900_v42 = vsel %vm600_vm0, %v23077_v31, %v23076_v6  ;;  %v23080_v5 = vmov %v23076_v6  ;;  %v23085_v31 = vmov %v23079_v9  ;;  %13244 = vmatprep.mubr.msk.f32.mxu1 %vm3431_vm3, %v5480_v14  ;;  %v5413_v8 = vrot.slane %v23088_v61, 7 }
 0x6ca   : > { %23078 = vst [vmem:[#allocation96_spill] sm:$0xff] %v18900_v42  ;;  %v18907_v1 = vsel %vm600_vm0, %v23080_v5, %v23079_v9  ;;  %v18918_v6 = vsel %vm600_vm0, %v23085_v31, %v23084_v44  ;;  %v5411_v42 = vrot.slane %v18306_v36, 7  ;;  %v5352_v5 = vsel %vm600_vm0, %v5350_v32, %v5351_v41 }
 0x6cb   : > { %23081 = vst [vmem:[#allocation58_spill] sm:$0xff] %v18907_v1  ;;  %23086 = vst [vmem:[#allocation99_spill] sm:$0xff] %v18918_v6  ;;  %v5355_v1 = vrot.slane %v23087_v13, 7  ;;  %12982 = vmatmul.mubr.msk.f32.gmra.mrb[144].mxu0 %vm3431_vm3, %v5352_v5  ;;  %v23090_v49 = vrot.slane %v23089_v62, 7  ;;  %v23091_v31 = vrot.slane %v18054_v46, 7  ;;  %v23092_v9 = vrot.slane %v18035_v26, 7 }
 0x6cc   : > { %v23094_v13 = vld [vmem:[#allocation81_spill] sm:$0xff]  ;;  %v5650_v14 = vsel %vm801_vm2, %v5479_v12, 0.0  ;;  %v5484_v61 = vrot.slane %v23095_v50, 1  ;;  %v23096_v5 = vrot.slane %v18134_v45, 7  ;;  %v23097_v36 = vrot.slane %v18114_v54, 7 }
 0x6cd   : > { %v5354_v44 = vsel %vm600_vm0, %v5351_v41, %v23090_v49  ;;  %v18936_v32 = vsel %vm600_vm0, %v23092_v9, %v23091_v31  ;;  %v5415_v6 = vrot.slane %v23094_v13, 7  ;;  %13245 = vmatmul.mubr.msk.f32.gmra.mrb[60].mxu1 %vm3431_vm3, %v5650_v14  ;;  %v5483_v9 = vsel %vm801_vm2, %v5481_v60, %v5482_v40  ;;  %v23099_v31 = vld [vmem:[#allocation69_spill] sm:$0xff] }
 0x6ce   : > { %23093 = vst [vmem:[#allocation59_spill] sm:$0xff] %v18936_v32  ;;  %12984 = vmatprep.mubr.msk.f32.mxu0 %vm3431_vm3, %v5354_v44  ;;  %v18947_v49 = vsel %vm600_vm0, %v23097_v36, %v23096_v5  ;;  %v5486_v32 = vrot.slane %v23099_v31, 1  ;;  %v23100_v44 = vrot.slane %v23047_v20, 7  ;;  %v23101_v12 = vmov %v23096_v5  ;;  %13247 = vmatprep.mubr.msk.f32.mxu1 %vm3431_vm3, %v5483_v9  ;;  %v23109_v9 = vld [vmem:[#allocation25_spill] sm:$0xff] }
 0x6cf   : > { %23098 = vst [vmem:[#allocation98_spill] sm:$0xff] %v18947_v49  ;;  %v5417_v54 = vrot.slane %v23103_v21, 7  ;;  %v23104_v41 = vrot.slane %v23089_v62, 7  ;;  %v5422_v31 = vrot.slane %v18477_v63, 7  ;;  %v23106_v36 = vrot.slane %v23050_v51, 7 }
 0x6d0   : > { %v18958_v50 = vsel %vm600_vm0, %v23101_v12, %v23100_v44  ;;  %v23105_v44 = vrot.slane %v17517_v16, 7  ;;  %v23107_v5 = vrot.slane %v23047_v20, 7  ;;  %v5488_v60 = vrot.slane %v23109_v9, 1 }
 0x6d1   : > { %23102 = vst [vmem:[#allocation61_spill] sm:$0xff] %v18958_v50  ;;  %v5356_v14 = vsel %vm600_vm0, %v23104_v41, %v5355_v1  ;;  %v5485_v41 = vsel %vm801_vm2, %v5482_v40, %v5484_v61  ;;  %v23110_v50 = vrot.slane %v23053_v25, 7  ;;  %v5487_v40 = vsel %vm801_vm2, %v5484_v61, %v5486_v32  ;;  %v23121_v61 = vld [vmem:[#allocation48_spill] sm:$0xff] }
 0x6d2   : > { %12985 = vmatmul.mubr.msk.f32.gmra.mrb[146].mxu0 %vm3431_vm3, %v5356_v14  ;;  %v5358_v12 = vsel %vm600_vm0, %v5355_v1, %v23105_v44  ;;  %v18978_v62 = vsel %vm600_vm0, %v23107_v5, %v23106_v36  ;;  %v23111_v14 = vmov %v23106_v36  ;;  %v23113_v1 = vrot.slane %v23056_v30, 7  ;;  %13248 = vmatmul.mubr.msk.f32.gmra.mrb[62].mxu1 %vm3431_vm3, %v5485_v41  ;;  %v23125_v5 = vld [vmem:[#allocation88_spill] sm:$0xff] }
 0x6d3   : > { %23108 = vst [vmem:[#allocation63_spill] sm:$0xff] %v18978_v62  ;;  %12987 = vmatprep.mubr.msk.f32.mxu0 %vm3431_vm3, %v5358_v12  ;;  %v18988_v49 = vsel %vm600_vm0, %v23111_v14, %v23110_v50  ;;  %v23114_v44 = vmov %v23110_v50  ;;  %v23116_v12 = vld [vmem:[#allocation70_spill] sm:$0xff]  ;;  %v5424_v14 = vrot.slane %v18499_v0, 7  ;;  %13250 = vmatprep.mubr.msk.f32.mxu1 %vm3431_vm3, %v5487_v40  ;;  %v19013_v41 = vsel %vm600_vm0, %v5411_v42, %v5413_v8 }
 0x6d4   : > { %23112 = vst [vmem:[#allocation64_spill] sm:$0xff] %v18988_v49  ;;  %v18995_v36 = vsel %vm600_vm0, %v23114_v44, %v23113_v1  ;;  %v5490_v9 = vrot.slane %v23116_v12, 1  ;;  %v23117_v62 = vmov %v23113_v1  ;;  %v19010_v1 = vsel %vm600_vm0, %v5409_v27, %v5411_v42  ;;  %23120 = vst [vmem:[#allocation73_spill] sm:$0xff] %v19013_v41  ;;  %v23122_v40 = vld [vmem:[#allocation26_spill] sm:$0xff] }
 0x6d5   : > { %23115 = vst [vmem:[#allocation52_spill] sm:$0xff] %v18995_v36  ;;  %v19004_v50 = vsel %vm600_vm0, %v23117_v62, %v5409_v27  ;;  %23119 = vst [vmem:[#allocation84_spill] sm:$0xff] %v19010_v1  ;;  %v5426_v44 = vrot.slane %v23121_v61, 7  ;;  %v5428_v12 = vrot.slane %v18553_v15, 7  ;;  %v5489_v27 = vsel %vm801_vm2, %v5486_v32, %v5488_v60 }
 0x6d6   : > { %23118 = vst [vmem:[#allocation51_spill] sm:$0xff] %v19004_v50  ;;  %12988 = vmatmul.mubr.msk.f32.gmra.mrb[148].mxu0 %vm3431_vm3, %v18748_v57  ;;  %v5492_v49 = vrot.slane %v23122_v40, 1  ;;  %v19026_v42 = vsel %vm600_vm0, %v5413_v8, %v5415_v6  ;;  %v19029_v41 = vsel %vm600_vm0, %v5415_v6, %v5417_v54  ;;  %v5430_v1 = vrot.slane %v23125_v5, 7  ;;  %13251 = vmatmul.mubr.msk.f32.gmra.mrb[64].mxu1 %vm3431_vm3, %v5489_v27  ;;  %v23126_v50 = vld [vmem:[#allocation71_spill] sm:$0xff] }
 0x6d7   : > { %12990 = vmatprep.mubr.msk.f32.mxu0 %vm3431_vm3, %v18755_v2  ;;  %23123 = vst [vmem:[#allocation72_spill] sm:$0xff] %v19026_v42  ;;  %23124 = vst [vmem:[#allocation75_spill] sm:$0xff] %v19029_v41  ;;  %v5491_v57 = vsel %vm801_vm2, %v5488_v60, %v5490_v9  ;;  %v5494_v2 = vrot.slane %v23126_v50, 1  ;;  %v5432_v32 = vrot.slane %v18615_v17, 7  ;;  %v5434_v8 = vrot.slane %v18637_v53, 7  ;;  %v23129_v50 = vld [vmem:[#allocation66_spill] sm:$0xff] }
 0x6d8   : > { %13253 = vmatprep.mubr.msk.f32.mxu1 %vm3431_vm3, %v5491_v57  ;;  %v23127_v54 = vrot.slane %v18446_v58, 7  ;;  %v5436_v62 = vrot.slane %v18663_v24, 7  ;;  %v5438_v27 = vrot.slane %v18693_v43, 7  ;;  %v5440_v60 = vrot.slane %v18715_v18, 7  ;;  %v23130_v41 = vld [vmem:[#allocation28_spill] sm:$0xff] }
 0x6d9   : > { %v5373_v40 = vrot.slane %v23129_v50, 7  ;;  %v5493_v57 = vsel %vm801_vm2, %v5490_v9, %v5492_v49  ;;  %v5496_v42 = vrot.slane %v23130_v41, 1  ;;  %v5495_v36 = vsel %vm801_vm2, %v5492_v49, %v5494_v2  ;;  %v23133_v49 = vld [vmem:[#allocation78_spill] sm:$0xff] }
 0x6da   : > { %v19043_v6 = vsel %vm600_vm0, %v23127_v54, %v5422_v31  ;;  %12991 = vmatmul.mubr.msk.f32.gmra.mrb[150].mxu0 %vm3431_vm3, %v18765_v47  ;;  %v19056_v54 = vsel %vm600_vm0, %v5422_v31, %v5424_v14  ;;  %13254 = vmatmul.mubr.msk.f32.gmra.mrb[66].mxu1 %vm3431_vm3, %v5493_v57  ;;  %v23131_v47 = vld [vmem:[#allocation76_spill] sm:$0xff]  ;;  %v19065_v50 = vsel %vm600_vm0, %v5426_v44, %v5428_v12  ;;  %v23134_v57 = vld [vmem:[#allocation82_spill] sm:$0xff] }
 0x6db   : > { %23128 = vst [vmem:[#allocation81_spill] sm:$0xff] %v19043_v6  ;;  %12993 = vmatprep.mubr.msk.f32.mxu0 %vm3431_vm3, %v18777_v59  ;;  %v19059_v6 = vsel %vm600_vm0, %v5424_v14, %v5426_v44  ;;  %v5498_v17 = vrot.slane %v23131_v47, 1  ;;  %v19068_v59 = vsel %vm600_vm0, %v5428_v12, %v5430_v1  ;;  %13256 = vmatprep.mubr.msk.f32.mxu1 %vm3431_vm3, %v5495_v36  ;;  %v5500_v44 = vrot.slane %v23133_v49, 1 }
 0x6dc   : > { %v19075_v14 = vsel %vm600_vm0, %v5430_v1, %v5432_v32  ;;  %v5502_v47 = vrot.slane %v23134_v57, 1  ;;  %v19082_v12 = vsel %vm600_vm0, %v5432_v32, %v5434_v8  ;;  %v19085_v9 = vsel %vm600_vm0, %v5434_v8, %v5436_v62  ;;  %v23135_v1 = vld [vmem:[#allocation35_spill] sm:$0xff] }
 0x6dd   : > { %23132 = vst [vmem:[#allocation80_spill] sm:$0xff] %v19075_v14  ;;  %v5497_v36 = vsel %vm801_vm2, %v5494_v2, %v5496_v42  ;;  %v5504_v31 = vrot.slane %v23135_v1, 1  ;;  %v5455_v49 = vsel %vm600_vm0, 0.0, %v5373_v40  ;;  %v5499_v32 = vsel %vm801_vm2, %v5496_v42, %v5498_v17 }
 0x6de   : > { %12994 = vmatmul.mubr.msk.f32.gmra.mrb[152].mxu0 %vm3431_vm3, %v18784_v23  ;;  %v23136_v23 = vld [vmem:[#allocation37_spill] sm:$0xff]  ;;  %13257 = vmatmul.mubr.msk.f32.gmra.mrb[68].mxu1 %vm3431_vm3, %v5497_v36  ;;  %v19097_v8 = vsel %vm600_vm0, %v5436_v62, %v5438_v27  ;;  %v19100_v41 = vsel %vm600_vm0, %v5438_v27, %v5440_v60  ;;  %v23138_v2 = vrot.slane %v17517_v16, 1  ;;  %v23139_v1 = vrot.slane %v17562_v35, 1 }
 0x6df   : > { %12996 = vmatprep.mubr.msk.f32.mxu0 %vm3431_vm3, %v18804_v56  ;;  %v5505_v14 = vrot.slane %v23136_v23, 1  ;;  %13259 = vmatprep.mubr.msk.f32.mxu1 %vm3431_vm3, %v5499_v32  ;;  %v23137_v56 = vrot.slane %v17534_v55, 1  ;;  %v23141_v62 = vrot.slane %v17581_v33, 1  ;;  %v23143_v32 = vrot.slane %v17598_v38, 1  ;;  %v23152_v38 = vld [vmem:[#allocation39_spill] sm:$0xff] }
 0x6e0   : > { %v23142_v27 = vmov %v23139_v1  ;;  %v23145_v55 = vrot.slane %v17773_v29, 7  ;;  %v5503_v35 = vsel %vm801_vm2, %v5500_v44, %v5502_v47 }
 0x6e1   : > { %v19108_v23 = vsel %vm801_vm2, %v23138_v2, %v23137_v56  ;;  %v23140_v36 = vmov %v23137_v56  ;;  %v19122_v60 = vsel %vm801_vm2, %v23142_v27, %v23141_v62  ;;  %v23144_v57 = vmov %v23141_v62 }
 0x6e2   : > { %v19115_v42 = vsel %vm801_vm2, %v23140_v36, %v23139_v1  ;;  %v19129_v56 = vsel %vm801_vm2, %v23144_v57, %v23143_v32  ;;  %12997 = vmatmul.mubr.msk.f32.gmra.mrb[154].mxu0 %vm3431_vm3, %v18814_v3  ;;  %v5375_v1 = vsel %vm600_vm0, %v5373_v40, %v23145_v55  ;;  %v5501_v2 = vsel %vm801_vm2, %v5498_v17, %v5500_v44 }
 0x6e3   : > { %v5651_v36 = vsel %vm801_vm2, %v5502_v47, 0.0  ;;  %12999 = vmatprep.mubr.msk.f32.mxu0 %vm3431_vm3, %v5455_v49  ;;  %v5506_v33 = vsel %vm801_vm2, %v5504_v31, %v5505_v14  ;;  %v23146_v57 = vrot.slane %v17674_v34, 1  ;;  %v23147_v62 = vmov %v23143_v32  ;;  %13260 = vmatmul.mubr.msk.f32.gmra.mrb[70].mxu1 %vm3431_vm3, %v5501_v2 }
 0x6e4   : > { %v23148_v27 = vrot.slane %v17716_v28, 1  ;;  %v23150_v47 = vrot.slane %v17738_v48, 1  ;;  %v5507_v44 = vrot.slane %v23152_v38, 1  ;;  %v23153_v32 = vrot.slane %v17801_v39, 1  ;;  %13262 = vmatprep.mubr.msk.f32.mxu1 %vm3431_vm3, %v5503_v35 }
 0x6e5   : > { %v19146_v3 = vsel %vm801_vm2, %v23147_v62, %v23146_v57  ;;  %v23149_v40 = vmov %v23146_v57  ;;  %v23154_v55 = vrot.slane %v17773_v29, 1  ;;  %v23155_v57 = vrot.slane %v17826_v37, 1 }
 0x6e6   : > { %v19153_v17 = vsel %vm801_vm2, %v23149_v40, %v23148_v27  ;;  %v23151_v49 = vmov %v23148_v27  ;;  %v23156_v62 = vmov %v23153_v32  ;;  %v23157_v27 = vrot.slane %v17859_v10, 1  ;;  %13000 = vmatmul.mubr.msk.f32.gmra.mrb[156].mxu0 %vm3431_vm3, %v5375_v1 }
 0x6e7   : > { %v19160_v31 = vsel %vm801_vm2, %v23151_v49, %v23150_v47  ;;  %v19169_v34 = vsel %vm801_vm2, %v23154_v55, %v23153_v32  ;;  %v19176_v28 = vsel %vm801_vm2, %v23156_v62, %v23155_v57  ;;  %v23158_v2 = vmov %v23155_v57  ;;  %13002 = vmatprep.mubr.msk.f32.mxu0 %vm3431_vm3, %v18835_v52 }
 0x6e8   : > { %v19183_v40 = vsel %vm801_vm2, %v23158_v2, %v23157_v27  ;;  %v23159_v47 = vrot.slane %v17889_v19, 1  ;;  %v23160_v49 = vmov %v23157_v27  ;;  %v23161_v39 = vrot.slane %v17919_v22, 1  ;;  %v23167_v19 = vld [vmem:[#allocation40_spill] sm:$0xff]  ;;  %13263 = vmatmul.mubr.msk.f32.gmra.mrb[72].mxu1 %vm3431_vm3, %v5651_v36 }
 0x6e9   : > { %v23163_v37 = vrot.slane %v17938_v11, 1  ;;  %v23165_v27 = vrot.slane %v17983_v4, 1  ;;  %v23174_v4 = vld [vmem:[#allocation32_spill] sm:$0xff]  ;;  %13265 = vmatprep.mubr.msk.f32.mxu1 %vm3431_vm3, %v5506_v33 }
 0x6ea   : > { %v19191_v32 = vsel %vm801_vm2, %v23160_v49, %v23159_v47  ;;  %v23162_v55 = vmov %v23159_v47  ;;  %v23164_v62 = vmov %v23161_v39  ;;  %v5509_v47 = vrot.slane %v23167_v19, 1 }
 0x6eb   : > { %v19198_v57 = vsel %vm801_vm2, %v23162_v55, %v23161_v39  ;;  %v19205_v35 = vsel %vm801_vm2, %v23164_v62, %v23163_v37  ;;  %v23166_v10 = vmov %v23163_v37  ;;  %v23168_v49 = vrot.slane %v17997_v7, 1 }
 0x6ec   : > { %v19212_v2 = vsel %vm801_vm2, %v23166_v10, %v23165_v27  ;;  %v23169_v39 = vmov %v23165_v27  ;;  %v23170_v55 = vrot.slane %v18035_v26, 1  ;;  %v23172_v62 = vrot.slane %v18054_v46, 1 }
 0x6ed   : > { %v19221_v22 = vsel %vm801_vm2, %v23169_v39, %v23168_v49  ;;  %v23171_v37 = vmov %v23168_v49  ;;  %v5511_v10 = vrot.slane %v23174_v4, 1  ;;  %v23175_v49 = vrot.slane %v18134_v45, 1  ;;  %v23176_v39 = vld [vmem:[#allocation33_spill] sm:$0xff] }
 0x6ee   : > { %v19228_v11 = vsel %vm801_vm2, %v23171_v37, %v23170_v55  ;;  %v23173_v1 = vmov %v23170_v55  ;;  %v23177_v19 = vrot.slane %v23176_v39, 1  ;;  %v23178_v55 = vrot.slane %v23047_v20, 1  ;;  %v23188_v20 = vld [vmem:[#allocation74_spill] sm:$0xff] }
 0x6ef   : > { %v19235_v27 = vsel %vm801_vm2, %v23173_v1, %v23172_v62  ;;  %v23179_v37 = vmov %v23175_v49  ;;  %v23180_v62 = vrot.slane %v23050_v51, 1  ;;  %v23183_v4 = vrot.slane %v23053_v25, 1  ;;  %v23194_v25 = vld [vmem:[#allocation31_spill] sm:$0xff] }
 0x6f0   : > { %v19245_v7 = vsel %vm801_vm2, %v23177_v19, %v23175_v49  ;;  %v19252_v26 = vsel %vm801_vm2, %v23179_v37, %v23178_v55  ;;  %v23181_v52 = vmov %v23178_v55  ;;  %v23185_v45 = vrot.slane %v23056_v30, 1 }
 0x6f1   : > { %v19259_v1 = vsel %vm801_vm2, %v23181_v52, %v23180_v62  ;;  %v23184_v19 = vmov %v23180_v62  ;;  %v23186_v55 = vmov %v23183_v4  ;;  %v23189_v38 = vrot.slane %v23188_v20, 1  ;;  %v23191_v52 = vld [vmem:[#allocation79_spill] sm:$0xff] }
 0x6f2   : > { %23182 = vst [vmem:[#allocation48_spill] sm:$0xff] %v19259_v1  ;;  %v19267_v49 = vsel %vm801_vm2, %v23184_v19, %v23183_v4  ;;  %v19274_v37 = vsel %vm801_vm2, %v23186_v55, %v23185_v45  ;;  %v23190_v62 = vmov %v23185_v45  ;;  %v23192_v1 = vrot.slane %v23191_v52, 1  ;;  %v23195_v45 = vld [vmem:[#allocation77_spill] sm:$0xff] }
 0x6f3   : > { %23187 = vst [vmem:[#allocation88_spill] sm:$0xff] %v19274_v37  ;;  %v19281_v36 = vsel %vm801_vm2, %v23190_v62, %v23189_v38  ;;  %v23193_v51 = vmov %v23189_v38  ;;  %v5513_v19 = vrot.slane %v23194_v25, 1  ;;  %v23196_v55 = vrot.slane %v23195_v45, 1  ;;  %v23202_v25 = vld [vmem:[#allocation95_spill] sm:$0xff] }
 0x6f4   : > { %v19288_v4 = vsel %vm801_vm2, %v23193_v51, %v23192_v1  ;;  %v23197_v37 = vmov %v23192_v1  ;;  %v23198_v38 = vrot.slane %v23094_v13, 1  ;;  %v23200_v1 = vrot.slane %v23103_v21, 1  ;;  %13003 = vmatmul.mubr.msk.f32.gmra.mrb[158].mxu0 %vm3431_vm3, %v23202_v25 }
 0x6f5   : > { %v19297_v30 = vsel %vm801_vm2, %v23197_v37, %v23196_v55  ;;  %v23199_v62 = vmov %v23196_v55  ;;  %v5508_v37 = vsel %vm801_vm2, %v5505_v14, %v5507_v44  ;;  %v23203_v52 = vrot.slane %v18477_v63, 1 }
 0x6f6   : > { %v19304_v20 = vsel %vm801_vm2, %v23199_v62, %v23198_v38  ;;  %v23201_v33 = vmov %v23198_v38  ;;  %v23204_v55 = vrot.slane %v18446_v58, 1  ;;  %v23206_v38 = vrot.slane %v18499_v0, 1  ;;  %v23216_v0 = vld [vmem:[#allocation87_spill] sm:$0xff]  ;;  %13266 = vmatmul.mubr.msk.f32.gmra.mrb[74].mxu1 %vm3431_vm3, %v5508_v37 }
 0x6f7   : > { %v19311_v51 = vsel %vm801_vm2, %v23201_v33, %v23200_v1  ;;  %v23207_v62 = vmov %v23203_v52  ;;  %v23208_v1 = vrot.slane %v23121_v61, 1  ;;  %v23211_v33 = vld [vmem:[#allocation50_spill] sm:$0xff]  ;;  %v23214_v63 = vrot.slane %v23125_v5, 1 }
 0x6f8   : > { %v19321_v45 = vsel %vm801_vm2, %v23204_v55, %v23203_v52  ;;  %v19328_v13 = vsel %vm801_vm2, %v23207_v62, %v23206_v38  ;;  %v23209_v25 = vmov %v23206_v38  ;;  %13005 = vmatprep.mubr.msk.f32.mxu0 %vm3431_vm3, %v23211_v33  ;;  %v23212_v52 = vrot.slane %v18553_v15, 1 }
 0x6f9   : > { %23205 = vst [vmem:[#allocation33_spill] sm:$0xff] %v19321_v45  ;;  %v19335_v14 = vsel %vm801_vm2, %v23209_v25, %v23208_v1  ;;  %v23213_v55 = vmov %v23208_v1  ;;  %v23217_v1 = vrot.slane %v23216_v0, 1  ;;  %v23218_v25 = vmov %v23214_v63 }
 0x6fa   : > { %23210 = vst [vmem:[#allocation74_spill] sm:$0xff] %v19335_v14  ;;  %v19344_v45 = vsel %vm801_vm2, %v23213_v55, %v23212_v52  ;;  %v23215_v38 = vmov %v23212_v52  ;;  %v23219_v14 = vrot.slane %v18637_v53, 1  ;;  %v5510_v15 = vsel %vm801_vm2, %v5507_v44, %v5509_v47  ;;  %v23231_v53 = vld [vmem:[#allocation94_spill] sm:$0xff] }
 0x6fb   : > { %v19351_v62 = vsel %vm801_vm2, %v23215_v38, %v23214_v63  ;;  %v19358_v33 = vsel %vm801_vm2, %v23218_v25, %v23217_v1  ;;  %v23220_v61 = vmov %v23217_v1  ;;  %v23222_v55 = vrot.slane %v18663_v24, 1  ;;  %13268 = vmatprep.mubr.msk.f32.mxu1 %vm3431_vm3, %v5510_v15  ;;  %13006 = vmatmul.mubr.msk.f32.gmra.mrb[160].mxu0 %vm3431_vm3, %v23231_v53  ;;  %v23232_v25 = vld [vmem:[#allocation54_spill] sm:$0xff]  ;;  %v23236_v15 = vld [vmem:[#allocation96_spill] sm:$0xff] }
 0x6fc   : > { %v19365_v52 = vsel %vm801_vm2, %v23220_v61, %v23219_v14  ;;  %v23223_v63 = vmov %v23219_v14  ;;  %v23225_v38 = vrot.slane %v18693_v43, 1  ;;  %v23228_v14 = vrot.slane %v18715_v18, 1  ;;  %13008 = vmatprep.mubr.msk.f32.mxu0 %vm3431_vm3, %v23232_v25  ;;  %v23233_v61 = vld [vmem:[#allocation34_spill] sm:$0xff]  ;;  %v23234_v43 = vld [vmem:[#allocation36_spill] sm:$0xff]  ;;  %v23238_v25 = vld [vmem:[#allocation41_spill] sm:$0xff] }
 0x6fd   : > { %23221 = vst [vmem:[#allocation79_spill] sm:$0xff] %v19365_v52  ;;  %v19374_v5 = vsel %vm801_vm2, %v23223_v63, %v23222_v55  ;;  %v23226_v1 = vmov %v23222_v55  ;;  %v5512_v24 = vsel %vm801_vm2, %v5509_v47, %v5511_v10  ;;  %v5515_v55 = vrot.slane %v23233_v61, 1  ;;  %v23241_v18 = vld [vmem:[#allocation99_spill] sm:$0xff] }
 0x6fe   : > { %23224 = vst [vmem:[#allocation77_spill] sm:$0xff] %v19374_v5  ;;  %v19381_v0 = vsel %vm801_vm2, %v23226_v1, %v23225_v38  ;;  %v23229_v37 = vmov %v23225_v38  ;;  %13269 = vmatmul.mubr.msk.f32.gmra.mrb[76].mxu1 %vm3431_vm3, %v5512_v24  ;;  %v5514_v63 = vsel %vm801_vm2, %v5511_v10, %v5513_v19  ;;  %v5517_v38 = vrot.slane %v23234_v43, 1  ;;  %v23235_v1 = vld [vmem:[#allocation55_spill] sm:$0xff]  ;;  %v23239_v24 = vld [vmem:[#allocation58_spill] sm:$0xff] }
 0x6ff   : > { %23227 = vst [vmem:[#allocation95_spill] sm:$0xff] %v19381_v0  ;;  %v19388_v44 = vsel %vm801_vm2, %v23229_v37, %v23228_v14  ;;  %13271 = vmatprep.mubr.msk.f32.mxu1 %vm3431_vm3, %v5514_v63  ;;  %13009 = vmatmul.mubr.msk.f32.gmra.mrb[162].mxu0 %vm3431_vm3, %v23235_v1  ;;  %v5516_v14 = vsel %vm801_vm2, %v5513_v19, %v5515_v55  ;;  %v23237_v37 = vld [vmem:[#allocation38_spill] sm:$0xff]  ;;  %v5521_v10 = vrot.slane %v23238_v25, 1  ;;  %v23240_v63 = vld [vmem:[#allocation29_spill] sm:$0xff] }
 0x700   : > { %23230 = vst [vmem:[#allocation50_spill] sm:$0xff] %v19388_v44  ;;  %13011 = vmatprep.mubr.msk.f32.mxu0 %vm3431_vm3, %v23236_v15  ;;  %v5519_v47 = vrot.slane %v23237_v37, 1  ;;  %v5518_v53 = vsel %vm801_vm2, %v5515_v55, %v5517_v38  ;;  %v5396_v1 = vrot.slane %v23240_v63, 7  ;;  %v23242_v15 = vld [vmem:[#allocation42_spill] sm:$0xff]  ;;  %v23273_v25 = vld [vmem:[#allocation81_spill] sm:$0xff] }
 0x701   : > { %v5523_v44 = vrot.slane %v23242_v15, 1 }
 0x702   : > { %13272 = vmatmul.mubr.msk.f32.gmra.mrb[78].mxu1 %vm3431_vm3, %v5516_v14  ;;  %v5520_v19 = vsel %vm801_vm2, %v5517_v38, %v5519_v47  ;;  %v5522_v55 = vsel %vm801_vm2, %v5519_v47, %v5521_v10  ;;  %v23243_v14 = vld [vmem:[#allocation85_spill] sm:$0xff]  ;;  %v23246_v47 = vld [vmem:[#allocation86_spill] sm:$0xff] }
 0x703   : > { %13274 = vmatprep.mubr.msk.f32.mxu1 %vm3431_vm3, %v5518_v53  ;;  %13012 = vmatmul.mubr.msk.f32.gmra.mrb[164].mxu0 %vm3431_vm3, %v23239_v24  ;;  %v5525_v0 = vrot.slane %v23243_v14, 1  ;;  %v23244_v53 = vld [vmem:[#allocation59_spill] sm:$0xff]  ;;  %v5456_v24 = vsel %vm600_vm0, 0.0, %v5396_v1  ;;  %v5528_v52 = vrot.slane %v23246_v47, 1  ;;  %v23247_v14 = vrot.slane %v23176_v39, 7 }
 0x704   : > { %13014 = vmatprep.mubr.msk.f32.mxu0 %vm3431_vm3, %v23241_v18  ;;  %v5524_v18 = vsel %vm801_vm2, %v5521_v10, %v5523_v44  ;;  %v23250_v47 = vld [vmem:[#allocation47_spill] sm:$0xff] }
 0x705   : > { %v5526_v38 = vsel %vm801_vm2, %v5523_v44, %v5525_v0  ;;  %v5652_v10 = vsel %vm801_vm2, %v5525_v0, 0.0 }
 0x706   : > { %13275 = vmatmul.mubr.msk.f32.gmra.mrb[80].mxu1 %vm3431_vm3, %v5520_v19  ;;  %v23245_v19 = vld [vmem:[#allocation45_spill] sm:$0xff] }
 0x707   : > { %13277 = vmatprep.mubr.msk.f32.mxu1 %vm3431_vm3, %v5522_v55  ;;  %13015 = vmatmul.mubr.msk.f32.gmra.mrb[166].mxu0 %vm3431_vm3, %v23244_v53  ;;  %v5527_v5 = vrot.slane %v23245_v19, 1  ;;  %v5398_v55 = vsel %vm600_vm0, %v5396_v1, %v23247_v14  ;;  %v23248_v53 = vld [vmem:[#allocation98_spill] sm:$0xff]  ;;  %v5532_v19 = vrot.slane %v23250_v47, 1  ;;  %v23251_v1 = vld [vmem:[#allocation61_spill] sm:$0xff]  ;;  %v23252_v14 = vld [vmem:[#allocation63_spill] sm:$0xff] }
 0x708   : > { %13017 = vmatprep.mubr.msk.f32.mxu0 %vm3431_vm3, %v5456_v24  ;;  %v23249_v24 = vld [vmem:[#allocation89_spill] sm:$0xff]  ;;  %v23255_v47 = vld [vmem:[#allocation64_spill] sm:$0xff] }
 0x709   : > { %v5529_v44 = vsel %vm801_vm2, %v5527_v5, %v5528_v52 }
 0x70a   : > { %13278 = vmatmul.mubr.msk.f32.gmra.mrb[82].mxu1 %vm3431_vm3, %v5524_v18  ;;  %v5530_v18 = vrot.slane %v23249_v24, 1  ;;  %v23265_v24 = vld [vmem:[#allocation72_spill] sm:$0xff] }
 0x70b   : > { %13280 = vmatprep.mubr.msk.f32.mxu1 %vm3431_vm3, %v5526_v38  ;;  %13018 = vmatmul.mubr.msk.f32.gmra.mrb[168].mxu0 %vm3431_vm3, %v5398_v55  ;;  %v23253_v55 = vld [vmem:[#allocation53_spill] sm:$0xff] }
 0x70c   : > { %13020 = vmatprep.mubr.msk.f32.mxu0 %vm3431_vm3, %v23248_v53  ;;  %v5531_v38 = vsel %vm801_vm2, %v5528_v52, %v5530_v18  ;;  %v5534_v0 = vrot.slane %v23253_v55, 1  ;;  %v5533_v53 = vsel %vm801_vm2, %v5530_v18, %v5532_v19  ;;  %v23258_v55 = vld [vmem:[#allocation44_spill] sm:$0xff] }
 0x70d   : > { %v5540_v18 = vrot.slane %v23258_v55, 1  ;;  %v23263_v55 = vld [vmem:[#allocation73_spill] sm:$0xff] }
 0x70e   : > { %13281 = vmatmul.mubr.msk.f32.gmra.mrb[84].mxu1 %vm3431_vm3, %v5652_v10  ;;  %v23254_v10 = vld [vmem:[#allocation56_spill] sm:$0xff] }
 0x70f   : > { %13283 = vmatprep.mubr.msk.f32.mxu1 %vm3431_vm3, %v5529_v44  ;;  %13021 = vmatmul.mubr.msk.f32.gmra.mrb[170].mxu0 %vm3431_vm3, %v23251_v1  ;;  %v5536_v5 = vrot.slane %v23254_v10, 1  ;;  %v23256_v44 = vld [vmem:[#allocation52_spill] sm:$0xff]  ;;  %v5535_v1 = vsel %vm801_vm2, %v5532_v19, %v5534_v0  ;;  %v23259_v10 = vld [vmem:[#allocation51_spill] sm:$0xff] }
 0x710   : > { %13023 = vmatprep.mubr.msk.f32.mxu0 %vm3431_vm3, %v23252_v14  ;;  %v23257_v14 = vld [vmem:[#allocation91_spill] sm:$0xff] }
 0x711   : > { %v5538_v52 = vrot.slane %v23257_v14, 1  ;;  %v23262_v14 = vld [vmem:[#allocation93_spill] sm:$0xff] }
 0x712   : > { %13284 = vmatmul.mubr.msk.f32.gmra.mrb[86].mxu1 %vm3431_vm3, %v5531_v38  ;;  %v5537_v38 = vsel %vm801_vm2, %v5534_v0, %v5536_v5  ;;  %v5544_v0 = vrot.slane %v23262_v14, 1 }
 0x713   : > { %13286 = vmatprep.mubr.msk.f32.mxu1 %vm3431_vm3, %v5533_v53  ;;  %13024 = vmatmul.mubr.msk.f32.gmra.mrb[172].mxu0 %vm3431_vm3, %v23255_v47  ;;  %v23260_v53 = vld [vmem:[#allocation84_spill] sm:$0xff]  ;;  %v5539_v47 = vsel %vm801_vm2, %v5536_v5, %v5538_v52 }
 0x714   : > { %13026 = vmatprep.mubr.msk.f32.mxu0 %vm3431_vm3, %v23256_v44  ;;  %v23261_v44 = vld [vmem:[#allocation90_spill] sm:$0xff] }
 0x715   : > { %v5542_v19 = vrot.slane %v23261_v44, 1 }
 0x716   : > { %13287 = vmatmul.mubr.msk.f32.gmra.mrb[88].mxu1 %vm3431_vm3, %v5535_v1  ;;  %v5541_v1 = vsel %vm801_vm2, %v5538_v52, %v5540_v18 }
 0x717   : > { %13289 = vmatprep.mubr.msk.f32.mxu1 %vm3431_vm3, %v5537_v38  ;;  %13027 = vmatmul.mubr.msk.f32.gmra.mrb[174].mxu0 %vm3431_vm3, %v23259_v10  ;;  %v23264_v38 = vld [vmem:[#allocation83_spill] sm:$0xff]  ;;  %v5543_v5 = vsel %vm801_vm2, %v5540_v18, %v5542_v19  ;;  %v5545_v52 = vsel %vm801_vm2, %v5542_v19, %v5544_v0  ;;  %v23270_v19 = vld [vmem:[#allocation97_spill] sm:$0xff] }
 0x718   : > { %13029 = vmatprep.mubr.msk.f32.mxu0 %vm3431_vm3, %v23260_v53  ;;  %v5419_v10 = vrot.slane %v23264_v38, 7  ;;  %v23266_v53 = vld [vmem:[#allocation46_spill] sm:$0xff]  ;;  %v5551_v15 = vrot.slane %v23270_v19, 1 }
 0x719   : > { %v5546_v44 = vrot.slane %v23266_v53, 1 }
 0x71a   : > { %13290 = vmatmul.mubr.msk.f32.gmra.mrb[90].mxu1 %vm3431_vm3, %v5539_v47  ;;  %v23267_v47 = vld [vmem:[#allocation92_spill] sm:$0xff] }
 0x71b   : > { %13292 = vmatprep.mubr.msk.f32.mxu1 %vm3431_vm3, %v5541_v1  ;;  %13030 = vmatmul.mubr.msk.f32.gmra.mrb[176].mxu0 %vm3431_vm3, %v23263_v55  ;;  %v5548_v14 = vrot.slane %v23267_v47, 1  ;;  %v23268_v1 = vld [vmem:[#allocation75_spill] sm:$0xff]  ;;  %v5457_v55 = vsel %vm600_vm0, 0.0, %v5419_v10  ;;  %v23271_v47 = vrot.slane %v18446_v58, 7 }
 0x71c   : > { %13032 = vmatprep.mubr.msk.f32.mxu0 %vm3431_vm3, %v23265_v24  ;;  %v5547_v24 = vsel %vm801_vm2, %v5544_v0, %v5546_v44 }
 0x71d   : > { %v5549_v18 = vsel %vm801_vm2, %v5546_v44, %v5548_v14  ;;  %v5653_v0 = vsel %vm801_vm2, %v5548_v14, 0.0  ;;  %v23275_v14 = vrot.slane %v17517_v16, 1  ;;  %v23277_v16 = vld [vmem:[#allocation102_spill] sm:$0xff] }
 0x71e   : > { %13293 = vmatmul.mubr.msk.f32.gmra.mrb[92].mxu1 %vm3431_vm3, %v5543_v5  ;;  %v23269_v5 = vld [vmem:[#allocation49_spill] sm:$0xff] }
 0x71f   : > { %13295 = vmatprep.mubr.msk.f32.mxu1 %vm3431_vm3, %v5545_v52  ;;  %13033 = vmatmul.mubr.msk.f32.gmra.mrb[178].mxu0 %vm3431_vm3, %v23268_v1  ;;  %v5550_v53 = vrot.slane %v23269_v5, 1  ;;  %v5421_v52 = vsel %vm600_vm0, %v5419_v10, %v23271_v47  ;;  %v23272_v1 = vld [vmem:[#allocation101_spill] sm:$0xff]  ;;  %v23302_v47 = vld [vmem:[#allocation71_spill] sm:$0xff]  ;;  %vm8590_vm0 = vcmask 130048  }
 0x720   : > { %13035 = vmatprep.mubr.msk.f32.mxu0 %vm3431_vm3, %v5457_v55  ;;  %v5553_v55 = vrot.slane %v23272_v1, 1  ;;  %v23309_v1 = vld [vmem:[#allocation37_spill] sm:$0xff] }
 0x721   : > { %v5552_v44 = vsel %vm801_vm2, %v5550_v53, %v5551_v15  ;;  %v23301_v53 = vld [vmem:[#allocation48_spill] sm:$0xff] }
 0x722   : > { %13296 = vmatmul.mubr.msk.f32.gmra.mrb[94].mxu1 %vm3431_vm3, %v5547_v24  ;;  %v23274_v24 = vld [vmem:[#allocation103_spill] sm:$0xff]  ;;  %v5554_v10 = vsel %vm801_vm2, %v5551_v15, %v5553_v55 }
 0x723   : > { %13298 = vmatprep.mubr.msk.f32.mxu1 %vm3431_vm3, %v5549_v18  ;;  %13036 = vmatmul.mubr.msk.f32.gmra.mrb[180].mxu0 %vm3431_vm3, %v5421_v52  ;;  %v5555_v19 = vrot.slane %v23274_v24, 1  ;;  %v23303_v18 = vld [vmem:[#allocation28_spill] sm:$0xff]  ;;  %v23308_v52 = vld [vmem:[#allocation35_spill] sm:$0xff] }
 0x724   : > { %13038 = vmatprep.mubr.msk.f32.mxu0 %vm3431_vm3, %v23273_v25  ;;  %v23320_v24 = vld [vmem:[#allocation79_spill] sm:$0xff] }
 0x725   : > { %v5556_v25 = vsel %vm801_vm2, %v5553_v55, %v5555_v19 }
 0x726   : > { %13299 = vmatmul.mubr.msk.f32.gmra.mrb[96].mxu1 %vm3431_vm3, %v5653_v0 }
 0x727   : > { %13301 = vmatprep.mubr.msk.f32.mxu1 %vm3431_vm3, %v5552_v44  ;;  %13039 = vmatmul.mubr.msk.f32.gmra.mrb[182].mxu0 %vm3431_vm3, %v19056_v54  ;;  %v5558_v54 = vsel %vm801_vm2, %v5555_v19, %v23275_v14  ;;  %v23306_v19 = vld [vmem:[#allocation78_spill] sm:$0xff]  ;;  %v23315_v44 = vld [vmem:[#allocation33_spill] sm:$0xff]  ;;  %v23328_v14 = vld [vmem:[#allocation43_spill] sm:$0xff] }
 0x728   : > { %13041 = vmatprep.mubr.msk.f32.mxu0 %vm3431_vm3, %v19059_v6  ;;  %v23276_v6 = vld [vmem:[#allocation80_spill] sm:$0xff] }
 0x72a   : > { %13302 = vmatmul.mubr.msk.f32.gmra.mrb[98].mxu1 %vm3431_vm3, %v5554_v10  ;;  %v23326_v10 = vld [vmem:[#allocation86_spill] sm:$0xff] }
 0x72b   : > { %13304 = vmatprep.mubr.msk.f32.mxu1 %vm3431_vm3, %v5556_v25  ;;  %13042 = vmatmul.mubr.msk.f32.gmra.mrb[184].mxu0 %vm3431_vm3, %v19065_v50  ;;  %v23278_v50 = vld [vmem:[#allocation66_spill] sm:$0xff]  ;;  %v23327_v25 = vld [vmem:[#allocation89_spill] sm:$0xff] }
 0x72c   : > { %13044 = vmatprep.mubr.msk.f32.mxu0 %vm3431_vm3, %v19068_v59  ;;  %v5573_v59 = vrot.slane %v23278_v50, 1  ;;  %v23331_v50 = vld [vmem:[#allocation53_spill] sm:$0xff] }
 0x72e   : > { %13305 = vmatmul.mubr.msk.f32.gmra.mrb[4].mxu1 %vm3431_vm3, %v5558_v54  ;;  %v23329_v54 = vrot.slane %v23328_v14, 1 }
 0x72f   : > { %13307 = vmatprep.mubr.msk.f32.mxu1 %vm3431_vm3, %v19108_v23  ;;  %13045 = vmatmul.mubr.msk.f32.gmra.mrb[186].mxu0 %vm3431_vm3, %v23276_v6  ;;  %v23281_v23 = vrot.slane %v17738_v48, 1  ;;  %v23285_v48 = vld [vmem:[#allocation108_spill] sm:$0xff] }
 0x730   : > { %13047 = vmatprep.mubr.msk.f32.mxu0 %vm3431_vm3, %v19082_v12  ;;  %v23280_v12 = vld [vmem:[#allocation105_spill] sm:$0xff]  ;;  %v5657_v6 = vsel %vm801_vm2, %v23329_v54, 0.0 }
 0x732   : > { %13308 = vmatmul.mubr.msk.f32.gmra.mrb[6].mxu1 %vm3431_vm3, %v19115_v42 }
 0x733   : > { %13310 = vmatprep.mubr.msk.f32.mxu1 %vm3431_vm3, %v19122_v60  ;;  %13048 = vmatmul.mubr.msk.f32.gmra.mrb[188].mxu0 %vm3431_vm3, %v19085_v9  ;;  %v23279_v9 = vld [vmem:[#allocation104_spill] sm:$0xff]  ;;  %v23283_v60 = vld [vmem:[#allocation106_spill] sm:$0xff] }
 0x734   : > { %13050 = vmatprep.mubr.msk.f32.mxu0 %vm3431_vm3, %v19097_v8  ;;  %v23282_v8 = vrot.slane %v17773_v29, 1  ;;  %v23286_v29 = vld [vmem:[#allocation109_spill] sm:$0xff] }
 0x736   : > { %13311 = vmatmul.mubr.msk.f32.gmra.mrb[8].mxu1 %vm3431_vm3, %v19129_v56  ;;  %v5575_v42 = vsel %vm801_vm2, %v5573_v59, %v23282_v8  ;;  %v23284_v56 = vld [vmem:[#allocation107_spill] sm:$0xff]  ;;  %v23332_v59 = vld [vmem:[#allocation56_spill] sm:$0xff]  ;;  %v23337_v8 = vld [vmem:[#allocation46_spill] sm:$0xff] }
 0x737   : > { %13313 = vmatprep.mubr.msk.f32.mxu1 %vm3431_vm3, %v19146_v3  ;;  %13051 = vmatmul.mubr.msk.f32.gmra.mrb[190].mxu0 %vm3431_vm3, %v19100_v41  ;;  %v5654_v41 = vsel %vm801_vm2, %v23281_v23, 0.0  ;;  %v23287_v3 = vld [vmem:[#allocation27_spill] sm:$0xff]  ;;  %v23335_v23 = vld [vmem:[#allocation90_spill] sm:$0xff] }
 0x738   : > { %13069 = vmatprep.mubr.msk.f32.mxu0 %vm3431_vm3, %v23277_v16  ;;  %v23330_v16 = vld [vmem:[#allocation47_spill] sm:$0xff] }
 0x73a   : > { %13314 = vmatmul.mubr.msk.f32.gmra.mrb[10].mxu1 %vm3431_vm3, %v19153_v17  ;;  %v23288_v17 = vld [vmem:[#allocation65_spill] sm:$0xff] }
 0x73b   : > { %13316 = vmatprep.mubr.msk.f32.mxu1 %vm3431_vm3, %v19160_v31  ;;  %13070 = vmatmul.mubr.msk.f32.vlgmr.msra.gmra.mrb[96].mxu0 %vm3431_vm3, %v23279_v9  ;;  %v23289_v31 = vld [vmem:[#allocation30_spill] sm:$0xff]  ;;  %v23333_v9 = vld [vmem:[#allocation91_spill] sm:$0xff] }
 0x73c   : > { %13072 = vmatprep.mubr.msk.f32.mxu0 %vm3431_vm3, %v23280_v12  ;;  %v23334_v12 = vld [vmem:[#allocation44_spill] sm:$0xff] }
 0x73e   : > { %13317 = vmatmul.mubr.msk.f32.gmra.mrb[12].mxu1 %vm3431_vm3, %v5654_v41  ;;  %v23336_v41 = vld [vmem:[#allocation93_spill] sm:$0xff] }
 0x73f   : > { %13319 = vmatprep.mubr.msk.f32.mxu1 %vm3431_vm3, %v5575_v42  ;;  %13073 = vmatmul.mubr.msk.f32.gmra.mrb[98].mxu0 %vm3431_vm3, %v23283_v60  ;;  %v23338_v42 = vld [vmem:[#allocation92_spill] sm:$0xff]  ;;  %v23339_v60 = vld [vmem:[#allocation97_spill] sm:$0xff] }
 0x740   : > { %13075 = vmatprep.mubr.msk.f32.mxu0 %vm3431_vm3, %v23284_v56 }
 0x742   : > { %13320 = vmatmul.mubr.msk.f32.gmra.mrb[14].mxu1 %vm3431_vm3, %v19169_v34  ;;  %v23290_v34 = vld [vmem:[#allocation60_spill] sm:$0xff] }
 0x743   : > { %13322 = vmatprep.mubr.msk.f32.mxu1 %vm3431_vm3, %v19176_v28  ;;  %13076 = vmatmul.mubr.msk.f32.gmra.mrb[100].mxu0 %vm3431_vm3, %v23285_v48  ;;  %v23291_v28 = vld [vmem:[#allocation67_spill] sm:$0xff] }
 0x744   : > { %13078 = vmatprep.mubr.msk.f32.mxu0 %vm3431_vm3, %v23286_v29 }
 0x746   : > { %13323 = vmatmul.mubr.msk.f32.gmra.mrb[16].mxu1 %vm3431_vm3, %v19183_v40  ;;  %v23292_v40 = vld [vmem:[#allocation57_spill] sm:$0xff] }
 0x747   : > { %13325 = vmatprep.mubr.msk.f32.mxu1 %vm3431_vm3, %v19191_v32  ;;  %13079 = vmatmul.mubr.msk.f32.gmra.mrb[102].mxu0 %vm3431_vm3, %v23287_v3  ;;  %v5596_v32 = vrot.slane %v23240_v63, 1  ;;  %v23296_v63 = vrot.slane %v23176_v39, 1  ;;  %v23300_v39 = vld [vmem:[#allocation26_spill] sm:$0xff] }
 0x748   : > { %13081 = vmatprep.mubr.msk.f32.mxu0 %vm3431_vm3, %v23288_v17 }
 0x749   : > { %v5598_v15 = vsel %vm801_vm2, %v5596_v32, %v23296_v63 }
 0x74a   : > { %13326 = vmatmul.mubr.msk.f32.gmra.mrb[18].mxu1 %vm3431_vm3, %v19198_v57  ;;  %v23293_v57 = vld [vmem:[#allocation68_spill] sm:$0xff] }
 0x74b   : > { %13328 = vmatprep.mubr.msk.f32.mxu1 %vm3431_vm3, %v19205_v35  ;;  %13082 = vmatmul.mubr.msk.f32.gmra.mrb[104].mxu0 %vm3431_vm3, %v23289_v31  ;;  %v23294_v35 = vld [vmem:[#allocation62_spill] sm:$0xff] }
 0x74c   : > { %13084 = vmatprep.mubr.msk.f32.mxu0 %vm3431_vm3, %v23290_v34 }
 0x74e   : > { %13329 = vmatmul.mubr.msk.f32.gmra.mrb[20].mxu1 %vm3431_vm3, %v19212_v2  ;;  %v23295_v2 = vrot.slane %v18054_v46, 1  ;;  %v23299_v46 = vld [vmem:[#allocation70_spill] sm:$0xff] }
 0x74f   : > { %13331 = vmatprep.mubr.msk.f32.mxu1 %vm3431_vm3, %v19221_v22  ;;  %13085 = vmatmul.mubr.msk.f32.gmra.mrb[106].mxu0 %vm3431_vm3, %v23291_v28 }
 0x750   : > { %13087 = vmatprep.mubr.msk.f32.mxu0 %vm3431_vm3, %v23292_v40  ;;  %v5655_v22 = vsel %vm801_vm2, %v23295_v2, 0.0 }
 0x752   : > { %13332 = vmatmul.mubr.msk.f32.gmra.mrb[22].mxu1 %vm3431_vm3, %v19228_v11  ;;  %v23297_v11 = vld [vmem:[#allocation69_spill] sm:$0xff] }
 0x753   : > { %13334 = vmatprep.mubr.msk.f32.mxu1 %vm3431_vm3, %v19235_v27  ;;  %13088 = vmatmul.mubr.msk.f32.gmra.mrb[108].mxu0 %vm3431_vm3, %v23293_v57  ;;  %v23298_v27 = vld [vmem:[#allocation25_spill] sm:$0xff] }
 0x754   : > { %13090 = vmatprep.mubr.msk.f32.mxu0 %vm3431_vm3, %v23294_v35 }
 0x756   : > { %13335 = vmatmul.mubr.msk.f32.gmra.mrb[24].mxu1 %vm3431_vm3, %v5655_v22 }
 0x757   : > { %13337 = vmatprep.mubr.msk.f32.mxu1 %vm3431_vm3, %v5598_v15  ;;  %13091 = vmatmul.mubr.msk.f32.gmra.mrb[110].mxu0 %vm3431_vm3, %v23297_v11 }
 0x758   : > { %13093 = vmatprep.mubr.msk.f32.mxu0 %vm3431_vm3, %v23298_v27 }
 0x75a   : > { %13338 = vmatmul.mubr.msk.f32.gmra.mrb[26].mxu1 %vm3431_vm3, %v19245_v7  ;;  %v23304_v7 = vld [vmem:[#allocation88_spill] sm:$0xff] }
 0x75b   : > { %13340 = vmatprep.mubr.msk.f32.mxu1 %vm3431_vm3, %v19252_v26  ;;  %13094 = vmatmul.mubr.msk.f32.gmra.mrb[112].mxu0 %vm3431_vm3, %v23299_v46  ;;  %v23305_v26 = vld [vmem:[#allocation76_spill] sm:$0xff] }
 0x75c   : > { %13096 = vmatprep.mubr.msk.f32.mxu0 %vm3431_vm3, %v23300_v39 }
 0x75e   : > { %13341 = vmatmul.mubr.msk.f32.gmra.mrb[28].mxu1 %vm3431_vm3, %v23301_v53 }
 0x75f   : > { %13343 = vmatprep.mubr.msk.f32.mxu1 %vm3431_vm3, %v19267_v49  ;;  %13097 = vmatmul.mubr.msk.f32.gmra.mrb[114].mxu0 %vm3431_vm3, %v23302_v47  ;;  %v23307_v49 = vld [vmem:[#allocation82_spill] sm:$0xff] }
 0x760   : > { %13099 = vmatprep.mubr.msk.f32.mxu0 %vm3431_vm3, %v23303_v18 }
 0x762   : > { %13344 = vmatmul.mubr.msk.f32.gmra.mrb[30].mxu1 %vm3431_vm3, %v23304_v7 }
 0x763   : > { %13346 = vmatprep.mubr.msk.f32.mxu1 %vm3431_vm3, %v19281_v36  ;;  %13100 = vmatmul.mubr.msk.f32.gmra.mrb[116].mxu0 %vm3431_vm3, %v23305_v26  ;;  %v5619_v36 = vrot.slane %v23264_v38, 1  ;;  %v23312_v38 = vrot.slane %v18446_v58, 1  ;;  %v23317_v58 = vld [vmem:[#allocation74_spill] sm:$0xff] }
 0x764   : > { %13102 = vmatprep.mubr.msk.f32.mxu0 %vm3431_vm3, %v23306_v19 }
 0x765   : > { %v5621_v0 = vsel %vm801_vm2, %v5619_v36, %v23312_v38 }
 0x766   : > { %13347 = vmatmul.mubr.msk.f32.gmra.mrb[32].mxu1 %vm3431_vm3, %v19288_v4  ;;  %v23310_v4 = vld [vmem:[#allocation39_spill] sm:$0xff] }
 0x767   : > { %13349 = vmatprep.mubr.msk.f32.mxu1 %vm3431_vm3, %v19297_v30  ;;  %13103 = vmatmul.mubr.msk.f32.gmra.mrb[118].mxu0 %vm3431_vm3, %v23307_v49  ;;  %v23311_v30 = vrot.slane %v23103_v21, 1  ;;  %v23316_v21 = vld [vmem:[#allocation31_spill] sm:$0xff] }
 0x768   : > { %13105 = vmatprep.mubr.msk.f32.mxu0 %vm3431_vm3, %v23308_v52 }
 0x769   : > { %v5656_v55 = vsel %vm801_vm2, %v23311_v30, 0.0 }
 0x76a   : > { %13350 = vmatmul.mubr.msk.f32.gmra.mrb[34].mxu1 %vm3431_vm3, %v19304_v20  ;;  %v23313_v20 = vld [vmem:[#allocation40_spill] sm:$0xff] }
 0x76b   : > { %13352 = vmatprep.mubr.msk.f32.mxu1 %vm3431_vm3, %v19311_v51  ;;  %13106 = vmatmul.mubr.msk.f32.gmra.mrb[120].mxu0 %vm3431_vm3, %v23309_v1  ;;  %v23314_v51 = vld [vmem:[#allocation32_spill] sm:$0xff] }
 0x76c   : > { %13108 = vmatprep.mubr.msk.f32.mxu0 %vm3431_vm3, %v23310_v4 }
 0x76e   : > { %13353 = vmatmul.mubr.msk.f32.gmra.mrb[36].mxu1 %vm3431_vm3, %v5656_v55 }
 0x76f   : > { %13355 = vmatprep.mubr.msk.f32.mxu1 %vm3431_vm3, %v5621_v0  ;;  %13109 = vmatmul.mubr.msk.f32.gmra.mrb[122].mxu0 %vm3431_vm3, %v23313_v20 }
 0x770   : > { %13111 = vmatprep.mubr.msk.f32.mxu0 %vm3431_vm3, %v23314_v51 }
 0x772   : > { %13356 = vmatmul.mubr.msk.f32.gmra.mrb[38].mxu1 %vm3431_vm3, %v23315_v44 }
 0x773   : > { %13358 = vmatprep.mubr.msk.f32.mxu1 %vm3431_vm3, %v19328_v13  ;;  %13112 = vmatmul.mubr.msk.f32.gmra.mrb[124].mxu0 %vm3431_vm3, %v23316_v21  ;;  %v23318_v13 = vld [vmem:[#allocation41_spill] sm:$0xff] }
 0x774   : > { %13114 = vmatprep.mubr.msk.f32.mxu0 %vm3431_vm3, %v23233_v61  ;;  %v23319_v61 = vld [vmem:[#allocation42_spill] sm:$0xff] }
 0x776   : > { %13359 = vmatmul.mubr.msk.f32.gmra.mrb[40].mxu1 %vm3431_vm3, %v23317_v58 }
 0x777   : > { %13361 = vmatprep.mubr.msk.f32.mxu1 %vm3431_vm3, %v19344_v45  ;;  %13115 = vmatmul.mubr.msk.f32.gmra.mrb[126].mxu0 %vm3431_vm3, %v23234_v43  ;;  %v23321_v45 = vld [vmem:[#allocation77_spill] sm:$0xff] }
 0x778   : > { %13117 = vmatprep.mubr.msk.f32.mxu0 %vm3431_vm3, %v23237_v37  ;;  %v23322_v43 = vld [vmem:[#allocation85_spill] sm:$0xff] }
 0x779   : > { %v23323_v37 = vld [vmem:[#allocation45_spill] sm:$0xff] }
 0x77a   : > { %13362 = vmatmul.mubr.msk.f32.gmra.mrb[42].mxu1 %vm3431_vm3, %v19351_v62  ;;  %v23324_v62 = vld [vmem:[#allocation95_spill] sm:$0xff] }
 0x77b   : > { %13364 = vmatprep.mubr.msk.f32.mxu1 %vm3431_vm3, %v19358_v33  ;;  %13118 = vmatmul.mubr.msk.f32.gmra.mrb[128].mxu0 %vm3431_vm3, %v23318_v13  ;;  %v23325_v33 = vld [vmem:[#allocation50_spill] sm:$0xff] }
 0x77c   : > { %13120 = vmatprep.mubr.msk.f32.mxu0 %vm3431_vm3, %v23319_v61 }
 0x77e   : > { %13365 = vmatmul.mubr.msk.f32.gmra.mrb[44].mxu1 %vm3431_vm3, %v23320_v24 }
 0x77f   : > { %13367 = vmatprep.mubr.msk.f32.mxu1 %vm3431_vm3, %v23321_v45  ;;  %13121 = vmatmul.mubr.msk.f32.gmra.mrb[130].mxu0 %vm3431_vm3, %v23322_v43 }
 0x780   : > { %13123 = vmatprep.mubr.msk.f32.mxu0 %vm3431_vm3, %v23323_v37 }
 0x782   : > { %13368 = vmatmul.mubr.msk.f32.gmra.mrb[46].mxu1 %vm3431_vm3, %v23324_v62 }
 0x783   : > { %13370 = vmatprep.mubr.msk.f32.mxu1 %vm3431_vm3, %v23325_v33  ;;  %13124 = vmatmul.mubr.msk.f32.gmra.mrb[132].mxu0 %vm3431_vm3, %v23326_v10 }
 0x784   : > { %13126 = vmatprep.mubr.msk.f32.mxu0 %vm3431_vm3, %v23327_v25 }
 0x786   : > { %13371 = vmatmul.mubr.msk.f32.gmra.mrb[48].mxu1 %vm3431_vm3, %v5657_v6 }
 0x787   : > { %13127 = vmatmul.mubr.msk.f32.gmra.mrb[134].mxu0 %vm3431_vm3, %v23330_v16 }
 0x788   : > { %13129 = vmatprep.mubr.msk.f32.mxu0 %vm3431_vm3, %v23331_v50 }
 0x78a   : > { %v19738_v56 = vpop.f32.mrb[50].mxu1 }
 0x78b   : > { %13130 = vmatmul.mubr.msk.f32.gmra.mrb[136].mxu0 %vm3431_vm3, %v23332_v59  ;;  %v19740_v48 = vpop.f32.mrb[51].mxu1 }
 0x78c   : > { %13132 = vmatprep.mubr.msk.f32.mxu0 %vm3431_vm3, %v23333_v9 }
 0x78e   : > { %v19742_v29 = vpop.f32.mrb[52].mxu1 }
 0x78f   : > { %13133 = vmatmul.mubr.msk.f32.gmra.mrb[138].mxu0 %vm3431_vm3, %v23334_v12  ;;  %v19744_v3 = vpop.f32.mrb[53].mxu1 }
 0x790   : > { %13135 = vmatprep.mubr.msk.f32.mxu0 %vm3431_vm3, %v23335_v23 }
 0x792   : > { %v19746_v17 = vpop.f32.mrb[54].mxu1 }
 0x793   : > { %13136 = vmatmul.mubr.msk.f32.gmra.mrb[140].mxu0 %vm3431_vm3, %v23336_v41  ;;  %v19748_v31 = vpop.f32.mrb[55].mxu1 }
 0x794   : > { %13138 = vmatprep.mubr.msk.f32.mxu0 %vm3431_vm3, %v23337_v8 }
 0x796   : > { %v19750_v34 = vpop.f32.mrb[56].mxu1 }
 0x797   : > { %13139 = vmatmul.mubr.msk.f32.gmra.mrb[142].mxu0 %vm3431_vm3, %v23338_v42  ;;  %v19752_v28 = vpop.f32.mrb[57].mxu1 }
 0x798   : > { %13141 = vmatprep.mubr.msk.f32.mxu0 %vm3431_vm3, %v23269_v5 }
 0x79a   : > { %v19754_v5 = vpop.f32.mrb[58].mxu1 }
 0x79b   : > { %13142 = vmatmul.mubr.msk.f32.gmra.mrb[144].mxu0 %vm3431_vm3, %v23339_v60  ;;  %v19756_v40 = vpop.f32.mrb[59].mxu1 }
 0x7a0   : > { %v19758_v32 = vpop.f32.mrb[60].mxu1 }
 0x7a1   : > { %v19760_v57 = vpop.f32.mrb[61].mxu1 }
 0x7a5   : > { %v19762_v35 = vpop.f32.mrb[146].mxu0  ;;  %v19766_v22 = vpop.f32.mrb[62].mxu1 }
 0x7a6   : > { %v19764_v2 = vpop.f32.mrb[147].mxu0  ;;  %v19768_v63 = vpop.f32.mrb[63].mxu1 }
 0x7a9   : > { %v19770_v15 = vpop.f32.mrb[148].mxu0  ;;  %v19774_v27 = vpop.f32.mrb[64].mxu1 }
 0x7aa   : > { %v19772_v11 = vpop.f32.mrb[149].mxu0  ;;  %v19776_v46 = vpop.f32.mrb[65].mxu1 }
 0x7ad   : > { %v19778_v39 = vpop.f32.mrb[150].mxu0  ;;  %v19782_v47 = vpop.f32.mrb[66].mxu1 }
 0x7ae   : > { %v19780_v53 = vpop.f32.mrb[151].mxu0  ;;  %v19784_v18 = vpop.f32.mrb[67].mxu1 }
 0x7b1   : > { %v19786_v7 = vpop.f32.mrb[152].mxu0  ;;  %v19790_v19 = vpop.f32.mrb[68].mxu1 }
 0x7b2   : > { %v19788_v26 = vpop.f32.mrb[153].mxu0  ;;  %v19792_v49 = vpop.f32.mrb[69].mxu1 }
 0x7b5   : > { %v19794_v52 = vpop.f32.mrb[154].mxu0 }
 0x7b6   : > { %v19796_v36 = vpop.f32.mrb[155].mxu0  ;;  %v19798_v1 = vpop.f32.mrb[70].mxu1 }
 0x7b7   : > { %v19800_v4 = vpop.f32.mrb[71].mxu1 }
 0x7b9   : > { %v19802_v30 = vpop.f32.mrb[156].mxu0 }
 0x7ba   : > { %v19804_v55 = vpop.f32.mrb[157].mxu0 }
 0x7bb   : > { %v19806_v38 = vpop.f32.mrb[72].mxu1 }
 0x7bc   : > { %v19808_v0 = vpop.f32.mrb[73].mxu1 }
 0x7c7   : > { %v19810_v20 = vpop.f32.mrb[158].mxu0 }
 0x7c8   : > { %v19812_v51 = vpop.f32.mrb[159].mxu0 }
 0x7c9   : > { %v19814_v44 = vpop.f32.mrb[74].mxu1 }
 0x7ca   : > { %v19816_v21 = vpop.f32.mrb[75].mxu1 }
 0x7cb   : > { %23340 = vst [vmem:[#allocation87_spill] sm:$0xff] %v19816_v21 }
 0x7ce   : > { %v19818_v58 = vpop.f32.mrb[160].mxu0 }
 0x7cf   : > { %v19820_v13 = vpop.f32.mrb[161].mxu0 }
 0x7d1   : > { %v19822_v61 = vpop.f32.mrb[76].mxu1 }
 0x7d2   : > { %23341 = vst [vmem:[#allocation94_spill] sm:$0xff] %v19822_v61  ;;  %v19824_v24 = vpop.f32.mrb[77].mxu1  ;;  %v19826_v45 = vpop.f32.mrb[162].mxu0 }
 0x7d3   : > { %23342 = vst [vmem:[#allocation54_spill] sm:$0xff] %v19824_v24  ;;  %v19828_v43 = vpop.f32.mrb[163].mxu0 }
 0x7d5   : > { %v19830_v37 = vpop.f32.mrb[78].mxu1 }
 0x7d6   : > { %23343 = vst [vmem:[#allocation34_spill] sm:$0xff] %v19830_v37  ;;  %v19832_v62 = vpop.f32.mrb[79].mxu1  ;;  %v19834_v33 = vpop.f32.mrb[164].mxu0 }
 0x7d7   : > { %23344 = vst [vmem:[#allocation36_spill] sm:$0xff] %v19832_v62  ;;  %v19836_v10 = vpop.f32.mrb[165].mxu0 }
 0x7d9   : > { %v19838_v25 = vpop.f32.mrb[80].mxu1 }
 0x7da   : > { %23345 = vst [vmem:[#allocation55_spill] sm:$0xff] %v19838_v25  ;;  %v19840_v14 = vpop.f32.mrb[81].mxu1  ;;  %v19842_v54 = vpop.f32.mrb[166].mxu0 }
 0x7db   : > { %23346 = vst [vmem:[#allocation96_spill] sm:$0xff] %v19840_v14  ;;  %v19844_v6 = vpop.f32.mrb[167].mxu0 }
 0x7dd   : > { %v19846_v16 = vpop.f32.mrb[82].mxu1 }
 0x7de   : > { %23347 = vst [vmem:[#allocation38_spill] sm:$0xff] %v19846_v16  ;;  %v19848_v50 = vpop.f32.mrb[83].mxu1  ;;  %v19850_v59 = vpop.f32.mrb[168].mxu0 }
 0x7df   : > { %23348 = vst [vmem:[#allocation58_spill] sm:$0xff] %v19848_v50  ;;  %v19852_v9 = vpop.f32.mrb[169].mxu0 }
 0x7e1   : > { %v19854_v12 = vpop.f32.mrb[84].mxu1 }
 0x7e2   : > { %23349 = vst [vmem:[#allocation29_spill] sm:$0xff] %v19854_v12  ;;  %v19856_v23 = vpop.f32.mrb[85].mxu1  ;;  %v19858_v41 = vpop.f32.mrb[170].mxu0 }
 0x7e3   : > { %23350 = vst [vmem:[#allocation99_spill] sm:$0xff] %v19856_v23  ;;  %v19860_v8 = vpop.f32.mrb[171].mxu0 }
 0x7e4   : > { %23351 = vst [vmem:[#allocation59_spill] sm:$0xff] %v19860_v8 }
 0x7e5   : > { %v19862_v42 = vpop.f32.mrb[86].mxu1 }
 0x7e6   : > { %23352 = vst [vmem:[#allocation98_spill] sm:$0xff] %v19862_v42  ;;  %v19864_v60 = vpop.f32.mrb[87].mxu1  ;;  %v19866_v14 = vpop.f32.mrb[172].mxu0 }
 0x7e7   : > { %23353 = vst [vmem:[#allocation61_spill] sm:$0xff] %v19864_v60  ;;  %23354 = vst [vmem:[#allocation63_spill] sm:$0xff] %v19866_v14  ;;  %v19868_v16 = vpop.f32.mrb[173].mxu0 }
 0x7e8   : > { %23355 = vst [vmem:[#allocation64_spill] sm:$0xff] %v19868_v16 }
 0x7e9   : > { %v19870_v50 = vpop.f32.mrb[88].mxu1 }
 0x7ea   : > { %23356 = vst [vmem:[#allocation52_spill] sm:$0xff] %v19870_v50  ;;  %v19872_v25 = vpop.f32.mrb[89].mxu1  ;;  %v19874_v62 = vpop.f32.mrb[174].mxu0 }
 0x7eb   : > { %23357 = vst [vmem:[#allocation51_spill] sm:$0xff] %v19872_v25  ;;  %23358 = vst [vmem:[#allocation84_spill] sm:$0xff] %v19874_v62  ;;  %v19876_v12 = vpop.f32.mrb[175].mxu0 }
 0x7ec   : > { %23359 = vst [vmem:[#allocation73_spill] sm:$0xff] %v19876_v12 }
 0x7ed   : > { %v19878_v23 = vpop.f32.mrb[90].mxu1 }
 0x7ee   : > { %23360 = vst [vmem:[#allocation83_spill] sm:$0xff] %v19878_v23  ;;  %v19880_v37 = vpop.f32.mrb[91].mxu1  ;;  %v19882_v24 = vpop.f32.mrb[176].mxu0 }
 0x7ef   : > { %23361 = vst [vmem:[#allocation72_spill] sm:$0xff] %v19880_v37  ;;  %23362 = vst [vmem:[#allocation75_spill] sm:$0xff] %v19882_v24  ;;  %v19884_v42 = vpop.f32.mrb[177].mxu0 }
 0x7f0   : > { %23363 = vst [vmem:[#allocation49_spill] sm:$0xff] %v19884_v42 }
 0x7f1   : > { %v19886_v60 = vpop.f32.mrb[92].mxu1 }
 0x7f2   : > { %23364 = vst [vmem:[#allocation101_spill] sm:$0xff] %v19886_v60  ;;  %v19888_v61 = vpop.f32.mrb[93].mxu1  ;;  %v19890_v16 = vpop.f32.mrb[178].mxu0 }
 0x7f3   : > { %23365 = vst [vmem:[#allocation81_spill] sm:$0xff] %v19888_v61  ;;  %23366 = vst [vmem:[#allocation103_spill] sm:$0xff] %v19890_v16  ;;  %v19892_v50 = vpop.f32.mrb[179].mxu0 }
 0x7f4   : > { %23367 = vst [vmem:[#allocation80_spill] sm:$0xff] %v19892_v50 }
 0x7f5   : > { %v19894_v25 = vpop.f32.mrb[94].mxu1 }
 0x7f6   : > { %23368 = vst [vmem:[#allocation102_spill] sm:$0xff] %v19894_v25  ;;  %v19896_v62 = vpop.f32.mrb[95].mxu1  ;;  %v19898_v12 = vpop.f32.mrb[180].mxu0 }
 0x7f7   : > { %23369 = vst [vmem:[#allocation66_spill] sm:$0xff] %v19896_v62  ;;  %23370 = vst [vmem:[#allocation104_spill] sm:$0xff] %v19898_v12  ;;  %v19900_v23 = vpop.f32.mrb[181].mxu0 }
 0x7f8   : > { %23371 = vst [vmem:[#allocation105_spill] sm:$0xff] %v19900_v23 }
 0x7f9   : > { %v19902_v37 = vpop.f32.mrb[96].mxu1 }
 0x7fa   : > { %23372 = vst [vmem:[#allocation106_spill] sm:$0xff] %v19902_v37  ;;  %v19904_v24 = vpop.f32.mrb[97].mxu1  ;;  %v19906_v42 = vpop.f32.mrb[182].mxu0 }
 0x7fb   : > { %23373 = vst [vmem:[#allocation107_spill] sm:$0xff] %v19904_v24  ;;  %23374 = vst [vmem:[#allocation108_spill] sm:$0xff] %v19906_v42  ;;  %v19908_v60 = vpop.f32.mrb[183].mxu0 }
 0x7fc   : > { %23375 = vst [vmem:[#allocation109_spill] sm:$0xff] %v19908_v60 }
 0x7fd   : > { %v19910_v61 = vpop.f32.mrb[98].mxu1 }
 0x7fe   : > { %23376 = vst [vmem:[#allocation27_spill] sm:$0xff] %v19910_v61  ;;  %v19912_v16 = vpop.f32.mrb[99].mxu1  ;;  %v19914_v50 = vpop.f32.mrb[184].mxu0 }
 0x7ff   : > { %23377 = vst [vmem:[#allocation65_spill] sm:$0xff] %v19912_v16  ;;  %23378 = vst [vmem:[#allocation30_spill] sm:$0xff] %v19914_v50  ;;  %v19916_v25 = vpop.f32.mrb[185].mxu0 }
 0x800   : > { %23379 = vst [vmem:[#allocation60_spill] sm:$0xff] %v19916_v25 }
 0x801   : > { %v13306_v62 = vpop.f32.mrb[4].mxu1 }
 0x802   : > { %v19919_v12 = vadd.f32 %v13306_v62, %v19762_v35  ;;  %v7682_v23 = vpop.f32.mrb[5].mxu1  ;;  %v19921_v37 = vpop.f32.mrb[186].mxu0 }
 0x803   : > { %23380 = vst [vmem:[#allocation67_spill] sm:$0xff] %v19921_v37  ;;  %v19924_v24 = vadd.f32 %v7682_v23, %v19764_v2  ;;  %v19926_v42 = vpop.f32.mrb[187].mxu0 }
 0x804   : > { %23381 = vst [vmem:[#allocation57_spill] sm:$0xff] %v19926_v42  ;;  %v5159_v42 = vld [vmem:[#allocation10] sm:$0xff] }
 0x805   : > { %v13309_v60 = vpop.f32.mrb[6].mxu1 }
 0x806   : > { %v19929_v61 = vadd.f32 %v13309_v60, %v19770_v15  ;;  %v7692_v16 = vpop.f32.mrb[7].mxu1  ;;  %v19931_v50 = vpop.f32.mrb[188].mxu0 }
 0x807   : > { %23382 = vst [vmem:[#allocation68_spill] sm:$0xff] %v19931_v50  ;;  %v19934_v25 = vadd.f32 %v7692_v16, %v19772_v11  ;;  %v19936_v35 = vpop.f32.mrb[189].mxu0  ;;  %v23386_v50 = vld [vmem:[#allocation24_spill] sm:$0xff] }
 0x808   : > { %23383 = vst [vmem:[#allocation62_spill] sm:$0xff] %v19936_v35  ;;  %v19949_v21 = vrot.slane %v5159_v42, %v23386_v50 }
 0x809   : > { %v13312_v62 = vpop.f32.mrb[8].mxu1 }
 0x80a   : > { %v19939_v37 = vadd.f32 %v13312_v62, %v19778_v39  ;;  %v7702_v2 = vpop.f32.mrb[9].mxu1  ;;  %v19941_v23 = vpop.f32.mrb[190].mxu0 }
 0x80b   : > { %23384 = vst [vmem:[#allocation69_spill] sm:$0xff] %v19941_v23  ;;  %v19944_v14 = vadd.f32 %v7702_v2, %v19780_v53  ;;  %v19946_v15 = vpop.f32.mrb[191].mxu0 }
 0x80c   : > { %23385 = vst [vmem:[#allocation25_spill] sm:$0xff] %v19946_v15 }
 0x80d   : > { %v13315_v60 = vpop.f32.mrb[10].mxu1 }
 0x80e   : > { %v19952_v11 = vadd.f32 %v13315_v60, %v19786_v7  ;;  %v7712_v16 = vpop.f32.mrb[11].mxu1  ;;  %v13071_v35 = vpop.f32.mrb[96].mxu0 }
 0x80f   : > { %v19955_v39 = vadd.f32 %v7712_v16, %v19788_v26  ;;  %v13595_v62 = vadd.f32 %v19738_v56, %v13071_v35  ;;  %v6678_v23 = vpop.f32.mrb[97].mxu0 }
 0x810   : > { %v13596_v53 = vadd.f32 %v19740_v48, %v6678_v23 }
 0x811   : > { %v13318_v2 = vpop.f32.mrb[12].mxu1  ;;  %v19960_v15 = vadd.f32 %v13595_v62, %v19949_v21 }
 0x812   : > { %v19963_v42 = vadd.f32 %v13318_v2, %v19794_v52  ;;  %v7722_v50 = vpop.f32.mrb[13].mxu1  ;;  %v19966_v7 = vadd.f32 %v13596_v53, %v19949_v21  ;;  %v13074_v60 = vpop.f32.mrb[98].mxu0 }
 0x813   : > { %23387 = vst [vmem:[#allocation70_spill] sm:$0xff] %v19960_v15  ;;  %v19969_v26 = vadd.f32 %v7722_v50, %v19796_v36  ;;  %v13597_v56 = vadd.f32 %v19742_v29, %v13074_v60  ;;  %v6688_v35 = vpop.f32.mrb[99].mxu0  ;;  %v8244_v48 = vmul.f32 %v19960_v15, %v19960_v15 }
 0x814   : > { %23388 = vst [vmem:[#allocation26_spill] sm:$0xff] %v19966_v7  ;;  %v8243_v23 = vmul.f32 %v19966_v7, %v19966_v7  ;;  %v13598_v52 = vadd.f32 %v19744_v3, %v6688_v35  ;;  %v8107_v29 = vadd.f32 %v19960_v15, %v19966_v7 }
 0x815   : > { %23389 = vst [vmem:[#allocation48_spill] sm:$0xff] %v19969_v26  ;;  %v13321_v16 = vpop.f32.mrb[14].mxu1  ;;  %v19978_v62 = vadd.f32 %v13597_v56, %v19949_v21 }
 0x816   : > { %v19981_v53 = vadd.f32 %v13321_v16, %v19802_v30  ;;  %v7732_v36 = vpop.f32.mrb[15].mxu1  ;;  %v19986_v50 = vadd.f32 %v13598_v52, %v19949_v21  ;;  %v13077_v2 = vpop.f32.mrb[100].mxu0  ;;  %v8339_v35 = vadd.f32 %v8244_v48, %v8243_v23 }
 0x817   : > { %23390 = vst [vmem:[#allocation71_spill] sm:$0xff] %v19978_v62  ;;  %v13656_v60 = vadd.f32 %v7732_v36, %v19804_v55  ;;  %v13599_v26 = vadd.f32 %v19746_v17, %v13077_v2  ;;  %v6698_v3 = vpop.f32.mrb[101].mxu0  ;;  %v8246_v15 = vmul.f32 %v19978_v62, %v19978_v62 }
 0x818   : > { %23391 = vst [vmem:[#allocation28_spill] sm:$0xff] %v19986_v50  ;;  %v8108_v56 = vadd.f32 %v8107_v29, %v19986_v50  ;;  %v8245_v30 = vmul.f32 %v19986_v50, %v19986_v50  ;;  %v13600_v16 = vadd.f32 %v19748_v31, %v6698_v3 }
 0x819   : > { %v13324_v8 = vpop.f32.mrb[16].mxu1  ;;  %v20000_v17 = vadd.f32 %v13599_v26, %v19949_v21 }
 0x81a   : > { %v19997_v52 = vadd.f32 %v13324_v8, %v19810_v20  ;;  %v7742_v7 = vpop.f32.mrb[17].mxu1  ;;  %v8340_v55 = vadd.f32 %v8339_v35, %v8245_v30  ;;  %v20003_v48 = vadd.f32 %v13600_v16, %v19949_v21  ;;  %v8109_v23 = vadd.f32 %v8108_v56, %v19978_v62  ;;  %v13080_v36 = vpop.f32.mrb[102].mxu0 }
 0x81b   : > { %23392 = vst [vmem:[#allocation88_spill] sm:$0xff] %v20000_v17  ;;  %v13601_v31 = vadd.f32 %v19750_v34, %v13080_v36  ;;  %v6708_v29 = vpop.f32.mrb[103].mxu0  ;;  %v13658_v26 = vadd.f32 %v7742_v7, %v19812_v51  ;;  %v8248_v16 = vmul.f32 %v20000_v17, %v20000_v17 }
 0x81c   : > { %23393 = vst [vmem:[#allocation76_spill] sm:$0xff] %v20003_v48  ;;  %v8110_v2 = vadd.f32 %v8109_v23, %v20003_v48  ;;  %v8247_v20 = vmul.f32 %v20003_v48, %v20003_v48  ;;  %v8341_v8 = vadd.f32 %v8340_v55, %v8246_v15  ;;  %v13602_v3 = vadd.f32 %v19752_v28, %v6708_v29 }
 0x81d   : > { %v13327_v35 = vpop.f32.mrb[18].mxu1 }
 0x81e   : > { %v7752_v30 = vpop.f32.mrb[19].mxu1  ;;  %v8342_v56 = vadd.f32 %v8341_v8, %v8247_v20  ;;  %v20015_v62 = vadd.f32 %v13602_v3, %v19949_v21  ;;  %v13083_v34 = vpop.f32.mrb[104].mxu0  ;;  %v20018_v23 = vadd.f32 %v13327_v35, %v19818_v58  ;;  %v8111_v51 = vadd.f32 %v8110_v2, %v20000_v17 }
 0x81f   : > { %v13603_v36 = vadd.f32 %v19754_v5, %v13083_v34  ;;  %v6718_v15 = vpop.f32.mrb[105].mxu0  ;;  %v20022_v28 = vadd.f32 %v7752_v30, %v19820_v13  ;;  %v20029_v3 = vadd.f32 %v13601_v31, %v19949_v21 }
 0x820   : > { %23394 = vst [vmem:[#allocation78_spill] sm:$0xff] %v20015_v62  ;;  %v8249_v7 = vmul.f32 %v20015_v62, %v20015_v62  ;;  %v8343_v55 = vadd.f32 %v8342_v56, %v8248_v16  ;;  %v13604_v29 = vadd.f32 %v19756_v40, %v6718_v15  ;;  %v8112_v13 = vadd.f32 %v8111_v51, %v20015_v62 }
 0x821   : > { %v13330_v20 = vpop.f32.mrb[20].mxu1  ;;  %23395 = vst [vmem:[#allocation82_spill] sm:$0xff] %v20029_v3  ;;  %v8250_v40 = vmul.f32 %v20029_v3, %v20029_v3 }
 0x822   : > { %v7762_v8 = vpop.f32.mrb[21].mxu1  ;;  %v13086_v58 = vpop.f32.mrb[106].mxu0  ;;  %v8344_v30 = vadd.f32 %v8343_v55, %v8249_v7  ;;  %v20034_v2 = vadd.f32 %v13604_v29, %v19949_v21  ;;  %v20040_v31 = vadd.f32 %v13330_v20, %v19826_v45  ;;  %v8113_v51 = vadd.f32 %v8112_v13, %v20029_v3 }
 0x823   : > { %v13605_v5 = vadd.f32 %v19758_v32, %v13086_v58  ;;  %v6728_v35 = vpop.f32.mrb[107].mxu0  ;;  %v20054_v45 = vadd.f32 %v13656_v60, %v19949_v21  ;;  %v20062_v13 = vadd.f32 %v13603_v36, %v19949_v21 }
 0x824   : > { %23396 = vst [vmem:[#allocation35_spill] sm:$0xff] %v20034_v2  ;;  %v13606_v34 = vadd.f32 %v19760_v57, %v6728_v35  ;;  %v8251_v7 = vmul.f32 %v20034_v2, %v20034_v2  ;;  %v8345_v55 = vadd.f32 %v8344_v30, %v8250_v40  ;;  %v20051_v35 = vadd.f32 %v19981_v53, %v19949_v21 }
 0x825   : > { %v13333_v16 = vpop.f32.mrb[22].mxu1  ;;  %23398 = vst [vmem:[#allocation39_spill] sm:$0xff] %v20054_v45  ;;  %23399 = vst [vmem:[#allocation40_spill] sm:$0xff] %v20062_v13 }
 0x826   : > { %v7772_v56 = vpop.f32.mrb[23].mxu1  ;;  %v13089_v15 = vpop.f32.mrb[108].mxu0  ;;  %23397 = vst [vmem:[#allocation37_spill] sm:$0xff] %v20051_v35  ;;  %v8346_v60 = vadd.f32 %v8345_v55, %v8251_v7  ;;  %v8304_v36 = vmul.f32 %v20051_v35, %v20051_v35  ;;  %v20086_v7 = vadd.f32 %v13333_v16, %v19834_v33 }
 0x827   : > { %v13607_v32 = vadd.f32 %v19766_v22, %v13089_v15  ;;  %v6738_v58 = vpop.f32.mrb[109].mxu0  ;;  %v20057_v22 = vadd.f32 %v7762_v8, %v19828_v43  ;;  %v8114_v15 = vadd.f32 %v8113_v51, %v20034_v2  ;;  %v8303_v8 = vmul.f32 %v20054_v45, %v20054_v45 }
 0x828   : > { %v13608_v57 = vadd.f32 %v19768_v63, %v6738_v58  ;;  %v20065_v63 = vadd.f32 %v13658_v26, %v19949_v21  ;;  %v20072_v58 = vadd.f32 %v13606_v34, %v19949_v21  ;;  %v8192_v34 = vadd.f32 %v20051_v35, %v20054_v45 }
 0x829   : > { %v20047_v29 = vpop.f32.mrb[24].mxu1  ;;  %v8424_v16 = vadd.f32 %v8304_v36, %v8303_v8  ;;  %v20105_v35 = vadd.f32 %v19997_v52, %v19949_v21 }
 0x82a   : > { %v20059_v20 = vpop.f32.mrb[25].mxu1  ;;  %v13092_v30 = vpop.f32.mrb[110].mxu0  ;;  %23400 = vst [vmem:[#allocation32_spill] sm:$0xff] %v20065_v63  ;;  %23401 = vst [vmem:[#allocation33_spill] sm:$0xff] %v20072_v58  ;;  %v8305_v55 = vmul.f32 %v20065_v63, %v20065_v63 }
 0x82b   : > { %v20068_v40 = vadd.f32 %v19774_v27, %v13092_v30  ;;  %v6748_v53 = vpop.f32.mrb[111].mxu0  ;;  %v8252_v27 = vmul.f32 %v20062_v13, %v20062_v13  ;;  %23402 = vst [vmem:[#allocation31_spill] sm:$0xff] %v20105_v35 }
 0x82c   : > { %v13610_v26 = vadd.f32 %v19776_v46, %v6748_v53  ;;  %v8115_v46 = vadd.f32 %v8114_v15, %v20062_v13  ;;  %v8253_v53 = vmul.f32 %v20072_v58, %v20072_v58  ;;  %v20114_v15 = vadd.f32 %v19919_v12, %v19949_v21 }
 0x82d   : > { %v20074_v43 = vpop.f32.mrb[26].mxu1  ;;  %v8347_v62 = vadd.f32 %v8346_v60, %v8252_v27  ;;  %v8193_v60 = vadd.f32 %v8192_v34, %v20065_v63  ;;  %v8425_v36 = vadd.f32 %v8424_v16, %v8305_v55  ;;  %v20137_v34 = vadd.f32 %v13607_v32, %v19949_v21 }
 0x82e   : > { %v20081_v3 = vpop.f32.mrb[27].mxu1  ;;  %v13095_v51 = vpop.f32.mrb[112].mxu0  ;;  %23403 = vst [vmem:[#allocation74_spill] sm:$0xff] %v20114_v15  ;;  %v8116_v8 = vadd.f32 %v8115_v46, %v20072_v58  ;;  %v20140_v55 = vadd.f32 %v13608_v57, %v19949_v21  ;;  %v20165_v58 = vadd.f32 %v19929_v61, %v19949_v21  ;;  %v20183_v61 = vadd.f32 %v20059_v20, %v19844_v6 }
 0x82f   : > { %v20093_v30 = vadd.f32 %v19782_v47, %v13095_v51  ;;  %v6758_v2 = vpop.f32.mrb[113].mxu0  ;;  %v20108_v47 = vadd.f32 %v7772_v56, %v19836_v10  ;;  %v20126_v10 = vadd.f32 %v20022_v28, %v19949_v21  ;;  %v8348_v27 = vadd.f32 %v8347_v62, %v8253_v53  ;;  %23407 = vst [vmem:[#allocation77_spill] sm:$0xff] %v20137_v34 }
 0x830   : > { %v20099_v17 = vadd.f32 %v19784_v18, %v6758_v2  ;;  %v20118_v18 = vadd.f32 %v19924_v24, %v19949_v21  ;;  %v20121_v2 = vadd.f32 %v13605_v5, %v19949_v21  ;;  %v8306_v5 = vmul.f32 %v20105_v35, %v20105_v35  ;;  %23408 = vst [vmem:[#allocation85_spill] sm:$0xff] %v20140_v55 }
 0x831   : > { %v20101_v33 = vpop.f32.mrb[28].mxu1  ;;  %23406 = vst [vmem:[#allocation79_spill] sm:$0xff] %v20126_v10  ;;  %v8194_v53 = vadd.f32 %v8193_v60, %v20105_v35  ;;  %v8307_v57 = vmul.f32 %v20126_v10, %v20126_v10  ;;  %23410 = vst [vmem:[#allocation95_spill] sm:$0xff] %v20165_v58  ;;  %v20170_v60 = vadd.f32 %v20047_v29, %v19842_v54 }
 0x832   : > { %v20110_v51 = vpop.f32.mrb[29].mxu1  ;;  %23404 = vst [vmem:[#allocation41_spill] sm:$0xff] %v20118_v18  ;;  %23405 = vst [vmem:[#allocation42_spill] sm:$0xff] %v20121_v2  ;;  %v13098_v52 = vpop.f32.mrb[114].mxu0  ;;  %v20150_v62 = vmul.f32 %v20118_v18, %v20118_v18  ;;  %v8254_v46 = vmul.f32 %v20121_v2, %v20121_v2  ;;  %v8426_v16 = vadd.f32 %v8425_v36, %v8306_v5 }
 0x833   : > { %v20129_v56 = vadd.f32 %v19790_v19, %v13098_v52  ;;  %v6768_v12 = vpop.f32.mrb[115].mxu0  ;;  %v20146_v19 = vmul.f32 %v20114_v15, %v20114_v15  ;;  %v20158_v52 = vadd.f32 %v13610_v26, %v19949_v21  ;;  %v8117_v13 = vadd.f32 %v8116_v8, %v20121_v2 }
 0x834   : > { %v20161_v63 = vadd.f32 %v19792_v49, %v6768_v12  ;;  %v8349_v48 = vadd.f32 %v8348_v27, %v8254_v46  ;;  %v8256_v26 = vmul.f32 %v20137_v34, %v20137_v34  ;;  %v8255_v49 = vmul.f32 %v20140_v55, %v20140_v55 }
 0x835   : > { %v20132_v24 = vpop.f32.mrb[30].mxu1  ;;  %23409 = vst [vmem:[#allocation45_spill] sm:$0xff] %v20158_v52  ;;  %v20189_v54 = vadd.f32 %v19934_v25, %v19949_v21  ;;  %v20193_v29 = vadd.f32 %v19939_v37, %v19949_v21  ;;  %v8195_v8 = vadd.f32 %v8194_v53, %v20126_v10  ;;  %v8124_v6 = vadd.f32 %v20137_v34, %v20140_v55 }
 0x836   : > { %v20142_v28 = vpop.f32.mrb[31].mxu1  ;;  %v13101_v32 = vpop.f32.mrb[116].mxu0  ;;  %v20203_v20 = vadd.f32 %v20018_v23, %v19949_v21  ;;  %v8427_v5 = vadd.f32 %v8426_v16, %v8307_v57  ;;  %v8257_v25 = vmul.f32 %v20158_v52, %v20158_v52  ;;  %v8118_v37 = vrot.slane %v8117_v13, 4 }
 0x837   : > { %v6778_v45 = vpop.f32.mrb[117].mxu0  ;;  %v20179_v36 = vadd.f32 %v19798_v1, %v13101_v32  ;;  %23411 = vst [vmem:[#allocation50_spill] sm:$0xff] %v20189_v54  ;;  %23412 = vst [vmem:[#allocation86_spill] sm:$0xff] %v20193_v29  ;;  %v8350_v32 = vrot.slane %v8349_v48, 4  ;;  %v20209_v53 = vadd.f32 %v20074_v43, %v19850_v59  ;;  %v8356_v10 = vadd.f32 %v8256_v26, %v8255_v49 }
 0x838   : > { %v20197_v27 = vadd.f32 %v19800_v4, %v6778_v45  ;;  %23413 = vst [vmem:[#allocation89_spill] sm:$0xff] %v20203_v20  ;;  %v20218_v23 = vadd.f32 %v20068_v40, %v19949_v21  ;;  %v8125_v57 = vadd.f32 %v8124_v6, %v20158_v52  ;;  %v20223_v16 = vadd.f32 %v20057_v22, %v19949_v21 }
 0x839   : > { %v20172_v35 = vpop.f32.mrb[32].mxu1  ;;  %v20229_v59 = vmul.f32 %v20165_v58, %v20165_v58  ;;  %v20237_v40 = vadd.f32 %v19944_v14, %v19949_v21  ;;  %v8196_v43 = vadd.f32 %v8195_v8, %v20203_v20  ;;  %v8308_v22 = vmul.f32 %v20203_v20, %v20203_v20 }
 0x83a   : > { %v20185_v12 = vpop.f32.mrb[33].mxu1  ;;  %v13104_v1 = vpop.f32.mrb[118].mxu0  ;;  %23414 = vst [vmem:[#allocation43_spill] sm:$0xff] %v20218_v23  ;;  %23415 = vst [vmem:[#allocation47_spill] sm:$0xff] %v20223_v16  ;;  %v8357_v49 = vadd.f32 %v8356_v10, %v8257_v25  ;;  %v20248_v6 = vadd.f32 %v20081_v3, %v19852_v9  ;;  %v20252_v14 = vmul.f32 %v20193_v29, %v20193_v29 }
 0x83b   : > { %v6788_v46 = vpop.f32.mrb[119].mxu0  ;;  %v20212_v4 = vadd.f32 %v19806_v38, %v13104_v1  ;;  %23416 = vst [vmem:[#allocation53_spill] sm:$0xff] %v20229_v59  ;;  %v20233_v38 = vmul.f32 %v20189_v54, %v20189_v54  ;;  %23418 = vst [vmem:[#allocation91_spill] sm:$0xff] %v20237_v40  ;;  %v20244_v1 = vadd.f32 %v20099_v17, %v19949_v21 }
 0x83c   : > { %23420 = vst [vmem:[#allocation90_spill] sm:$0xff] %v20252_v14  ;;  %v8119_v55 = vadd.f32 %v8118_v37, %v8117_v13  ;;  %v8351_v8 = vadd.f32 %v8350_v32, %v8349_v48  ;;  %v20255_v2 = vadd.f32 %v19808_v0, %v6788_v46  ;;  %v8258_v17 = vmul.f32 %v20218_v23, %v20218_v23 }
 0x83d   : > { %v20214_v45 = vpop.f32.mrb[34].mxu1  ;;  %23417 = vst [vmem:[#allocation56_spill] sm:$0xff] %v20233_v38  ;;  %23419 = vst [vmem:[#allocation44_spill] sm:$0xff] %v20244_v1  ;;  %v8309_v10 = vmul.f32 %v20223_v16, %v20223_v16  ;;  %v8428_v9 = vadd.f32 %v8427_v5, %v8308_v22  ;;  %v8126_v3 = vadd.f32 %v8125_v57, %v20218_v23 }
 0x83e   : > { %v20225_v34 = vpop.f32.mrb[35].mxu1  ;;  %v13107_v26 = vpop.f32.mrb[120].mxu0  ;;  %v20268_v13 = vadd.f32 %v20040_v31, %v19949_v21  ;;  %v8197_v0 = vadd.f32 %v8196_v43, %v20223_v16  ;;  %v20273_v48 = vadd.f32 %v20101_v33, %v19858_v41  ;;  %v20280_v5 = vmul.f32 %v20237_v40, %v20237_v40 }
 0x83f   : > { %v6798_v52 = vpop.f32.mrb[121].mxu0  ;;  %v20276_v46 = vadd.f32 %v19814_v44, %v13107_v26  ;;  %v20284_v32 = vadd.f32 %v19952_v11, %v19949_v21  ;;  %v8259_v31 = vmul.f32 %v20244_v1, %v20244_v1  ;;  %v8358_v57 = vadd.f32 %v8357_v49, %v8258_v17 }
 0x840   : > { %23421 = vst [vmem:[#allocation93_spill] sm:$0xff] %v20268_v13  ;;  %23422 = vst [vmem:[#allocation46_spill] sm:$0xff] %v20280_v5  ;;  %v20290_v41 = vadd.f32 %v19955_v39, %v19949_v21  ;;  %v8120_v44 = vrot.slane %v8119_v55, 2  ;;  %v8352_v33 = vrot.slane %v8351_v8, 2  ;;  %v20294_v26 = vadd.f32 %v20093_v30, %v19949_v21  ;;  %v23432_v5 = vld [vmem:[#allocation63_spill] sm:$0xff] }
 0x841   : > { %v20257_v20 = vpop.f32.mrb[36].mxu1  ;;  %23423 = vst [vmem:[#allocation92_spill] sm:$0xff] %v20284_v32  ;;  %v20300_v11 = vadd.f32 %v19963_v42, %v19949_v21  ;;  %v8429_v16 = vadd.f32 %v8428_v9, %v8309_v10  ;;  %v8127_v49 = vadd.f32 %v8126_v3, %v20244_v1  ;;  %v20305_v17 = vadd.f32 %v20108_v47, %v19949_v21  ;;  %v23429_v42 = vld [vmem:[#allocation59_spill] sm:$0xff] }
 0x842   : > { %v20264_v25 = vpop.f32.mrb[37].mxu1  ;;  %v13110_v37 = vpop.f32.mrb[122].mxu0  ;;  %23424 = vst [vmem:[#allocation97_spill] sm:$0xff] %v20290_v41  ;;  %23425 = vst [vmem:[#allocation110_spill] sm:$0xff] %v20294_v26  ;;  %v8310_v23 = vmul.f32 %v20268_v13, %v20268_v13  ;;  %v20313_v30 = vadd.f32 %v20086_v7, %v19949_v21  ;;  %v8198_v50 = vadd.f32 %v8197_v0, %v20268_v13  ;;  %v23431_v1 = vld [vmem:[#allocation87_spill] sm:$0xff] }
 0x843   : > { %v6808_v43 = vpop.f32.mrb[123].mxu0  ;;  %23426 = vst [vmem:[#allocation111_spill] sm:$0xff] %v20300_v11  ;;  %23427 = vst [vmem:[#allocation112_spill] sm:$0xff] %v20305_v17  ;;  %v13670_v10 = vadd.f32 %v20110_v51, %v23429_v42  ;;  %v8359_v3 = vadd.f32 %v8358_v57, %v8259_v31  ;;  %v20320_v47 = vadd.f32 %v20161_v63, %v19949_v21  ;;  %v23433_v42 = vld [vmem:[#allocation94_spill] sm:$0xff] }
 0x844   : > { %23428 = vst [vmem:[#allocation113_spill] sm:$0xff] %v20313_v30  ;;  %v20323_v14 = vadd.f32 %v23431_v1, %v6798_v52  ;;  %v20327_v29 = vadd.f32 %v20132_v24, %v23432_v5  ;;  %v8121_v59 = vadd.f32 %v8120_v44, %v8119_v55  ;;  %v8353_v0 = vadd.f32 %v8352_v33, %v8351_v8  ;;  %v23434_v24 = vld [vmem:[#allocation64_spill] sm:$0xff] }
 0x845   : > { %v20296_v22 = vpop.f32.mrb[38].mxu1  ;;  %23430 = vst [vmem:[#allocation59_spill] sm:$0xff] %v20320_v47  ;;  %v8260_v51 = vmul.f32 %v20294_v26, %v20294_v26  ;;  %v20334_v31 = vadd.f32 %v23433_v42, %v13110_v37  ;;  %v8311_v63 = vmul.f32 %v20305_v17, %v20305_v17  ;;  %v8430_v52 = vadd.f32 %v8429_v16, %v8310_v23  ;;  %v23437_v44 = vld [vmem:[#allocation48_spill] sm:$0xff] }
 0x846   : > { %v20307_v39 = vpop.f32.mrb[39].mxu1  ;;  %v13113_v9 = vpop.f32.mrb[124].mxu0  ;;  %v8128_v1 = vadd.f32 %v8127_v49, %v20294_v26  ;;  %v20343_v5 = vadd.f32 %v20142_v28, %v23434_v24  ;;  %v20349_v8 = vmul.f32 %v20284_v32, %v20284_v32  ;;  %v20353_v37 = vmul.f32 %v20290_v41, %v20290_v41 }
 0x847   : > { %v20329_v7 = vpop.f32.mrb[125].mxu0  ;;  %v20357_v33 = vadd.f32 %v23437_v44, %v19949_v21  ;;  %v8199_v23 = vadd.f32 %v8198_v50, %v20305_v17  ;;  %v20362_v28 = vmul.f32 %v20300_v11, %v20300_v11  ;;  %v8312_v49 = vmul.f32 %v20313_v30, %v20313_v30 }
 0x848   : > { %23435 = vst [vmem:[#allocation87_spill] sm:$0xff] %v20349_v8  ;;  %23436 = vst [vmem:[#allocation63_spill] sm:$0xff] %v20353_v37  ;;  %v8261_v42 = vmul.f32 %v20320_v47, %v20320_v47  ;;  %v8360_v24 = vadd.f32 %v8359_v3, %v8260_v51  ;;  %v8122_v26 = vrot.slane %v8121_v59, 1  ;;  %v20370_v44 = vadd.f32 %v20129_v56, %v19949_v21  ;;  %v23443_v51 = vld [vmem:[#allocation54_spill] sm:$0xff] }
 0x849   : > { %v20336_v57 = vpop.f32.mrb[40].mxu1  ;;  %23438 = vst [vmem:[#allocation94_spill] sm:$0xff] %v20357_v33  ;;  %23439 = vst [vmem:[#allocation64_spill] sm:$0xff] %v20362_v28  ;;  %v20374_v50 = vadd.f32 %v20209_v53, %v19949_v21  ;;  %v20378_v17 = vadd.f32 %v20248_v6, %v19949_v21  ;;  %v8354_v11 = vrot.slane %v8353_v0, 1  ;;  %v8431_v8 = vadd.f32 %v8430_v52, %v8311_v63 }
 0x84a   : > { %v20345_v55 = vpop.f32.mrb[41].mxu1  ;;  %v13116_v16 = vpop.f32.mrb[126].mxu0  ;;  %23440 = vst [vmem:[#allocation48_spill] sm:$0xff] %v20370_v44  ;;  %v8129_v3 = vadd.f32 %v8128_v1, %v20320_v47  ;;  %v13622_v32 = vadd.f32 %v23443_v51, %v6808_v43  ;;  %v20388_v56 = vadd.f32 %v20170_v60, %v19949_v21  ;;  %v20392_v53 = vadd.f32 %v20183_v61, %v19949_v21  ;;  %v23448_v1 = vld [vmem:[#allocation84_spill] sm:$0xff]  ;;  %v23449_v51 = vld [vmem:[#allocation34_spill] sm:$0xff] }
 0x84b   : > { %v6828_v13 = vpop.f32.mrb[127].mxu0  ;;  %23441 = vst [vmem:[#allocation114_spill] sm:$0xff] %v20374_v50  ;;  %23442 = vst [vmem:[#allocation115_spill] sm:$0xff] %v20378_v17  ;;  %v8200_v6 = vadd.f32 %v8199_v23, %v20313_v30  ;;  %v20396_v41 = vadd.f32 %v13670_v10, %v19949_v21  ;;  %v8361_v52 = vadd.f32 %v8360_v24, %v8261_v42 }
 0x84c   : > { %23444 = vst [vmem:[#allocation54_spill] sm:$0xff] %v20388_v56  ;;  %23445 = vst [vmem:[#allocation116_spill] sm:$0xff] %v20392_v53  ;;  %v20402_v43 = vadd.f32 %v20197_v27, %v19949_v21  ;;  %v20406_v60 = vadd.f32 %v20172_v35, %v23448_v1  ;;  %v20409_v47 = vadd.f32 %v23449_v51, %v13113_v9  ;;  %v23450_v27 = vld [vmem:[#allocation73_spill] sm:$0xff] }
 0x84d   : > { %v20380_v28 = vpop.f32.mrb[42].mxu1  ;;  %23446 = vst [vmem:[#allocation117_spill] sm:$0xff] %v20396_v41  ;;  %v8316_v10 = vmul.f32 %v20374_v50, %v20374_v50  ;;  %v8209_v23 = vadd.f32 %v20374_v50, %v20378_v17  ;;  %v8315_v42 = vmul.f32 %v20378_v17, %v20378_v17  ;;  %v20421_v24 = vadd.f32 %v20185_v12, %v23450_v27 }
 0x84e   : > { %v20384_v37 = vpop.f32.mrb[43].mxu1  ;;  %v20398_v63 = vpop.f32.mrb[128].mxu0  ;;  %23447 = vst [vmem:[#allocation118_spill] sm:$0xff] %v20402_v43  ;;  %v20427_v9 = vmul.f32 %v20357_v33, %v20357_v33  ;;  %v20429_v1 = vadd.f32 %v8122_v26, %v8121_v59  ;;  %v8262_v51 = vmul.f32 %v20370_v44, %v20370_v44  ;;  %v8130_v50 = vadd.f32 %v8129_v3, %v20370_v44 }
 0x84f   : > { %v20411_v61 = vpop.f32.mrb[129].mxu0  ;;  %v20436_v17 = vadd.f32 %v8354_v11, %v8353_v0  ;;  %v8432_v40 = vadd.f32 %v8431_v8, %v8312_v49  ;;  %v8210_v12 = vadd.f32 %v8209_v23, %v20396_v41  ;;  %v8317_v27 = vmul.f32 %v20396_v41, %v20396_v41  ;;  %v23456_v41 = vld [vmem:[#allocation36_spill] sm:$0xff] }
 0x850   : > { %23451 = vst [vmem:[#allocation84_spill] sm:$0xff] %v20427_v9  ;;  %23452 = vst [vmem:[#allocation34_spill] sm:$0xff] %v20429_v1  ;;  %v20443_v59 = vmul.f32 %v20388_v56, %v20388_v56  ;;  %v20447_v26 = vadd.f32 %v20179_v36, %v19949_v21  ;;  %v8201_v3 = vadd.f32 %v8200_v6, %v20392_v53  ;;  %v23458_v1 = vld [vmem:[#allocation75_spill] sm:$0xff] }
 0x851   : > { %v20423_v35 = vpop.f32.mrb[44].mxu1  ;;  %23453 = vst [vmem:[#allocation73_spill] sm:$0xff] %v20436_v17  ;;  %v8263_v11 = vmul.f32 %v20402_v43, %v20402_v43  ;;  %v8362_v8 = vadd.f32 %v8361_v52, %v8262_v51  ;;  %v8441_v49 = vadd.f32 %v8316_v10, %v8315_v42  ;;  %v20456_v23 = vadd.f32 %v20273_v48, %v19949_v21  ;;  %v23459_v52 = vld [vmem:[#allocation55_spill] sm:$0xff] }
 0x852   : > { %v20434_v30 = vpop.f32.mrb[45].mxu1  ;;  %v13122_v38 = vpop.f32.mrb[130].mxu0  ;;  %23454 = vst [vmem:[#allocation119_spill] sm:$0xff] %v20447_v26  ;;  %v13624_v44 = vadd.f32 %v23456_v41, %v20329_v7  ;;  %v8131_v36 = vadd.f32 %v8130_v50, %v20402_v43  ;;  %v20465_v6 = vadd.f32 %v20276_v46, %v19949_v21  ;;  %v20469_v9 = vadd.f32 %v20214_v45, %v23458_v1  ;;  %v23461_v50 = vld [vmem:[#allocation49_spill] sm:$0xff]  ;;  %v23463_v1 = vld [vmem:[#allocation96_spill] sm:$0xff] }
 0x853   : > { %v20452_v0 = vpop.f32.mrb[131].mxu0  ;;  %23455 = vst [vmem:[#allocation120_spill] sm:$0xff] %v20456_v23  ;;  %v20472_v10 = vadd.f32 %v23459_v52, %v13116_v16  ;;  %v8442_v42 = vadd.f32 %v8441_v49, %v8317_v27  ;;  %v20478_v41 = vadd.f32 %v20343_v5, %v19949_v21  ;;  %v8211_v7 = vadd.f32 %v8210_v12, %v20456_v23  ;;  %v23464_v5 = vld [vmem:[#allocation103_spill] sm:$0xff] }
 0x854   : > { %23457 = vst [vmem:[#allocation36_spill] sm:$0xff] %v20465_v6  ;;  %v20483_v46 = vadd.f32 %v20225_v34, %v23461_v50  ;;  %v8264_v45 = vmul.f32 %v20447_v26, %v20447_v26  ;;  %v20491_v16 = vadd.f32 %v20323_v14, %v19949_v21  ;;  %v20494_v27 = vadd.f32 %v23463_v1, %v6828_v13 }
 0x855   : > { %v20460_v17 = vpop.f32.mrb[46].mxu1  ;;  %23460 = vst [vmem:[#allocation75_spill] sm:$0xff] %v20478_v41  ;;  %v20498_v49 = vadd.f32 %v20257_v20, %v23464_v5  ;;  %v8313_v34 = vmul.f32 %v20392_v53, %v20392_v53  ;;  %v8363_v52 = vadd.f32 %v8362_v8, %v8263_v11  ;;  %v20506_v50 = vadd.f32 %v20255_v2, %v19949_v21 }
 0x856   : > { %v20474_v48 = vpop.f32.mrb[47].mxu1  ;;  %v20485_v51 = vpop.f32.mrb[132].mxu0  ;;  %23462 = vst [vmem:[#allocation55_spill] sm:$0xff] %v20491_v16  ;;  %v8318_v14 = vmul.f32 %v20456_v23, %v20456_v23  ;;  %v20513_v13 = vadd.f32 %v8201_v3, %v20388_v56  ;;  %v20517_v20 = vadd.f32 %v20212_v4, %v19949_v21  ;;  %v8132_v1 = vadd.f32 %v8131_v36, %v20447_v26  ;;  %v23468_v36 = vld [vmem:[#allocation38_spill] sm:$0xff]  ;;  %v23469_v26 = vld [vmem:[#allocation80_spill] sm:$0xff] }
 0x857   : > { %v20500_v12 = vpop.f32.mrb[133].mxu0  ;;  %v20521_v11 = vadd.f32 %v13622_v32, %v19949_v21  ;;  %v8268_v2 = vmul.f32 %v20465_v6, %v20465_v6  ;;  %v8212_v5 = vadd.f32 %v8211_v7, %v20478_v41  ;;  %v8319_v3 = vmul.f32 %v20478_v41, %v20478_v41 }
 0x858   : > { %23465 = vst [vmem:[#allocation49_spill] sm:$0xff] %v20513_v13  ;;  %23466 = vst [vmem:[#allocation96_spill] sm:$0xff] %v20517_v20  ;;  %v8443_v23 = vadd.f32 %v8442_v42, %v8318_v14  ;;  %v8141_v4 = vadd.f32 %v20465_v6, %v20491_v16  ;;  %v8267_v32 = vmul.f32 %v20491_v16, %v20491_v16 }
 0x859   : > { %v20510_v43 = vpop.f32.mrb[48].mxu1  ;;  %23467 = vst [vmem:[#allocation103_spill] sm:$0xff] %v20521_v11  ;;  %v20538_v53 = vadd.f32 %v23468_v36, %v20398_v63  ;;  %v20542_v33 = vadd.f32 %v20264_v25, %v23469_v26  ;;  %v8433_v41 = vadd.f32 %v8432_v40, %v8313_v34  ;;  %v8265_v42 = vmul.f32 %v20506_v50, %v20506_v50  ;;  %v23471_v36 = vld [vmem:[#allocation58_spill] sm:$0xff]  ;;  %v23472_v26 = vld [vmem:[#allocation104_spill] sm:$0xff] }
 0x85a   : > { %v20523_v8 = vpop.f32.mrb[49].mxu1  ;;  %v20530_v56 = vpop.f32.mrb[134].mxu0  ;;  %v8364_v14 = vadd.f32 %v8363_v52, %v8264_v45  ;;  %v20550_v6 = vadd.f32 %v20327_v29, %v19949_v21  ;;  %v8142_v16 = vadd.f32 %v8141_v4, %v20521_v11  ;;  %v8269_v63 = vmul.f32 %v20521_v11, %v20521_v11  ;;  %v23474_v52 = vld [vmem:[#allocation29_spill] sm:$0xff] }
 0x85b   : > { %v20544_v7 = vpop.f32.mrb[135].mxu0  ;;  %v20557_v25 = vadd.f32 %v23471_v36, %v20411_v61  ;;  %v13679_v40 = vadd.f32 %v20296_v22, %v23472_v26  ;;  %v8444_v34 = vadd.f32 %v8443_v23, %v8319_v3  ;;  %v20563_v45 = vadd.f32 %v20421_v24, %v19949_v21  ;;  %v23477_v3 = vld [vmem:[#allocation105_spill] sm:$0xff] }
 0x85c   : > { %23470 = vst [vmem:[#allocation38_spill] sm:$0xff] %v20550_v6  ;;  %v8213_v29 = vadd.f32 %v8212_v5, %v20550_v6  ;;  %v20567_v13 = vadd.f32 %v23474_v52, %v13122_v38  ;;  %v8266_v11 = vmul.f32 %v20517_v20, %v20517_v20  ;;  %v8133_v61 = vadd.f32 %v8132_v1, %v20506_v50 }
 0x85d   : > { %23473 = vst [vmem:[#allocation80_spill] sm:$0xff] %v20563_v45  ;;  %v8373_v36 = vadd.f32 %v8268_v2, %v8267_v32  ;;  %v20576_v22 = vadd.f32 %v20334_v31, %v19949_v21  ;;  %v8365_v24 = vadd.f32 %v8364_v14, %v8265_v42  ;;  %v8320_v5 = vmul.f32 %v20550_v6, %v20550_v6  ;;  %v23480_v14 = vld [vmem:[#allocation99_spill] sm:$0xff] }
 0x85e   : > { %v20569_v4 = vpop.f32.mrb[136].mxu0  ;;  %v20584_v38 = vadd.f32 %v20406_v60, %v19949_v21  ;;  %v13680_v26 = vadd.f32 %v20307_v39, %v23477_v3  ;;  %v20590_v1 = vadd.f32 %v20409_v47, %v19949_v21  ;;  %v20593_v31 = vadd.f32 %v13624_v44, %v19949_v21 }
 0x85f   : > { %23475 = vst [vmem:[#allocation58_spill] sm:$0xff] %v20576_v22  ;;  %v20578_v23 = vpop.f32.mrb[137].mxu0  ;;  %v8374_v52 = vadd.f32 %v8373_v36, %v8269_v63  ;;  %v8143_v2 = vadd.f32 %v8142_v16, %v20576_v22  ;;  %v8214_v32 = vadd.f32 %v8213_v29, %v20563_v45  ;;  %v8321_v42 = vmul.f32 %v20563_v45, %v20563_v45 }
 0x860   : > { %23476 = vst [vmem:[#allocation104_spill] sm:$0xff] %v20584_v38  ;;  %23478 = vst [vmem:[#allocation29_spill] sm:$0xff] %v20590_v1  ;;  %v8445_v60 = vadd.f32 %v8444_v34, %v8320_v5  ;;  %v20601_v6 = vadd.f32 %v23480_v14, %v20452_v0  ;;  %v20606_v47 = vadd.f32 %v8433_v41, %v20443_v59  ;;  %v23483_v41 = vld [vmem:[#allocation108_spill] sm:$0xff] }
 0x861   : > { %23479 = vst [vmem:[#allocation105_spill] sm:$0xff] %v20593_v31  ;;  %v8270_v44 = vmul.f32 %v20576_v22, %v20576_v22  ;;  %v20611_v16 = vadd.f32 %v13679_v40, %v19949_v21  ;;  %v20614_v63 = vadd.f32 %v13680_v26, %v19949_v21  ;;  %v20619_v34 = vadd.f32 %v8133_v61, %v20517_v20  ;;  %v23484_v26 = vld [vmem:[#allocation98_spill] sm:$0xff]  ;;  %v23496_v22 = vld [vmem:[#allocation51_spill] sm:$0xff] }
 0x862   : > { %v20603_v39 = vpop.f32.mrb[138].mxu0  ;;  %v20621_v0 = vadd.f32 %v8365_v24, %v8266_v11  ;;  %v8322_v59 = vmul.f32 %v20584_v38, %v20584_v38  ;;  %v13681_v36 = vadd.f32 %v20336_v57, %v23483_v41  ;;  %v8144_v5 = vadd.f32 %v8143_v2, %v20593_v31  ;;  %v23487_v41 = vld [vmem:[#allocation61_spill] sm:$0xff] }
 0x863   : > { %23481 = vst [vmem:[#allocation99_spill] sm:$0xff] %v20611_v16  ;;  %23482 = vst [vmem:[#allocation121_spill] sm:$0xff] %v20614_v63  ;;  %v20616_v29 = vpop.f32.mrb[139].mxu0  ;;  %v8271_v40 = vmul.f32 %v20593_v31, %v20593_v31  ;;  %v8375_v3 = vadd.f32 %v8374_v52, %v8270_v44  ;;  %v13631_v14 = vadd.f32 %v23484_v26, %v20485_v51  ;;  %v23486_v44 = vld [vmem:[#allocation109_spill] sm:$0xff] }
 0x864   : > { %v8272_v61 = vmul.f32 %v20590_v1, %v20590_v1  ;;  %v8446_v11 = vadd.f32 %v8445_v60, %v8321_v42  ;;  %v20636_v24 = vadd.f32 %v20469_v9, %v19949_v21  ;;  %v8215_v45 = vadd.f32 %v8214_v32, %v20584_v38  ;;  %v23489_v38 = vld [vmem:[#allocation30_spill] sm:$0xff] }
 0x865   : > { %v8328_v2 = vmul.f32 %v20611_v16, %v20611_v16  ;;  %v8327_v52 = vmul.f32 %v20614_v63, %v20614_v63  ;;  %v13682_v51 = vadd.f32 %v20345_v55, %v23486_v44  ;;  %v13632_v42 = vadd.f32 %v23487_v41, %v20500_v12 }
 0x866   : > { %23485 = vst [vmem:[#allocation108_spill] sm:$0xff] %v20636_v24  ;;  %v20639_v57 = vpop.f32.mrb[140].mxu0  ;;  %v20653_v9 = vadd.f32 %v20472_v10, %v19949_v21  ;;  %v20657_v32 = vadd.f32 %v20483_v46, %v19949_v21  ;;  %v20661_v26 = vadd.f32 %v20494_v27, %v19949_v21  ;;  %v13683_v55 = vadd.f32 %v20380_v28, %v23489_v38  ;;  %v23494_v28 = vld [vmem:[#allocation52_spill] sm:$0xff] }
 0x867   : > { %v20649_v60 = vpop.f32.mrb[141].mxu0  ;;  %v8376_v44 = vadd.f32 %v8375_v3, %v8271_v40  ;;  %v8145_v12 = vadd.f32 %v8144_v5, %v20590_v1  ;;  %v8226_v41 = vadd.f32 %v20611_v16, %v20614_v63  ;;  %v20669_v10 = vadd.f32 %v13682_v51, %v19949_v21 }
 0x868   : > { %23488 = vst [vmem:[#allocation98_spill] sm:$0xff] %v20657_v32  ;;  %v20672_v31 = vadd.f32 %v13681_v36, %v19949_v21  ;;  %v20675_v46 = vadd.f32 %v13631_v14, %v19949_v21  ;;  %v20678_v27 = vadd.f32 %v13632_v42, %v19949_v21  ;;  %v13633_v38 = vadd.f32 %v23494_v28, %v20530_v56 }
 0x869   : > { %23490 = vst [vmem:[#allocation109_spill] sm:$0xff] %v20669_v10  ;;  %v20686_v5 = vmul.f32 %v20636_v24, %v20636_v24  ;;  %v8447_v3 = vadd.f32 %v8446_v11, %v8322_v59  ;;  %v8458_v51 = vadd.f32 %v8328_v2, %v8327_v52  ;;  %v8329_v36 = vmul.f32 %v20669_v10, %v20669_v10  ;;  %v23495_v11 = vld [vmem:[#allocation60_spill] sm:$0xff] }
 0x86a   : > { %23491 = vst [vmem:[#allocation61_spill] sm:$0xff] %v20672_v31  ;;  %23492 = vst [vmem:[#allocation30_spill] sm:$0xff] %v20675_v46  ;;  %v20682_v40 = vpop.f32.mrb[142].mxu0  ;;  %v8216_v14 = vadd.f32 %v8215_v45, %v20657_v32  ;;  %v8323_v42 = vmul.f32 %v20657_v32, %v20657_v32  ;;  %v8273_v56 = vmul.f32 %v20661_v26, %v20661_v26 }
 0x86b   : > { %23493 = vst [vmem:[#allocation122_spill] sm:$0xff] %v20678_v27  ;;  %v20690_v16 = vpop.f32.mrb[143].mxu0  ;;  %v8227_v28 = vadd.f32 %v8226_v41, %v20669_v10  ;;  %v8146_v63 = vadd.f32 %v8145_v12, %v20661_v26  ;;  %v8377_v1 = vadd.f32 %v8376_v44, %v8272_v61  ;;  %v8459_v59 = vadd.f32 %v8458_v51, %v8329_v36  ;;  %v23499_v51 = vld [vmem:[#allocation83_spill] sm:$0xff] }
 0x86c   : > { %v13684_v2 = vadd.f32 %v20384_v37, %v23495_v11  ;;  %v8330_v52 = vmul.f32 %v20672_v31, %v20672_v31  ;;  %v8280_v45 = vmul.f32 %v20675_v46, %v20675_v46  ;;  %v8279_v32 = vmul.f32 %v20678_v27, %v20678_v27  ;;  %v23498_v37 = vld [vmem:[#allocation67_spill] sm:$0xff] }
 0x86d   : > { %v13634_v20 = vadd.f32 %v23496_v22, %v20544_v7  ;;  %v8158_v61 = vadd.f32 %v20675_v46, %v20678_v27  ;;  %v13685_v12 = vadd.f32 %v20423_v35, %v23498_v37  ;;  %v13635_v36 = vadd.f32 %v23499_v51, %v20569_v4  ;;  %v23500_v46 = vld [vmem:[#allocation57_spill] sm:$0xff] }
 0x86e   : > { %v20709_v41 = vpop.f32.mrb[144].mxu0  ;;  %v20714_v44 = vadd.f32 %v13684_v2, %v19949_v21  ;;  %v20723_v10 = vadd.f32 %v13633_v38, %v19949_v21  ;;  %v8228_v7 = vadd.f32 %v8227_v28, %v20672_v31  ;;  %v13686_v2 = vadd.f32 %v20434_v30, %v23500_v46 }
 0x86f   : > { %v20720_v11 = vpop.f32.mrb[145].mxu0  ;;  %v20727_v22 = vadd.f32 %v13634_v20, %v19949_v21  ;;  %v8274_v27 = vmul.f32 %v20653_v9, %v20653_v9  ;;  %v20735_v35 = vadd.f32 %v20498_v49, %v19949_v21  ;;  %v8460_v38 = vadd.f32 %v8459_v59, %v8330_v52 }
 0x870   : > { %23497 = vst [vmem:[#allocation52_spill] sm:$0xff] %v20714_v44  ;;  %v8331_v4 = vmul.f32 %v20714_v44, %v20714_v44  ;;  %v8390_v37 = vadd.f32 %v8280_v45, %v8279_v32  ;;  %v20740_v28 = vadd.f32 %v13683_v55, %v19949_v21  ;;  %v20745_v46 = vadd.f32 %v8447_v3, %v8323_v42 }
 0x871   : > { %23501 = vst [vmem:[#allocation60_spill] sm:$0xff] %v20735_v35  ;;  %v8159_v20 = vadd.f32 %v8158_v61, %v20727_v22  ;;  %v8281_v30 = vmul.f32 %v20727_v22, %v20727_v22  ;;  %v8378_v51 = vadd.f32 %v8377_v1, %v8273_v56  ;;  %v20749_v49 = vadd.f32 %v20538_v53, %v19949_v21  ;;  %v23504_v1 = vld [vmem:[#allocation72_spill] sm:$0xff] }
 0x872   : > { %23502 = vst [vmem:[#allocation51_spill] sm:$0xff] %v20740_v28  ;;  %v20752_v31 = vadd.f32 %v8216_v14, %v20636_v24  ;;  %v8147_v32 = vadd.f32 %v8146_v63, %v20653_v9  ;;  %v8282_v55 = vmul.f32 %v20723_v10, %v20723_v10  ;;  %v8229_v59 = vadd.f32 %v8228_v7, %v20714_v44  ;;  %v23505_v61 = vld [vmem:[#allocation68_spill] sm:$0xff]  ;;  %v23516_v44 = vld [vmem:[#allocation106_spill] sm:$0xff] }
 0x873   : > { %v8391_v52 = vadd.f32 %v8390_v37, %v8281_v30  ;;  %v8461_v45 = vadd.f32 %v8460_v38, %v8331_v4  ;;  %v20759_v3 = vadd.f32 %v13686_v2, %v19949_v21  ;;  %v13636_v42 = vadd.f32 %v23504_v1, %v20578_v23  ;;  %v23506_v23 = vld [vmem:[#allocation101_spill] sm:$0xff]  ;;  %v23507_v37 = vld [vmem:[#allocation62_spill] sm:$0xff] }
 0x874   : > { %v8160_v53 = vadd.f32 %v8159_v20, %v20723_v10  ;;  %v20766_v14 = vadd.f32 %v20557_v25, %v19949_v21  ;;  %v8332_v63 = vmul.f32 %v20740_v28, %v20740_v28  ;;  %v20771_v56 = vadd.f32 %v13635_v36, %v19949_v21  ;;  %v23509_v30 = vld [vmem:[#allocation81_spill] sm:$0xff] }
 0x875   : > { %23503 = vst [vmem:[#allocation67_spill] sm:$0xff] %v20759_v3  ;;  %v13687_v7 = vadd.f32 %v20460_v17, %v23505_v61  ;;  %v20776_v2 = vadd.f32 %v13636_v42, %v19949_v21  ;;  %v8392_v4 = vadd.f32 %v8391_v52, %v8282_v55  ;;  %v13637_v38 = vadd.f32 %v23506_v23, %v20603_v39  ;;  %v23510_v17 = vld [vmem:[#allocation69_spill] sm:$0xff] }
 0x876   : > { %v13688_v25 = vadd.f32 %v20474_v48, %v23507_v37  ;;  %v20784_v20 = vadd.f32 %v20542_v33, %v19949_v21  ;;  %v8230_v36 = vadd.f32 %v8229_v59, %v20740_v28  ;;  %v13638_v1 = vadd.f32 %v23509_v30, %v20616_v29  ;;  %v23513_v28 = vld [vmem:[#allocation25_spill] sm:$0xff] }
 0x877   : > { %v20791_v42 = vadd.f32 %v20510_v43, %v23510_v17  ;;  %v8333_v55 = vmul.f32 %v20759_v3, %v20759_v3  ;;  %v8462_v39 = vadd.f32 %v8461_v45, %v8332_v63  ;;  %v8161_v52 = vadd.f32 %v8160_v53, %v20776_v2 }
 0x878   : > { %23508 = vst [vmem:[#allocation83_spill] sm:$0xff] %v20784_v20  ;;  %v8283_v48 = vmul.f32 %v20776_v2, %v20776_v2  ;;  %v8276_v33 = vmul.f32 %v20749_v49, %v20749_v49  ;;  %v8148_v59 = vadd.f32 %v8147_v32, %v20766_v14  ;;  %v8379_v61 = vadd.f32 %v8378_v51, %v8274_v27  ;;  %v23512_v51 = vld [vmem:[#allocation102_spill] sm:$0xff] }
 0x879   : > { %v20802_v29 = vadd.f32 %v13638_v1, %v19949_v21  ;;  %v8275_v43 = vmul.f32 %v20766_v14, %v20766_v14  ;;  %v8284_v45 = vmul.f32 %v20771_v56, %v20771_v56  ;;  %v20809_v53 = vadd.f32 %v13637_v38, %v19949_v21 }
 0x87a   : > { %v8393_v63 = vadd.f32 %v8392_v4, %v8283_v48  ;;  %v20812_v23 = vadd.f32 %v13685_v12, %v19949_v21  ;;  %v8162_v37 = vadd.f32 %v8161_v52, %v20771_v56  ;;  %v13639_v32 = vadd.f32 %v23512_v51, %v20639_v57  ;;  %v23515_v52 = vld [vmem:[#allocation66_spill] sm:$0xff]  ;;  %v23518_v51 = vld [vmem:[#allocation27_spill] sm:$0xff] }
 0x87b   : > { %v8285_v27 = vmul.f32 %v20802_v29, %v20802_v29  ;;  %v8231_v30 = vadd.f32 %v8230_v36, %v20759_v3  ;;  %v8463_v1 = vadd.f32 %v8462_v39, %v8333_v55  ;;  %v13690_v4 = vadd.f32 %v20523_v8, %v23513_v28  ;;  %v23517_v8 = vld [vmem:[#allocation107_spill] sm:$0xff] }
 0x87c   : > { %23511 = vst [vmem:[#allocation57_spill] sm:$0xff] %v20812_v23  ;;  %v8394_v17 = vadd.f32 %v8393_v63, %v8284_v45  ;;  %v20823_v38 = vadd.f32 %v13688_v25, %v19949_v21  ;;  %v8163_v12 = vadd.f32 %v8162_v37, %v20802_v29  ;;  %v13640_v48 = vadd.f32 %v23515_v52, %v20649_v60 }
 0x87d   : > { %v13641_v24 = vadd.f32 %v23516_v44, %v20682_v40  ;;  %v8286_v57 = vmul.f32 %v20809_v53, %v20809_v53  ;;  %v20833_v55 = vadd.f32 %v13639_v32, %v19949_v21  ;;  %v13642_v28 = vadd.f32 %v23517_v8, %v20690_v16  ;;  %v5161_v16 = vld [vmem:[#allocation11 + $0x8] sm:$0xff] }
 0x87e   : > { %23514 = vst [vmem:[#allocation72_spill] sm:$0xff] %v20823_v38  ;;  %v8395_v36 = vadd.f32 %v8394_v17, %v8285_v27  ;;  %v8380_v25 = vadd.f32 %v8379_v61, %v8275_v43  ;;  %v8149_v39 = vadd.f32 %v8148_v59, %v20749_v49  ;;  %v20839_v45 = vadd.f32 %v13640_v48, %v19949_v21  ;;  %v5160_v27 = vld [vmem:[#allocation11] sm:$0xff] }
 0x87f   : > { %v8164_v60 = vadd.f32 %v8163_v12, %v20809_v53  ;;  %v20844_v40 = vadd.f32 %v20601_v6, %v19949_v21  ;;  %v8334_v44 = vmul.f32 %v20812_v23, %v20812_v23  ;;  %v8232_v63 = vadd.f32 %v8231_v30, %v20812_v23  ;;  %v23519_v12 = vld [vmem:[#allocation65_spill] sm:$0xff] }
 0x880   : > { %v8396_v37 = vadd.f32 %v8395_v36, %v8286_v57  ;;  %v8287_v59 = vmul.f32 %v20839_v45, %v20839_v45  ;;  %v20853_v43 = vadd.f32 %v13642_v28, %v19949_v21  ;;  %v13643_v6 = vadd.f32 %v23518_v51, %v20709_v41 }
 0x881   : > { %v8165_v61 = vadd.f32 %v8164_v60, %v20839_v45  ;;  %v8335_v32 = vmul.f32 %v20823_v38, %v20823_v38  ;;  %v8464_v17 = vadd.f32 %v8463_v1, %v8334_v44  ;;  %v8288_v30 = vmul.f32 %v20833_v55, %v20833_v55 }
 0x882   : > { %v13644_v52 = vadd.f32 %v23519_v12, %v20720_v11  ;;  %v8397_v48 = vadd.f32 %v8396_v37, %v8287_v59  ;;  %v20865_v36 = vadd.f32 %v13643_v6, %v19949_v21  ;;  %v20867_v8 = vpack.c.bf16 %v5161_v16, %v5160_v27 }
 0x883   : > { %v8166_v57 = vadd.f32 %v8165_v61, %v20833_v55  ;;  %v8277_v41 = vmul.f32 %v20844_v40, %v20844_v40  ;;  %v8381_v28 = vadd.f32 %v8380_v25, %v8276_v33  ;;  %v20872_v1 = vadd.f32 %v13687_v7, %v19949_v21 }
 0x884   : > { %23520 = vst [vmem:[#allocation68_spill] sm:$0xff] %v20865_v36  ;;  %v20875_v60 = vadd.f32 %v13644_v52, %v19949_v21  ;;  %v8233_v11 = vadd.f32 %v8232_v63, %v20823_v38  ;;  %v8289_v44 = vmul.f32 %v20853_v43, %v20853_v43  ;;  %v8398_v37 = vadd.f32 %v8397_v48, %v8288_v30 }
 0x885   : > { %23521 = vst [vmem:[#allocation101_spill] sm:$0xff] %v20872_v1  ;;  %v8292_v27 = vmul.f32 %v20865_v36, %v20865_v36  ;;  %13436 = vmatprep.subr.bf16.mxu0 %v20867_v8  ;;  %v20885_v33 = vadd.f32 %v20567_v13, %v19949_v21  ;;  %v8150_v7 = vadd.f32 %v8149_v39, %v20844_v40 }
 0x886   : > { %23522 = vst [vmem:[#allocation62_spill] sm:$0xff] %v20875_v60  ;;  %v8175_v25 = vadd.f32 %v20865_v36, %v20875_v60  ;;  %v8291_v63 = vmul.f32 %v20875_v60, %v20875_v60  ;;  %13438 = vmatpush3.bf16.xpose.msra.mxu0 %v20867_v8  ;;  %v8465_v16 = vadd.f32 %v8464_v17, %v8335_v32 }
 0x887   : > { %v20894_v61 = vadd.f32 %v13690_v4, %v19949_v21  ;;  %v20897_v59 = vadd.f32 %v13641_v24, %v19949_v21  ;;  %v8167_v13 = vadd.f32 %v8166_v57, %v20853_v43  ;;  %13440 = vmatprep.subr.bf16.mxu0 %v20867_v8  ;;  %v8449_v39 = vadd.f32 %v20745_v46, %v20686_v5 }
 0x888   : > { %v8382_v51 = vadd.f32 %v8381_v28, %v8277_v41  ;;  %v8176_v6 = vadd.f32 %v8175_v25, %v20118_v18  ;;  %v8407_v30 = vadd.f32 %v8292_v27, %v8291_v63  ;;  %v8325_v32 = vmul.f32 %v20784_v20, %v20784_v20 }
 0x889   : > { %23523 = vst [vmem:[#allocation81_spill] sm:$0xff] %v20894_v61  ;;  %v8336_v4 = vmul.f32 %v20872_v1, %v20872_v1  ;;  %v8234_v24 = vadd.f32 %v8233_v11, %v20872_v1  ;;  %v8399_v17 = vadd.f32 %v8398_v37, %v8289_v44  ;;  %v8278_v12 = vmul.f32 %v20885_v33, %v20885_v33 }
 0x88a   : > { %v8151_v52 = vadd.f32 %v8150_v7, %v20885_v33  ;;  %v8177_v5 = vadd.f32 %v8176_v6, %v20114_v15  ;;  %v8408_v46 = vadd.f32 %v8407_v30, %v20150_v62  ;;  %v8337_v48 = vmul.f32 %v20894_v61, %v20894_v61  ;;  %v23525_v30 = vld [vmem:[#allocation56_spill] sm:$0xff] }
 0x88b   : > { %v8466_v57 = vadd.f32 %v8465_v16, %v8336_v4  ;;  %v8290_v41 = vmul.f32 %v20897_v59, %v20897_v59  ;;  %v8168_v28 = vadd.f32 %v8167_v13, %v20897_v59  ;;  %v8218_v11 = vadd.f32 %v20752_v31, %v20784_v20 }
 0x88c   : > { %v8383_v44 = vadd.f32 %v8382_v51, %v8278_v12  ;;  %v8178_v37 = vadd.f32 %v8177_v5, %v20189_v54  ;;  %v8409_v27 = vadd.f32 %v8408_v46, %v20146_v19  ;;  %v8135_v7 = vrot.slane %v20619_v34, 4 }
 0x88d   : > { %v20926_v62 = vadd.f32 %v20791_v42, %v19949_v21  ;;  %v8235_v25 = vadd.f32 %v8234_v24, %v20894_v61  ;;  %v8400_v63 = vadd.f32 %v8399_v17, %v8290_v41  ;;  %v8450_v16 = vadd.f32 %v8449_v39, %v8325_v32  ;;  %v23526_v42 = vld [vmem:[#allocation91_spill] sm:$0xff]  ;;  %v23527_v24 = vld [vmem:[#allocation53_spill] sm:$0xff]  ;;  %v23528_v61 = vld [vmem:[#allocation86_spill] sm:$0xff] }
 0x88e   : > { %v8152_v6 = vrot.slane %v8151_v52, 4  ;;  %v8179_v13 = vadd.f32 %v8178_v37, %v20165_v58  ;;  %v8410_v31 = vadd.f32 %v8409_v27, %v23525_v30  ;;  %v8367_v51 = vrot.slane %v20621_v0, 4 }
 0x88f   : > { %23524 = vst [vmem:[#allocation69_spill] sm:$0xff] %v20926_v62  ;;  %v8326_v19 = vmul.f32 %v20735_v35, %v20735_v35  ;;  %v8467_v4 = vadd.f32 %v8466_v57, %v8337_v48  ;;  %v8169_v12 = vrot.slane %v8168_v28, 4  ;;  %v8219_v5 = vadd.f32 %v8218_v11, %v20735_v35  ;;  %v23529_v57 = vld [vmem:[#allocation46_spill] sm:$0xff]  ;;  %v23530_v11 = vld [vmem:[#allocation49_spill] sm:$0xff] }
 0x890   : > { %v8384_v21 = vrot.slane %v8383_v44, 4  ;;  %v8180_v46 = vadd.f32 %v8179_v13, %v23526_v42  ;;  %v8411_v17 = vadd.f32 %v8410_v31, %v23527_v24  ;;  %v8136_v39 = vadd.f32 %v8135_v7, %v20619_v34  ;;  %v23531_v7 = vld [vmem:[#allocation97_spill] sm:$0xff]  ;;  %v23532_v35 = vld [vmem:[#allocation90_spill] sm:$0xff] }
 0x891   : > { %v8338_v32 = vmul.f32 %v20926_v62, %v20926_v62  ;;  %v8236_v41 = vadd.f32 %v8235_v25, %v20926_v62  ;;  %v8401_v37 = vrot.slane %v8400_v63, 4  ;;  %v8451_v27 = vadd.f32 %v8450_v16, %v8326_v19  ;;  %v23534_v62 = vld [vmem:[#allocation92_spill] sm:$0xff] }
 0x892   : > { %v8153_v30 = vadd.f32 %v8152_v6, %v8151_v52  ;;  %v8181_v48 = vadd.f32 %v8180_v46, %v23528_v61  ;;  %v8412_v1 = vadd.f32 %v8411_v17, %v23529_v57  ;;  %v8203_v38 = vrot.slane %v23530_v11, 4  ;;  %v23533_v17 = vld [vmem:[#allocation63_spill] sm:$0xff] }
 0x893   : > { %v8368_v13 = vadd.f32 %v8367_v51, %v20621_v0  ;;  %v8468_v23 = vadd.f32 %v8467_v4, %v8338_v32  ;;  %v8170_v31 = vadd.f32 %v8169_v12, %v8168_v28  ;;  %v8220_v24 = vrot.slane %v8219_v5, 4 }
 0x894   : > { %v8385_v34 = vadd.f32 %v8384_v21, %v8383_v44  ;;  %v8182_v3 = vadd.f32 %v8181_v48, %v23531_v7  ;;  %v8413_v20 = vadd.f32 %v8412_v1, %v23532_v35  ;;  %v8435_v25 = vrot.slane %v20606_v47, 4  ;;  %v23535_v21 = vld [vmem:[#allocation87_spill] sm:$0xff]  ;;  %v23536_v1 = vld [vmem:[#allocation94_spill] sm:$0xff] }
 0x895   : > { %v8137_v16 = vrot.slane %v8136_v39, 2  ;;  %v8237_v52 = vrot.slane %v8236_v41, 4  ;;  %v8402_v6 = vadd.f32 %v8401_v37, %v8400_v63  ;;  %v8452_v19 = vrot.slane %v8451_v27, 4 }
 0x896   : > { %v8154_v46 = vrot.slane %v8153_v30, 2  ;;  %v8414_v57 = vadd.f32 %v8413_v20, %v23533_v17  ;;  %v8183_v61 = vadd.f32 %v8182_v3, %v23534_v62  ;;  %v8204_v0 = vadd.f32 %v8203_v38, %v23530_v11  ;;  %v23537_v17 = vld [vmem:[#allocation111_spill] sm:$0xff]  ;;  %v23538_v62 = vld [vmem:[#allocation84_spill] sm:$0xff] }
 0x897   : > { %v8369_v28 = vrot.slane %v8368_v13, 2  ;;  %v8469_v51 = vrot.slane %v8468_v23, 4  ;;  %v8171_v44 = vrot.slane %v8170_v31, 2  ;;  %v8221_v4 = vadd.f32 %v8220_v24, %v8219_v5 }
 0x898   : > { %v8386_v12 = vrot.slane %v8385_v34, 2  ;;  %v8415_v35 = vadd.f32 %v8414_v57, %v23535_v21  ;;  %v8184_v32 = vadd.f32 %v8183_v61, %v23536_v1  ;;  %v8436_v48 = vadd.f32 %v8435_v25, %v20606_v47  ;;  %v23539_v21 = vld [vmem:[#allocation64_spill] sm:$0xff] }
 0x899   : > { %v8138_v63 = vadd.f32 %v8137_v16, %v8136_v39  ;;  %v8403_v37 = vrot.slane %v8402_v6, 2  ;;  %v8238_v7 = vadd.f32 %v8237_v52, %v8236_v41  ;;  %v8453_v42 = vadd.f32 %v8452_v19, %v8451_v27 }
 0x89a   : > { %v8155_v20 = vadd.f32 %v8154_v46, %v8153_v30  ;;  %v8185_v3 = vadd.f32 %v8184_v32, %v23537_v17  ;;  %v8416_v38 = vadd.f32 %v8415_v35, %v23538_v62  ;;  %v8205_v11 = vrot.slane %v8204_v0, 2 }
 0x89b   : > { %v8370_v58 = vadd.f32 %v8369_v28, %v8368_v13  ;;  %v8470_v54 = vadd.f32 %v8469_v51, %v8468_v23  ;;  %v8172_v5 = vadd.f32 %v8171_v44, %v8170_v31  ;;  %v8387_v24 = vadd.f32 %v8386_v12, %v8385_v34 }
 0x89c   : > { %v8186_v15 = vrot.slane %v8185_v3, 4  ;;  %v8222_v57 = vrot.slane %v8221_v4, 2  ;;  %v8417_v61 = vadd.f32 %v8416_v38, %v23539_v21  ;;  %v8437_v1 = vrot.slane %v8436_v48, 2 }
 0x89d   : > { %v8139_v47 = vrot.slane %v8138_v63, 1  ;;  %v8404_v39 = vadd.f32 %v8403_v37, %v8402_v6  ;;  %v8239_v25 = vrot.slane %v8238_v7, 2  ;;  %v8454_v41 = vrot.slane %v8453_v42, 2 }
 0x89e   : > { %v8156_v27 = vrot.slane %v8155_v20, 1  ;;  %v8187_v30 = vadd.f32 %v8186_v15, %v8185_v3  ;;  %v8418_v16 = vrot.slane %v8417_v61, 4  ;;  %v8371_v52 = vrot.slane %v8370_v58, 1 }
 0x89f   : > { %v8173_v19 = vrot.slane %v8172_v5, 1  ;;  %v8206_v62 = vadd.f32 %v8205_v11, %v8204_v0  ;;  %v8471_v46 = vrot.slane %v8470_v54, 2  ;;  %v8388_v13 = vrot.slane %v8387_v24, 1 }
 0x8a0   : > { %v8188_v23 = vrot.slane %v8187_v30, 2  ;;  %v8223_v31 = vadd.f32 %v8222_v57, %v8221_v4  ;;  %v8419_v34 = vadd.f32 %v8418_v16, %v8417_v61  ;;  %v8438_v28 = vadd.f32 %v8437_v1, %v8436_v48  ;;  %v23540_v4 = vld [vmem:[#allocation34_spill] sm:$0xff] }
 0x8a1   : > { %v8140_v51 = vadd.f32 %v8139_v47, %v8138_v63  ;;  %v8405_v44 = vrot.slane %v8404_v39, 1  ;;  %v8240_v12 = vadd.f32 %v8239_v25, %v8238_v7  ;;  %v8157_v35 = vadd.f32 %v8156_v27, %v8155_v20 }
 0x8a2   : > { %v8189_v32 = vadd.f32 %v8188_v23, %v8187_v30  ;;  %v8420_v6 = vrot.slane %v8419_v34, 2  ;;  %v8455_v37 = vadd.f32 %v8454_v41, %v8453_v42  ;;  %v8372_v38 = vadd.f32 %v8371_v52, %v8370_v58 }
 0x8a3   : > { %v8174_v21 = vadd.f32 %v8173_v19, %v8172_v5  ;;  %v8207_v15 = vrot.slane %v8206_v62, 1  ;;  %v8472_v3 = vadd.f32 %v8471_v46, %v8470_v54  ;;  %v8389_v17 = vadd.f32 %v8388_v13, %v8387_v24  ;;  %v23541_v54 = vld [vmem:[#allocation73_spill] sm:$0xff] }
 0x8a4   : > { %v8190_v18 = vrot.slane %v8189_v32, 1  ;;  %v8224_v0 = vrot.slane %v8223_v31, 1  ;;  %v8421_v11 = vadd.f32 %v8420_v6, %v8419_v34  ;;  %v8406_v36 = vadd.f32 %v8405_v44, %v8404_v39 }
 0x8a5   : > { %v8241_v60 = vrot.slane %v8240_v12, 1  ;;  %v8483_v1 = vsel %vm4000_vm4, %v8140_v51, %v23540_v4  ;;  %v8439_v48 = vrot.slane %v8438_v28, 1  ;;  %v8456_v57 = vrot.slane %v8455_v37, 1 }
 0x8a6   : > { %v8191_v63 = vadd.f32 %v8190_v18, %v8189_v32  ;;  %v8484_v7 = vsel %vm4002_vm5, %v8157_v35, %v8483_v1  ;;  %v8422_v20 = vrot.slane %v8421_v11, 1  ;;  %v8208_v42 = vadd.f32 %v8207_v15, %v8206_v62 }
 0x8a7   : > { %v8485_v58 = vsel %vm4004_vm6, %v8174_v21, %v8484_v7  ;;  %v8473_v5 = vrot.slane %v8472_v3, 1  ;;  %v8499_v24 = vsel %vm4000_vm4, %v8372_v38, %v23541_v54  ;;  %v8225_v61 = vadd.f32 %v8224_v0, %v8223_v31  ;;  %v23542_v38 = vld [vmem:[#allocation23_spill] sm:$0xff] }
 0x8a8   : > { %v8486_v47 = vsel %vm4006_vm7, %v8191_v63, %v8485_v58  ;;  %v8423_v39 = vadd.f32 %v8422_v20, %v8421_v11  ;;  %v8500_v25 = vsel %vm4002_vm5, %v8389_v17, %v8499_v24  ;;  %v8242_v41 = vadd.f32 %v8241_v60, %v8240_v12  ;;  %v23545_v20 = vld [vmem:[#allocation100_spill] sm:$0xff] }
 0x8a9   : > { %v8487_v18 = vsel %vm4008_vm8, %v8208_v42, %v8486_v47  ;;  %v8440_v27 = vadd.f32 %v8439_v48, %v8438_v28  ;;  %v8501_v30 = vsel %vm4004_vm6, %v8406_v36, %v8500_v25  ;;  %v8457_v52 = vadd.f32 %v8456_v57, %v8455_v37  ;;  %v9632_v37 = vld [vmem:[#allocation13 + $0x8] sm:$0xff] }
 0x8aa   : > { %v8488_v16 = vsel %vm4010_vm9, %v8225_v61, %v8487_v18  ;;  %v8502_v19 = vsel %vm4006_vm7, %v8423_v39, %v8501_v30  ;;  %v8474_v46 = vadd.f32 %v8473_v5, %v8472_v3  ;;  %v22645_v6 = vmov 0.0|0.0   ;;  %9983 = vmatprep.mubr.f32.mxu1 %v9632_v37 }
 0x8ab   : > { %v8489_v62 = vsel %vm4012_vm10, %v8242_v41, %v8488_v16  ;;  %v8503_v13 = vsel %vm4008_vm8, %v8440_v27, %v8502_v19  ;;  %13443 = vmatprep.subr.bf16.mxu1 %v22645_v6  ;;  %v23543_v21 = vsub.s32 1, %v23542_v38  ;;  %v23544_v3 = vsub.s32 2, %v23542_v38  ;;  %v23547_v38 = vld [vmem:[#allocation26_spill] sm:$0xff] }
 0x8ac   : > { %13377 = vmatprep.mubr.f32.mxu0 %v8489_v62  ;;  %v8504_v23 = vsel %vm4010_vm9, %v8457_v52, %v8503_v13 }
 0x8ad   : > { %v8505_v60 = vsel %vm4012_vm10, %v8474_v46, %v8504_v23  ;;  %v23546_v23 = vld [vmem:[#allocation24_spill] sm:$0xff] }
 0x8ae   : > { %13378 = vmatmul.mubr.f32.vlgmr.msra.gmra.mrb[192].mxu0 %v8505_v60 }
 0x8af   : > { %13442 = vmatpush3.bf16.msra.mxu0 %v20867_v8  ;;  %v14682_v8 = vld [vmem:[#allocation10] sm:$0xff] }
 0x8b0   : > { %v8675_v15 = vrot.slane %v14682_v8, %v23543_v21  ;;  %v8681_v0 = vrot.slane %v14682_v8, %v23544_v3 }
 0x981   : > { %v13379_v17 = vpop.f32.mrb[192].mxu0 }
 0x982   : > { %v8573_v36 = vpop.f32.mrb[193].mxu0  ;;  %v8583_v34 = vmul.f32 0.0013020834, %v13379_v17 }
 0x983   : > { %v8582_v31 = vmul.f32 0.0013020834, %v8573_v36 }
 0x985   : > { %v8584_v28 = vmul.f32 %v8582_v31, %v8582_v31 }
 0x987   : > { %v8585_v51 = vsub.f32 %v8583_v34, %v8584_v28 }
 0x989   : > { %v8586_v44 = vmax.f32 %v8585_v51, 0.0 }
 0x98b   : > { %v8587_v12 = vadd.f32 1e-05, %v8586_v44 }
 0x98d   : > { %14486 = vrsqrt.f32 %v8587_v12 }
 0x997   : > { %v14487_v35 = vpop.eup %14486 }
 0x998   : > { %v8589_v32 = vmul.f32 %v14487_v35, %v8582_v31  ;;  %13384 = vmatprep.mubr.msk.f32.mxu0 %vm8590_vm0, %v14487_v35 }
 0x99a   : > { %13385 = vmatmul.mubr.msk.f32.vlgmr.msra.gmra.mrb[194].mxu0 %vm8590_vm0, %v8589_v32 }
 0xa6d   : > { %v13386_v11 = vpop.f32.mrb[194].mxu0 }
 0xa6e   : > { %v8677_v4 = vmul.f32 %v13386_v11, %v8675_v15  ;;  %v8663_v1 = vpop.f32.mrb[195].mxu0 }
 0xa6f   : > { %v8676_v48 = vmul.f32 %v8675_v15, %v8663_v1  ;;  %v23548_v15 = vld [vmem:[#allocation70_spill] sm:$0xff] }
 0xa70   : > { %v8682_v63 = vsub.f32 %v8681_v0, %v8677_v4  ;;  %v23549_v0 = vld [vmem:[#allocation28_spill] sm:$0xff]  ;;  %v23550_v4 = vld [vmem:[#allocation71_spill] sm:$0xff] }
 0xa71   : > { %v8684_v7 = vcombine.high %v8676_v48, %v8676_v48  ;;  %v8691_v57 = vrot.slane %v8676_v48, %v23545_v20  ;;  %v23551_v48 = vld [vmem:[#allocation76_spill] sm:$0xff] }
 0xa72   : > { %v8870_v42 = vcombine.high %v8682_v63, %v8682_v63  ;;  %v8877_v58 = vrot.slane %v8682_v63, %v23545_v20 }
 0xa73   : > { %v8698_v5 = vrot.slane %v8684_v7, %v23545_v20  ;;  %v8699_v54 = vcombine.high %v8691_v57, %v8691_v57  ;;  %v8707_v25 = vrot.slane %v8691_v57, %v23545_v20  ;;  %v23552_v7 = vld [vmem:[#allocation88_spill] sm:$0xff]  ;;  %v23553_v57 = vld [vmem:[#allocation78_spill] sm:$0xff] }
 0xa74   : > { %v8884_v24 = vrot.slane %v8870_v42, %v23545_v20  ;;  %v8885_v61 = vcombine.high %v8877_v58, %v8877_v58  ;;  %v8893_v47 = vrot.slane %v8877_v58, %v23545_v20  ;;  %v23554_v58 = vld [vmem:[#allocation82_spill] sm:$0xff] }
 0xa75   : > { %v8700_v39 = vcombine.high %v8698_v5, %v8698_v5  ;;  %v8714_v41 = vrot.slane %v8698_v5, %v23545_v20  ;;  %v8721_v16 = vrot.slane %v8699_v54, %v23545_v20  ;;  %v8736_v60 = vrot.slane %v8707_v25, %v23546_v23 }
 0xa76   : > { %v8886_v18 = vcombine.high %v8884_v24, %v8884_v24  ;;  %v8900_v27 = vrot.slane %v8884_v24, %v23545_v20  ;;  %v8907_v30 = vrot.slane %v8885_v61, %v23545_v20  ;;  %v8915_v52 = vcombine.high %v8893_v47, %v8893_v47 }
 0xa77   : > { %v8728_v19 = vrot.slane %v8700_v39, %v23545_v20  ;;  %v20993_v17 = vrot.slane %v8893_v47, %v23546_v23  ;;  %v8729_v36 = vcombine.high %v8707_v25, %v8707_v25  ;;  %v8730_v31 = vcombine.high %v8714_v41, %v8714_v41 }
 0xa78   : > { %v8914_v62 = vrot.slane %v8886_v18, %v23545_v20  ;;  %v8916_v46 = vcombine.high %v8900_v27, %v8900_v27  ;;  %v8917_v13 = vcombine.high %v8907_v30, %v8907_v30  ;;  %v8731_v34 = vcombine.high %v8721_v16, %v8721_v16 }
 0xa79   : > { %v20996_v28 = vrot.slane %v8907_v30, %v23546_v23  ;;  %v20999_v51 = vrot.slane %v8915_v52, %v23546_v23  ;;  %v21002_v44 = vrot.slane %v8900_v27, %v23546_v23  ;;  %v8732_v12 = vcombine.high %v8728_v19, %v8728_v19 }
 0xa7a   : > { %v8918_v35 = vcombine.high %v8914_v62, %v8914_v62  ;;  %v21005_v32 = vrot.slane %v8917_v13, %v23546_v23  ;;  %v21008_v37 = vrot.slane %v8914_v62, %v23546_v23  ;;  %v21011_v8 = vrot.slane %v8916_v46, %v23546_v23 }
 0xa7b   : > { %v8773_v21 = vmul.f32 %v8736_v60, %v23547_v38  ;;  %v8774_v3 = vmul.f32 %v8736_v60, %v23548_v15  ;;  %v8775_v11 = vmul.f32 %v8736_v60, %v23549_v0  ;;  %v8776_v1 = vmul.f32 %v8736_v60, %v23550_v4 }
 0xa7c   : > { %v8777_v63 = vmul.f32 %v8736_v60, %v23551_v48  ;;  %v8778_v20 = vmul.f32 %v8736_v60, %v23552_v7  ;;  %v8779_v42 = vmul.f32 %v8736_v60, %v23553_v57  ;;  %v8780_v5 = vmul.f32 %v8736_v60, %v23554_v58  ;;  %v23556_v57 = vld [vmem:[#allocation35_spill] sm:$0xff]  ;;  %v23557_v58 = vld [vmem:[#allocation40_spill] sm:$0xff] }
 0xa7d   : > { %v21022_v54 = vadd.f32 %v20993_v17, %v8773_v21  ;;  %v21025_v24 = vadd.f32 %v20993_v17, %v8774_v3  ;;  %v21028_v61 = vadd.f32 %v20993_v17, %v8775_v11  ;;  %v21031_v47 = vadd.f32 %v20993_v17, %v8776_v1 }
 0xa7e   : > { %v21034_v39 = vadd.f32 %v20993_v17, %v8777_v63  ;;  %v21037_v25 = vadd.f32 %v20993_v17, %v8778_v20  ;;  %v21040_v18 = vadd.f32 %v20993_v17, %v8779_v42  ;;  %v21043_v27 = vadd.f32 %v20993_v17, %v8780_v5 }
 0xa7f   : > { %v21046_v30 = vrot.slane %v8721_v16, %v23546_v23  ;;  %v21049_v52 = vrot.slane %v8729_v36, %v23546_v23  ;;  %v9151_v62 = vmin.f32 %v21022_v54, 0.0  ;;  %v9152_v46 = vmin.f32 %v21025_v24, 0.0 }
 0xa80   : > { %v21054_v13 = vrot.slane %v8731_v34, %v23546_v23  ;;  %v21057_v38 = vrot.slane %v8714_v41, %v23546_v23  ;;  %v9153_v21 = vmin.f32 %v21028_v61, 0.0  ;;  %v9154_v15 = vmin.f32 %v21031_v47, 0.0 }
 0xa81   : > { %v21062_v16 = vrot.slane %v8918_v35, %v23546_v23  ;;  %v21065_v36 = vrot.slane %v8728_v19, %v23546_v23  ;;  %v9247_v3 = vmul.f32 1.442695, %v9151_v62  ;;  %v9249_v0 = vmul.f32 1.442695, %v9152_v46  ;;  %v23558_v62 = vld [vmem:[#allocation33_spill] sm:$0xff] }
 0xa82   : > { %v9251_v11 = vmul.f32 1.442695, %v9153_v21  ;;  %v9253_v4 = vmul.f32 1.442695, %v9154_v15  ;;  %v9155_v34 = vmin.f32 %v21034_v39, 0.0  ;;  %v9156_v1 = vmin.f32 %v21037_v25, 0.0 }
 0xa83   : > { %23555 = vst [vmem:[#allocation102_spill] sm:$0xff] %v21062_v16  ;;  %v21070_v41 = vrot.slane %v8730_v31, %v23546_v23  ;;  %v21073_v48 = vrot.slane %v8732_v12, %v23546_v23  ;;  %14488 = vpow2.f32 %v9247_v3  ;;  %v9157_v35 = vmin.f32 %v21040_v18, 0.0  ;;  %v23559_v23 = vld [vmem:[#allocation42_spill] sm:$0xff]  ;;  %v23560_v3 = vld [vmem:[#allocation85_spill] sm:$0xff] }
 0xa84   : > { %14490 = vpow2.f32 %v9249_v0  ;;  %v9255_v19 = vmul.f32 1.442695, %v9155_v34  ;;  %v9257_v63 = vmul.f32 1.442695, %v9156_v1  ;;  %v9158_v7 = vmin.f32 %v21043_v27, 0.0  ;;  %v23561_v34 = vld [vmem:[#allocation77_spill] sm:$0xff] }
 0xa85   : > { %14492 = vpow2.f32 %v9251_v11  ;;  %v9259_v20 = vmul.f32 1.442695, %v9157_v35  ;;  %v8781_v42 = vmul.f32 %v8736_v60, %v23556_v57  ;;  %v8782_v5 = vmul.f32 %v8736_v60, %v23557_v58 }
 0xa86   : > { %14494 = vpow2.f32 %v9253_v4  ;;  %v9261_v31 = vmul.f32 1.442695, %v9158_v7  ;;  %v8783_v46 = vmul.f32 %v8736_v60, %v23558_v62  ;;  %v8784_v12 = vmul.f32 %v8736_v60, %v23559_v23 }
 0xa87   : > { %14496 = vpow2.f32 %v9255_v19  ;;  %v21082_v21 = vadd.f32 %v20993_v17, %v8781_v42  ;;  %v21085_v15 = vadd.f32 %v20993_v17, %v8782_v5  ;;  %v8785_v0 = vmul.f32 %v21046_v30, %v23560_v3  ;;  %v23562_v42 = vld [vmem:[#allocation45_spill] sm:$0xff] }
 0xa88   : > { %14498 = vpow2.f32 %v9257_v63  ;;  %v21090_v11 = vadd.f32 %v20993_v17, %v8783_v46  ;;  %v21093_v4 = vadd.f32 %v20993_v17, %v8784_v12  ;;  %v8786_v60 = vmul.f32 %v21046_v30, %v23561_v34  ;;  %v23563_v46 = vld [vmem:[#allocation43_spill] sm:$0xff] }
 0xa89   : > { %vm9055_vm2 = vcmp.gt.f32.partialorder %v21022_v54, 0.0  ;;  %vm9056_vm3 = vcmp.gt.f32.partialorder %v21025_v24, 0.0  ;;  %14500 = vpow2.f32 %v9259_v20  ;;  %v9159_v1 = vmin.f32 %v21082_v21, 0.0 }
 0xa8a   : > { %vm9057_vm4 = vcmp.gt.f32.partialorder %v21028_v61, 0.0  ;;  %vm9058_vm5 = vcmp.gt.f32.partialorder %v21031_v47, 0.0  ;;  %14502 = vpow2.f32 %v9261_v31  ;;  %v9160_v35 = vmin.f32 %v21085_v15, 0.0 }
 0xa8b   : > { %vm9059_vm6 = vcmp.gt.f32.partialorder %v21034_v39, 0.0  ;;  %v9263_v17 = vmul.f32 1.442695, %v9159_v1  ;;  %v9161_v19 = vmin.f32 %v21090_v11, 0.0  ;;  %v9162_v63 = vmin.f32 %v21093_v4, 0.0 }
 0xa8c   : > { %v21107_v7 = vadd.f32 %v20996_v28, %v8785_v0  ;;  %vm9060_vm7 = vcmp.gt.f32.partialorder %v21037_v25, 0.0  ;;  %v9265_v20 = vmul.f32 1.442695, %v9160_v35  ;;  %v21111_v57 = vadd.f32 %v20996_v28, %v8786_v60 }
 0xa8d   : > { %v8787_v58 = vmul.f32 %v21046_v30, %v23562_v42  ;;  %v14489_v5 = vpop.eup %14488  ;;  %vm9061_vm8 = vcmp.gt.f32.partialorder %v21040_v18, 0.0  ;;  %14504 = vpow2.f32 %v9263_v17  ;;  %v9267_v31 = vmul.f32 1.442695, %v9161_v19 }
 0xa8e   : > { %v9269_v62 = vmul.f32 1.442695, %v9162_v63  ;;  %v8788_v23 = vmul.f32 %v21046_v30, %v23563_v46  ;;  %v14491_v12 = vpop.eup %14490  ;;  %v11727_v3 = vadd.f32 -1.0, %v14489_v5  ;;  %vm9062_vm9 = vcmp.gt.f32.partialorder %v21043_v27, 0.0 }
 0xa8f   : > { %14506 = vpow2.f32 %v9265_v20  ;;  %v9163_v0 = vmin.f32 %v21107_v7, 0.0  ;;  %v14493_v34 = vpop.eup %14492  ;;  %v11728_v60 = vadd.f32 -1.0, %v14491_v12  ;;  %v9164_v1 = vmin.f32 %v21111_v57, 0.0 }
 0xa90   : > { %14508 = vpow2.f32 %v9267_v31  ;;  %v21122_v35 = vadd.f32 %v20996_v28, %v8787_v58  ;;  %v14495_v17 = vpop.eup %14494  ;;  %v9535_v19 = vsel %vm9055_vm2, %v21022_v54, %v11727_v3  ;;  %v11729_v63 = vadd.f32 -1.0, %v14493_v34 }
 0xa91   : > { %14510 = vpow2.f32 %v9269_v62  ;;  %v9271_v42 = vmul.f32 1.442695, %v9163_v0  ;;  %v14497_v5 = vpop.eup %14496  ;;  %v9536_v20 = vsel %vm9056_vm3, %v21025_v24, %v11728_v60  ;;  %v11730_v46 = vadd.f32 -1.0, %v14495_v17 }
 0xa92   : > { %v9273_v31 = vmul.f32 1.442695, %v9164_v1  ;;  %v21131_v12 = vadd.f32 %v20996_v28, %v8788_v23  ;;  %v14499_v58 = vpop.eup %14498  ;;  %v13444_v6 = vpack.c.bf16 %v9536_v20, %v9535_v19  ;;  %v9537_v16 = vsel %vm9057_vm4, %v21028_v61, %v11729_v63 }
 0xa93   : > { %v11731_v54 = vadd.f32 -1.0, %v14497_v5  ;;  %14512 = vpow2.f32 %v9271_v42  ;;  %v14501_v62 = vpop.eup %14500  ;;  %v9538_v3 = vsel %vm9058_vm5, %v21031_v47, %v11730_v46  ;;  %v11732_v0 = vadd.f32 -1.0, %v14499_v58  ;;  %v23566_v42 = vld [vmem:[#allocation110_spill] sm:$0xff]  ;;  %v23567_v58 = vld [vmem:[#allocation59_spill] sm:$0xff] }
 0xa94   : > { %vm9063_vm10 = vcmp.gt.f32.partialorder %v21082_v21, 0.0  ;;  %14514 = vpow2.f32 %v9273_v31  ;;  %v14503_v24 = vpop.eup %14502  ;;  %13445 = vmatpush1.bf16.msra.mxu1 %v13444_v6  ;;  %v13447_v23 = vpack.c.bf16 %v9538_v3, %v9537_v16  ;;  %v11733_v60 = vadd.f32 -1.0, %v14501_v62 }
 0xa95   : > { %v9539_v34 = vsel %vm9059_vm6, %v21034_v39, %v11731_v54  ;;  %vm9064_vm11 = vcmp.gt.f32.partialorder %v21085_v15, 0.0  ;;  %v23564_v61 = vmov 0.0|0.0   ;;  %v9540_v47 = vsel %vm9060_vm7, %v21037_v25, %v11732_v0  ;;  %v23565_v39 = vld [vmem:[#allocation44_spill] sm:$0xff] }
 0xa96   : > { %13446 = vmatprep.subr.bf16.mxu1 %v23564_v61  ;;  %v11734_v1 = vadd.f32 -1.0, %v14503_v24  ;;  %v9165_v17 = vmin.f32 %v21122_v35, 0.0  ;;  %v9166_v19 = vmin.f32 %v21131_v12, 0.0  ;;  %v13450_v6 = vpack.c.bf16 %v9540_v47, %v9539_v34 }
 0xa97   : > { %v9541_v16 = vsel %vm9061_vm8, %v21040_v18, %v11733_v60  ;;  %v8789_v63 = vmul.f32 %v21046_v30, %v23565_v39  ;;  %v8790_v5 = vmul.f32 %v21046_v30, %v23566_v42  ;;  %v14505_v20 = vpop.eup %14504  ;;  %v8791_v54 = vmul.f32 %v21046_v30, %v23567_v58 }
 0xa98   : > { %v9542_v25 = vsel %vm9062_vm9, %v21043_v27, %v11734_v1  ;;  %v9275_v46 = vmul.f32 1.442695, %v9165_v17  ;;  %v9277_v31 = vmul.f32 1.442695, %v9166_v19  ;;  %13448 = vmatpush1.bf16.msra.mxu1 %v13447_v23  ;;  %v11735_v18 = vadd.f32 -1.0, %v14505_v20  ;;  %v23568_v27 = vld [vmem:[#allocation48_spill] sm:$0xff] }
 0xa99   : > { %v14507_v62 = vpop.eup %14506  ;;  %v13453_v3 = vpack.c.bf16 %v9542_v25, %v9541_v16  ;;  %v21163_v0 = vadd.f32 %v20996_v28, %v8789_v63  ;;  %v21166_v24 = vadd.f32 %v20996_v28, %v8790_v5  ;;  %13449 = vmatprep.subr.bf16.mxu1 %v23564_v61  ;;  %v8792_v47 = vmul.f32 %v21046_v30, %v23568_v27 }
 0xa9a   : > { %v14509_v34 = vpop.eup %14508  ;;  %v11736_v60 = vadd.f32 -1.0, %v14507_v62  ;;  %14516 = vpow2.f32 %v9275_v46  ;;  %v21172_v1 = vadd.f32 %v20996_v28, %v8791_v54  ;;  %v9543_v17 = vsel %vm9063_vm10, %v21082_v21, %v11735_v18 }
 0xa9b   : > { %v14511_v23 = vpop.eup %14510  ;;  %vm9065_vm12 = vcmp.gt.f32.partialorder %v21090_v11, 0.0  ;;  %v11737_v19 = vadd.f32 -1.0, %v14509_v34  ;;  %14518 = vpow2.f32 %v9277_v31  ;;  %vm9066_vm13 = vcmp.gt.f32.partialorder %v21093_v4, 0.0 }
 0xa9c   : > { %v9544_v16 = vsel %vm9064_vm11, %v21085_v15, %v11736_v60  ;;  %v11738_v39 = vadd.f32 -1.0, %v14511_v23  ;;  %v9167_v63 = vmin.f32 %v21163_v0, 0.0  ;;  %13451 = vmatpush1.bf16.msra.mxu1 %v13450_v6  ;;  %v9168_v21 = vmin.f32 %v21166_v24, 0.0 }
 0xa9d   : > { %v14513_v42 = vpop.eup %14512  ;;  %v13456_v5 = vpack.c.bf16 %v9544_v16, %v9543_v17  ;;  %v9545_v20 = vsel %vm9065_vm12, %v21090_v11, %v11737_v19  ;;  %v21186_v25 = vadd.f32 %v20996_v28, %v8792_v47  ;;  %13452 = vmatprep.subr.bf16.mxu1 %v23564_v61  ;;  %vm9067_vm14 = vcmp.gt.f32.partialorder %v21107_v7, 0.0  ;;  %v23570_v47 = vld [vmem:[#allocation119_spill] sm:$0xff] }
 0xa9e   : > { %v14515_v46 = vpop.eup %14514  ;;  %v9546_v15 = vsel %vm9066_vm13, %v21093_v4, %v11738_v39  ;;  %v11739_v31 = vadd.f32 -1.0, %v14513_v42  ;;  %v9279_v58 = vmul.f32 1.442695, %v9167_v63  ;;  %vm9068_vm15 = vcmp.gt.f32.partialorder %v21111_v57, 0.0  ;;  %v23569_v4 = vld [vmem:[#allocation118_spill] sm:$0xff]  ;;  %v23572_v42 = vld [vmem:[#allocation55_spill] sm:$0xff] }
 0xa9f   : > { %v13459_v54 = vpack.c.bf16 %v9546_v15, %v9545_v20  ;;  %v11740_v6 = vadd.f32 -1.0, %v14515_v46  ;;  %v9281_v62 = vmul.f32 1.442695, %v9168_v21  ;;  %v9169_v18 = vmin.f32 %v21172_v1, 0.0 }
 0xaa0   : > { %v9547_v11 = vsel %vm9067_vm14, %v21107_v7, %v11739_v31  ;;  %14520 = vpow2.f32 %v9279_v58  ;;  %v9170_v34 = vmin.f32 %v21186_v25, 0.0  ;;  %13454 = vmatpush1.bf16.msra.mxu1 %v13453_v3  ;;  %v8793_v27 = vmul.f32 %v21046_v30, %v23569_v4  ;;  %v23571_v3 = vld [vmem:[#allocation96_spill] sm:$0xff] }
 0xaa1   : > { %v9548_v60 = vsel %vm9068_vm15, %v21111_v57, %v11740_v6  ;;  %14522 = vpow2.f32 %v9281_v62  ;;  %v8794_v23 = vmul.f32 %v21046_v30, %v23570_v47  ;;  %13455 = vmatprep.subr.bf16.mxu1 %v23564_v61  ;;  %v9283_v19 = vmul.f32 1.442695, %v9169_v18  ;;  %v23573_v31 = vld [vmem:[#allocation36_spill] sm:$0xff]  ;;  %v23574_v47 = vld [vmem:[#allocation103_spill] sm:$0xff] }
 0xaa2   : > { %v13462_v17 = vpack.c.bf16 %v9548_v60, %v9547_v11  ;;  %v9285_v7 = vmul.f32 1.442695, %v9170_v34  ;;  %v8795_v16 = vmul.f32 %v21046_v30, %v20506_v50  ;;  %v21204_v39 = vadd.f32 %v20996_v28, %v8793_v27 }
 0xaa3   : > { %v21207_v57 = vadd.f32 %v20996_v28, %v8794_v23  ;;  %v8796_v63 = vmul.f32 %v21046_v30, %v23571_v3  ;;  %v8797_v20 = vmul.f32 %v21049_v52, %v23572_v42  ;;  %vm9069_vm1 = vcmp.gt.f32.partialorder %v21122_v35, 0.0  ;;  %v23575_v3 = vld [vmem:[#allocation58_spill] sm:$0xff] }
 0xaa4   : > { %v14517_v21 = vpop.eup %14516  ;;  %vm9070_vm0 = vcmp.gt.f32.partialorder %v21131_v12, 0.0  ;;  %14524 = vpow2.f32 %v9283_v19  ;;  %v21216_v50 = vadd.f32 %v20996_v28, %v8795_v16  ;;  %13457 = vmatpush1.bf16.msra.mxu1 %v13456_v5  ;;  %vm9071_vm2 = vcmp.gt.f32.partialorder %v21163_v0, 0.0 }
 0xaa5   : > { %v14519_v46 = vpop.eup %14518  ;;  %v11741_v15 = vadd.f32 -1.0, %v14517_v21  ;;  %14526 = vpow2.f32 %v9285_v7  ;;  %v8798_v30 = vmul.f32 %v21049_v52, %v23573_v31  ;;  %13458 = vmatprep.subr.bf16.mxu1 %v23564_v61  ;;  %v9171_v6 = vmin.f32 %v21204_v39, 0.0 }
 0xaa6   : > { %v11742_v58 = vadd.f32 -1.0, %v14519_v46  ;;  %v9172_v62 = vmin.f32 %v21207_v57, 0.0  ;;  %v21225_v11 = vadd.f32 %v20996_v28, %v8796_v63  ;;  %vm9072_vm3 = vcmp.gt.f32.partialorder %v21166_v24, 0.0 }
 0xaa7   : > { %v9549_v18 = vsel %vm9069_vm1, %v21122_v35, %v11741_v15  ;;  %v9173_v5 = vmin.f32 %v21216_v50, 0.0  ;;  %v21231_v34 = vadd.f32 %v20999_v51, %v8797_v20  ;;  %v9287_v4 = vmul.f32 1.442695, %v9171_v6 }
 0xaa8   : > { %v9550_v60 = vsel %vm9070_vm0, %v21131_v12, %v11742_v58  ;;  %v9289_v27 = vmul.f32 1.442695, %v9172_v62  ;;  %v8799_v23 = vmul.f32 %v21049_v52, %v23574_v47  ;;  %13460 = vmatpush1.bf16.msra.mxu1 %v13459_v54  ;;  %v9174_v35 = vmin.f32 %v21225_v11, 0.0 }
 0xaa9   : > { %v13465_v28 = vpack.c.bf16 %v9550_v60, %v9549_v18  ;;  %v9291_v19 = vmul.f32 1.442695, %v9173_v5  ;;  %v21240_v7 = vadd.f32 %v20999_v51, %v8798_v30  ;;  %13461 = vmatprep.subr.bf16.mxu1 %v23564_v61  ;;  %vm9073_vm4 = vcmp.gt.f32.partialorder %v21172_v1, 0.0  ;;  %v23576_v18 = vld [vmem:[#allocation105_spill] sm:$0xff] }
 0xaaa   : > { %v14521_v16 = vpop.eup %14520  ;;  %14528 = vpow2.f32 %v9287_v4  ;;  %v9175_v12 = vmin.f32 %v21231_v34, 0.0  ;;  %v8800_v63 = vmul.f32 %v21049_v52, %v23575_v3  ;;  %vm9074_vm5 = vcmp.gt.f32.partialorder %v21186_v25, 0.0 }
 0xaab   : > { %v14523_v42 = vpop.eup %14522  ;;  %v11743_v54 = vadd.f32 -1.0, %v14521_v16  ;;  %14530 = vpow2.f32 %v9289_v27  ;;  %v9293_v20 = vmul.f32 1.442695, %v9174_v35  ;;  %v9176_v46 = vmin.f32 %v21240_v7, 0.0  ;;  %v23577_v35 = vld [vmem:[#allocation29_spill] sm:$0xff] }
 0xaac   : > { %v11744_v21 = vadd.f32 -1.0, %v14523_v42  ;;  %14532 = vpow2.f32 %v9291_v19  ;;  %v9295_v15 = vmul.f32 1.442695, %v9175_v12  ;;  %13463 = vmatpush1.bf16.msra.mxu1 %v13462_v17  ;;  %v21253_v30 = vadd.f32 %v20999_v51, %v8799_v23 }
 0xaad   : > { %v9551_v31 = vsel %vm9071_vm2, %v21163_v0, %v11743_v54  ;;  %14534 = vpow2.f32 %v9293_v20  ;;  %v21256_v58 = vadd.f32 %v20999_v51, %v8800_v63  ;;  %13464 = vmatprep.subr.bf16.mxu1 %v23564_v61  ;;  %v9297_v17 = vmul.f32 1.442695, %v9176_v46 }
 0xaae   : > { %v14525_v6 = vpop.eup %14524  ;;  %v9552_v62 = vsel %vm9072_vm3, %v21166_v24, %v11744_v21  ;;  %14536 = vpow2.f32 %v9295_v15  ;;  %v8801_v5 = vmul.f32 %v21049_v52, %v23576_v18  ;;  %vm9075_vm6 = vcmp.gt.f32.partialorder %v21204_v39, 0.0 }
 0xaaf   : > { %v14527_v0 = vpop.eup %14526  ;;  %v13468_v60 = vpack.c.bf16 %v9552_v62, %v9551_v31  ;;  %v11745_v4 = vadd.f32 -1.0, %v14525_v6  ;;  %vm9076_vm7 = vcmp.gt.f32.partialorder %v21207_v57, 0.0  ;;  %14538 = vpow2.f32 %v9297_v17 }
 0xab0   : > { %v11746_v27 = vadd.f32 -1.0, %v14527_v0  ;;  %v9177_v47 = vmin.f32 %v21253_v30, 0.0  ;;  %v9178_v23 = vmin.f32 %v21256_v58, 0.0  ;;  %13466 = vmatpush1.bf16.msra.mxu1 %v13465_v28  ;;  %v8802_v19 = vmul.f32 %v21049_v52, %v23577_v35 }
 0xab1   : > { %v9553_v24 = vsel %vm9073_vm4, %v21172_v1, %v11745_v4  ;;  %v21274_v16 = vadd.f32 %v20999_v51, %v8801_v5  ;;  %v8803_v12 = vmul.f32 %v21049_v52, %v20661_v26  ;;  %13467 = vmatprep.subr.bf16.mxu1 %v23564_v61  ;;  %v8804_v1 = vmul.f32 %v21049_v52, %v20653_v9 }
 0xab2   : > { %v9554_v3 = vsel %vm9074_vm5, %v21186_v25, %v11746_v27  ;;  %v9299_v28 = vmul.f32 1.442695, %v9177_v47  ;;  %v9301_v63 = vmul.f32 1.442695, %v9178_v23  ;;  %vm9077_vm8 = vcmp.gt.f32.partialorder %v21216_v50, 0.0 }
 0xab3   : > { %v13471_v42 = vpack.c.bf16 %v9554_v3, %v9553_v24  ;;  %v21286_v54 = vadd.f32 %v20999_v51, %v8802_v19  ;;  %v9179_v20 = vmin.f32 %v21274_v16, 0.0  ;;  %vm9078_vm9 = vcmp.gt.f32.partialorder %v21225_v11, 0.0 }
 0xab4   : > { %v14529_v26 = vpop.eup %14528  ;;  %14540 = vpow2.f32 %v9299_v28  ;;  %v21291_v21 = vadd.f32 %v20999_v51, %v8803_v12  ;;  %v21294_v25 = vadd.f32 %v20999_v51, %v8804_v1  ;;  %13469 = vmatpush1.bf16.msra.mxu1 %v13468_v60  ;;  %vm9079_vm10 = vcmp.gt.f32.partialorder %v21231_v34, 0.0 }
 0xab5   : > { %v14531_v46 = vpop.eup %14530  ;;  %v11747_v9 = vadd.f32 -1.0, %v14529_v26  ;;  %14542 = vpow2.f32 %v9301_v63  ;;  %v9180_v15 = vmin.f32 %v21286_v54, 0.0  ;;  %13470 = vmatprep.subr.bf16.mxu1 %v23564_v61  ;;  %vm9080_vm11 = vcmp.gt.f32.partialorder %v21240_v7, 0.0 }
 0xab6   : > { %v14533_v31 = vpop.eup %14532  ;;  %v11748_v6 = vadd.f32 -1.0, %v14531_v46  ;;  %v9303_v62 = vmul.f32 1.442695, %v9179_v20  ;;  %v8805_v17 = vmul.f32 %v21049_v52, %v20766_v14  ;;  %v9181_v4 = vmin.f32 %v21291_v21, 0.0 }
 0xab7   : > { %v14535_v18 = vpop.eup %14534  ;;  %v9555_v5 = vsel %vm9075_vm6, %v21204_v39, %v11747_v9  ;;  %v11749_v0 = vadd.f32 -1.0, %v14533_v31  ;;  %v9305_v60 = vmul.f32 1.442695, %v9180_v15  ;;  %v9182_v24 = vmin.f32 %v21294_v25, 0.0 }
 0xab8   : > { %v14537_v27 = vpop.eup %14536  ;;  %v9556_v47 = vsel %vm9076_vm7, %v21207_v57, %v11748_v6  ;;  %v11750_v23 = vadd.f32 -1.0, %v14535_v18  ;;  %14544 = vpow2.f32 %v9303_v62  ;;  %13472 = vmatpush1.bf16.msra.mxu1 %v13471_v42  ;;  %v9307_v57 = vmul.f32 1.442695, %v9181_v4  ;;  %v23578_v6 = vld [vmem:[#allocation122_spill] sm:$0xff] }
 0xab9   : > { %v13474_v14 = vpack.c.bf16 %v9556_v47, %v9555_v5  ;;  %v9557_v35 = vsel %vm9077_vm8, %v21216_v50, %v11749_v0  ;;  %v11751_v39 = vadd.f32 -1.0, %v14537_v27  ;;  %14546 = vpow2.f32 %v9305_v60  ;;  %v14539_v19 = vpop.eup %14538  ;;  %13473 = vmatprep.subr.bf16.mxu1 %v23564_v61  ;;  %v23579_v47 = vld [vmem:[#allocation30_spill] sm:$0xff] }
 0xaba   : > { %v9558_v12 = vsel %vm9078_vm9, %v21225_v11, %v11750_v23  ;;  %v9309_v3 = vmul.f32 1.442695, %v9182_v24  ;;  %v8806_v28 = vmul.f32 %v21049_v52, %v20749_v49  ;;  %v11752_v1 = vadd.f32 -1.0, %v14539_v19 }
 0xabb   : > { %v13477_v63 = vpack.c.bf16 %v9558_v12, %v9557_v35  ;;  %v9559_v50 = vsel %vm9079_vm10, %v21231_v34, %v11751_v39  ;;  %v21323_v42 = vadd.f32 %v20999_v51, %v8805_v17  ;;  %14548 = vpow2.f32 %v9307_v57 }
 0xabc   : > { %v21326_v20 = vadd.f32 %v20999_v51, %v8806_v28  ;;  %v8807_v11 = vmul.f32 %v21049_v52, %v20844_v40  ;;  %v8808_v26 = vmul.f32 %v21049_v52, %v20885_v33  ;;  %13475 = vmatpush1.bf16.msra.mxu1 %v13474_v14  ;;  %v9560_v49 = vsel %vm9080_vm11, %v21240_v7, %v11752_v1 }
 0xabd   : > { %vm9081_vm12 = vcmp.gt.f32.partialorder %v21253_v30, 0.0  ;;  %14550 = vpow2.f32 %v9309_v3  ;;  %v9183_v34 = vmin.f32 %v21323_v42, 0.0  ;;  %13476 = vmatprep.subr.bf16.mxu1 %v23564_v61  ;;  %v13480_v9 = vpack.c.bf16 %v9560_v49, %v9559_v50 }
 0xabe   : > { %v14541_v46 = vpop.eup %14540  ;;  %vm9082_vm13 = vcmp.gt.f32.partialorder %v21256_v58, 0.0  ;;  %v9184_v40 = vmin.f32 %v21326_v20, 0.0  ;;  %v21341_v33 = vadd.f32 %v20999_v51, %v8807_v11  ;;  %v21344_v7 = vadd.f32 %v20999_v51, %v8808_v26 }
 0xabf   : > { %v14543_v52 = vpop.eup %14542  ;;  %v11753_v15 = vadd.f32 -1.0, %v14541_v46  ;;  %v9311_v31 = vmul.f32 1.442695, %v9183_v34  ;;  %v8809_v62 = vmul.f32 %v21054_v13, %v23578_v6  ;;  %vm9083_vm14 = vcmp.gt.f32.partialorder %v21274_v16, 0.0 }
 0xac0   : > { %v11754_v17 = vadd.f32 -1.0, %v14543_v52  ;;  %v9313_v18 = vmul.f32 1.442695, %v9184_v40  ;;  %v9185_v5 = vmin.f32 %v21341_v33, 0.0  ;;  %13478 = vmatpush1.bf16.msra.mxu1 %v13477_v63  ;;  %vm9084_vm15 = vcmp.gt.f32.partialorder %v21286_v54, 0.0 }
 0xac1   : > { %v9561_v0 = vsel %vm9081_vm12, %v21253_v30, %v11753_v15  ;;  %14552 = vpow2.f32 %v9311_v31  ;;  %v9186_v51 = vmin.f32 %v21344_v7, 0.0  ;;  %13479 = vmatprep.subr.bf16.mxu1 %v23564_v61  ;;  %v8810_v23 = vmul.f32 %v21054_v13, %v23579_v47 }
 0xac2   : > { %v14545_v60 = vpop.eup %14544  ;;  %v9562_v4 = vsel %vm9082_vm13, %v21256_v58, %v11754_v17  ;;  %14554 = vpow2.f32 %v9313_v18  ;;  %v9315_v27 = vmul.f32 1.442695, %v9185_v5  ;;  %v21362_v39 = vadd.f32 %v21005_v32, %v8809_v62 }
 0xac3   : > { %v14547_v24 = vpop.eup %14546  ;;  %v13483_v14 = vpack.c.bf16 %v9562_v4, %v9561_v0  ;;  %v11755_v30 = vadd.f32 -1.0, %v14545_v60  ;;  %v9317_v35 = vmul.f32 1.442695, %v9186_v51  ;;  %v21365_v12 = vadd.f32 %v21005_v32, %v8810_v23 }
 0xac4   : > { %v11756_v19 = vadd.f32 -1.0, %v14547_v24  ;;  %14556 = vpow2.f32 %v9315_v27  ;;  %v8811_v58 = vmul.f32 %v21054_v13, %v20727_v22  ;;  %13481 = vmatpush1.bf16.msra.mxu1 %v13480_v9  ;;  %vm9085_vm1 = vcmp.gt.f32.partialorder %v21291_v21, 0.0 }
 0xac5   : > { %v9563_v57 = vsel %vm9083_vm14, %v21274_v16, %v11755_v30  ;;  %14558 = vpow2.f32 %v9317_v35  ;;  %v9187_v3 = vmin.f32 %v21362_v39, 0.0  ;;  %v14549_v28 = vpop.eup %14548  ;;  %13482 = vmatprep.subr.bf16.mxu1 %v23564_v61  ;;  %vm9086_vm0 = vcmp.gt.f32.partialorder %v21294_v25, 0.0 }
 0xac6   : > { %v9564_v63 = vsel %vm9084_vm15, %v21286_v54, %v11756_v19  ;;  %v9188_v22 = vmin.f32 %v21365_v12, 0.0  ;;  %v8812_v1 = vmul.f32 %v21054_v13, %v20723_v10  ;;  %v11757_v11 = vadd.f32 -1.0, %v14549_v28  ;;  %v9631_v19 = vld [vmem:[#allocation13] sm:$0xff] }
 0xac7   : > { %v14551_v16 = vpop.eup %14550  ;;  %v13486_v50 = vpack.c.bf16 %v9564_v63, %v9563_v57  ;;  %v9319_v26 = vmul.f32 1.442695, %v9187_v3  ;;  %v21383_v49 = vadd.f32 %v21005_v32, %v8811_v58  ;;  %v8813_v54 = vmul.f32 %v21054_v13, %v20776_v2  ;;  %v9638_v3 = vld [vmem:[#allocation13 + $0x38] sm:$0xff] }
 0xac8   : > { %v11758_v34 = vadd.f32 -1.0, %v14551_v16  ;;  %v9321_v46 = vmul.f32 1.442695, %v9188_v22  ;;  %v21386_v9 = vadd.f32 %v21005_v32, %v8812_v1  ;;  %13484 = vmatpush1.bf16.msra.mxu1 %v13483_v14  ;;  %v9565_v10 = vsel %vm9085_vm1, %v21291_v21, %v11757_v11 }
 0xac9   : > { %vm9087_vm2 = vcmp.gt.f32.partialorder %v21323_v42, 0.0  ;;  %14560 = vpow2.f32 %v9319_v26  ;;  %v9189_v40 = vmin.f32 %v21383_v49, 0.0  ;;  %13485 = vmatprep.subr.bf16.mxu1 %v23564_v61  ;;  %vm9088_vm3 = vcmp.gt.f32.partialorder %v21326_v20, 0.0 }
 0xaca   : > { %v9566_v52 = vsel %vm9086_vm0, %v21294_v25, %v11758_v34  ;;  %14562 = vpow2.f32 %v9321_v46  ;;  %v9190_v2 = vmin.f32 %v21386_v9, 0.0  ;;  %v8814_v21 = vmul.f32 %v21054_v13, %v20771_v56  ;;  %v9637_v46 = vld [vmem:[#allocation13 + $0x30] sm:$0xff] }
 0xacb   : > { %v14553_v15 = vpop.eup %14552  ;;  %v13489_v31 = vpack.c.bf16 %v9566_v52, %v9565_v10  ;;  %v9323_v6 = vmul.f32 1.442695, %v9189_v40  ;;  %v21404_v62 = vadd.f32 %v21005_v32, %v8813_v54  ;;  %v8815_v25 = vmul.f32 %v21054_v13, %v20802_v29  ;;  %v9644_v40 = vld [vmem:[#allocation13 + $0x68] sm:$0xff] }
 0xacc   : > { %v14555_v17 = vpop.eup %14554  ;;  %v11759_v18 = vadd.f32 -1.0, %v14553_v15  ;;  %v9325_v5 = vmul.f32 1.442695, %v9190_v2  ;;  %v8816_v0 = vmul.f32 %v21054_v13, %v20809_v53  ;;  %13487 = vmatpush1.bf16.msra.mxu1 %v13486_v50  ;;  %vm9089_vm4 = vcmp.gt.f32.partialorder %v21341_v33, 0.0 }
 0xacd   : > { %v11760_v51 = vadd.f32 -1.0, %v14555_v17  ;;  %14564 = vpow2.f32 %v9323_v6  ;;  %v21412_v60 = vadd.f32 %v21005_v32, %v8814_v21  ;;  %13488 = vmatprep.subr.bf16.mxu1 %v23564_v61  ;;  %v9191_v29 = vmin.f32 %v21404_v62, 0.0  ;;  %v9643_v17 = vld [vmem:[#allocation13 + $0x60] sm:$0xff] }
 0xace   : > { %v14557_v56 = vpop.eup %14556  ;;  %v9567_v4 = vsel %vm9087_vm2, %v21323_v42, %v11759_v18  ;;  %14566 = vpow2.f32 %v9325_v5  ;;  %v21420_v53 = vadd.f32 %v21005_v32, %v8815_v25  ;;  %vm9090_vm5 = vcmp.gt.f32.partialorder %v21344_v7, 0.0 }
 0xacf   : > { %v14559_v27 = vpop.eup %14558  ;;  %v9568_v47 = vsel %vm9088_vm3, %v21326_v20, %v11760_v51  ;;  %v11761_v23 = vadd.f32 -1.0, %v14557_v56  ;;  %v9192_v24 = vmin.f32 %v21412_v60, 0.0  ;;  %v9327_v35 = vmul.f32 1.442695, %v9191_v29 }
 0xad0   : > { %v13492_v14 = vpack.c.bf16 %v9568_v47, %v9567_v4  ;;  %v11762_v30 = vadd.f32 -1.0, %v14559_v27  ;;  %v21428_v42 = vadd.f32 %v21005_v32, %v8816_v0  ;;  %13490 = vmatpush1.bf16.msra.mxu1 %v13489_v31  ;;  %vm9091_vm6 = vcmp.gt.f32.partialorder %v21362_v39, 0.0  ;;  %v23580_v4 = vld [vmem:[#allocation62_spill] sm:$0xff]  ;;  %v23581_v27 = vld [vmem:[#allocation68_spill] sm:$0xff] }
 0xad1   : > { %v9569_v58 = vsel %vm9089_vm4, %v21341_v33, %v11761_v23  ;;  %v9329_v20 = vmul.f32 1.442695, %v9192_v24  ;;  %v9193_v57 = vmin.f32 %v21420_v53, 0.0  ;;  %13491 = vmatprep.subr.bf16.mxu1 %v23564_v61  ;;  %vm9092_vm7 = vcmp.gt.f32.partialorder %v21365_v12, 0.0 }
 0xad2   : > { %v9570_v28 = vsel %vm9090_vm5, %v21344_v7, %v11762_v30  ;;  %14568 = vpow2.f32 %v9327_v35  ;;  %v9194_v63 = vmin.f32 %v21428_v42, 0.0  ;;  %v8817_v33 = vmul.f32 %v21054_v13, %v20839_v45  ;;  %v9649_v35 = vld [vmem:[#allocation13 + $0x90] sm:$0xff] }
 0xad3   : > { %v14561_v22 = vpop.eup %14560  ;;  %v13495_v1 = vpack.c.bf16 %v9570_v28, %v9569_v58  ;;  %14570 = vpow2.f32 %v9329_v20  ;;  %v9331_v16 = vmul.f32 1.442695, %v9193_v57  ;;  %9984 = vmatmul.mubr.f32.vlgmr.msra.gmra.mrb[100].mxu1 %v9631_v19  ;;  %v8818_v34 = vmul.f32 %v21054_v13, %v20833_v55  ;;  %v23582_v20 = vld [vmem:[#allocation41_spill] sm:$0xff] }
 0xad4   : > { %v14563_v50 = vpop.eup %14562  ;;  %v11763_v11 = vadd.f32 -1.0, %v14561_v22  ;;  %v9333_v26 = vmul.f32 1.442695, %v9194_v63  ;;  %v8819_v7 = vmul.f32 %v21054_v13, %v20853_v43  ;;  %13493 = vmatpush1.bf16.msra.mxu1 %v13492_v14  ;;  %9988 = vmatprep.mubr.f32.mxu1 %v9638_v3  ;;  %v21446_v10 = vadd.f32 %v21005_v32, %v8817_v33  ;;  %v9656_v3 = vld [vmem:[#allocation13 + $0xc8] sm:$0xff]  ;;  %v23583_v63 = vld [vmem:[#allocation74_spill] sm:$0xff] }
 0xad5   : > { %v11764_v54 = vadd.f32 -1.0, %v14563_v50  ;;  %14572 = vpow2.f32 %v9331_v16  ;;  %v8820_v45 = vmul.f32 %v21054_v13, %v20897_v59  ;;  %13494 = vmatprep.subr.bf16.mxu1 %v23564_v61  ;;  %v21455_v43 = vadd.f32 %v21005_v32, %v8818_v34  ;;  %v23584_v33 = vld [vmem:[#allocation50_spill] sm:$0xff] }
 0xad6   : > { %v9571_v55 = vsel %vm9091_vm6, %v21362_v39, %v11763_v11  ;;  %14574 = vpow2.f32 %v9333_v26  ;;  %v21458_v52 = vadd.f32 %v21005_v32, %v8819_v7  ;;  %vm9093_vm8 = vcmp.gt.f32.partialorder %v21383_v49, 0.0 }
 0xad7   : > { %v14565_v2 = vpop.eup %14564  ;;  %v9572_v15 = vsel %vm9092_vm7, %v21365_v12, %v11764_v54  ;;  %v9195_v59 = vmin.f32 %v21446_v10, 0.0  ;;  %v21466_v13 = vadd.f32 %v21005_v32, %v8820_v45  ;;  %9989 = vmatmul.mubr.f32.gmra.mrb[102].mxu1 %v9637_v46  ;;  %vm9094_vm9 = vcmp.gt.f32.partialorder %v21386_v9, 0.0  ;;  %v9650_v32 = vld [vmem:[#allocation13 + $0x98] sm:$0xff] }
 0xad8   : > { %v14567_v39 = vpop.eup %14566  ;;  %v13498_v31 = vpack.c.bf16 %v9572_v15, %v9571_v55  ;;  %v11765_v6 = vadd.f32 -1.0, %v14565_v2  ;;  %v9196_v21 = vmin.f32 %v21455_v43, 0.0  ;;  %13496 = vmatpush1.bf16.msra.mxu1 %v13495_v1  ;;  %9993 = vmatprep.mubr.f32.mxu1 %v9644_v40  ;;  %vm9095_vm10 = vcmp.gt.f32.partialorder %v21404_v62, 0.0  ;;  %v9662_v2 = vld [vmem:[#allocation13 + $0xf8] sm:$0xff] }
 0xad9   : > { %v11766_v18 = vadd.f32 -1.0, %v14567_v39  ;;  %vm9096_vm11 = vcmp.gt.f32.partialorder %v21412_v60, 0.0  ;;  %v9335_v12 = vmul.f32 1.442695, %v9195_v59  ;;  %13497 = vmatprep.subr.bf16.mxu1 %v23564_v61  ;;  %v9197_v0 = vmin.f32 %v21458_v52, 0.0  ;;  %v23585_v39 = vld [vmem:[#allocation95_spill] sm:$0xff] }
 0xada   : > { %v9573_v5 = vsel %vm9093_vm8, %v21383_v49, %v11765_v6  ;;  %v9337_v25 = vmul.f32 1.442695, %v9196_v21  ;;  %v9198_v51 = vmin.f32 %v21466_v13, 0.0  ;;  %v8821_v29 = vmul.f32 %v21057_v38, %v23580_v4 }
 0xadb   : > { %v9574_v56 = vsel %vm9094_vm9, %v21386_v9, %v11766_v18  ;;  %14576 = vpow2.f32 %v9335_v12  ;;  %v8822_v47 = vmul.f32 %v21057_v38, %v23581_v27  ;;  %9994 = vmatmul.mubr.f32.gmra.mrb[104].mxu1 %v9643_v17  ;;  %v9339_v49 = vmul.f32 1.442695, %v9197_v0 }
 0xadc   : > { %v14569_v23 = vpop.eup %14568  ;;  %v13501_v24 = vpack.c.bf16 %v9574_v56, %v9573_v5  ;;  %14578 = vpow2.f32 %v9337_v25  ;;  %v9341_v14 = vmul.f32 1.442695, %v9198_v51  ;;  %13499 = vmatpush1.bf16.msra.mxu1 %v13498_v31  ;;  %9998 = vmatprep.mubr.f32.mxu1 %v9650_v32  ;;  %v21486_v9 = vadd.f32 %v21002_v44, %v8821_v29  ;;  %v9661_v32 = vld [vmem:[#allocation13 + $0xf0] sm:$0xff]  ;;  %v23586_v25 = vld [vmem:[#allocation91_spill] sm:$0xff]  ;;  %v9668_v56 = vld [vmem:[#allocation13 + $0x128] sm:$0xff] }
 0xadd   : > { %v14571_v30 = vpop.eup %14570  ;;  %v11767_v19 = vadd.f32 -1.0, %v14569_v23  ;;  %v21489_v58 = vadd.f32 %v21002_v44, %v8822_v47  ;;  %v8823_v57 = vmul.f32 %v21057_v38, %v23582_v20  ;;  %13500 = vmatprep.subr.bf16.mxu1 %v23564_v61  ;;  %vm9097_vm12 = vcmp.gt.f32.partialorder %v21420_v53, 0.0  ;;  %v9667_v20 = vld [vmem:[#allocation13 + $0x120] sm:$0xff] }
 0xade   : > { %v11768_v28 = vadd.f32 -1.0, %v14571_v30  ;;  %14580 = vpow2.f32 %v9339_v49  ;;  %v8824_v22 = vmul.f32 %v21057_v38, %v23583_v63  ;;  %vm9098_vm13 = vcmp.gt.f32.partialorder %v21428_v42, 0.0  ;;  %v23587_v30 = vld [vmem:[#allocation86_spill] sm:$0xff] }
 0xadf   : > { %v14573_v1 = vpop.eup %14572  ;;  %v9575_v16 = vsel %vm9095_vm10, %v21404_v62, %v11767_v19  ;;  %14582 = vpow2.f32 %v9341_v14  ;;  %v8825_v50 = vmul.f32 %v21057_v38, %v23584_v33  ;;  %9999 = vmatmul.mubr.f32.gmra.mrb[106].mxu1 %v9649_v35  ;;  %v9199_v7 = vmin.f32 %v21486_v9, 0.0  ;;  %v9655_v62 = vld [vmem:[#allocation13 + $0xc0] sm:$0xff] }
 0xae0   : > { %v14575_v11 = vpop.eup %14574  ;;  %v9576_v26 = vsel %vm9096_vm11, %v21412_v60, %v11768_v28  ;;  %v11769_v34 = vadd.f32 -1.0, %v14573_v1  ;;  %v9200_v46 = vmin.f32 %v21489_v58, 0.0  ;;  %13502 = vmatpush1.bf16.msra.mxu1 %v13501_v24  ;;  %10003 = vmatprep.mubr.f32.mxu1 %v9656_v3  ;;  %v21509_v40 = vadd.f32 %v21002_v44, %v8823_v57 }
 0xae1   : > { %v13504_v54 = vpack.c.bf16 %v9576_v26, %v9575_v16  ;;  %v11770_v45 = vadd.f32 -1.0, %v14575_v11  ;;  %v21512_v55 = vadd.f32 %v21002_v44, %v8824_v22  ;;  %13503 = vmatprep.subr.bf16.mxu1 %v23564_v61  ;;  %v9343_v15 = vmul.f32 1.442695, %v9199_v7  ;;  %v9674_v22 = vld [vmem:[#allocation13 + $0x158] sm:$0xff]  ;;  %v23588_v26 = vld [vmem:[#allocation97_spill] sm:$0xff] }
 0xae2   : > { %v9577_v60 = vsel %vm9097_vm12, %v21420_v53, %v11769_v34  ;;  %v9345_v59 = vmul.f32 1.442695, %v9200_v46  ;;  %v8826_v31 = vmul.f32 %v21057_v38, %v23585_v39  ;;  %vm9099_vm14 = vcmp.gt.f32.partialorder %v21446_v10, 0.0  ;;  %v23591_v39 = vld [vmem:[#allocation111_spill] sm:$0xff] }
 0xae3   : > { %v9578_v6 = vsel %vm9098_vm13, %v21428_v42, %v11770_v45  ;;  %vm9100_vm15 = vcmp.gt.f32.partialorder %v21455_v43, 0.0  ;;  %v9201_v21 = vmin.f32 %v21509_v40, 0.0  ;;  %10004 = vmatmul.mubr.f32.gmra.mrb[108].mxu1 %v9655_v62  ;;  %14584 = vpow2.f32 %v9343_v15  ;;  %v23589_v62 = vld [vmem:[#allocation92_spill] sm:$0xff]  ;;  %v23590_v45 = vld [vmem:[#allocation94_spill] sm:$0xff] }
 0xae4   : > { %v13507_v17 = vpack.c.bf16 %v9578_v6, %v9577_v60  ;;  %v9202_v53 = vmin.f32 %v21512_v55, 0.0  ;;  %v21528_v18 = vadd.f32 %v21002_v44, %v8825_v50  ;;  %13505 = vmatpush1.bf16.msra.mxu1 %v13504_v54  ;;  %10008 = vmatprep.mubr.f32.mxu1 %v9662_v2  ;;  %14586 = vpow2.f32 %v9345_v59 }
 0xae5   : > { %v14577_v12 = vpop.eup %14576  ;;  %v9347_v42 = vmul.f32 1.442695, %v9201_v21  ;;  %v21531_v5 = vadd.f32 %v21002_v44, %v8826_v31  ;;  %v8827_v0 = vmul.f32 %v21057_v38, %v23586_v25  ;;  %13506 = vmatprep.subr.bf16.mxu1 %v23564_v61  ;;  %vm9101_vm1 = vcmp.gt.f32.partialorder %v21458_v52, 0.0 }
 0xae6   : > { %v14579_v51 = vpop.eup %14578  ;;  %v11771_v4 = vadd.f32 -1.0, %v14577_v12  ;;  %v9349_v29 = vmul.f32 1.442695, %v9202_v53  ;;  %v9203_v27 = vmin.f32 %v21528_v18, 0.0  ;;  %vm9102_vm0 = vcmp.gt.f32.partialorder %v21466_v13, 0.0 }
 0xae7   : > { %v11772_v47 = vadd.f32 -1.0, %v14579_v51  ;;  %14588 = vpow2.f32 %v9347_v42  ;;  %v9204_v23 = vmin.f32 %v21531_v5, 0.0  ;;  %10009 = vmatmul.mubr.f32.gmra.mrb[110].mxu1 %v9661_v32  ;;  %v8828_v35 = vmul.f32 %v21057_v38, %v23587_v30 }
 0xae8   : > { %v14581_v24 = vpop.eup %14580  ;;  %v9579_v49 = vsel %vm9099_vm14, %v21446_v10, %v11771_v4  ;;  %14590 = vpow2.f32 %v9349_v29  ;;  %v9351_v14 = vmul.f32 1.442695, %v9203_v27  ;;  %13508 = vmatpush1.bf16.msra.mxu1 %v13507_v17  ;;  %10013 = vmatprep.mubr.f32.mxu1 %v9668_v56  ;;  %v21549_v63 = vadd.f32 %v21002_v44, %v8827_v0  ;;  %v9686_v29 = vld [vmem:[#allocation13 + $0x1b8] sm:$0xff] }
 0xae9   : > { %v14583_v19 = vpop.eup %14582  ;;  %v9580_v57 = vsel %vm9100_vm15, %v21455_v43, %v11772_v47  ;;  %v11773_v3 = vadd.f32 -1.0, %v14581_v24  ;;  %v9353_v28 = vmul.f32 1.442695, %v9204_v23  ;;  %13509 = vmatprep.subr.bf16.mxu1 %v23564_v61  ;;  %v21553_v16 = vadd.f32 %v21002_v44, %v8828_v35 }
 0xaea   : > { %v13510_v10 = vpack.c.bf16 %v9580_v57, %v9579_v49  ;;  %v11774_v1 = vadd.f32 -1.0, %v14583_v19  ;;  %14592 = vpow2.f32 %v9351_v14  ;;  %vm9103_vm2 = vcmp.gt.f32.partialorder %v21486_v9, 0.0  ;;  %v23592_v49 = vld [vmem:[#allocation39_spill] sm:$0xff] }
 0xaeb   : > { %v9581_v33 = vsel %vm9101_vm1, %v21458_v52, %v11773_v3  ;;  %14594 = vpow2.f32 %v9353_v28  ;;  %v9205_v43 = vmin.f32 %v21549_v63, 0.0  ;;  %10014 = vmatmul.mubr.f32.gmra.mrb[112].mxu1 %v9667_v20  ;;  %vm9104_vm3 = vcmp.gt.f32.partialorder %v21489_v58, 0.0  ;;  %v9673_v52 = vld [vmem:[#allocation13 + $0x150] sm:$0xff] }
 0xaec   : > { %v9582_v50 = vsel %vm9102_vm0, %v21466_v13, %v11774_v1  ;;  %v9206_v11 = vmin.f32 %v21553_v16, 0.0  ;;  %v8829_v34 = vmul.f32 %v21057_v38, %v23588_v26  ;;  %13511 = vmatpush1.bf16.msra.mxu1 %v13510_v10  ;;  %10018 = vmatprep.mubr.f32.mxu1 %v9674_v22  ;;  %v8830_v54 = vmul.f32 %v21057_v38, %v23589_v62  ;;  %v9680_v13 = vld [vmem:[#allocation13 + $0x188] sm:$0xff]  ;;  %v9685_v20 = vld [vmem:[#allocation13 + $0x1b0] sm:$0xff]  ;;  %v23596_v62 = vld [vmem:[#allocation79_spill] sm:$0xff] }
 0xaed   : > { %v13513_v7 = vpack.c.bf16 %v9582_v50, %v9581_v33  ;;  %v9355_v46 = vmul.f32 1.442695, %v9205_v43  ;;  %v8831_v2 = vmul.f32 %v21057_v38, %v23590_v45  ;;  %v14585_v60 = vpop.eup %14584  ;;  %13512 = vmatprep.subr.bf16.mxu1 %v23564_v61  ;;  %vm9105_vm4 = vcmp.gt.f32.partialorder %v21509_v40, 0.0  ;;  %v23593_v28 = vld [vmem:[#allocation37_spill] sm:$0xff]  ;;  %v9692_v22 = vld [vmem:[#allocation13 + $0x1e8] sm:$0xff]  ;;  %v9691_v45 = vld [vmem:[#allocation13 + $0x1e0] sm:$0xff] }
 0xaee   : > { %v9357_v15 = vmul.f32 1.442695, %v9206_v11  ;;  %v21574_v59 = vadd.f32 %v21002_v44, %v8829_v34  ;;  %v8832_v31 = vmul.f32 %v21057_v38, %v23591_v39  ;;  %v14587_v6 = vpop.eup %14586  ;;  %v11775_v21 = vadd.f32 -1.0, %v14585_v60  ;;  %v9679_v38 = vld [vmem:[#allocation13 + $0x180] sm:$0xff]  ;;  %v23594_v26 = vld [vmem:[#allocation32_spill] sm:$0xff] }
 0xaef   : > { %14596 = vpow2.f32 %v9355_v46  ;;  %v21579_v17 = vadd.f32 %v21002_v44, %v8830_v54  ;;  %v21582_v53 = vadd.f32 %v21002_v44, %v8831_v2  ;;  %10019 = vmatmul.mubr.f32.gmra.mrb[114].mxu1 %v9673_v52  ;;  %v11776_v12 = vadd.f32 -1.0, %v14587_v6 }
 0xaf0   : > { %vm9106_vm5 = vcmp.gt.f32.partialorder %v21512_v55, 0.0  ;;  %14598 = vpow2.f32 %v9357_v15  ;;  %v9207_v32 = vmin.f32 %v21574_v59, 0.0  ;;  %13514 = vmatpush1.bf16.msra.mxu1 %v13513_v7  ;;  %10023 = vmatprep.mubr.f32.mxu1 %v9680_v13  ;;  %v9583_v25 = vsel %vm9103_vm2, %v21486_v9, %v11775_v21  ;;  %v23595_v7 = vld [vmem:[#allocation31_spill] sm:$0xff] }
 0xaf1   : > { %v14589_v42 = vpop.eup %14588  ;;  %vm9107_vm6 = vcmp.gt.f32.partialorder %v21528_v18, 0.0  ;;  %v9208_v0 = vmin.f32 %v21579_v17, 0.0  ;;  %v21592_v51 = vadd.f32 %v21002_v44, %v8832_v31  ;;  %13515 = vmatprep.subr.bf16.mxu1 %v23564_v61  ;;  %v9584_v4 = vsel %vm9104_vm3, %v21489_v58, %v11776_v12  ;;  %v23597_v12 = vld [vmem:[#allocation89_spill] sm:$0xff] }
 0xaf2   : > { %v14591_v56 = vpop.eup %14590  ;;  %v11777_v27 = vadd.f32 -1.0, %v14589_v42  ;;  %vm9108_vm7 = vcmp.gt.f32.partialorder %v21531_v5, 0.0  ;;  %v9359_v47 = vmul.f32 1.442695, %v9207_v32  ;;  %v13516_v9 = vpack.c.bf16 %v9584_v4, %v9583_v25 }
 0xaf3   : > { %v11778_v23 = vadd.f32 -1.0, %v14591_v56  ;;  %v9361_v24 = vmul.f32 1.442695, %v9208_v0  ;;  %v8833_v14 = vmul.f32 %v21065_v36, %v23592_v49  ;;  %10024 = vmatmul.mubr.f32.gmra.mrb[116].mxu1 %v9679_v38  ;;  %v9209_v58 = vmin.f32 %v21582_v53, 0.0  ;;  %v9697_v56 = vld [vmem:[#allocation13 + $0x210] sm:$0xff] }
 0xaf4   : > { %v14593_v44 = vpop.eup %14592  ;;  %v9585_v30 = vsel %vm9105_vm4, %v21509_v40, %v11777_v27  ;;  %14600 = vpow2.f32 %v9359_v47  ;;  %v9210_v35 = vmin.f32 %v21592_v51, 0.0  ;;  %13517 = vmatpush1.bf16.msra.mxu1 %v13516_v9  ;;  %10028 = vmatprep.mubr.f32.mxu1 %v9686_v29  ;;  %v8834_v10 = vmul.f32 %v21065_v36, %v23593_v28  ;;  %v9704_v9 = vld [vmem:[#allocation13 + $0x248] sm:$0xff] }
 0xaf5   : > { %v14595_v19 = vpop.eup %14594  ;;  %v9586_v57 = vsel %vm9106_vm5, %v21512_v55, %v11778_v23  ;;  %v11779_v3 = vadd.f32 -1.0, %v14593_v44  ;;  %14602 = vpow2.f32 %v9361_v24  ;;  %13518 = vmatprep.subr.bf16.mxu1 %v23564_v61  ;;  %v9363_v33 = vmul.f32 1.442695, %v9209_v58 }
 0xaf6   : > { %v13519_v40 = vpack.c.bf16 %v9586_v57, %v9585_v30  ;;  %v11780_v1 = vadd.f32 -1.0, %v14595_v19  ;;  %v9365_v43 = vmul.f32 1.442695, %v9210_v35  ;;  %v21616_v11 = vadd.f32 %v21008_v37, %v8833_v14  ;;  %v9703_v35 = vld [vmem:[#allocation13 + $0x240] sm:$0xff] }
 0xaf7   : > { %v9587_v50 = vsel %vm9107_vm6, %v21528_v18, %v11779_v3  ;;  %v21619_v55 = vadd.f32 %v21008_v37, %v8834_v10  ;;  %v8835_v34 = vmul.f32 %v21065_v36, %v23594_v26  ;;  %10029 = vmatmul.mubr.f32.gmra.mrb[118].mxu1 %v9685_v20  ;;  %14604 = vpow2.f32 %v9363_v33  ;;  %v23598_v20 = vld [vmem:[#allocation47_spill] sm:$0xff]  ;;  %v23599_v3 = vld [vmem:[#allocation93_spill] sm:$0xff] }
 0xaf8   : > { %v9588_v52 = vsel %vm9108_vm7, %v21531_v5, %v11780_v1  ;;  %v8836_v46 = vmul.f32 %v21065_v36, %v23595_v7  ;;  %v8837_v18 = vmul.f32 %v21065_v36, %v23596_v62  ;;  %13520 = vmatpush1.bf16.msra.mxu1 %v13519_v40  ;;  %10033 = vmatprep.mubr.f32.mxu1 %v9692_v22  ;;  %vm9109_vm8 = vcmp.gt.f32.partialorder %v21549_v63, 0.0  ;;  %v9698_v5 = vld [vmem:[#allocation13 + $0x218] sm:$0xff]  ;;  %v23600_v7 = vld [vmem:[#allocation112_spill] sm:$0xff] }
 0xaf9   : > { %v14597_v54 = vpop.eup %14596  ;;  %v13522_v2 = vpack.c.bf16 %v9588_v52, %v9587_v50  ;;  %vm9110_vm9 = vcmp.gt.f32.partialorder %v21553_v16, 0.0  ;;  %14606 = vpow2.f32 %v9365_v43  ;;  %13521 = vmatprep.subr.bf16.mxu1 %v23564_v61  ;;  %v9211_v15 = vmin.f32 %v21616_v11, 0.0  ;;  %v9710_v22 = vld [vmem:[#allocation13 + $0x278] sm:$0xff] }
 0xafa   : > { %v14599_v60 = vpop.eup %14598  ;;  %v11781_v13 = vadd.f32 -1.0, %v14597_v54  ;;  %v9212_v39 = vmin.f32 %v21619_v55, 0.0  ;;  %v21636_v31 = vadd.f32 %v21008_v37, %v8835_v34  ;;  %v21639_v21 = vadd.f32 %v21008_v37, %v8836_v46 }
 0xafb   : > { %v11782_v6 = vadd.f32 -1.0, %v14599_v60  ;;  %v8838_v32 = vmul.f32 %v21065_v36, %v23597_v12  ;;  %v21644_v42 = vadd.f32 %v21008_v37, %v8837_v18  ;;  %10034 = vmatmul.mubr.f32.gmra.mrb[120].mxu1 %v9691_v45  ;;  %vm9111_vm10 = vcmp.gt.f32.partialorder %v21574_v59, 0.0  ;;  %v9709_v18 = vld [vmem:[#allocation13 + $0x270] sm:$0xff]  ;;  %v23603_v12 = vld [vmem:[#allocation54_spill] sm:$0xff] }
 0xafc   : > { %v9589_v38 = vsel %vm9109_vm8, %v21549_v63, %v11781_v13  ;;  %v9367_v25 = vmul.f32 1.442695, %v9211_v15  ;;  %v9369_v0 = vmul.f32 1.442695, %v9212_v39  ;;  %13523 = vmatpush1.bf16.msra.mxu1 %v13522_v2  ;;  %10038 = vmatprep.mubr.f32.mxu1 %v9698_v5  ;;  %vm9112_vm11 = vcmp.gt.f32.partialorder %v21579_v17, 0.0  ;;  %v9716_v2 = vld [vmem:[#allocation13 + $0x2a8] sm:$0xff] }
 0xafd   : > { %v9590_v4 = vsel %vm9110_vm9, %v21553_v16, %v11782_v6  ;;  %v9213_v29 = vmin.f32 %v21636_v31, 0.0  ;;  %v9214_v27 = vmin.f32 %v21639_v21, 0.0  ;;  %13524 = vmatprep.subr.bf16.mxu1 %v23564_v61  ;;  %vm9113_vm12 = vcmp.gt.f32.partialorder %v21582_v53, 0.0  ;;  %v23602_v39 = vld [vmem:[#allocation116_spill] sm:$0xff] }
 0xafe   : > { %v14601_v47 = vpop.eup %14600  ;;  %v13525_v63 = vpack.c.bf16 %v9590_v4, %v9589_v38  ;;  %14608 = vpow2.f32 %v9367_v25  ;;  %v21657_v23 = vadd.f32 %v21008_v37, %v8838_v32  ;;  %vm9114_vm13 = vcmp.gt.f32.partialorder %v21592_v51, 0.0 }
 0xaff   : > { %v14603_v24 = vpop.eup %14602  ;;  %v11783_v49 = vadd.f32 -1.0, %v14601_v47  ;;  %14610 = vpow2.f32 %v9369_v0  ;;  %v9371_v16 = vmul.f32 1.442695, %v9213_v29  ;;  %v9373_v14 = vmul.f32 1.442695, %v9214_v27  ;;  %10039 = vmatmul.mubr.f32.gmra.mrb[122].mxu1 %v9697_v56  ;;  %v9715_v56 = vld [vmem:[#allocation13 + $0x2a0] sm:$0xff] }
 0xb00   : > { %v11784_v44 = vadd.f32 -1.0, %v14603_v24  ;;  %v9215_v30 = vmin.f32 %v21644_v42, 0.0  ;;  %v9216_v58 = vmin.f32 %v21657_v23, 0.0  ;;  %13526 = vmatpush1.bf16.msra.mxu1 %v13525_v63  ;;  %10043 = vmatprep.mubr.f32.mxu1 %v9704_v9  ;;  %v8839_v57 = vmul.f32 %v21065_v36, %v23598_v20  ;;  %v23604_v47 = vld [vmem:[#allocation115_spill] sm:$0xff]  ;;  %v9722_v9 = vld [vmem:[#allocation13 + $0x2d8] sm:$0xff]  ;;  %v9721_v20 = vld [vmem:[#allocation13 + $0x2d0] sm:$0xff] }
 0xb01   : > { %v9591_v19 = vsel %vm9111_vm10, %v21574_v59, %v11783_v49  ;;  %14612 = vpow2.f32 %v9371_v16  ;;  %v8840_v28 = vmul.f32 %v21065_v36, %v23599_v3  ;;  %v14605_v10 = vpop.eup %14604  ;;  %13527 = vmatprep.subr.bf16.mxu1 %v23564_v61  ;;  %v8841_v46 = vmul.f32 %v21065_v36, %v23600_v7 }
 0xb02   : > { %v9592_v40 = vsel %vm9112_vm11, %v21579_v17, %v11784_v44  ;;  %14614 = vpow2.f32 %v9373_v14  ;;  %v9375_v1 = vmul.f32 1.442695, %v9215_v30  ;;  %v9377_v33 = vmul.f32 1.442695, %v9216_v58  ;;  %v23601_v17 = vld [vmem:[#allocation113_spill] sm:$0xff] }
 0xb03   : > { %v14607_v43 = vpop.eup %14606  ;;  %v13528_v59 = vpack.c.bf16 %v9592_v40, %v9591_v19  ;;  %v11785_v50 = vadd.f32 -1.0, %v14605_v10  ;;  %v21674_v26 = vadd.f32 %v21008_v37, %v8839_v57  ;;  %v21677_v34 = vadd.f32 %v21008_v37, %v8840_v28  ;;  %10044 = vmatmul.mubr.f32.gmra.mrb[124].mxu1 %v9703_v35  ;;  %v9728_v10 = vld [vmem:[#allocation13 + $0x308] sm:$0xff]  ;;  %v23605_v40 = vld [vmem:[#allocation114_spill] sm:$0xff] }
 0xb04   : > { %v11786_v52 = vadd.f32 -1.0, %v14607_v43  ;;  %14616 = vpow2.f32 %v9375_v1  ;;  %v8842_v62 = vmul.f32 %v21065_v36, %v23601_v17  ;;  %10048 = vmatprep.mubr.f32.mxu1 %v9710_v22  ;;  %vm9115_vm14 = vcmp.gt.f32.partialorder %v21616_v11, 0.0  ;;  %v9727_v17 = vld [vmem:[#allocation13 + $0x300] sm:$0xff] }
 0xb05   : > { %13529 = vmatpush1.bf16.msra.mxu1 %v13528_v59  ;;  %v9593_v54 = vsel %vm9113_vm12, %v21582_v53, %v11785_v50  ;;  %vm9116_vm15 = vcmp.gt.f32.partialorder %v21619_v55, 0.0  ;;  %14618 = vpow2.f32 %v9377_v33  ;;  %v9217_v60 = vmin.f32 %v21674_v26, 0.0 }
 0xb06   : > { %13530 = vmatprep.subr.bf16.mxu1 %v23564_v61  ;;  %v9594_v45 = vsel %vm9114_vm13, %v21592_v51, %v11786_v52  ;;  %v9218_v5 = vmin.f32 %v21677_v34, 0.0  ;;  %v21695_v13 = vadd.f32 %v21008_v37, %v8841_v46  ;;  %v21698_v15 = vadd.f32 %v21008_v37, %v8842_v62 }
 0xb07   : > { %v13531_v53 = vpack.c.bf16 %v9594_v45, %v9593_v54  ;;  %v8843_v6 = vmul.f32 %v21065_v36, %v23602_v39  ;;  %v8844_v32 = vmul.f32 %v21065_v36, %v23603_v12  ;;  %10049 = vmatmul.mubr.f32.gmra.mrb[126].mxu1 %v9709_v18  ;;  %vm9117_vm1 = vcmp.gt.f32.partialorder %v21636_v31, 0.0  ;;  %v9734_v18 = vld [vmem:[#allocation13 + $0x338] sm:$0xff]  ;;  %v23608_v12 = vld [vmem:[#allocation75_spill] sm:$0xff] }
 0xb08   : > { %v14609_v38 = vpop.eup %14608  ;;  %vm9118_vm0 = vcmp.gt.f32.partialorder %v21639_v21, 0.0  ;;  %v9379_v51 = vmul.f32 1.442695, %v9217_v60  ;;  %v9381_v25 = vmul.f32 1.442695, %v9218_v5  ;;  %10053 = vmatprep.mubr.f32.mxu1 %v9716_v2  ;;  %v9219_v29 = vmin.f32 %v21695_v13, 0.0 }
 0xb09   : > { %v14611_v0 = vpop.eup %14610  ;;  %13532 = vmatpush1.bf16.msra.mxu1 %v13531_v53  ;;  %v11787_v4 = vadd.f32 -1.0, %v14609_v38  ;;  %v9220_v27 = vmin.f32 %v21698_v15, 0.0  ;;  %v8845_v36 = vmul.f32 %v21070_v41, %v23604_v47  ;;  %v21712_v24 = vadd.f32 %v21008_v37, %v8843_v6  ;;  %v23606_v60 = vld [vmem:[#allocation117_spill] sm:$0xff]  ;;  %v23607_v53 = vld [vmem:[#allocation120_spill] sm:$0xff]  ;;  %v23609_v38 = vld [vmem:[#allocation38_spill] sm:$0xff] }
 0xb0a   : > { %13533 = vmatprep.subr.bf16.mxu1 %v23564_v61  ;;  %v11788_v63 = vadd.f32 -1.0, %v14611_v0  ;;  %14620 = vpow2.f32 %v9379_v51  ;;  %v21715_v49 = vadd.f32 %v21008_v37, %v8844_v32  ;;  %v9383_v44 = vmul.f32 1.442695, %v9219_v29  ;;  %v9733_v0 = vld [vmem:[#allocation13 + $0x330] sm:$0xff] }
 0xb0b   : > { %v14613_v16 = vpop.eup %14612  ;;  %v9595_v14 = vsel %vm9115_vm14, %v21616_v11, %v11787_v4  ;;  %14622 = vpow2.f32 %v9381_v25  ;;  %v9385_v30 = vmul.f32 1.442695, %v9220_v27  ;;  %10054 = vmatmul.mubr.f32.gmra.mrb[128].mxu1 %v9715_v56  ;;  %vm9119_vm2 = vcmp.gt.f32.partialorder %v21644_v42, 0.0  ;;  %v9740_v27 = vld [vmem:[#allocation13 + $0x368] sm:$0xff] }
 0xb0c   : > { %v14615_v58 = vpop.eup %14614  ;;  %v9596_v35 = vsel %vm9116_vm15, %v21619_v55, %v11788_v63  ;;  %v11789_v19 = vadd.f32 -1.0, %v14613_v16  ;;  %vm9120_vm3 = vcmp.gt.f32.partialorder %v21657_v23, 0.0  ;;  %10058 = vmatprep.mubr.f32.mxu1 %v9722_v9  ;;  %14624 = vpow2.f32 %v9383_v44  ;;  %v23610_v44 = vld [vmem:[#allocation80_spill] sm:$0xff] }
 0xb0d   : > { %v13534_v37 = vpack.c.bf16 %v9596_v35, %v9595_v14  ;;  %v11790_v57 = vadd.f32 -1.0, %v14615_v58  ;;  %v9221_v11 = vmin.f32 %v21712_v24, 0.0  ;;  %14626 = vpow2.f32 %v9385_v30 }
 0xb0e   : > { %v14617_v3 = vpop.eup %14616  ;;  %v9597_v28 = vsel %vm9117_vm1, %v21636_v31, %v11789_v19  ;;  %v9222_v55 = vmin.f32 %v21715_v49, 0.0  ;;  %v8846_v22 = vmul.f32 %v21070_v41, %v23605_v40  ;;  %v21736_v50 = vadd.f32 %v21011_v8, %v8845_v36 }
 0xb0f   : > { %v14619_v1 = vpop.eup %14618  ;;  %13535 = vmatpush1.bf16.msra.mxu1 %v13534_v37  ;;  %v9598_v33 = vsel %vm9118_vm0, %v21639_v21, %v11790_v57  ;;  %v11791_v43 = vadd.f32 -1.0, %v14617_v3  ;;  %v9387_v59 = vmul.f32 1.442695, %v9221_v11  ;;  %vm9121_vm4 = vcmp.gt.f32.partialorder %v21674_v26, 0.0  ;;  %v9739_v37 = vld [vmem:[#allocation13 + $0x360] sm:$0xff]  ;;  %v9746_v3 = vld [vmem:[#allocation13 + $0x398] sm:$0xff] }
 0xb10   : > { %10059 = vmatmul.mubr.f32.gmra.mrb[130].mxu1 %v9721_v20  ;;  %13536 = vmatprep.subr.bf16.mxu1 %v23564_v61  ;;  %v13537_v31 = vpack.c.bf16 %v9598_v33, %v9597_v28  ;;  %v11792_v52 = vadd.f32 -1.0, %v14619_v1  ;;  %v9389_v7 = vmul.f32 1.442695, %v9222_v55  ;;  %v21740_v46 = vadd.f32 %v21011_v8, %v8846_v22  ;;  %v23611_v1 = vld [vmem:[#allocation104_spill] sm:$0xff] }
 0xb11   : > { %10063 = vmatprep.mubr.f32.mxu1 %v9728_v10  ;;  %v21745_v21 = vsel %vm9119_vm2, %v21644_v42, %v11791_v43  ;;  %14628 = vpow2.f32 %v9387_v59  ;;  %v9223_v62 = vmin.f32 %v21736_v50, 0.0  ;;  %vm9122_vm5 = vcmp.gt.f32.partialorder %v21677_v34, 0.0 }
 0xb12   : > { %v21752_v54 = vsel %vm9120_vm3, %v21657_v23, %v11792_v52  ;;  %14630 = vpow2.f32 %v9389_v7  ;;  %v9224_v45 = vmin.f32 %v21740_v46, 0.0  ;;  %v8847_v5 = vmul.f32 %v21070_v41, %v23606_v60  ;;  %v9745_v7 = vld [vmem:[#allocation13 + $0x390] sm:$0xff]  ;;  %v23612_v60 = vld [vmem:[#allocation98_spill] sm:$0xff] }
 0xb13   : > { %13538 = vmatpush1.bf16.msra.mxu1 %v13537_v31  ;;  %v13540_v42 = vpack.c.bf16 %v21752_v54, %v21745_v21  ;;  %v9391_v2 = vmul.f32 1.442695, %v9223_v62  ;;  %v8848_v39 = vmul.f32 %v21070_v41, %v23607_v53  ;;  %vm9123_vm6 = vcmp.gt.f32.partialorder %v21695_v13, 0.0  ;;  %v9651_v21 = vld [vmem:[#allocation13 + $0xa0] sm:$0xff]  ;;  %v9658_v54 = vld [vmem:[#allocation13 + $0xd8] sm:$0xff] }
 0xb14   : > { %v14621_v6 = vpop.eup %14620  ;;  %10064 = vmatmul.mubr.f32.gmra.mrb[132].mxu1 %v9727_v17  ;;  %13539 = vmatprep.subr.bf16.mxu1 %v23564_v61  ;;  %v9393_v23 = vmul.f32 1.442695, %v9224_v45  ;;  %v8849_v32 = vmul.f32 %v21070_v41, %v23608_v12  ;;  %v8850_v51 = vmul.f32 %v21070_v41, %v23609_v38  ;;  %v21769_v4 = vadd.f32 %v21011_v8, %v8847_v5  ;;  %v23613_v38 = vld [vmem:[#allocation108_spill] sm:$0xff] }
 0xb15   : > { %v14623_v25 = vpop.eup %14622  ;;  %10068 = vmatprep.mubr.f32.mxu1 %v9734_v18  ;;  %v11793_v56 = vadd.f32 -1.0, %v14621_v6  ;;  %14632 = vpow2.f32 %v9391_v2  ;;  %v21772_v29 = vadd.f32 %v21011_v8, %v8848_v39  ;;  %vm9124_vm7 = vcmp.gt.f32.partialorder %v21698_v15, 0.0  ;;  %v9752_v18 = vld [vmem:[#allocation13 + $0x3c8] sm:$0xff] }
 0xb16   : > { %v11794_v47 = vadd.f32 -1.0, %v14623_v25  ;;  %14634 = vpow2.f32 %v9393_v23  ;;  %v21775_v36 = vadd.f32 %v21011_v8, %v8849_v32  ;;  %v21778_v63 = vadd.f32 %v21011_v8, %v8850_v51  ;;  %v14625_v9 = vpop.eup %14624  ;;  %v9751_v25 = vld [vmem:[#allocation13 + $0x3c0] sm:$0xff] }
 0xb17   : > { %v21783_v16 = vsel %vm9121_vm4, %v21674_v26, %v11793_v56  ;;  %v9225_v14 = vmin.f32 %v21769_v4, 0.0  ;;  %v8851_v30 = vmul.f32 %v21070_v41, %v23610_v44  ;;  %v14627_v58 = vpop.eup %14626  ;;  %v11795_v19 = vadd.f32 -1.0, %v14625_v9  ;;  %v9758_v9 = vld [vmem:[#allocation13 + $0x3f8] sm:$0xff] }
 0xb18   : > { %10069 = vmatmul.mubr.f32.gmra.mrb[134].mxu1 %v9733_v0  ;;  %v21792_v35 = vsel %vm9122_vm5, %v21677_v34, %v11794_v47  ;;  %vm9125_vm8 = vcmp.gt.f32.partialorder %v21712_v24, 0.0  ;;  %v9226_v26 = vmin.f32 %v21772_v29, 0.0  ;;  %v11796_v57 = vadd.f32 -1.0, %v14627_v58 }
 0xb19   : > { %10073 = vmatprep.mubr.f32.mxu1 %v9740_v27  ;;  %v13543_v20 = vpack.c.bf16 %v21792_v35, %v21783_v16  ;;  %vm9126_vm9 = vcmp.gt.f32.partialorder %v21715_v49, 0.0  ;;  %v9395_v11 = vmul.f32 1.442695, %v9225_v14  ;;  %v21802_v34 = vsel %vm9123_vm6, %v21695_v13, %v11795_v19  ;;  %v23614_v27 = vld [vmem:[#allocation83_spill] sm:$0xff]  ;;  %v9664_v16 = vld [vmem:[#allocation13 + $0x108] sm:$0xff] }
 0xb1a   : > { %v9397_v28 = vmul.f32 1.442695, %v9226_v26  ;;  %v9227_v10 = vmin.f32 %v21775_v36, 0.0  ;;  %v9228_v55 = vmin.f32 %v21778_v63, 0.0  ;;  %v21809_v22 = vsel %vm9124_vm7, %v21698_v15, %v11796_v57  ;;  %v9663_v35 = vld [vmem:[#allocation13 + $0x100] sm:$0xff] }
 0xb1b   : > { %v14629_v40 = vpop.eup %14628  ;;  %14636 = vpow2.f32 %v9395_v11  ;;  %v8852_v33 = vmul.f32 %v21070_v41, %v23611_v1  ;;  %v21814_v43 = vadd.f32 %v21011_v8, %v8851_v30  ;;  %v13546_v59 = vpack.c.bf16 %v21809_v22, %v21802_v34  ;;  %v23615_v30 = vld [vmem:[#allocation60_spill] sm:$0xff]  ;;  %v9669_v34 = vld [vmem:[#allocation13 + $0x130] sm:$0xff] }
 0xb1c   : > { %v14631_v13 = vpop.eup %14630  ;;  %10074 = vmatmul.mubr.f32.gmra.mrb[136].mxu1 %v9739_v37  ;;  %v11797_v31 = vadd.f32 -1.0, %v14629_v40  ;;  %14638 = vpow2.f32 %v9397_v28  ;;  %v9399_v52 = vmul.f32 1.442695, %v9227_v10  ;;  %vm9127_vm10 = vcmp.gt.f32.partialorder %v21736_v50, 0.0  ;;  %v23616_v28 = vld [vmem:[#allocation121_spill] sm:$0xff]  ;;  %v9676_v22 = vld [vmem:[#allocation13 + $0x168] sm:$0xff] }
 0xb1d   : > { %10078 = vmatprep.mubr.f32.mxu1 %v9746_v3  ;;  %v11798_v17 = vadd.f32 -1.0, %v14631_v13  ;;  %v9401_v15 = vmul.f32 1.442695, %v9228_v55  ;;  %v21820_v62 = vadd.f32 %v21011_v8, %v8852_v33  ;;  %v9229_v2 = vmin.f32 %v21814_v43, 0.0  ;;  %v23617_v55 = vld [vmem:[#allocation99_spill] sm:$0xff]  ;;  %v9764_v33 = vld [vmem:[#allocation13 + $0x428] sm:$0xff] }
 0xb1e   : > { %v21825_v45 = vsel %vm9125_vm8, %v21712_v24, %v11797_v31  ;;  %14640 = vpow2.f32 %v9399_v52  ;;  %v8853_v5 = vmul.f32 %v21070_v41, %v23612_v60  ;;  %vm9128_vm11 = vcmp.gt.f32.partialorder %v21740_v46, 0.0 }
 0xb1f   : > { %v14633_v53 = vpop.eup %14632  ;;  %v21833_v39 = vsel %vm9126_vm9, %v21715_v49, %v11798_v17  ;;  %14642 = vpow2.f32 %v9401_v15  ;;  %v9230_v6 = vmin.f32 %v21820_v62, 0.0  ;;  %v9403_v32 = vmul.f32 1.442695, %v9229_v2  ;;  %v23618_v2 = vld [vmem:[#allocation102_spill] sm:$0xff] }
 0xb20   : > { %v14635_v23 = vpop.eup %14634  ;;  %10079 = vmatmul.mubr.f32.gmra.mrb[138].mxu1 %v9745_v7  ;;  %v13549_v24 = vpack.c.bf16 %v21833_v39, %v21825_v45  ;;  %v11799_v12 = vadd.f32 -1.0, %v14633_v53  ;;  %v8854_v51 = vmul.f32 %v21070_v41, %v23613_v38  ;;  %v21842_v56 = vadd.f32 %v21011_v8, %v8853_v5  ;;  %v9763_v53 = vld [vmem:[#allocation13 + $0x420] sm:$0xff]  ;;  %v9682_v45 = vld [vmem:[#allocation13 + $0x198] sm:$0xff]  ;;  %v9681_v39 = vld [vmem:[#allocation13 + $0x190] sm:$0xff] }
 0xb21   : > { %10083 = vmatprep.mubr.f32.mxu1 %v9752_v18  ;;  %v11800_v0 = vadd.f32 -1.0, %v14635_v23  ;;  %v9405_v49 = vmul.f32 1.442695, %v9230_v6  ;;  %v8855_v47 = vmul.f32 %v21070_v41, %v23614_v27  ;;  %14644 = vpow2.f32 %v9403_v32 }
 0xb22   : > { %v21849_v14 = vsel %vm9127_vm10, %v21736_v50, %v11799_v12  ;;  %v21852_v44 = vadd.f32 %v21011_v8, %v8854_v51  ;;  %v8856_v58 = vmul.f32 %v21070_v41, %v23615_v30  ;;  %vm9129_vm12 = vcmp.gt.f32.partialorder %v21769_v4, 0.0  ;;  %v23620_v30 = vld [vmem:[#allocation61_spill] sm:$0xff] }
 0xb23   : > { %v21859_v19 = vsel %vm9128_vm11, %v21740_v46, %v11800_v0  ;;  %14646 = vpow2.f32 %v9405_v49  ;;  %v9231_v26 = vmin.f32 %v21842_v56, 0.0  ;;  %vm9130_vm13 = vcmp.gt.f32.partialorder %v21772_v29, 0.0  ;;  %v9757_v46 = vld [vmem:[#allocation13 + $0x3f0] sm:$0xff] }
 0xb24   : > { %10084 = vmatmul.mubr.f32.gmra.mrb[140].mxu1 %v9751_v25  ;;  %v13552_v50 = vpack.c.bf16 %v21859_v19, %v21849_v14  ;;  %v9232_v37 = vmin.f32 %v21852_v44, 0.0  ;;  %v21868_v41 = vadd.f32 %v21011_v8, %v8855_v47  ;;  %v21871_v3 = vadd.f32 %v21011_v8, %v8856_v58  ;;  %v23619_v47 = vld [vmem:[#allocation109_spill] sm:$0xff]  ;;  %v9687_v14 = vld [vmem:[#allocation13 + $0x1c0] sm:$0xff]  ;;  %v9694_v19 = vld [vmem:[#allocation13 + $0x1f8] sm:$0xff] }
 0xb25   : > { %v14637_v57 = vpop.eup %14636  ;;  %10088 = vmatprep.mubr.f32.mxu1 %v9758_v9  ;;  %v9407_v11 = vmul.f32 1.442695, %v9231_v26  ;;  %v8857_v10 = vmul.f32 %v21073_v48, %v23616_v28  ;;  %v8858_v40 = vmul.f32 %v21073_v48, %v23617_v55  ;;  %vm9131_vm14 = vcmp.gt.f32.partialorder %v21775_v36, 0.0  ;;  %v9769_v26 = vld [vmem:[#allocation13 + $0x450] sm:$0xff]  ;;  %v9776_v28 = vld [vmem:[#allocation13 + $0x488] sm:$0xff] }
 0xb26   : > { %v14639_v1 = vpop.eup %14638  ;;  %v11801_v13 = vadd.f32 -1.0, %v14637_v57  ;;  %v9409_v31 = vmul.f32 1.442695, %v9232_v37  ;;  %v9233_v52 = vmin.f32 %v21868_v41, 0.0  ;;  %vm9132_vm15 = vcmp.gt.f32.partialorder %v21778_v63, 0.0 }
 0xb27   : > { %v11802_v7 = vadd.f32 -1.0, %v14639_v1  ;;  %14648 = vpow2.f32 %v9407_v11  ;;  %v9234_v8 = vmin.f32 %v21871_v3, 0.0  ;;  %v21887_v60 = vadd.f32 %v23618_v2, %v8857_v10  ;;  %v23621_v11 = vld [vmem:[#allocation52_spill] sm:$0xff] }
 0xb28   : > { %v14641_v17 = vpop.eup %14640  ;;  %10089 = vmatmul.mubr.f32.gmra.mrb[142].mxu1 %v9757_v46  ;;  %v21884_v15 = vsel %vm9129_vm12, %v21769_v4, %v11801_v13  ;;  %14650 = vpow2.f32 %v9409_v31  ;;  %v9411_v18 = vmul.f32 1.442695, %v9233_v52  ;;  %v21895_v32 = vadd.f32 %v23618_v2, %v8858_v40  ;;  %v9770_v4 = vld [vmem:[#allocation13 + $0x458] sm:$0xff]  ;;  %v23622_v13 = vld [vmem:[#allocation51_spill] sm:$0xff] }
 0xb29   : > { %v14643_v5 = vpop.eup %14642  ;;  %10093 = vmatprep.mubr.f32.mxu1 %v9764_v33  ;;  %v21892_v6 = vsel %vm9130_vm13, %v21772_v29, %v11802_v7  ;;  %v11803_v23 = vadd.f32 -1.0, %v14641_v17  ;;  %v9413_v12 = vmul.f32 1.442695, %v9234_v8  ;;  %vm9133_vm1 = vcmp.gt.f32.partialorder %v21814_v43, 0.0 }
 0xb2a   : > { %v13555_v38 = vpack.c.bf16 %v21892_v6, %v21884_v15  ;;  %v11804_v51 = vadd.f32 -1.0, %v14643_v5  ;;  %14652 = vpow2.f32 %v9411_v18  ;;  %vm9134_vm0 = vcmp.gt.f32.partialorder %v21820_v62, 0.0  ;;  %v9700_v15 = vld [vmem:[#allocation13 + $0x228] sm:$0xff]  ;;  %v9699_v6 = vld [vmem:[#allocation13 + $0x220] sm:$0xff] }
 0xb2b   : > { %v21903_v25 = vsel %vm9131_vm14, %v21775_v36, %v11803_v23  ;;  %14654 = vpow2.f32 %v9413_v12  ;;  %v9235_v29 = vmin.f32 %v21887_v60, 0.0  ;;  %v14645_v0 = vpop.eup %14644  ;;  %v9236_v27 = vmin.f32 %v21895_v32, 0.0  ;;  %v9782_v12 = vld [vmem:[#allocation13 + $0x4b8] sm:$0xff] }
 0xb2c   : > { %10094 = vmatmul.mubr.f32.gmra.mrb[144].mxu1 %v9763_v53  ;;  %v21910_v49 = vsel %vm9132_vm15, %v21778_v63, %v11804_v51  ;;  %v8859_v9 = vmul.f32 %v21073_v48, %v23619_v47  ;;  %v8860_v36 = vmul.f32 %v21073_v48, %v23620_v30  ;;  %v11805_v57 = vadd.f32 -1.0, %v14645_v0  ;;  %v23623_v51 = vld [vmem:[#allocation67_spill] sm:$0xff] }
 0xb2d   : > { %v14647_v58 = vpop.eup %14646  ;;  %10098 = vmatprep.mubr.f32.mxu1 %v9770_v4  ;;  %v13558_v37 = vpack.c.bf16 %v21910_v49, %v21903_v25  ;;  %v9415_v46 = vmul.f32 1.442695, %v9235_v29  ;;  %v8861_v63 = vmul.f32 %v21073_v48, %v23621_v11  ;;  %v9417_v55 = vmul.f32 1.442695, %v9236_v27  ;;  %v9781_v11 = vld [vmem:[#allocation13 + $0x4b0] sm:$0xff]  ;;  %v9712_v49 = vld [vmem:[#allocation13 + $0x288] sm:$0xff] }
 0xb2e   : > { %v11806_v10 = vadd.f32 -1.0, %v14647_v58  ;;  %v21922_v40 = vadd.f32 %v23618_v2, %v8859_v9  ;;  %v21925_v1 = vadd.f32 %v23618_v2, %v8860_v36  ;;  %v21930_v33 = vsel %vm9133_vm1, %v21814_v43, %v11805_v57  ;;  %v9775_v43 = vld [vmem:[#allocation13 + $0x480] sm:$0xff]  ;;  %v9705_v25 = vld [vmem:[#allocation13 + $0x250] sm:$0xff] }
 0xb2f   : > { %14656 = vpow2.f32 %v9415_v46  ;;  %v8862_v31 = vmul.f32 %v21073_v48, %v23622_v13  ;;  %v21935_v52 = vadd.f32 %v23618_v2, %v8861_v63  ;;  %vm9135_vm2 = vcmp.gt.f32.partialorder %v21842_v56, 0.0 }
 0xb30   : > { %10099 = vmatmul.mubr.f32.gmra.mrb[146].mxu1 %v9769_v26  ;;  %v21940_v7 = vsel %vm9134_vm0, %v21820_v62, %v11806_v10  ;;  %14658 = vpow2.f32 %v9417_v55  ;;  %v9237_v18 = vmin.f32 %v21922_v40, 0.0  ;;  %v9238_v5 = vmin.f32 %v21925_v1, 0.0  ;;  %v23624_v26 = vld [vmem:[#allocation57_spill] sm:$0xff] }
 0xb31   : > { %v14649_v8 = vpop.eup %14648  ;;  %10103 = vmatprep.mubr.f32.mxu1 %v9776_v28  ;;  %v13561_v17 = vpack.c.bf16 %v21940_v7, %v21930_v33  ;;  %v21948_v53 = vadd.f32 %v23618_v2, %v8862_v31  ;;  %vm9136_vm3 = vcmp.gt.f32.partialorder %v21852_v44, 0.0  ;;  %v9239_v4 = vmin.f32 %v21935_v52, 0.0  ;;  %v9718_v33 = vld [vmem:[#allocation13 + $0x2b8] sm:$0xff]  ;;  %v9717_v7 = vld [vmem:[#allocation13 + $0x2b0] sm:$0xff] }
 0xb32   : > { %v14651_v23 = vpop.eup %14650  ;;  %v11807_v62 = vadd.f32 -1.0, %v14649_v8  ;;  %v8863_v29 = vmul.f32 %v21073_v48, %v23623_v51  ;;  %vm9137_vm4 = vcmp.gt.f32.partialorder %v21868_v41, 0.0  ;;  %v9419_v27 = vmul.f32 1.442695, %v9237_v18  ;;  %v23626_v51 = vld [vmem:[#allocation101_spill] sm:$0xff] }
 0xb33   : > { %v11808_v0 = vadd.f32 -1.0, %v14651_v23  ;;  %v9421_v47 = vmul.f32 1.442695, %v9238_v5  ;;  %v9240_v36 = vmin.f32 %v21948_v53, 0.0  ;;  %v9423_v58 = vmul.f32 1.442695, %v9239_v4 }
 0xb34   : > { %v14653_v9 = vpop.eup %14652  ;;  %10104 = vmatmul.mubr.f32.gmra.mrb[148].mxu1 %v9775_v43  ;;  %v21958_v30 = vsel %vm9135_vm2, %v21842_v56, %v11807_v62  ;;  %v8864_v57 = vmul.f32 %v21073_v48, %v23624_v26  ;;  %14660 = vpow2.f32 %v9419_v27  ;;  %v21969_v10 = vadd.f32 %v23618_v2, %v8863_v29  ;;  %v9788_v56 = vld [vmem:[#allocation13 + $0x4e8] sm:$0xff]  ;;  %v9787_v62 = vld [vmem:[#allocation13 + $0x4e0] sm:$0xff] }
 0xb35   : > { %v14655_v46 = vpop.eup %14654  ;;  %10108 = vmatprep.mubr.f32.mxu1 %v9782_v12  ;;  %v21966_v63 = vsel %vm9136_vm3, %v21852_v44, %v11808_v0  ;;  %v11809_v28 = vadd.f32 -1.0, %v14653_v9  ;;  %14662 = vpow2.f32 %v9421_v47  ;;  %v9425_v31 = vmul.f32 1.442695, %v9240_v36  ;;  %v23625_v5 = vld [vmem:[#allocation72_spill] sm:$0xff]  ;;  %v9794_v0 = vld [vmem:[#allocation13 + $0x518] sm:$0xff]  ;;  %v23627_v36 = vld [vmem:[#allocation81_spill] sm:$0xff] }
 0xb36   : > { %v13564_v55 = vpack.c.bf16 %v21966_v63, %v21958_v30  ;;  %v11810_v13 = vadd.f32 -1.0, %v14655_v46  ;;  %vm9138_vm5 = vcmp.gt.f32.partialorder %v21871_v3, 0.0  ;;  %14664 = vpow2.f32 %v9423_v58  ;;  %v9723_v30 = vld [vmem:[#allocation13 + $0x2e0] sm:$0xff]  ;;  %v9730_v63 = vld [vmem:[#allocation13 + $0x318] sm:$0xff] }
 0xb37   : > { %v21977_v8 = vsel %vm9137_vm4, %v21868_v41, %v11809_v28  ;;  %v21980_v44 = vadd.f32 %v23618_v2, %v8864_v57  ;;  %14666 = vpow2.f32 %v9425_v31  ;;  %v9241_v18 = vmin.f32 %v21969_v10, 0.0  ;;  %v9793_v31 = vld [vmem:[#allocation13 + $0x510] sm:$0xff] }
 0xb38   : > { %10109 = vmatmul.mubr.f32.gmra.mrb[150].mxu1 %v9781_v11  ;;  %v21983_v43 = vsel %vm9138_vm5, %v21871_v3, %v11810_v13  ;;  %v8865_v23 = vmul.f32 %v21073_v48, %v23625_v5  ;;  %vm9139_vm6 = vcmp.gt.f32.partialorder %v21887_v60, 0.0  ;;  %v8866_v3 = vmul.f32 %v21073_v48, %v23626_v51  ;;  %v23628_v11 = vld [vmem:[#allocation69_spill] sm:$0xff] }
 0xb39   : > { %v14657_v12 = vpop.eup %14656  ;;  %10113 = vmatprep.mubr.f32.mxu1 %v9788_v56  ;;  %v13567_v41 = vpack.c.bf16 %v21983_v43, %v21977_v8  ;;  %v9242_v4 = vmin.f32 %v21980_v44, 0.0  ;;  %v9427_v47 = vmul.f32 1.442695, %v9241_v18  ;;  %v8867_v58 = vmul.f32 %v21073_v48, %v23627_v36  ;;  %v9736_v8 = vld [vmem:[#allocation13 + $0x348] sm:$0xff]  ;;  %v9735_v43 = vld [vmem:[#allocation13 + $0x340] sm:$0xff] }
 0xb3a   : > { %v14659_v29 = vpop.eup %14658  ;;  %v11811_v27 = vadd.f32 -1.0, %v14657_v12  ;;  %v21995_v9 = vadd.f32 %v23618_v2, %v8865_v23  ;;  %v22000_v46 = vadd.f32 %v23618_v2, %v8866_v3  ;;  %v8868_v28 = vmul.f32 %v21073_v48, %v23628_v11  ;;  %v9800_v23 = vld [vmem:[#allocation13 + $0x548] sm:$0xff] }
 0xb3b   : > { %v11812_v26 = vadd.f32 -1.0, %v14659_v29  ;;  %v9429_v57 = vmul.f32 1.442695, %v9242_v4  ;;  %vm9140_vm7 = vcmp.gt.f32.partialorder %v21895_v32, 0.0  ;;  %14668 = vpow2.f32 %v9427_v47 }
 0xb3c   : > { %10114 = vmatmul.mubr.f32.gmra.mrb[152].mxu1 %v9787_v62  ;;  %v22006_v56 = vsel %vm9139_vm6, %v21887_v60, %v11811_v27  ;;  %v9243_v13 = vmin.f32 %v21995_v9, 0.0  ;;  %v9244_v5 = vmin.f32 %v22000_v46, 0.0  ;;  %v22016_v62 = vadd.f32 %v23618_v2, %v8867_v58 }
 0xb3d   : > { %10118 = vmatprep.mubr.f32.mxu1 %v9794_v0  ;;  %v22010_v18 = vsel %vm9140_vm7, %v21895_v32, %v11812_v26  ;;  %14670 = vpow2.f32 %v9429_v57  ;;  %v22019_v60 = vadd.f32 %v23618_v2, %v8868_v28  ;;  %vm9141_vm8 = vcmp.gt.f32.partialorder %v21922_v40, 0.0  ;;  %v9799_v0 = vld [vmem:[#allocation13 + $0x540] sm:$0xff]  ;;  %v9806_v2 = vld [vmem:[#allocation13 + $0x578] sm:$0xff] }
 0xb3e   : > { %v13570_v48 = vpack.c.bf16 %v22010_v18, %v22006_v56  ;;  %v9431_v12 = vmul.f32 1.442695, %v9243_v13  ;;  %v14661_v4 = vpop.eup %14660  ;;  %v9433_v51 = vmul.f32 1.442695, %v9244_v5  ;;  %v9245_v47 = vmin.f32 %v22016_v62, 0.0  ;;  %v9741_v56 = vld [vmem:[#allocation13 + $0x370] sm:$0xff] }
 0xb3f   : > { %v14663_v3 = vpop.eup %14662  ;;  %v11813_v32 = vadd.f32 -1.0, %v14661_v4  ;;  %v9246_v36 = vmin.f32 %v22019_v60, 0.0  ;;  %vm9142_vm9 = vcmp.gt.f32.partialorder %v21925_v1, 0.0  ;;  %vm9143_vm10 = vcmp.gt.f32.partialorder %v21935_v52, 0.0  ;;  %v9812_v4 = vld [vmem:[#allocation13 + $0x5a8] sm:$0xff] }
 0xb40   : > { %10119 = vmatmul.mubr.f32.gmra.mrb[154].mxu1 %v9793_v31  ;;  %14672 = vpow2.f32 %v9431_v12  ;;  %v14665_v29 = vpop.eup %14664  ;;  %v11814_v27 = vadd.f32 -1.0, %v14663_v3  ;;  %v9435_v13 = vmul.f32 1.442695, %v9245_v47  ;;  %vm9144_vm11 = vcmp.gt.f32.partialorder %v21948_v53, 0.0  ;;  %v9748_v18 = vld [vmem:[#allocation13 + $0x3a8] sm:$0xff] }
 0xb41   : > { %10123 = vmatprep.mubr.f32.mxu1 %v9800_v23  ;;  %14674 = vpow2.f32 %v9433_v51  ;;  %v14667_v58 = vpop.eup %14666  ;;  %v22026_v26 = vsel %vm9141_vm8, %v21922_v40, %v11813_v32  ;;  %v11815_v57 = vadd.f32 -1.0, %v14665_v29  ;;  %v9437_v31 = vmul.f32 1.442695, %v9246_v36  ;;  %v9805_v40 = vld [vmem:[#allocation13 + $0x570] sm:$0xff] }
 0xb42   : > { %v22030_v11 = vsel %vm9142_vm9, %v21925_v1, %v11814_v27  ;;  %v11816_v28 = vadd.f32 -1.0, %v14667_v58  ;;  %14676 = vpow2.f32 %v9435_v13  ;;  %vm9145_vm12 = vcmp.gt.f32.partialorder %v21969_v10, 0.0  ;;  %v9818_v27 = vld [vmem:[#allocation13 + $0x5d8] sm:$0xff]  ;;  %v9824_v13 = vld [vmem:[#allocation13 + $0x608] sm:$0xff] }
 0xb43   : > { %v13573_v5 = vpack.c.bf16 %v22030_v11, %v22026_v26  ;;  %v22036_v23 = vsel %vm9143_vm10, %v21935_v52, %v11815_v57  ;;  %14678 = vpow2.f32 %v9437_v31  ;;  %v9811_v52 = vld [vmem:[#allocation13 + $0x5a0] sm:$0xff]  ;;  %vm9146_vm13 = vcmp.gt.f32.partialorder %v21980_v44, 0.0  ;;  %v9753_v26 = vld [vmem:[#allocation13 + $0x3d0] sm:$0xff]  ;;  %v9760_v11 = vld [vmem:[#allocation13 + $0x408] sm:$0xff] }
 0xb44   : > { %10124 = vmatmul.mubr.f32.gmra.mrb[156].mxu1 %v9799_v0  ;;  %v22039_v12 = vsel %vm9144_vm11, %v21948_v53, %v11816_v28  ;;  %vm9147_vm14 = vcmp.gt.f32.partialorder %v21995_v9, 0.0  ;;  %v9817_v28 = vld [vmem:[#allocation13 + $0x5d0] sm:$0xff]  ;;  %vm9148_vm15 = vcmp.gt.f32.partialorder %v22000_v46, 0.0  ;;  %vm9149_vm1 = vcmp.gt.f32.partialorder %v22016_v62, 0.0 }
 0xb45   : > { %10128 = vmatprep.mubr.f32.mxu1 %v9806_v2  ;;  %v14669_v1 = vpop.eup %14668  ;;  %v13576_v51 = vpack.c.bf16 %v22039_v12, %v22036_v23  ;;  %vm9150_vm0 = vcmp.gt.f32.partialorder %v22019_v60, 0.0  ;;  %v9766_v23 = vld [vmem:[#allocation13 + $0x438] sm:$0xff]  ;;  %v9765_v12 = vld [vmem:[#allocation13 + $0x430] sm:$0xff] }
 0xb46   : > { %v11817_v32 = vadd.f32 -1.0, %v14669_v1 }
 0xb47   : > { %v14671_v3 = vpop.eup %14670 }
 0xb48   : > { %10129 = vmatmul.mubr.f32.gmra.mrb[158].mxu1 %v9805_v40  ;;  %v11818_v29 = vadd.f32 -1.0, %v14671_v3  ;;  %v22046_v53 = vsel %vm9145_vm12, %v21969_v10, %v11817_v32  ;;  %v9823_v3 = vld [vmem:[#allocation13 + $0x600] sm:$0xff] }
 0xb49   : > { %10133 = vmatprep.mubr.f32.mxu1 %v9812_v4 }
 0xb4a   : > { %v14673_v0 = vpop.eup %14672  ;;  %v22049_v47 = vsel %vm9146_vm13, %v21980_v44, %v11818_v29  ;;  %v9830_v29 = vld [vmem:[#allocation13 + $0x638] sm:$0xff] }
 0xb4b   : > { %v14675_v36 = vpop.eup %14674  ;;  %v13579_v58 = vpack.c.bf16 %v22049_v47, %v22046_v53  ;;  %v11819_v2 = vadd.f32 -1.0, %v14673_v0  ;;  %v9829_v0 = vld [vmem:[#allocation13 + $0x630] sm:$0xff]  ;;  %v9771_v53 = vld [vmem:[#allocation13 + $0x460] sm:$0xff]  ;;  %v9778_v47 = vld [vmem:[#allocation13 + $0x498] sm:$0xff] }
 0xb4c   : > { %10134 = vmatmul.mubr.f32.gmra.mrb[160].mxu1 %v9811_v52  ;;  %v11820_v57 = vadd.f32 -1.0, %v14675_v36  ;;  %v14677_v31 = vpop.eup %14676  ;;  %v9835_v36 = vld [vmem:[#allocation13 + $0x660] sm:$0xff] }
 0xb4d   : > { %10138 = vmatprep.mubr.f32.mxu1 %v9818_v27  ;;  %v22056_v10 = vsel %vm9147_vm14, %v21995_v9, %v11819_v2  ;;  %v14679_v1 = vpop.eup %14678  ;;  %v11821_v4 = vadd.f32 -1.0, %v14677_v31  ;;  %v9836_v27 = vld [vmem:[#allocation13 + $0x668] sm:$0xff]  ;;  %v9842_v2 = vld [vmem:[#allocation13 + $0x698] sm:$0xff] }
 0xb4e   : > { %v22059_v44 = vsel %vm9148_vm15, %v22000_v46, %v11820_v57  ;;  %v11822_v32 = vadd.f32 -1.0, %v14679_v1  ;;  %v9841_v57 = vld [vmem:[#allocation13 + $0x690] sm:$0xff]  ;;  %v9860_v31 = vld [vmem:[#allocation13 + $0x728] sm:$0xff]  ;;  %v9859_v1 = vld [vmem:[#allocation13 + $0x720] sm:$0xff] }
 0xb4f   : > { %v13582_v40 = vpack.c.bf16 %v22059_v44, %v22056_v10  ;;  %v22066_v9 = vsel %vm9149_vm1, %v22016_v62, %v11821_v4  ;;  %v9847_v62 = vld [vmem:[#allocation13 + $0x6c0] sm:$0xff]  ;;  %v9866_v4 = vld [vmem:[#allocation13 + $0x758] sm:$0xff]  ;;  %v9784_v10 = vld [vmem:[#allocation13 + $0x4c8] sm:$0xff] }
 0xb50   : > { %10139 = vmatmul.mubr.f32.gmra.mrb[162].mxu1 %v9817_v28  ;;  %v22069_v46 = vsel %vm9150_vm0, %v22019_v60, %v11822_v32  ;;  %v9848_v28 = vld [vmem:[#allocation13 + $0x6c8] sm:$0xff]  ;;  %v9854_v60 = vld [vmem:[#allocation13 + $0x6f8] sm:$0xff]  ;;  %v9783_v44 = vld [vmem:[#allocation13 + $0x4c0] sm:$0xff] }
 0xb51   : > { %10143 = vmatprep.mubr.f32.mxu1 %v9824_v13  ;;  %v13585_v52 = vpack.c.bf16 %v22069_v46, %v22066_v9  ;;  %v9853_v13 = vld [vmem:[#allocation13 + $0x6f0] sm:$0xff]  ;;  %v9872_v32 = vld [vmem:[#allocation13 + $0x788] sm:$0xff] }
 0xb52   : > { %v9789_v9 = vld [vmem:[#allocation13 + $0x4f0] sm:$0xff]  ;;  %v9796_v46 = vld [vmem:[#allocation13 + $0x528] sm:$0xff] }
 0xb54   : > { %10144 = vmatmul.mubr.f32.gmra.mrb[164].mxu1 %v9823_v3  ;;  %v9865_v3 = vld [vmem:[#allocation13 + $0x750] sm:$0xff] }
 0xb55   : > { %10148 = vmatprep.mubr.f32.mxu1 %v9830_v29  ;;  %v9871_v29 = vld [vmem:[#allocation13 + $0x780] sm:$0xff] }
 0xb58   : > { %10149 = vmatmul.mubr.f32.gmra.mrb[166].mxu1 %v9829_v0  ;;  %v9878_v0 = vld [vmem:[#allocation13 + $0x7b8] sm:$0xff] }
 0xb59   : > { %10153 = vmatprep.mubr.f32.mxu1 %v9836_v27  ;;  %v9877_v27 = vld [vmem:[#allocation13 + $0x7b0] sm:$0xff] }
 0xb5c   : > { %10154 = vmatmul.mubr.f32.gmra.mrb[168].mxu1 %v9835_v36  ;;  %v9884_v36 = vld [vmem:[#allocation13 + $0x7e8] sm:$0xff] }
 0xb5d   : > { %10158 = vmatprep.mubr.f32.mxu1 %v9842_v2  ;;  %v9883_v2 = vld [vmem:[#allocation13 + $0x7e0] sm:$0xff] }
 0xb60   : > { %10159 = vmatmul.mubr.f32.gmra.mrb[170].mxu1 %v9841_v57  ;;  %v9890_v57 = vld [vmem:[#allocation13 + $0x818] sm:$0xff] }
 0xb61   : > { %10163 = vmatprep.mubr.f32.mxu1 %v9848_v28  ;;  %v9889_v28 = vld [vmem:[#allocation13 + $0x810] sm:$0xff] }
 0xb64   : > { %10164 = vmatmul.mubr.f32.gmra.mrb[172].mxu1 %v9847_v62  ;;  %v9896_v62 = vld [vmem:[#allocation13 + $0x848] sm:$0xff] }
 0xb65   : > { %10168 = vmatprep.mubr.f32.mxu1 %v9854_v60  ;;  %v9895_v60 = vld [vmem:[#allocation13 + $0x840] sm:$0xff] }
 0xb68   : > { %10169 = vmatmul.mubr.f32.gmra.mrb[174].mxu1 %v9853_v13  ;;  %v9902_v13 = vld [vmem:[#allocation13 + $0x878] sm:$0xff] }
 0xb69   : > { %10173 = vmatprep.mubr.f32.mxu1 %v9860_v31  ;;  %v9901_v31 = vld [vmem:[#allocation13 + $0x870] sm:$0xff] }
 0xb6c   : > { %10174 = vmatmul.mubr.f32.gmra.mrb[176].mxu1 %v9859_v1  ;;  %v9908_v1 = vld [vmem:[#allocation13 + $0x8a8] sm:$0xff] }
 0xb6d   : > { %10178 = vmatprep.mubr.f32.mxu1 %v9866_v4  ;;  %v9907_v4 = vld [vmem:[#allocation13 + $0x8a0] sm:$0xff] }
 0xb70   : > { %10179 = vmatmul.mubr.f32.gmra.mrb[178].mxu1 %v9865_v3  ;;  %v9914_v3 = vld [vmem:[#allocation13 + $0x8d8] sm:$0xff] }
 0xb71   : > { %10183 = vmatprep.mubr.f32.mxu1 %v9872_v32  ;;  %v9913_v32 = vld [vmem:[#allocation13 + $0x8d0] sm:$0xff] }
 0xb74   : > { %10184 = vmatmul.mubr.f32.gmra.mrb[180].mxu1 %v9871_v29  ;;  %v9634_v29 = vld [vmem:[#allocation13 + $0x18] sm:$0xff] }
 0xb75   : > { %10188 = vmatprep.mubr.f32.mxu1 %v9878_v0  ;;  %v9633_v0 = vld [vmem:[#allocation13 + $0x10] sm:$0xff] }
 0xb78   : > { %10189 = vmatmul.mubr.f32.gmra.mrb[182].mxu1 %v9877_v27  ;;  %v9640_v27 = vld [vmem:[#allocation13 + $0x48] sm:$0xff] }
 0xb79   : > { %10193 = vmatprep.mubr.f32.mxu1 %v9884_v36  ;;  %v9639_v36 = vld [vmem:[#allocation13 + $0x40] sm:$0xff] }
 0xb7c   : > { %10194 = vmatmul.mubr.f32.gmra.mrb[184].mxu1 %v9883_v2  ;;  %v9646_v2 = vld [vmem:[#allocation13 + $0x78] sm:$0xff] }
 0xb7d   : > { %10198 = vmatprep.mubr.f32.mxu1 %v9890_v57  ;;  %v9645_v57 = vld [vmem:[#allocation13 + $0x70] sm:$0xff] }
 0xb80   : > { %10199 = vmatmul.mubr.f32.gmra.mrb[186].mxu1 %v9889_v28  ;;  %v9652_v28 = vld [vmem:[#allocation13 + $0xa8] sm:$0xff] }
 0xb81   : > { %10203 = vmatprep.mubr.f32.mxu1 %v9896_v62  ;;  %v9802_v62 = vld [vmem:[#allocation13 + $0x558] sm:$0xff] }
 0xb84   : > { %10204 = vmatmul.mubr.f32.gmra.mrb[188].mxu1 %v9895_v60  ;;  %v9801_v60 = vld [vmem:[#allocation13 + $0x550] sm:$0xff] }
 0xb85   : > { %10208 = vmatprep.mubr.f32.mxu1 %v9902_v13  ;;  %v9808_v13 = vld [vmem:[#allocation13 + $0x588] sm:$0xff] }
 0xb88   : > { %10209 = vmatmul.mubr.f32.gmra.mrb[190].mxu1 %v9901_v31  ;;  %v9807_v31 = vld [vmem:[#allocation13 + $0x580] sm:$0xff] }
 0xb89   : > { %10213 = vmatprep.mubr.f32.mxu1 %v9908_v1  ;;  %v9814_v1 = vld [vmem:[#allocation13 + $0x5b8] sm:$0xff] }
 0xb8c   : > { %10214 = vmatmul.mubr.f32.gmra.mrb[192].mxu1 %v9907_v4  ;;  %v9813_v4 = vld [vmem:[#allocation13 + $0x5b0] sm:$0xff] }
 0xb8d   : > { %10218 = vmatprep.mubr.f32.mxu1 %v9914_v3  ;;  %v9820_v3 = vld [vmem:[#allocation13 + $0x5e8] sm:$0xff] }
 0xb90   : > { %10219 = vmatmul.mubr.f32.gmra.mrb[194].mxu1 %v9913_v32  ;;  %v9819_v32 = vld [vmem:[#allocation13 + $0x5e0] sm:$0xff] }
 0xb91   : > { %10288 = vmatprep.mubr.f32.mxu1 %v9634_v29  ;;  %v9826_v29 = vld [vmem:[#allocation13 + $0x618] sm:$0xff] }
 0xb94   : > { %10289 = vmatmul.mubr.f32.vlgmr.msra.gmra.mrb[100].mxu1 %v9633_v0  ;;  %v9825_v0 = vld [vmem:[#allocation13 + $0x610] sm:$0xff] }
 0xb95   : > { %13541 = vmatpush1.bf16.msra.mxu1 %v13540_v42  ;;  %10293 = vmatprep.mubr.f32.mxu1 %v9640_v27  ;;  %v9657_v42 = vld [vmem:[#allocation13 + $0xd0] sm:$0xff]  ;;  %v9832_v27 = vld [vmem:[#allocation13 + $0x648] sm:$0xff] }
 0xb96   : > { %13542 = vmatprep.subr.bf16.mxu1 %v23564_v61 }
 0xb98   : > { %10294 = vmatmul.mubr.f32.gmra.mrb[102].mxu1 %v9639_v36  ;;  %v9831_v36 = vld [vmem:[#allocation13 + $0x640] sm:$0xff] }
 0xb99   : > { %13544 = vmatpush1.bf16.msra.mxu1 %v13543_v20  ;;  %10298 = vmatprep.mubr.f32.mxu1 %v9646_v2  ;;  %v9670_v20 = vld [vmem:[#allocation13 + $0x138] sm:$0xff] }
 0xb9a   : > { %13545 = vmatprep.subr.bf16.mxu1 %v23564_v61  ;;  %v9838_v2 = vld [vmem:[#allocation13 + $0x678] sm:$0xff] }
 0xb9c   : > { %10299 = vmatmul.mubr.f32.gmra.mrb[104].mxu1 %v9645_v57  ;;  %v9837_v57 = vld [vmem:[#allocation13 + $0x670] sm:$0xff] }
 0xb9d   : > { %13547 = vmatpush1.bf16.msra.mxu1 %v13546_v59  ;;  %10303 = vmatprep.mubr.f32.mxu1 %v9652_v28  ;;  %v9675_v59 = vld [vmem:[#allocation13 + $0x160] sm:$0xff]  ;;  %v9844_v28 = vld [vmem:[#allocation13 + $0x6a8] sm:$0xff] }
 0xb9e   : > { %13548 = vmatprep.subr.bf16.mxu1 %v23564_v61 }
 0xba0   : > { %10304 = vmatmul.mubr.f32.gmra.mrb[106].mxu1 %v9651_v21  ;;  %v9843_v21 = vld [vmem:[#allocation13 + $0x6a0] sm:$0xff] }
 0xba1   : > { %13550 = vmatpush1.bf16.msra.mxu1 %v13549_v24  ;;  %10308 = vmatprep.mubr.f32.mxu1 %v9658_v54  ;;  %v9688_v24 = vld [vmem:[#allocation13 + $0x1c8] sm:$0xff]  ;;  %v9850_v54 = vld [vmem:[#allocation13 + $0x6d8] sm:$0xff] }
 0xba2   : > { %13551 = vmatprep.subr.bf16.mxu1 %v23564_v61 }
 0xba4   : > { %10309 = vmatmul.mubr.f32.gmra.mrb[108].mxu1 %v9657_v42  ;;  %v9849_v42 = vld [vmem:[#allocation13 + $0x6d0] sm:$0xff] }
 0xba5   : > { %13553 = vmatpush1.bf16.msra.mxu1 %v13552_v50  ;;  %10313 = vmatprep.mubr.f32.mxu1 %v9664_v16  ;;  %v9693_v50 = vld [vmem:[#allocation13 + $0x1f0] sm:$0xff]  ;;  %v9856_v16 = vld [vmem:[#allocation13 + $0x708] sm:$0xff] }
 0xba6   : > { %13554 = vmatprep.subr.bf16.mxu1 %v23564_v61 }
 0xba8   : > { %10314 = vmatmul.mubr.f32.gmra.mrb[110].mxu1 %v9663_v35  ;;  %v9855_v35 = vld [vmem:[#allocation13 + $0x700] sm:$0xff] }
 0xba9   : > { %13556 = vmatpush1.bf16.msra.mxu1 %v13555_v38  ;;  %10318 = vmatprep.mubr.f32.mxu1 %v9670_v20  ;;  %v9706_v38 = vld [vmem:[#allocation13 + $0x258] sm:$0xff] }
 0xbaa   : > { %13557 = vmatprep.subr.bf16.mxu1 %v23564_v61  ;;  %v9862_v20 = vld [vmem:[#allocation13 + $0x738] sm:$0xff] }
 0xbac   : > { %10319 = vmatmul.mubr.f32.gmra.mrb[112].mxu1 %v9669_v34  ;;  %v9861_v34 = vld [vmem:[#allocation13 + $0x730] sm:$0xff] }
 0xbad   : > { %13559 = vmatpush1.bf16.msra.mxu1 %v13558_v37  ;;  %10323 = vmatprep.mubr.f32.mxu1 %v9676_v22  ;;  %v9711_v37 = vld [vmem:[#allocation13 + $0x280] sm:$0xff]  ;;  %v9868_v22 = vld [vmem:[#allocation13 + $0x768] sm:$0xff] }
 0xbae   : > { %13560 = vmatprep.subr.bf16.mxu1 %v23564_v61 }
 0xbb0   : > { %10324 = vmatmul.mubr.f32.gmra.mrb[114].mxu1 %v9675_v59  ;;  %v9867_v59 = vld [vmem:[#allocation13 + $0x760] sm:$0xff] }
 0xbb1   : > { %13562 = vmatpush1.bf16.msra.mxu1 %v13561_v17  ;;  %10328 = vmatprep.mubr.f32.mxu1 %v9682_v45  ;;  %v9724_v17 = vld [vmem:[#allocation13 + $0x2e8] sm:$0xff]  ;;  %v9874_v45 = vld [vmem:[#allocation13 + $0x798] sm:$0xff] }
 0xbb2   : > { %13563 = vmatprep.subr.bf16.mxu1 %v23564_v61 }
 0xbb4   : > { %10329 = vmatmul.mubr.f32.gmra.mrb[116].mxu1 %v9681_v39  ;;  %v9873_v39 = vld [vmem:[#allocation13 + $0x790] sm:$0xff] }
 0xbb5   : > { %13565 = vmatpush1.bf16.msra.mxu1 %v13564_v55  ;;  %10333 = vmatprep.mubr.f32.mxu1 %v9688_v24  ;;  %v9729_v55 = vld [vmem:[#allocation13 + $0x310] sm:$0xff]  ;;  %v9880_v24 = vld [vmem:[#allocation13 + $0x7c8] sm:$0xff] }
 0xbb6   : > { %13566 = vmatprep.subr.bf16.mxu1 %v23564_v61 }
 0xbb8   : > { %10334 = vmatmul.mubr.f32.gmra.mrb[118].mxu1 %v9687_v14  ;;  %v9879_v14 = vld [vmem:[#allocation13 + $0x7c0] sm:$0xff] }
 0xbb9   : > { %13568 = vmatpush1.bf16.msra.mxu1 %v13567_v41  ;;  %10338 = vmatprep.mubr.f32.mxu1 %v9694_v19  ;;  %v9742_v41 = vld [vmem:[#allocation13 + $0x378] sm:$0xff] }
 0xbba   : > { %13569 = vmatprep.subr.bf16.mxu1 %v23564_v61  ;;  %v9886_v19 = vld [vmem:[#allocation13 + $0x7f8] sm:$0xff] }
 0xbbc   : > { %10339 = vmatmul.mubr.f32.gmra.mrb[120].mxu1 %v9693_v50  ;;  %v9885_v50 = vld [vmem:[#allocation13 + $0x7f0] sm:$0xff] }
 0xbbd   : > { %13571 = vmatpush1.bf16.msra.mxu1 %v13570_v48  ;;  %10343 = vmatprep.mubr.f32.mxu1 %v9700_v15  ;;  %v9754_v48 = vld [vmem:[#allocation13 + $0x3d8] sm:$0xff]  ;;  %v9892_v15 = vld [vmem:[#allocation13 + $0x828] sm:$0xff] }
 0xbbe   : > { %13572 = vmatprep.subr.bf16.mxu1 %v23564_v61 }
 0xbc0   : > { %10344 = vmatmul.mubr.f32.gmra.mrb[122].mxu1 %v9699_v6  ;;  %v9891_v6 = vld [vmem:[#allocation13 + $0x820] sm:$0xff] }
 0xbc1   : > { %13574 = vmatpush1.bf16.msra.mxu1 %v13573_v5  ;;  %10348 = vmatprep.mubr.f32.mxu1 %v9706_v38  ;;  %v9759_v5 = vld [vmem:[#allocation13 + $0x400] sm:$0xff]  ;;  %v9898_v38 = vld [vmem:[#allocation13 + $0x858] sm:$0xff] }
 0xbc2   : > { %13575 = vmatprep.subr.bf16.mxu1 %v23564_v61 }
 0xbc4   : > { %10349 = vmatmul.mubr.f32.gmra.mrb[124].mxu1 %v9705_v25  ;;  %v9897_v25 = vld [vmem:[#allocation13 + $0x850] sm:$0xff] }
 0xbc5   : > { %13577 = vmatpush1.bf16.msra.mxu1 %v13576_v51  ;;  %10353 = vmatprep.mubr.f32.mxu1 %v9712_v49  ;;  %v9772_v51 = vld [vmem:[#allocation13 + $0x468] sm:$0xff] }
 0xbc6   : > { %13578 = vmatprep.subr.bf16.mxu1 %v23564_v61  ;;  %v9904_v49 = vld [vmem:[#allocation13 + $0x888] sm:$0xff] }
 0xbc8   : > { %10354 = vmatmul.mubr.f32.gmra.mrb[126].mxu1 %v9711_v37  ;;  %v9903_v37 = vld [vmem:[#allocation13 + $0x880] sm:$0xff] }
 0xbc9   : > { %13580 = vmatpush1.bf16.msra.mxu1 %v13579_v58  ;;  %10358 = vmatprep.mubr.f32.mxu1 %v9718_v33  ;;  %v9777_v58 = vld [vmem:[#allocation13 + $0x490] sm:$0xff]  ;;  %v9910_v33 = vld [vmem:[#allocation13 + $0x8b8] sm:$0xff] }
 0xbca   : > { %13581 = vmatprep.subr.bf16.mxu1 %v23564_v61 }
 0xbcc   : > { %10359 = vmatmul.mubr.f32.gmra.mrb[128].mxu1 %v9717_v7  ;;  %v9909_v7 = vld [vmem:[#allocation13 + $0x8b0] sm:$0xff] }
 0xbcd   : > { %13583 = vmatpush1.bf16.msra.mxu1 %v13582_v40  ;;  %10363 = vmatprep.mubr.f32.mxu1 %v9724_v17  ;;  %v9790_v40 = vld [vmem:[#allocation13 + $0x4f8] sm:$0xff]  ;;  %v9916_v17 = vld [vmem:[#allocation13 + $0x8e8] sm:$0xff] }
 0xbce   : > { %13584 = vmatprep.subr.bf16.mxu1 %v23564_v61  ;;  %v9747_v61 = vld [vmem:[#allocation13 + $0x3a0] sm:$0xff] }
 0xbd0   : > { %10364 = vmatmul.mubr.f32.gmra.mrb[130].mxu1 %v9723_v30  ;;  %v9915_v30 = vld [vmem:[#allocation13 + $0x8e0] sm:$0xff] }
 0xbd1   : > { %13586 = vmatpush1.bf16.msra.mxu1 %v13585_v52  ;;  %10368 = vmatprep.mubr.f32.mxu1 %v9730_v63  ;;  %v9795_v52 = vld [vmem:[#allocation13 + $0x520] sm:$0xff]  ;;  %v9636_v63 = vld [vmem:[#allocation13 + $0x28] sm:$0xff] }
 0xbd4   : > { %10369 = vmatmul.mubr.f32.gmra.mrb[132].mxu1 %v9729_v55  ;;  %v9635_v55 = vld [vmem:[#allocation13 + $0x20] sm:$0xff] }
 0xbd5   : > { %10373 = vmatprep.mubr.f32.mxu1 %v9736_v8  ;;  %v9642_v8 = vld [vmem:[#allocation13 + $0x58] sm:$0xff] }
 0xbd8   : > { %10374 = vmatmul.mubr.f32.gmra.mrb[134].mxu1 %v9735_v43  ;;  %v9641_v43 = vld [vmem:[#allocation13 + $0x50] sm:$0xff] }
 0xbd9   : > { %10378 = vmatprep.mubr.f32.mxu1 %v9742_v41  ;;  %v9648_v41 = vld [vmem:[#allocation13 + $0x88] sm:$0xff] }
 0xbdc   : > { %10379 = vmatmul.mubr.f32.gmra.mrb[136].mxu1 %v9741_v56  ;;  %v9647_v56 = vld [vmem:[#allocation13 + $0x80] sm:$0xff] }
 0xbdd   : > { %10383 = vmatprep.mubr.f32.mxu1 %v9748_v18  ;;  %v9654_v18 = vld [vmem:[#allocation13 + $0xb8] sm:$0xff] }
 0xbe0   : > { %10384 = vmatmul.mubr.f32.gmra.mrb[138].mxu1 %v9747_v61  ;;  %v9653_v61 = vld [vmem:[#allocation13 + $0xb0] sm:$0xff] }
 0xbe1   : > { %10388 = vmatprep.mubr.f32.mxu1 %v9754_v48  ;;  %v9660_v48 = vld [vmem:[#allocation13 + $0xe8] sm:$0xff] }
 0xbe4   : > { %10389 = vmatmul.mubr.f32.gmra.mrb[140].mxu1 %v9753_v26  ;;  %v9659_v26 = vld [vmem:[#allocation13 + $0xe0] sm:$0xff] }
 0xbe5   : > { %10393 = vmatprep.mubr.f32.mxu1 %v9760_v11  ;;  %v9666_v11 = vld [vmem:[#allocation13 + $0x118] sm:$0xff] }
 0xbe8   : > { %10394 = vmatmul.mubr.f32.gmra.mrb[142].mxu1 %v9759_v5  ;;  %v9665_v5 = vld [vmem:[#allocation13 + $0x110] sm:$0xff] }
 0xbe9   : > { %10398 = vmatprep.mubr.f32.mxu1 %v9766_v23  ;;  %v9672_v23 = vld [vmem:[#allocation13 + $0x148] sm:$0xff] }
 0xbec   : > { %10399 = vmatmul.mubr.f32.gmra.mrb[144].mxu1 %v9765_v12  ;;  %v9671_v12 = vld [vmem:[#allocation13 + $0x140] sm:$0xff] }
 0xbed   : > { %10403 = vmatprep.mubr.f32.mxu1 %v9772_v51  ;;  %v9678_v51 = vld [vmem:[#allocation13 + $0x178] sm:$0xff] }
 0xbf0   : > { %10404 = vmatmul.mubr.f32.gmra.mrb[146].mxu1 %v9771_v53  ;;  %v9677_v53 = vld [vmem:[#allocation13 + $0x170] sm:$0xff] }
 0xbf1   : > { %10408 = vmatprep.mubr.f32.mxu1 %v9778_v47  ;;  %v9684_v47 = vld [vmem:[#allocation13 + $0x1a8] sm:$0xff] }
 0xbf4   : > { %10409 = vmatmul.mubr.f32.gmra.mrb[148].mxu1 %v9777_v58  ;;  %v9683_v58 = vld [vmem:[#allocation13 + $0x1a0] sm:$0xff] }
 0xbf5   : > { %10413 = vmatprep.mubr.f32.mxu1 %v9784_v10  ;;  %v9690_v10 = vld [vmem:[#allocation13 + $0x1d8] sm:$0xff] }
 0xbf8   : > { %10414 = vmatmul.mubr.f32.gmra.mrb[150].mxu1 %v9783_v44  ;;  %v9689_v44 = vld [vmem:[#allocation13 + $0x1d0] sm:$0xff] }
 0xbf9   : > { %10418 = vmatprep.mubr.f32.mxu1 %v9790_v40  ;;  %v9696_v40 = vld [vmem:[#allocation13 + $0x208] sm:$0xff] }
 0xbfc   : > { %10419 = vmatmul.mubr.f32.gmra.mrb[152].mxu1 %v9789_v9  ;;  %v9695_v9 = vld [vmem:[#allocation13 + $0x200] sm:$0xff] }
 0xbfd   : > { %10423 = vmatprep.mubr.f32.mxu1 %v9796_v46  ;;  %v9702_v46 = vld [vmem:[#allocation13 + $0x238] sm:$0xff] }
 0xc00   : > { %10424 = vmatmul.mubr.f32.gmra.mrb[154].mxu1 %v9795_v52  ;;  %v9701_v52 = vld [vmem:[#allocation13 + $0x230] sm:$0xff] }
 0xc01   : > { %10428 = vmatprep.mubr.f32.mxu1 %v9802_v62  ;;  %v9708_v62 = vld [vmem:[#allocation13 + $0x268] sm:$0xff] }
 0xc04   : > { %10429 = vmatmul.mubr.f32.gmra.mrb[156].mxu1 %v9801_v60  ;;  %v9707_v60 = vld [vmem:[#allocation13 + $0x260] sm:$0xff] }
 0xc05   : > { %10433 = vmatprep.mubr.f32.mxu1 %v9808_v13  ;;  %v9714_v13 = vld [vmem:[#allocation13 + $0x298] sm:$0xff] }
 0xc08   : > { %10434 = vmatmul.mubr.f32.gmra.mrb[158].mxu1 %v9807_v31  ;;  %v9713_v31 = vld [vmem:[#allocation13 + $0x290] sm:$0xff] }
 0xc09   : > { %10438 = vmatprep.mubr.f32.mxu1 %v9814_v1  ;;  %v9720_v1 = vld [vmem:[#allocation13 + $0x2c8] sm:$0xff] }
 0xc0c   : > { %10439 = vmatmul.mubr.f32.gmra.mrb[160].mxu1 %v9813_v4  ;;  %v9719_v4 = vld [vmem:[#allocation13 + $0x2c0] sm:$0xff] }
 0xc0d   : > { %10443 = vmatprep.mubr.f32.mxu1 %v9820_v3  ;;  %v9726_v3 = vld [vmem:[#allocation13 + $0x2f8] sm:$0xff] }
 0xc10   : > { %10444 = vmatmul.mubr.f32.gmra.mrb[162].mxu1 %v9819_v32  ;;  %v9725_v32 = vld [vmem:[#allocation13 + $0x2f0] sm:$0xff] }
 0xc11   : > { %10448 = vmatprep.mubr.f32.mxu1 %v9826_v29  ;;  %v9732_v29 = vld [vmem:[#allocation13 + $0x328] sm:$0xff] }
 0xc14   : > { %10449 = vmatmul.mubr.f32.gmra.mrb[164].mxu1 %v9825_v0  ;;  %v9731_v0 = vld [vmem:[#allocation13 + $0x320] sm:$0xff] }
 0xc15   : > { %10453 = vmatprep.mubr.f32.mxu1 %v9832_v27  ;;  %v9738_v27 = vld [vmem:[#allocation13 + $0x358] sm:$0xff] }
 0xc18   : > { %10454 = vmatmul.mubr.f32.gmra.mrb[166].mxu1 %v9831_v36  ;;  %v9737_v36 = vld [vmem:[#allocation13 + $0x350] sm:$0xff] }
 0xc19   : > { %10458 = vmatprep.mubr.f32.mxu1 %v9838_v2  ;;  %v9744_v2 = vld [vmem:[#allocation13 + $0x388] sm:$0xff] }
 0xc1c   : > { %10459 = vmatmul.mubr.f32.gmra.mrb[168].mxu1 %v9837_v57  ;;  %v9743_v57 = vld [vmem:[#allocation13 + $0x380] sm:$0xff] }
 0xc1d   : > { %10463 = vmatprep.mubr.f32.mxu1 %v9844_v28  ;;  %v9750_v28 = vld [vmem:[#allocation13 + $0x3b8] sm:$0xff] }
 0xc20   : > { %10464 = vmatmul.mubr.f32.gmra.mrb[170].mxu1 %v9843_v21  ;;  %v9749_v21 = vld [vmem:[#allocation13 + $0x3b0] sm:$0xff] }
 0xc21   : > { %10468 = vmatprep.mubr.f32.mxu1 %v9850_v54  ;;  %v9756_v54 = vld [vmem:[#allocation13 + $0x3e8] sm:$0xff] }
 0xc24   : > { %10469 = vmatmul.mubr.f32.gmra.mrb[172].mxu1 %v9849_v42  ;;  %v9755_v42 = vld [vmem:[#allocation13 + $0x3e0] sm:$0xff] }
 0xc25   : > { %10473 = vmatprep.mubr.f32.mxu1 %v9856_v16  ;;  %v9762_v16 = vld [vmem:[#allocation13 + $0x418] sm:$0xff] }
 0xc28   : > { %10474 = vmatmul.mubr.f32.gmra.mrb[174].mxu1 %v9855_v35  ;;  %v9761_v35 = vld [vmem:[#allocation13 + $0x410] sm:$0xff] }
 0xc29   : > { %10478 = vmatprep.mubr.f32.mxu1 %v9862_v20  ;;  %v9768_v20 = vld [vmem:[#allocation13 + $0x448] sm:$0xff] }
 0xc2c   : > { %10479 = vmatmul.mubr.f32.gmra.mrb[176].mxu1 %v9861_v34  ;;  %v9767_v34 = vld [vmem:[#allocation13 + $0x440] sm:$0xff] }
 0xc2d   : > { %10483 = vmatprep.mubr.f32.mxu1 %v9868_v22  ;;  %v9774_v22 = vld [vmem:[#allocation13 + $0x478] sm:$0xff] }
 0xc30   : > { %10484 = vmatmul.mubr.f32.gmra.mrb[178].mxu1 %v9867_v59  ;;  %v9773_v59 = vld [vmem:[#allocation13 + $0x470] sm:$0xff] }
 0xc31   : > { %10488 = vmatprep.mubr.f32.mxu1 %v9874_v45  ;;  %v9780_v45 = vld [vmem:[#allocation13 + $0x4a8] sm:$0xff] }
 0xc34   : > { %10489 = vmatmul.mubr.f32.gmra.mrb[180].mxu1 %v9873_v39  ;;  %v9779_v39 = vld [vmem:[#allocation13 + $0x4a0] sm:$0xff] }
 0xc35   : > { %10493 = vmatprep.mubr.f32.mxu1 %v9880_v24  ;;  %v9786_v24 = vld [vmem:[#allocation13 + $0x4d8] sm:$0xff] }
 0xc38   : > { %10494 = vmatmul.mubr.f32.gmra.mrb[182].mxu1 %v9879_v14  ;;  %v9785_v14 = vld [vmem:[#allocation13 + $0x4d0] sm:$0xff] }
 0xc39   : > { %10498 = vmatprep.mubr.f32.mxu1 %v9886_v19  ;;  %v9792_v19 = vld [vmem:[#allocation13 + $0x508] sm:$0xff] }
 0xc3c   : > { %10499 = vmatmul.mubr.f32.gmra.mrb[184].mxu1 %v9885_v50  ;;  %v9791_v50 = vld [vmem:[#allocation13 + $0x500] sm:$0xff] }
 0xc3d   : > { %10503 = vmatprep.mubr.f32.mxu1 %v9892_v15  ;;  %v9798_v15 = vld [vmem:[#allocation13 + $0x538] sm:$0xff] }
 0xc40   : > { %10504 = vmatmul.mubr.f32.gmra.mrb[186].mxu1 %v9891_v6  ;;  %v9797_v6 = vld [vmem:[#allocation13 + $0x530] sm:$0xff] }
 0xc41   : > { %10508 = vmatprep.mubr.f32.mxu1 %v9898_v38  ;;  %v9804_v38 = vld [vmem:[#allocation13 + $0x568] sm:$0xff] }
 0xc44   : > { %10509 = vmatmul.mubr.f32.gmra.mrb[188].mxu1 %v9897_v25  ;;  %v9803_v25 = vld [vmem:[#allocation13 + $0x560] sm:$0xff] }
 0xc45   : > { %10513 = vmatprep.mubr.f32.mxu1 %v9904_v49  ;;  %v9810_v49 = vld [vmem:[#allocation13 + $0x598] sm:$0xff] }
 0xc48   : > { %10514 = vmatmul.mubr.f32.gmra.mrb[190].mxu1 %v9903_v37  ;;  %v9809_v37 = vld [vmem:[#allocation13 + $0x590] sm:$0xff] }
 0xc49   : > { %10518 = vmatprep.mubr.f32.mxu1 %v9910_v33  ;;  %v9816_v33 = vld [vmem:[#allocation13 + $0x5c8] sm:$0xff] }
 0xc4c   : > { %10519 = vmatmul.mubr.f32.gmra.mrb[192].mxu1 %v9909_v7  ;;  %v9815_v7 = vld [vmem:[#allocation13 + $0x5c0] sm:$0xff] }
 0xc4d   : > { %10523 = vmatprep.mubr.f32.mxu1 %v9916_v17  ;;  %v9822_v17 = vld [vmem:[#allocation13 + $0x5f8] sm:$0xff] }
 0xc50   : > { %10524 = vmatmul.mubr.f32.gmra.mrb[194].mxu1 %v9915_v30  ;;  %v9821_v30 = vld [vmem:[#allocation13 + $0x5f0] sm:$0xff] }
 0xc51   : > { %10593 = vmatprep.mubr.f32.mxu1 %v9636_v63  ;;  %v9828_v63 = vld [vmem:[#allocation13 + $0x628] sm:$0xff] }
 0xc54   : > { %10594 = vmatmul.mubr.f32.vlgmr.msra.gmra.mrb[100].mxu1 %v9635_v55  ;;  %v9827_v55 = vld [vmem:[#allocation13 + $0x620] sm:$0xff] }
 0xc55   : > { %10598 = vmatprep.mubr.f32.mxu1 %v9642_v8  ;;  %v9834_v8 = vld [vmem:[#allocation13 + $0x658] sm:$0xff] }
 0xc58   : > { %10599 = vmatmul.mubr.f32.gmra.mrb[102].mxu1 %v9641_v43  ;;  %v9833_v43 = vld [vmem:[#allocation13 + $0x650] sm:$0xff] }
 0xc59   : > { %10603 = vmatprep.mubr.f32.mxu1 %v9648_v41  ;;  %v9840_v41 = vld [vmem:[#allocation13 + $0x688] sm:$0xff] }
 0xc5c   : > { %10604 = vmatmul.mubr.f32.gmra.mrb[104].mxu1 %v9647_v56  ;;  %v9839_v56 = vld [vmem:[#allocation13 + $0x680] sm:$0xff] }
 0xc5d   : > { %10608 = vmatprep.mubr.f32.mxu1 %v9654_v18  ;;  %v9846_v18 = vld [vmem:[#allocation13 + $0x6b8] sm:$0xff] }
 0xc60   : > { %10609 = vmatmul.mubr.f32.gmra.mrb[106].mxu1 %v9653_v61  ;;  %v9845_v61 = vld [vmem:[#allocation13 + $0x6b0] sm:$0xff] }
 0xc61   : > { %10613 = vmatprep.mubr.f32.mxu1 %v9660_v48  ;;  %v9852_v48 = vld [vmem:[#allocation13 + $0x6e8] sm:$0xff] }
 0xc64   : > { %10614 = vmatmul.mubr.f32.gmra.mrb[108].mxu1 %v9659_v26  ;;  %v9851_v26 = vld [vmem:[#allocation13 + $0x6e0] sm:$0xff] }
 0xc65   : > { %10618 = vmatprep.mubr.f32.mxu1 %v9666_v11  ;;  %v9858_v11 = vld [vmem:[#allocation13 + $0x718] sm:$0xff] }
 0xc68   : > { %10619 = vmatmul.mubr.f32.gmra.mrb[110].mxu1 %v9665_v5  ;;  %v9857_v5 = vld [vmem:[#allocation13 + $0x710] sm:$0xff] }
 0xc69   : > { %10623 = vmatprep.mubr.f32.mxu1 %v9672_v23  ;;  %v9864_v23 = vld [vmem:[#allocation13 + $0x748] sm:$0xff] }
 0xc6c   : > { %10624 = vmatmul.mubr.f32.gmra.mrb[112].mxu1 %v9671_v12  ;;  %v9863_v12 = vld [vmem:[#allocation13 + $0x740] sm:$0xff] }
 0xc6d   : > { %10628 = vmatprep.mubr.f32.mxu1 %v9678_v51  ;;  %v9870_v51 = vld [vmem:[#allocation13 + $0x778] sm:$0xff] }
 0xc70   : > { %10629 = vmatmul.mubr.f32.gmra.mrb[114].mxu1 %v9677_v53  ;;  %v9869_v53 = vld [vmem:[#allocation13 + $0x770] sm:$0xff] }
 0xc71   : > { %10633 = vmatprep.mubr.f32.mxu1 %v9684_v47  ;;  %v9876_v47 = vld [vmem:[#allocation13 + $0x7a8] sm:$0xff] }
 0xc74   : > { %10634 = vmatmul.mubr.f32.gmra.mrb[116].mxu1 %v9683_v58  ;;  %v9875_v58 = vld [vmem:[#allocation13 + $0x7a0] sm:$0xff] }
 0xc75   : > { %10638 = vmatprep.mubr.f32.mxu1 %v9690_v10  ;;  %v9882_v10 = vld [vmem:[#allocation13 + $0x7d8] sm:$0xff] }
 0xc78   : > { %10639 = vmatmul.mubr.f32.gmra.mrb[118].mxu1 %v9689_v44  ;;  %v9881_v44 = vld [vmem:[#allocation13 + $0x7d0] sm:$0xff] }
 0xc79   : > { %10643 = vmatprep.mubr.f32.mxu1 %v9696_v40  ;;  %v9888_v40 = vld [vmem:[#allocation13 + $0x808] sm:$0xff] }
 0xc7c   : > { %10644 = vmatmul.mubr.f32.gmra.mrb[120].mxu1 %v9695_v9  ;;  %v9887_v9 = vld [vmem:[#allocation13 + $0x800] sm:$0xff] }
 0xc7d   : > { %10648 = vmatprep.mubr.f32.mxu1 %v9702_v46  ;;  %v9894_v46 = vld [vmem:[#allocation13 + $0x838] sm:$0xff] }
 0xc80   : > { %10649 = vmatmul.mubr.f32.gmra.mrb[122].mxu1 %v9701_v52  ;;  %v9893_v52 = vld [vmem:[#allocation13 + $0x830] sm:$0xff] }
 0xc81   : > { %10653 = vmatprep.mubr.f32.mxu1 %v9708_v62  ;;  %v9900_v62 = vld [vmem:[#allocation13 + $0x868] sm:$0xff] }
 0xc84   : > { %10654 = vmatmul.mubr.f32.gmra.mrb[124].mxu1 %v9707_v60  ;;  %v9899_v60 = vld [vmem:[#allocation13 + $0x860] sm:$0xff] }
 0xc85   : > { %10658 = vmatprep.mubr.f32.mxu1 %v9714_v13  ;;  %v9906_v13 = vld [vmem:[#allocation13 + $0x898] sm:$0xff] }
 0xc88   : > { %10659 = vmatmul.mubr.f32.gmra.mrb[126].mxu1 %v9713_v31  ;;  %v9905_v31 = vld [vmem:[#allocation13 + $0x890] sm:$0xff] }
 0xc89   : > { %10663 = vmatprep.mubr.f32.mxu1 %v9720_v1  ;;  %v9912_v1 = vld [vmem:[#allocation13 + $0x8c8] sm:$0xff] }
 0xc8c   : > { %10664 = vmatmul.mubr.f32.gmra.mrb[128].mxu1 %v9719_v4  ;;  %v9911_v4 = vld [vmem:[#allocation13 + $0x8c0] sm:$0xff] }
 0xc8d   : > { %10668 = vmatprep.mubr.f32.mxu1 %v9726_v3  ;;  %v9918_v3 = vld [vmem:[#allocation13 + $0x8f8] sm:$0xff] }
 0xc90   : > { %10669 = vmatmul.mubr.f32.gmra.mrb[130].mxu1 %v9725_v32  ;;  %v9917_v32 = vld [vmem:[#allocation13 + $0x8f0] sm:$0xff] }
 0xc91   : > { %10673 = vmatprep.mubr.f32.mxu1 %v9732_v29 }
 0xc94   : > { %10674 = vmatmul.mubr.f32.gmra.mrb[132].mxu1 %v9731_v0 }
 0xc95   : > { %10678 = vmatprep.mubr.f32.mxu1 %v9738_v27 }
 0xc98   : > { %10679 = vmatmul.mubr.f32.gmra.mrb[134].mxu1 %v9737_v36 }
 0xc99   : > { %10683 = vmatprep.mubr.f32.mxu1 %v9744_v2 }
 0xc9c   : > { %10684 = vmatmul.mubr.f32.gmra.mrb[136].mxu1 %v9743_v57 }
 0xc9d   : > { %10688 = vmatprep.mubr.f32.mxu1 %v9750_v28 }
 0xca0   : > { %10689 = vmatmul.mubr.f32.gmra.mrb[138].mxu1 %v9749_v21 }
 0xca1   : > { %10693 = vmatprep.mubr.f32.mxu1 %v9756_v54 }
 0xca4   : > { %10694 = vmatmul.mubr.f32.gmra.mrb[140].mxu1 %v9755_v42 }
 0xca5   : > { %10698 = vmatprep.mubr.f32.mxu1 %v9762_v16 }
 0xca8   : > { %10699 = vmatmul.mubr.f32.gmra.mrb[142].mxu1 %v9761_v35 }
 0xca9   : > { %10703 = vmatprep.mubr.f32.mxu1 %v9768_v20 }
 0xcac   : > { %10704 = vmatmul.mubr.f32.gmra.mrb[144].mxu1 %v9767_v34 }
 0xcad   : > { %10708 = vmatprep.mubr.f32.mxu1 %v9774_v22 }
 0xcb0   : > { %10709 = vmatmul.mubr.f32.gmra.mrb[146].mxu1 %v9773_v59 }
 0xcb1   : > { %10713 = vmatprep.mubr.f32.mxu1 %v9780_v45 }
 0xcb4   : > { %10714 = vmatmul.mubr.f32.gmra.mrb[148].mxu1 %v9779_v39 }
 0xcb5   : > { %10718 = vmatprep.mubr.f32.mxu1 %v9786_v24 }
 0xcb8   : > { %10719 = vmatmul.mubr.f32.gmra.mrb[150].mxu1 %v9785_v14 }
 0xcb9   : > { %10723 = vmatprep.mubr.f32.mxu1 %v9792_v19 }
 0xcbc   : > { %10724 = vmatmul.mubr.f32.gmra.mrb[152].mxu1 %v9791_v50 }
 0xcbd   : > { %10728 = vmatprep.mubr.f32.mxu1 %v9798_v15 }
 0xcc0   : > { %10729 = vmatmul.mubr.f32.gmra.mrb[154].mxu1 %v9797_v6 }
 0xcc1   : > { %10733 = vmatprep.mubr.f32.mxu1 %v9804_v38 }
 0xcc4   : > { %10734 = vmatmul.mubr.f32.gmra.mrb[156].mxu1 %v9803_v25 }
 0xcc5   : > { %10738 = vmatprep.mubr.f32.mxu1 %v9810_v49 }
 0xcc8   : > { %10739 = vmatmul.mubr.f32.gmra.mrb[158].mxu1 %v9809_v37 }
 0xcc9   : > { %10743 = vmatprep.mubr.f32.mxu1 %v9816_v33 }
 0xccc   : > { %10744 = vmatmul.mubr.f32.gmra.mrb[160].mxu1 %v9815_v7 }
 0xccd   : > { %10748 = vmatprep.mubr.f32.mxu1 %v9822_v17 }
 0xcd0   : > { %10749 = vmatmul.mubr.f32.gmra.mrb[162].mxu1 %v9821_v30 }
 0xcd1   : > { %10753 = vmatprep.mubr.f32.mxu1 %v9828_v63 }
 0xcd4   : > { %10754 = vmatmul.mubr.f32.gmra.mrb[164].mxu1 %v9827_v55 }
 0xcd5   : > { %10758 = vmatprep.mubr.f32.mxu1 %v9834_v8 }
 0xcd8   : > { %10759 = vmatmul.mubr.f32.gmra.mrb[166].mxu1 %v9833_v43 }
 0xcd9   : > { %10763 = vmatprep.mubr.f32.mxu1 %v9840_v41 }
 0xcdc   : > { %10764 = vmatmul.mubr.f32.gmra.mrb[168].mxu1 %v9839_v56 }
 0xcdd   : > { %10768 = vmatprep.mubr.f32.mxu1 %v9846_v18 }
 0xce0   : > { %10769 = vmatmul.mubr.f32.gmra.mrb[170].mxu1 %v9845_v61 }
 0xce1   : > { %10773 = vmatprep.mubr.f32.mxu1 %v9852_v48 }
 0xce4   : > { %10774 = vmatmul.mubr.f32.gmra.mrb[172].mxu1 %v9851_v26 }
 0xce5   : > { %10778 = vmatprep.mubr.f32.mxu1 %v9858_v11 }
 0xce8   : > { %10779 = vmatmul.mubr.f32.gmra.mrb[174].mxu1 %v9857_v5 }
 0xce9   : > { %10783 = vmatprep.mubr.f32.mxu1 %v9864_v23 }
 0xcec   : > { %10784 = vmatmul.mubr.f32.gmra.mrb[176].mxu1 %v9863_v12 }
 0xced   : > { %10788 = vmatprep.mubr.f32.mxu1 %v9870_v51 }
 0xcf0   : > { %10789 = vmatmul.mubr.f32.gmra.mrb[178].mxu1 %v9869_v53 }
 0xcf1   : > { %10793 = vmatprep.mubr.f32.mxu1 %v9876_v47 }
 0xcf4   : > { %10794 = vmatmul.mubr.f32.gmra.mrb[180].mxu1 %v9875_v58 }
 0xcf5   : > { %10798 = vmatprep.mubr.f32.mxu1 %v9882_v10 }
 0xcf8   : > { %10799 = vmatmul.mubr.f32.gmra.mrb[182].mxu1 %v9881_v44 }
 0xcf9   : > { %10803 = vmatprep.mubr.f32.mxu1 %v9888_v40 }
 0xcfc   : > { %10804 = vmatmul.mubr.f32.gmra.mrb[184].mxu1 %v9887_v9 }
 0xcfd   : > { %10808 = vmatprep.mubr.f32.mxu1 %v9894_v46 }
 0xd00   : > { %10809 = vmatmul.mubr.f32.gmra.mrb[186].mxu1 %v9893_v52 }
 0xd01   : > { %10813 = vmatprep.mubr.f32.mxu1 %v9900_v62 }
 0xd04   : > { %10814 = vmatmul.mubr.f32.gmra.mrb[188].mxu1 %v9899_v60 }
 0xd05   : > { %10818 = vmatprep.mubr.f32.mxu1 %v9906_v13 }
 0xd08   : > { %10819 = vmatmul.mubr.f32.gmra.mrb[190].mxu1 %v9905_v31 }
 0xd09   : > { %10823 = vmatprep.mubr.f32.mxu1 %v9912_v1 }
 0xd0c   : > { %10824 = vmatmul.mubr.f32.gmra.mrb[192].mxu1 %v9911_v4 }
 0xd0d   : > { %10828 = vmatprep.mubr.f32.mxu1 %v9918_v3 }
 0xd10   : > { %10829 = vmatmul.mubr.f32.gmra.mrb[194].mxu1 %v9917_v32 }
 0xd27   : > { %v10595_v29 = vpop.f32.mrb[100].mxu1 }
 0xd28   : > { %10834 = vst [vmem:[%s22139_s10] sm:$0xff] %v10595_v29  ;;  %v10597_v0 = vpop.f32.mrb[101].mxu1 }
 0xd2b   : > { %v10600_v27 = vpop.f32.mrb[102].mxu1 }
 0xd2c   : > { %10835 = vst [vmem:[%s22139_s10 + $0x8] sm:$0xff] %v10600_v27  ;;  %v10602_v36 = vpop.f32.mrb[103].mxu1 }
 0xd2f   : > { %v10605_v2 = vpop.f32.mrb[104].mxu1 }
 0xd30   : > { %10836 = vst [vmem:[%s22139_s10 + $0x10] sm:$0xff] %v10605_v2  ;;  %v10607_v57 = vpop.f32.mrb[105].mxu1 }
 0xd33   : > { %v10610_v28 = vpop.f32.mrb[106].mxu1 }
 0xd34   : > { %10837 = vst [vmem:[%s22139_s10 + $0x18] sm:$0xff] %v10610_v28  ;;  %v10612_v21 = vpop.f32.mrb[107].mxu1 }
 0xd37   : > { %v10615_v54 = vpop.f32.mrb[108].mxu1 }
 0xd38   : > { %10838 = vst [vmem:[%s22139_s10 + $0x20] sm:$0xff] %v10615_v54  ;;  %v10617_v42 = vpop.f32.mrb[109].mxu1 }
 0xd3b   : > { %v10620_v16 = vpop.f32.mrb[110].mxu1 }
 0xd3c   : > { %10839 = vst [vmem:[%s22139_s10 + $0x28] sm:$0xff] %v10620_v16  ;;  %v10622_v35 = vpop.f32.mrb[111].mxu1 }
 0xd3f   : > { %v10625_v20 = vpop.f32.mrb[112].mxu1 }
 0xd40   : > { %10840 = vst [vmem:[%s22139_s10 + $0x30] sm:$0xff] %v10625_v20  ;;  %v10627_v34 = vpop.f32.mrb[113].mxu1 }
 0xd43   : > { %v10630_v22 = vpop.f32.mrb[114].mxu1 }
 0xd44   : > { %10841 = vst [vmem:[%s22139_s10 + $0x38] sm:$0xff] %v10630_v22  ;;  %v10632_v59 = vpop.f32.mrb[115].mxu1 }
 0xd47   : > { %v10635_v45 = vpop.f32.mrb[116].mxu1 }
 0xd48   : > { %10842 = vst [vmem:[%s22139_s10 + $0x40] sm:$0xff] %v10635_v45  ;;  %v10637_v39 = vpop.f32.mrb[117].mxu1 }
 0xd4b   : > { %v10640_v24 = vpop.f32.mrb[118].mxu1 }
 0xd4c   : > { %10843 = vst [vmem:[%s22139_s10 + $0x48] sm:$0xff] %v10640_v24  ;;  %v10642_v14 = vpop.f32.mrb[119].mxu1 }
 0xd4f   : > { %v10645_v19 = vpop.f32.mrb[120].mxu1 }
 0xd50   : > { %10844 = vst [vmem:[%s22139_s10 + $0x50] sm:$0xff] %v10645_v19  ;;  %v10647_v50 = vpop.f32.mrb[121].mxu1 }
 0xd53   : > { %v10650_v15 = vpop.f32.mrb[122].mxu1 }
 0xd54   : > { %10845 = vst [vmem:[%s22139_s10 + $0x58] sm:$0xff] %v10650_v15  ;;  %v10652_v6 = vpop.f32.mrb[123].mxu1 }
 0xd57   : > { %v10655_v38 = vpop.f32.mrb[124].mxu1 }
 0xd58   : > { %10846 = vst [vmem:[%s22139_s10 + $0x60] sm:$0xff] %v10655_v38  ;;  %v10657_v25 = vpop.f32.mrb[125].mxu1 }
 0xd5b   : > { %v10660_v49 = vpop.f32.mrb[126].mxu1 }
 0xd5c   : > { %10847 = vst [vmem:[%s22139_s10 + $0x68] sm:$0xff] %v10660_v49  ;;  %v10662_v37 = vpop.f32.mrb[127].mxu1 }
 0xd5f   : > { %v10665_v33 = vpop.f32.mrb[128].mxu1 }
 0xd60   : > { %10848 = vst [vmem:[%s22139_s10 + $0x70] sm:$0xff] %v10665_v33  ;;  %v10667_v7 = vpop.f32.mrb[129].mxu1 }
 0xd63   : > { %v10670_v17 = vpop.f32.mrb[130].mxu1 }
 0xd64   : > { %10849 = vst [vmem:[%s22139_s10 + $0x78] sm:$0xff] %v10670_v17  ;;  %v10672_v30 = vpop.f32.mrb[131].mxu1 }
 0xd67   : > { %v10675_v63 = vpop.f32.mrb[132].mxu1 }
 0xd68   : > { %10850 = vst [vmem:[%s22139_s10 + $0x80] sm:$0xff] %v10675_v63  ;;  %v10677_v55 = vpop.f32.mrb[133].mxu1 }
 0xd6b   : > { %v10680_v8 = vpop.f32.mrb[134].mxu1 }
 0xd6c   : > { %10851 = vst [vmem:[%s22139_s10 + $0x88] sm:$0xff] %v10680_v8  ;;  %v10682_v43 = vpop.f32.mrb[135].mxu1 }
 0xd6f   : > { %v10685_v41 = vpop.f32.mrb[136].mxu1 }
 0xd70   : > { %10852 = vst [vmem:[%s22139_s10 + $0x90] sm:$0xff] %v10685_v41  ;;  %v10687_v56 = vpop.f32.mrb[137].mxu1 }
 0xd73   : > { %v10690_v18 = vpop.f32.mrb[138].mxu1 }
 0xd74   : > { %10853 = vst [vmem:[%s22139_s10 + $0x98] sm:$0xff] %v10690_v18  ;;  %v10692_v61 = vpop.f32.mrb[139].mxu1 }
 0xd77   : > { %v10695_v48 = vpop.f32.mrb[140].mxu1 }
 0xd78   : > { %10854 = vst [vmem:[%s22139_s10 + $0xa0] sm:$0xff] %v10695_v48  ;;  %v10697_v26 = vpop.f32.mrb[141].mxu1 }
 0xd7b   : > { %v10700_v11 = vpop.f32.mrb[142].mxu1 }
 0xd7c   : > { %10855 = vst [vmem:[%s22139_s10 + $0xa8] sm:$0xff] %v10700_v11  ;;  %v10702_v5 = vpop.f32.mrb[143].mxu1 }
 0xd7f   : > { %v10705_v23 = vpop.f32.mrb[144].mxu1 }
 0xd80   : > { %10856 = vst [vmem:[%s22139_s10 + $0xb0] sm:$0xff] %v10705_v23  ;;  %v10707_v12 = vpop.f32.mrb[145].mxu1 }
 0xd83   : > { %v10710_v51 = vpop.f32.mrb[146].mxu1 }
 0xd84   : > { %10857 = vst [vmem:[%s22139_s10 + $0xb8] sm:$0xff] %v10710_v51  ;;  %v10712_v53 = vpop.f32.mrb[147].mxu1 }
 0xd87   : > { %v10715_v47 = vpop.f32.mrb[148].mxu1 }
 0xd88   : > { %10858 = vst [vmem:[%s22139_s10 + $0xc0] sm:$0xff] %v10715_v47  ;;  %v10717_v58 = vpop.f32.mrb[149].mxu1 }
 0xd8b   : > { %v10720_v10 = vpop.f32.mrb[150].mxu1 }
 0xd8c   : > { %10859 = vst [vmem:[%s22139_s10 + $0xc8] sm:$0xff] %v10720_v10  ;;  %v10722_v44 = vpop.f32.mrb[151].mxu1 }
 0xd8f   : > { %v10725_v40 = vpop.f32.mrb[152].mxu1 }
 0xd90   : > { %10860 = vst [vmem:[%s22139_s10 + $0xd0] sm:$0xff] %v10725_v40  ;;  %v10727_v9 = vpop.f32.mrb[153].mxu1 }
 0xd93   : > { %v10730_v46 = vpop.f32.mrb[154].mxu1 }
 0xd94   : > { %10861 = vst [vmem:[%s22139_s10 + $0xd8] sm:$0xff] %v10730_v46  ;;  %v10732_v52 = vpop.f32.mrb[155].mxu1 }
 0xd97   : > { %v10735_v62 = vpop.f32.mrb[156].mxu1 }
 0xd98   : > { %10862 = vst [vmem:[%s22139_s10 + $0xe0] sm:$0xff] %v10735_v62  ;;  %v10737_v60 = vpop.f32.mrb[157].mxu1 }
 0xd9b   : > { %v10740_v13 = vpop.f32.mrb[158].mxu1 }
 0xd9c   : > { %10863 = vst [vmem:[%s22139_s10 + $0xe8] sm:$0xff] %v10740_v13  ;;  %v10742_v31 = vpop.f32.mrb[159].mxu1 }
 0xd9f   : > { %v10745_v1 = vpop.f32.mrb[160].mxu1 }
 0xda0   : > { %10864 = vst [vmem:[%s22139_s10 + $0xf0] sm:$0xff] %v10745_v1  ;;  %v10747_v4 = vpop.f32.mrb[161].mxu1 }
 0xda3   : > { %v10750_v3 = vpop.f32.mrb[162].mxu1 }
 0xda4   : > { %10865 = vst [vmem:[%s22139_s10 + $0xf8] sm:$0xff] %v10750_v3  ;;  %v10752_v32 = vpop.f32.mrb[163].mxu1 }
 0xda7   : > { %v10755_v29 = vpop.f32.mrb[164].mxu1 }
 0xda8   : > { %10866 = vst [vmem:[%s22139_s10 + $0x100] sm:$0xff] %v10755_v29  ;;  %v10757_v0 = vpop.f32.mrb[165].mxu1 }
 0xdab   : > { %v10760_v27 = vpop.f32.mrb[166].mxu1 }
 0xdac   : > { %10867 = vst [vmem:[%s22139_s10 + $0x108] sm:$0xff] %v10760_v27  ;;  %v10762_v36 = vpop.f32.mrb[167].mxu1 }
 0xdaf   : > { %v10765_v2 = vpop.f32.mrb[168].mxu1 }
 0xdb0   : > { %10868 = vst [vmem:[%s22139_s10 + $0x110] sm:$0xff] %v10765_v2  ;;  %v10767_v57 = vpop.f32.mrb[169].mxu1 }
 0xdb3   : > { %v10770_v28 = vpop.f32.mrb[170].mxu1 }
 0xdb4   : > { %10869 = vst [vmem:[%s22139_s10 + $0x118] sm:$0xff] %v10770_v28  ;;  %v10772_v21 = vpop.f32.mrb[171].mxu1 }
 0xdb7   : > { %v10775_v54 = vpop.f32.mrb[172].mxu1 }
 0xdb8   : > { %10870 = vst [vmem:[%s22139_s10 + $0x120] sm:$0xff] %v10775_v54  ;;  %v10777_v42 = vpop.f32.mrb[173].mxu1 }
 0xdbb   : > { %v10780_v16 = vpop.f32.mrb[174].mxu1 }
 0xdbc   : > { %10871 = vst [vmem:[%s22139_s10 + $0x128] sm:$0xff] %v10780_v16  ;;  %v10782_v35 = vpop.f32.mrb[175].mxu1 }
 0xdbf   : > { %v10785_v20 = vpop.f32.mrb[176].mxu1 }
 0xdc0   : > { %10872 = vst [vmem:[%s22139_s10 + $0x130] sm:$0xff] %v10785_v20  ;;  %v10787_v34 = vpop.f32.mrb[177].mxu1 }
 0xdc3   : > { %v10790_v22 = vpop.f32.mrb[178].mxu1 }
 0xdc4   : > { %10873 = vst [vmem:[%s22139_s10 + $0x138] sm:$0xff] %v10790_v22  ;;  %v10792_v59 = vpop.f32.mrb[179].mxu1 }
 0xdc7   : > { %v10795_v45 = vpop.f32.mrb[180].mxu1 }
 0xdc8   : > { %10874 = vst [vmem:[%s22139_s10 + $0x140] sm:$0xff] %v10795_v45  ;;  %v10797_v39 = vpop.f32.mrb[181].mxu1 }
 0xdcb   : > { %v10800_v24 = vpop.f32.mrb[182].mxu1 }
 0xdcc   : > { %10875 = vst [vmem:[%s22139_s10 + $0x148] sm:$0xff] %v10800_v24  ;;  %v10802_v14 = vpop.f32.mrb[183].mxu1 }
 0xdcf   : > { %v10805_v19 = vpop.f32.mrb[184].mxu1 }
 0xdd0   : > { %10876 = vst [vmem:[%s22139_s10 + $0x150] sm:$0xff] %v10805_v19  ;;  %v10807_v50 = vpop.f32.mrb[185].mxu1 }
 0xdd3   : > { %v10810_v15 = vpop.f32.mrb[186].mxu1 }
 0xdd4   : > { %10877 = vst [vmem:[%s22139_s10 + $0x158] sm:$0xff] %v10810_v15  ;;  %v10812_v6 = vpop.f32.mrb[187].mxu1 }
 0xdd7   : > { %v10815_v38 = vpop.f32.mrb[188].mxu1 }
 0xdd8   : > { %10878 = vst [vmem:[%s22139_s10 + $0x160] sm:$0xff] %v10815_v38  ;;  %v10817_v25 = vpop.f32.mrb[189].mxu1 }
 0xddb   : > { %v10820_v49 = vpop.f32.mrb[190].mxu1 }
 0xddc   : > { %10879 = vst [vmem:[%s22139_s10 + $0x168] sm:$0xff] %v10820_v49  ;;  %v10822_v37 = vpop.f32.mrb[191].mxu1 }
 0xddf   : > { %v10825_v33 = vpop.f32.mrb[192].mxu1 }
 0xde0   : > { %10880 = vst [vmem:[%s22139_s10 + $0x170] sm:$0xff] %v10825_v33  ;;  %v10827_v7 = vpop.f32.mrb[193].mxu1 }
 0xde3   : > { %v10830_v17 = vpop.f32.mrb[194].mxu1 }
 0xde4   : > { %10881 = vst [vmem:[%s22139_s10 + $0x178] sm:$0xff] %v10830_v17  ;;  %v10832_v30 = vpop.f32.mrb[195].mxu1 }
 0xde5   : > { %14892 = shalt.err (!%p14889_p6)
}
 0xde6   : > { %s14893_s21 = scalar_lea.hbm %s22193_s23, 6144  ;;  %s14897_s18 = scalar_lea.hbm %s22249_s8, 12288 }
 0xde7   : > { %p14894_p5 = scmp.ne.s32.totalorder %s22193_s23, %s14893_s21  ;;  %p14898_p10 = scmp.lt.u32.totalorder %s22193_s23, %s22249_s8 }
 0xde8   : > { %p14899_p2 = scmp.lt.u32.totalorder %s14897_s18, %s14893_s21  ;;  %p14901_p4 = scmp.lt.u32.totalorder %s14893_s21, %s22193_s23 }
 0xde9   : > { %p14895_p9 = pnand %p14894_p5, %p23629_p7 }
 0xdea   : > { %p14900_p3 = por %p14899_p2, %p14898_p10 }
 0xdeb   : > { %p14896_p12 = pneg %p14895_p9 }
 0xdec   : > { %p14902_p8 = por %p14901_p4, %p14900_p3 }
 0xdee   : > { %p14903_p11 = pnand %p14902_p8, %p14896_p12 }
 0xdf0   : > { %14906 = shalt.err (!%p14903_p11)
}
 0xdf1   : > { %s14973_s14 = smov 128   ;;  %s14974_s29 = smov 8  }
 0xdf2   : > { %14202 = dma.vmem_to_hbm [thread:$0]  (%p23629_p7), %s22195_s22, 6144, %s22193_s23, %s22200_s25, %s14973_s14, %s14973_s14, %s14974_s29  }
 0xdf3 PF: > { %p14244_p13 = scmp.ge.s32.totalorder %s14957_s30, 2  ;;  %s10912_s10 = sand.u32 1, %s14945_s27  }
 0xdf4   : > { %p23630_p1 = scmp.ne.s32.totalorder %s22654_s16, 0  ;;  %s10913_s4 = scalar_lea.sflag [#allocation4], %s10912_s10 }
 0xdf6   : > { %p14227_p0 = pnand %p14244_p13, %p23630_p1 }
 0xdf8   : > { %14940 = dma.done.wait (!%p14227_p0), %s10913_s4, 6144  }
 0xdf9   : > { %14942 = vsyncadd (!%p14227_p0), %s10913_s4, 4294961152  ;;  %s23631_s30 = sld [smem:[#allocation21_spill]]  ;;  %s23632_s12 = sld [smem:[#allocation20_spill]] }
 0xdfa   : > { %s23633_s29 = sld [smem:[#allocation22_spill]]  ;;  %s23634_s27 = smov %s14949_s28 }
 0xdff   : > { %p22_p6 = scmp.ge.s32.totalorder %s23631_s30, 4   ;;  %s23635_s28 = smov %s23632_s12 }
 0xe01   :  { %24 = sbr.rel (!%p22_p6) target bundleno = 10 (0xa), region = 120 }
 0xe08   :  { %10918 = vsyncpa [#allocation3], 1 }
 0xe09   :  { %10920 = vsyncpa [#allocation3 + $0x1], 1 }
 0xe0a   :  { %10921 = vsyncpa [#allocation6], 1 }
 0xe0b   :  { %10922 = vsyncpa [#allocation9], 1 }
 0xe0c   :  { %10923 = vsyncpa [#allocation12], 1 }
 0xe0d   :  { %10924 = vsyncpa [#allocation4], 1 }
 0xe0e   :  { %10926 = vsyncpa [#allocation4 + $0x1], 1 }

</bundles_post_ra>
